<compile_context>
chip_gen: v6e
topology: v6e:2x2x1
jax: 0.10.0
libtpu: 0.0.40
codegen_flags: <defaults>
</compile_context>

<pallas_src>
import functools

import numpy as np
import jax
import jax.numpy as jnp
from jax.experimental import pallas as pl
from jax.experimental.pallas import tpu as pltpu


def _round_up(x, m):
    return (x + m - 1) // m * m


def _resblock_kernel(mask_ref, xp_ref, w1_ref, w2_ref, o_ref, raw_ref, mid_ref,
                     *, H, W, C, Wp, TM, nT, MB):
    """One batch sample: x + IN(conv2(reflpad(relu(IN(conv1(reflpad(x))))))).

    Flat "output" index f = h*Wp + w (row pitch Wp = W + 2; columns w >= W are junk);
    the padded-input flat index for tap (ki, kj) is simply f + ki*Wp + kj, so every
    tap is one contiguous slice.  raw_ref holds un-normalized conv outputs, mid_ref
    holds the reflection-padded normalized intermediate (offset MB keeps the big
    interior store 8-aligned on sublanes).
    """
    inv_hw = 1.0 / float(H * W)
    xp = xp_ref.at[0]          # (XP_ROWS, C) ref view, f32
    out = o_ref.at[0]          # (hw_pad,  C) ref view, f32

    # Scratch persists across grid steps: keep never-written tail rows finite.
    mid_ref[...] = jnp.zeros_like(mid_ref)

    def conv_pass(load_tap, w_ref):
        """3x3 conv as 9 shifted-slice bf16 matmuls per row tile, f32 accumulation
        into raw_ref.  Returns masked single-pass (sum, sum_sq) for InstanceNorm."""
        s1 = jnp.zeros((1, C), jnp.float32)
        s2 = jnp.zeros((1, C), jnp.float32)
        for t in range(nT):
            base = t * TM
            for k in range(9):
                ki, kj = divmod(k, 3)
                xs = load_tap(base + ki * Wp + kj)                    # (TM, C) bf16
                d = jnp.dot(xs, w_ref[k], preferred_element_type=jnp.float32)
                if k == 0:
                    raw_ref[pl.ds(base, TM), :] = d
                else:
                    raw_ref[pl.ds(base, TM), :] += d
            y = raw_ref[pl.ds(base, TM), :]
            ym = y * mask_ref[pl.ds(base, TM), :]                     # zero junk/tail rows
            s1 = s1 + jnp.sum(ym, axis=0, keepdims=True)
            s2 = s2 + jnp.sum(ym * ym, axis=0, keepdims=True)
        return s1, s2

    def in_stats(s1, s2):
        mean = s1 * inv_hw
        var = jnp.maximum(s2 * inv_hw - mean * mean, 0.0)             # biased variance
        return mean, jax.lax.rsqrt(var + 1e-5)

    # ---- conv1 + IN1 statistics (bias skipped: no-op under affine=False IN) ---------
    mean1, inv1 = in_stats(*conv_pass(
        lambda ofs: xp[pl.ds(ofs, TM), :].astype(jnp.bfloat16), w1_ref))

    # ---- IN1 + ReLU, build the reflection-padded intermediate in VMEM ---------------
    # valid f = h*Wp + w maps to padded position MB + (h+1)*Wp + (w+1) = f + MB + Wp + 1
    # (the stray junk written into border columns is fixed right below).
    for t in range(nT):
        seg = raw_ref[pl.ds(t * TM, TM), :]
        mid_ref[pl.ds(MB + Wp + 1 + t * TM, TM), :] = jnp.maximum((seg - mean1) * inv1, 0.0)
    for p in range(1, H + 1):                       # left / right reflection columns
        b = MB + p * Wp
        mid_ref[pl.ds(b, 1), :] = mid_ref[pl.ds(b + 2, 1), :]
        mid_ref[pl.ds(b + W + 1, 1), :] = mid_ref[pl.ds(b + W - 1, 1), :]
    mid_ref[pl.ds(MB, Wp), :] = mid_ref[pl.ds(MB + 2 * Wp, Wp), :]                       # top
    mid_ref[pl.ds(MB + (H + 1) * Wp, Wp), :] = mid_ref[pl.ds(MB + (H - 1) * Wp, Wp), :]  # bottom

    # ---- conv2 + IN2 statistics ------------------------------------------------------
    mean2, inv2 = in_stats(*conv_pass(
        lambda ofs: mid_ref[pl.ds(MB + ofs, TM), :].astype(jnp.bfloat16), w2_ref))

    # ---- IN2 + residual skip add (residual read exactly from the f32 padded input) ---
    for t in range(nT):
        seg = raw_ref[pl.ds(t * TM, TM), :]
        res = xp[pl.ds(Wp + 1 + t * TM, TM), :]
        out[pl.ds(t * TM, TM), :] = (seg - mean2) * inv2 + res


def make_residual_block(N, C, H, W):
    """Returns a jitted forward(x, w1, b1, w2, b2) for ResidualBlock(in_features=C)."""
    Wp, Hp = W + 2, H + 2
    HWp = H * Wp                                   # flat output length at row pitch Wp
    TM = min(512, _round_up(HWp, 8))               # row-tile size (multiple of 8)
    nT = pl.cdiv(HWp, TM)
    hw_pad = nT * TM
    span = hw_pad + 2 * Wp + 2                     # max flat extent any tap slice touches
    XP_ROWS = _round_up(max(span, Hp * Wp), 8)
    MB = (-(Wp + 1)) % 8                           # makes the big interior store 8-aligned
    MID_ROWS = _round_up(MB + span, 8)

    # Validity mask over the junky flat layout (1 on real (h, w), 0 on junk cols / tail).
    fidx = np.arange(hw_pad)
    mask = jnp.asarray(((fidx < HWp) & (fidx % Wp < W))
                       .astype(np.float32).reshape(hw_pad, 1))

    kernel = functools.partial(_resblock_kernel,
                               H=H, W=W, C=C, Wp=Wp, TM=TM, nT=nT, MB=MB)

    # Rough VMEM budget: double-buffered ins/outs + scratch.  Clamped to 64 MiB so it is
    # safe on v7x; on v6e/v5e this could be raised toward ~100 MiB for bigger tiles.
    est = (2 * (hw_pad * 128 * 4 + XP_ROWS * C * 4 + 2 * 9 * C * C * 2 + hw_pad * C * 4)
           + hw_pad * C * 4 + MID_ROWS * C * 4)
    vmem_limit = int(min(max(2 * est, 32 * 1024 * 1024), 64 * 1024 * 1024))

    call = pl.pallas_call(
        kernel,
        out_shape=jax.ShapeDtypeStruct((N, hw_pad, C), jnp.float32),
        grid=(N,),
        in_specs=[
            pl.BlockSpec((hw_pad, 1), lambda n: (0, 0)),            # validity mask
            pl.BlockSpec((1, XP_ROWS, C), lambda n: (n, 0, 0)),     # padded x, f32
            pl.BlockSpec((9, C, C), lambda n: (0, 0, 0)),           # conv1 taps, bf16
            pl.BlockSpec((9, C, C), lambda n: (0, 0, 0)),           # conv2 taps, bf16
        ],
        out_specs=pl.BlockSpec((1, hw_pad, C), lambda n: (n, 0, 0)),
        scratch_shapes=[
            pltpu.VMEM((hw_pad, C), jnp.float32),    # raw conv accumulator / storage
            pltpu.VMEM((MID_ROWS, C), jnp.float32),  # reflection-padded intermediate
        ],
        compiler_params=pltpu.CompilerParams(
            dimension_semantics=("parallel",),       # independent samples -> megacore
            vmem_limit_bytes=vmem_limit,
        ),
    )

    def forward(x, w1, b1, w2, b2):
        # x: (N, C, H, W) f32;  w*: (C, C, 3, 3) PyTorch OIHW layout.
        # b1/b2 are mathematically irrelevant: InstanceNorm2d(affine=False) removes any
        # per-channel constant shift, so the bias add is skipped (perf review).
        del b1, b2
        x_nhwc = jnp.transpose(x, (0, 2, 3, 1))
        xpad = jnp.pad(x_nhwc, ((0, 0), (1, 1), (1, 1), (0, 0)), mode="reflect")
        xp = xpad.reshape(N, Hp * Wp, C)
        xp = jnp.pad(xp, ((0, 0), (0, XP_ROWS - Hp * Wp), (0, 0)))
        w1t = jnp.transpose(w1, (2, 3, 1, 0)).reshape(9, C, C).astype(jnp.bfloat16)
        w2t = jnp.transpose(w2, (2, 3, 1, 0)).reshape(9, C, C).astype(jnp.bfloat16)
        y = call(mask, xp, w1t, w2t)                                  # (N, hw_pad, C)
        y = y[:, :HWp, :].reshape(N, H, Wp, C)[:, :, :W, :]           # drop junk columns
        return jnp.transpose(y, (0, 3, 1, 2))                         # back to NCHW

    return jax.jit(forward)


def _reference_residual_block(x, w1, b1, w2, b2):
    """Pure-JAX/XLA reference matching the PyTorch module (f32, bias included)."""
    def conv_in(h, w, b):
        hp = jnp.pad(h, ((0, 0), (0, 0), (1, 1), (1, 1)), mode="reflect")
        y = jax.lax.conv_general_dilated(
            hp, w, window_strides=(1, 1), padding="VALID",
            dimension_numbers=("NCHW", "OIHW", "NCHW"),
            precision=jax.lax.Precision.HIGHEST)
        y = y + b[None, :, None, None]
        mu = jnp.mean(y, axis=(2, 3), keepdims=True)
        var = jnp.mean(jnp.square(y - mu), axis=(2, 3), keepdims=True)
        return (y - mu) * jax.lax.rsqrt(var + 1e-5)

    t = jax.nn.relu(conv_in(x, w1, b1))
    return x + conv_in(t, w2, b2)


if __name__ == "__main__":
    key = jax.random.PRNGKey(0)
    k1, k2, k3, k4, kx = jax.random.split(key, 5)

    # ResidualBlock(in_features=128): C=128 keeps the channel axis lane-dense (128 lanes).
    N, C, H, W = 2, 128, 16, 16
    x = jax.random.normal(kx, (N, C, H, W), jnp.float32)
    w1 = 0.05 * jax.random.normal(k1, (C, C, 3, 3), jnp.float32)
    b1 = 0.05 * jax.random.normal(k2, (C,), jnp.float32)
    w2 = 0.05 * jax.random.normal(k3, (C, C, 3, 3), jnp.float32)
    b2 = 0.05 * jax.random.normal(k4, (C,), jnp.float32)

    forward = make_residual_block(N, C, H, W)
    y = jax.block_until_ready(forward(x, w1, b1, w2, b2))

    assert y.shape == (N, C, H, W), y.shape
    assert bool(jnp.all(jnp.isfinite(y)))

    y_ref = _reference_residual_block(x, w1, b1, w2, b2)
    rel = float(jnp.linalg.norm(y - y_ref) / jnp.linalg.norm(y_ref))
    assert rel < 2e-2, f"relative L2 error vs reference: {rel}"

    print("KERNEL_OK")
</pallas_src>

<mosaic_0001>
module attributes {stable_mosaic.version = 11 : i64} {
  func.func @_resblock_kernel(%arg0: i32, %arg1: memref<288x1xf32, #tpu.memory_space<vmem>>, %arg2: memref<1x328x128xf32, #tpu.memory_space<vmem>>, %arg3: memref<9x128x128xbf16, #tpu.memory_space<vmem>>, %arg4: memref<9x128x128xbf16, #tpu.memory_space<vmem>>, %arg5: memref<1x288x128xf32, #tpu.memory_space<vmem>>, %arg6: memref<288x128xf32, #tpu.memory_space<vmem>>, %arg7: memref<336x128xf32, #tpu.memory_space<vmem>>) attributes {dimension_semantics = [#tpu.dimension_semantics<parallel>], iteration_bounds = array<i64: 2>, scalar_prefetch = 0 : i64, scratch_operands = 2 : i64, tpu.core_type = #tpu.core_type<tc>, window_params = [{pipeline_mode = #tpu.pipeline_mode<synchronous>, transform_indices = @transform_0, window_bounds = array<i64: 288, 1>}, {transform_indices = @transform_1, window_bounds = array<i64: 1, 328, 128>}, {pipeline_mode = #tpu.pipeline_mode<synchronous>, transform_indices = @transform_2, window_bounds = array<i64: 9, 128, 128>}, {pipeline_mode = #tpu.pipeline_mode<synchronous>, transform_indices = @transform_3, window_bounds = array<i64: 9, 128, 128>}, {transform_indices = @transform_4, window_bounds = array<i64: 1, 288, 128>}]} {
    %cst = arith.constant 0.000000e+00 : f32
    %0 = vector.broadcast %cst : f32 to vector<336x128xf32>
    %c0 = arith.constant 0 : index
    %c0_0 = arith.constant 0 : index
    %1 = vector.load %arg7[%c0, %c0_0] : memref<336x128xf32, #tpu.memory_space<vmem>>, vector<336x128xf32>
    tpu.vector_store %arg7[%c0, %c0_0], %0 {strides = array<i32>} : memref<336x128xf32, #tpu.memory_space<vmem>>, vector<336x128xf32>,
    %cst_1 = arith.constant 0.000000e+00 : f32
    %2 = vector.broadcast %cst_1 : f32 to vector<1x128xf32>
    %cst_2 = arith.constant 0.000000e+00 : f32
    %3 = vector.broadcast %cst_2 : f32 to vector<1x128xf32>
    %c0_i32 = arith.constant 0 : i32
    %c0_i32_3 = arith.constant 0 : i32
    %c0_i32_4 = arith.constant 0 : i32
    %4 = tpu.memref_slice %arg2[%c0_i32, %c0_i32_3, %c0_i32_4] : memref<1x328x128xf32, #tpu.memory_space<vmem>> -> memref<1x328x128xf32, #tpu.memory_space<vmem>>
    %5 = tpu.memref_squeeze %4 : memref<1x328x128xf32, #tpu.memory_space<vmem>> -> memref<328x128xf32, #tpu.memory_space<vmem>>
    %c0_5 = arith.constant 0 : index
    %c0_6 = arith.constant 0 : index
    %6 = vector.load %5[%c0_5, %c0_6] : memref<328x128xf32, #tpu.memory_space<vmem>>, vector<288x128xf32>
    %7 = arith.truncf %6 : vector<288x128xf32> to vector<288x128xbf16>
    %c0_7 = arith.constant 0 : index
    %c0_8 = arith.constant 0 : index
    %c0_9 = arith.constant 0 : index
    %8 = vector.load %arg3[%c0_7, %c0_8, %c0_9] : memref<9x128x128xbf16, #tpu.memory_space<vmem>>, vector<1x128x128xbf16>
    %9 = vector.shape_cast %8 : vector<1x128x128xbf16> to vector<128x128xbf16>
    %cst_10 = arith.constant dense<0.000000e+00> : vector<288x128xf32>
    %10 = tpu.matmul %7, %9, %cst_10 {dimension_numbers = #tpu.dot_dimension_numbers<[1], [0], [0], [1], [0, 0, 1, 1], [], []>} : vector<288x128xbf16>, vector<128x128xbf16>, vector<288x128xf32> -> vector<288x128xf32>
    %c0_11 = arith.constant 0 : index
    %c0_12 = arith.constant 0 : index
    %11 = vector.load %arg6[%c0_11, %c0_12] : memref<288x128xf32, #tpu.memory_space<vmem>>, vector<288x128xf32>
    tpu.vector_store %arg6[%c0_11, %c0_12], %10 {strides = array<i32>} : memref<288x128xf32, #tpu.memory_space<vmem>>, vector<288x128xf32>,
    %c0_i32_13 = arith.constant 0 : i32
    %c0_i32_14 = arith.constant 0 : i32
    %c0_i32_15 = arith.constant 0 : i32
    %12 = tpu.memref_slice %arg2[%c0_i32_13, %c0_i32_14, %c0_i32_15] : memref<1x328x128xf32, #tpu.memory_space<vmem>> -> memref<1x328x128xf32, #tpu.memory_space<vmem>>
    %13 = tpu.memref_squeeze %12 : memref<1x328x128xf32, #tpu.memory_space<vmem>> -> memref<328x128xf32, #tpu.memory_space<vmem>>
    %c1 = arith.constant 1 : index
    %c0_16 = arith.constant 0 : index
    %14 = vector.load %13[%c1, %c0_16] : memref<328x128xf32, #tpu.memory_space<vmem>>, vector<288x128xf32>
    %15 = arith.truncf %14 : vector<288x128xf32> to vector<288x128xbf16>
    %c1_17 = arith.constant 1 : index
    %c0_18 = arith.constant 0 : index
    %c0_19 = arith.constant 0 : index
    %16 = vector.load %arg3[%c1_17, %c0_18, %c0_19] : memref<9x128x128xbf16, #tpu.memory_space<vmem>>, vector<1x128x128xbf16>
    %17 = vector.shape_cast %16 : vector<1x128x128xbf16> to vector<128x128xbf16>
    %cst_20 = arith.constant dense<0.000000e+00> : vector<288x128xf32>
    %18 = tpu.matmul %15, %17, %cst_20 {dimension_numbers = #tpu.dot_dimension_numbers<[1], [0], [0], [1], [0, 0, 1, 1], [], []>} : vector<288x128xbf16>, vector<128x128xbf16>, vector<288x128xf32> -> vector<288x128xf32>
    %c0_21 = arith.constant 0 : index
    %c0_22 = arith.constant 0 : index
    %19 = vector.load %arg6[%c0_21, %c0_22] : memref<288x128xf32, #tpu.memory_space<vmem>>, vector<288x128xf32>
    %20 = arith.addf %19, %18 : vector<288x128xf32>
    %c0_23 = arith.constant 0 : index
    %c0_24 = arith.constant 0 : index
    %21 = vector.load %arg6[%c0_23, %c0_24] : memref<288x128xf32, #tpu.memory_space<vmem>>, vector<288x128xf32>
    tpu.vector_store %arg6[%c0_23, %c0_24], %20 {strides = array<i32>} : memref<288x128xf32, #tpu.memory_space<vmem>>, vector<288x128xf32>,
    %c0_i32_25 = arith.constant 0 : i32
    %c0_i32_26 = arith.constant 0 : i32
    %c0_i32_27 = arith.constant 0 : i32
    %22 = tpu.memref_slice %arg2[%c0_i32_25, %c0_i32_26, %c0_i32_27] : memref<1x328x128xf32, #tpu.memory_space<vmem>> -> memref<1x328x128xf32, #tpu.memory_space<vmem>>
    %23 = tpu.memref_squeeze %22 : memref<1x328x128xf32, #tpu.memory_space<vmem>> -> memref<328x128xf32, #tpu.memory_space<vmem>>
    %c2 = arith.constant 2 : index
    %c0_28 = arith.constant 0 : index
    %24 = vector.load %23[%c2, %c0_28] : memref<328x128xf32, #tpu.memory_space<vmem>>, vector<288x128xf32>
    %25 = arith.truncf %24 : vector<288x128xf32> to vector<288x128xbf16>
    %c2_29 = arith.constant 2 : index
    %c0_30 = arith.constant 0 : index
    %c0_31 = arith.constant 0 : index
    %26 = vector.load %arg3[%c2_29, %c0_30, %c0_31] : memref<9x128x128xbf16, #tpu.memory_space<vmem>>, vector<1x128x128xbf16>
    %27 = vector.shape_cast %26 : vector<1x128x128xbf16> to vector<128x128xbf16>
    %cst_32 = arith.constant dense<0.000000e+00> : vector<288x128xf32>
    %28 = tpu.matmul %25, %27, %cst_32 {dimension_numbers = #tpu.dot_dimension_numbers<[1], [0], [0], [1], [0, 0, 1, 1], [], []>} : vector<288x128xbf16>, vector<128x128xbf16>, vector<288x128xf32> -> vector<288x128xf32>
    %c0_33 = arith.constant 0 : index
    %c0_34 = arith.constant 0 : index
    %29 = vector.load %arg6[%c0_33, %c0_34] : memref<288x128xf32, #tpu.memory_space<vmem>>, vector<288x128xf32>
    %30 = arith.addf %29, %28 : vector<288x128xf32>
    %c0_35 = arith.constant 0 : index
    %c0_36 = arith.constant 0 : index
    %31 = vector.load %arg6[%c0_35, %c0_36] : memref<288x128xf32, #tpu.memory_space<vmem>>, vector<288x128xf32>
    tpu.vector_store %arg6[%c0_35, %c0_36], %30 {strides = array<i32>} : memref<288x128xf32, #tpu.memory_space<vmem>>, vector<288x128xf32>,
    %c0_i32_37 = arith.constant 0 : i32
    %c0_i32_38 = arith.constant 0 : i32
    %c0_i32_39 = arith.constant 0 : i32
    %32 = tpu.memref_slice %arg2[%c0_i32_37, %c0_i32_38, %c0_i32_39] : memref<1x328x128xf32, #tpu.memory_space<vmem>> -> memref<1x328x128xf32, #tpu.memory_space<vmem>>
    %33 = tpu.memref_squeeze %32 : memref<1x328x128xf32, #tpu.memory_space<vmem>> -> memref<328x128xf32, #tpu.memory_space<vmem>>
    %c18 = arith.constant 18 : index
    %c0_40 = arith.constant 0 : index
    %34 = vector.load %33[%c18, %c0_40] : memref<328x128xf32, #tpu.memory_space<vmem>>, vector<288x128xf32>
    %35 = arith.truncf %34 : vector<288x128xf32> to vector<288x128xbf16>
    %c3 = arith.constant 3 : index
    %c0_41 = arith.constant 0 : index
    %c0_42 = arith.constant 0 : index
    %36 = vector.load %arg3[%c3, %c0_41, %c0_42] : memref<9x128x128xbf16, #tpu.memory_space<vmem>>, vector<1x128x128xbf16>
    %37 = vector.shape_cast %36 : vector<1x128x128xbf16> to vector<128x128xbf16>
    %cst_43 = arith.constant dense<0.000000e+00> : vector<288x128xf32>
    %38 = tpu.matmul %35, %37, %cst_43 {dimension_numbers = #tpu.dot_dimension_numbers<[1], [0], [0], [1], [0, 0, 1, 1], [], []>} : vector<288x128xbf16>, vector<128x128xbf16>, vector<288x128xf32> -> vector<288x128xf32>
    %c0_44 = arith.constant 0 : index
    %c0_45 = arith.constant 0 : index
    %39 = vector.load %arg6[%c0_44, %c0_45] : memref<288x128xf32, #tpu.memory_space<vmem>>, vector<288x128xf32>
    %40 = arith.addf %39, %38 : vector<288x128xf32>
    %c0_46 = arith.constant 0 : index
    %c0_47 = arith.constant 0 : index
    %41 = vector.load %arg6[%c0_46, %c0_47] : memref<288x128xf32, #tpu.memory_space<vmem>>, vector<288x128xf32>
    tpu.vector_store %arg6[%c0_46, %c0_47], %40 {strides = array<i32>} : memref<288x128xf32, #tpu.memory_space<vmem>>, vector<288x128xf32>,
    %c0_i32_48 = arith.constant 0 : i32
    %c0_i32_49 = arith.constant 0 : i32
    %c0_i32_50 = arith.constant 0 : i32
    %42 = tpu.memref_slice %arg2[%c0_i32_48, %c0_i32_49, %c0_i32_50] : memref<1x328x128xf32, #tpu.memory_space<vmem>> -> memref<1x328x128xf32, #tpu.memory_space<vmem>>
    %43 = tpu.memref_squeeze %42 : memref<1x328x128xf32, #tpu.memory_space<vmem>> -> memref<328x128xf32, #tpu.memory_space<vmem>>
    %c19 = arith.constant 19 : index
    %c0_51 = arith.constant 0 : index
    %44 = vector.load %43[%c19, %c0_51] : memref<328x128xf32, #tpu.memory_space<vmem>>, vector<288x128xf32>
    %45 = arith.truncf %44 : vector<288x128xf32> to vector<288x128xbf16>
    %c4 = arith.constant 4 : index
    %c0_52 = arith.constant 0 : index
    %c0_53 = arith.constant 0 : index
    %46 = vector.load %arg3[%c4, %c0_52, %c0_53] : memref<9x128x128xbf16, #tpu.memory_space<vmem>>, vector<1x128x128xbf16>
    %47 = vector.shape_cast %46 : vector<1x128x128xbf16> to vector<128x128xbf16>
    %cst_54 = arith.constant dense<0.000000e+00> : vector<288x128xf32>
    %48 = tpu.matmul %45, %47, %cst_54 {dimension_numbers = #tpu.dot_dimension_numbers<[1], [0], [0], [1], [0, 0, 1, 1], [], []>} : vector<288x128xbf16>, vector<128x128xbf16>, vector<288x128xf32> -> vector<288x128xf32>
    %c0_55 = arith.constant 0 : index
    %c0_56 = arith.constant 0 : index
    %49 = vector.load %arg6[%c0_55, %c0_56] : memref<288x128xf32, #tpu.memory_space<vmem>>, vector<288x128xf32>
    %50 = arith.addf %49, %48 : vector<288x128xf32>
    %c0_57 = arith.constant 0 : index
    %c0_58 = arith.constant 0 : index
    %51 = vector.load %arg6[%c0_57, %c0_58] : memref<288x128xf32, #tpu.memory_space<vmem>>, vector<288x128xf32>
    tpu.vector_store %arg6[%c0_57, %c0_58], %50 {strides = array<i32>} : memref<288x128xf32, #tpu.memory_space<vmem>>, vector<288x128xf32>,
    %c0_i32_59 = arith.constant 0 : i32
    %c0_i32_60 = arith.constant 0 : i32
    %c0_i32_61 = arith.constant 0 : i32
    %52 = tpu.memref_slice %arg2[%c0_i32_59, %c0_i32_60, %c0_i32_61] : memref<1x328x128xf32, #tpu.memory_space<vmem>> -> memref<1x328x128xf32, #tpu.memory_space<vmem>>
    %53 = tpu.memref_squeeze %52 : memref<1x328x128xf32, #tpu.memory_space<vmem>> -> memref<328x128xf32, #tpu.memory_space<vmem>>
    %c20 = arith.constant 20 : index
    %c0_62 = arith.constant 0 : index
    %54 = vector.load %53[%c20, %c0_62] : memref<328x128xf32, #tpu.memory_space<vmem>>, vector<288x128xf32>
    %55 = arith.truncf %54 : vector<288x128xf32> to vector<288x128xbf16>
    %c5 = arith.constant 5 : index
    %c0_63 = arith.constant 0 : index
    %c0_64 = arith.constant 0 : index
    %56 = vector.load %arg3[%c5, %c0_63, %c0_64] : memref<9x128x128xbf16, #tpu.memory_space<vmem>>, vector<1x128x128xbf16>
    %57 = vector.shape_cast %56 : vector<1x128x128xbf16> to vector<128x128xbf16>
    %cst_65 = arith.constant dense<0.000000e+00> : vector<288x128xf32>
    %58 = tpu.matmul %55, %57, %cst_65 {dimension_numbers = #tpu.dot_dimension_numbers<[1], [0], [0], [1], [0, 0, 1, 1], [], []>} : vector<288x128xbf16>, vector<128x128xbf16>, vector<288x128xf32> -> vector<288x128xf32>
    %c0_66 = arith.constant 0 : index
    %c0_67 = arith.constant 0 : index
    %59 = vector.load %arg6[%c0_66, %c0_67] : memref<288x128xf32, #tpu.memory_space<vmem>>, vector<288x128xf32>
    %60 = arith.addf %59, %58 : vector<288x128xf32>
    %c0_68 = arith.constant 0 : index
    %c0_69 = arith.constant 0 : index
    %61 = vector.load %arg6[%c0_68, %c0_69] : memref<288x128xf32, #tpu.memory_space<vmem>>, vector<288x128xf32>
    tpu.vector_store %arg6[%c0_68, %c0_69], %60 {strides = array<i32>} : memref<288x128xf32, #tpu.memory_space<vmem>>, vector<288x128xf32>,
    %c0_i32_70 = arith.constant 0 : i32
    %c0_i32_71 = arith.constant 0 : i32
    %c0_i32_72 = arith.constant 0 : i32
    %62 = tpu.memref_slice %arg2[%c0_i32_70, %c0_i32_71, %c0_i32_72] : memref<1x328x128xf32, #tpu.memory_space<vmem>> -> memref<1x328x128xf32, #tpu.memory_space<vmem>>
    %63 = tpu.memref_squeeze %62 : memref<1x328x128xf32, #tpu.memory_space<vmem>> -> memref<328x128xf32, #tpu.memory_space<vmem>>
    %c36 = arith.constant 36 : index
    %c0_73 = arith.constant 0 : index
    %64 = vector.load %63[%c36, %c0_73] : memref<328x128xf32, #tpu.memory_space<vmem>>, vector<288x128xf32>
    %65 = arith.truncf %64 : vector<288x128xf32> to vector<288x128xbf16>
    %c6 = arith.constant 6 : index
    %c0_74 = arith.constant 0 : index
    %c0_75 = arith.constant 0 : index
    %66 = vector.load %arg3[%c6, %c0_74, %c0_75] : memref<9x128x128xbf16, #tpu.memory_space<vmem>>, vector<1x128x128xbf16>
    %67 = vector.shape_cast %66 : vector<1x128x128xbf16> to vector<128x128xbf16>
    %cst_76 = arith.constant dense<0.000000e+00> : vector<288x128xf32>
    %68 = tpu.matmul %65, %67, %cst_76 {dimension_numbers = #tpu.dot_dimension_numbers<[1], [0], [0], [1], [0, 0, 1, 1], [], []>} : vector<288x128xbf16>, vector<128x128xbf16>, vector<288x128xf32> -> vector<288x128xf32>
    %c0_77 = arith.constant 0 : index
    %c0_78 = arith.constant 0 : index
    %69 = vector.load %arg6[%c0_77, %c0_78] : memref<288x128xf32, #tpu.memory_space<vmem>>, vector<288x128xf32>
    %70 = arith.addf %69, %68 : vector<288x128xf32>
    %c0_79 = arith.constant 0 : index
    %c0_80 = arith.constant 0 : index
    %71 = vector.load %arg6[%c0_79, %c0_80] : memref<288x128xf32, #tpu.memory_space<vmem>>, vector<288x128xf32>
    tpu.vector_store %arg6[%c0_79, %c0_80], %70 {strides = array<i32>} : memref<288x128xf32, #tpu.memory_space<vmem>>, vector<288x128xf32>,
    %c0_i32_81 = arith.constant 0 : i32
    %c0_i32_82 = arith.constant 0 : i32
    %c0_i32_83 = arith.constant 0 : i32
    %72 = tpu.memref_slice %arg2[%c0_i32_81, %c0_i32_82, %c0_i32_83] : memref<1x328x128xf32, #tpu.memory_space<vmem>> -> memref<1x328x128xf32, #tpu.memory_space<vmem>>
    %73 = tpu.memref_squeeze %72 : memref<1x328x128xf32, #tpu.memory_space<vmem>> -> memref<328x128xf32, #tpu.memory_space<vmem>>
    %c37 = arith.constant 37 : index
    %c0_84 = arith.constant 0 : index
    %74 = vector.load %73[%c37, %c0_84] : memref<328x128xf32, #tpu.memory_space<vmem>>, vector<288x128xf32>
    %75 = arith.truncf %74 : vector<288x128xf32> to vector<288x128xbf16>
    %c7 = arith.constant 7 : index
    %c0_85 = arith.constant 0 : index
    %c0_86 = arith.constant 0 : index
    %76 = vector.load %arg3[%c7, %c0_85, %c0_86] : memref<9x128x128xbf16, #tpu.memory_space<vmem>>, vector<1x128x128xbf16>
    %77 = vector.shape_cast %76 : vector<1x128x128xbf16> to vector<128x128xbf16>
    %cst_87 = arith.constant dense<0.000000e+00> : vector<288x128xf32>
    %78 = tpu.matmul %75, %77, %cst_87 {dimension_numbers = #tpu.dot_dimension_numbers<[1], [0], [0], [1], [0, 0, 1, 1], [], []>} : vector<288x128xbf16>, vector<128x128xbf16>, vector<288x128xf32> -> vector<288x128xf32>
    %c0_88 = arith.constant 0 : index
    %c0_89 = arith.constant 0 : index
    %79 = vector.load %arg6[%c0_88, %c0_89] : memref<288x128xf32, #tpu.memory_space<vmem>>, vector<288x128xf32>
    %80 = arith.addf %79, %78 : vector<288x128xf32>
    %c0_90 = arith.constant 0 : index
    %c0_91 = arith.constant 0 : index
    %81 = vector.load %arg6[%c0_90, %c0_91] : memref<288x128xf32, #tpu.memory_space<vmem>>, vector<288x128xf32>
    tpu.vector_store %arg6[%c0_90, %c0_91], %80 {strides = array<i32>} : memref<288x128xf32, #tpu.memory_space<vmem>>, vector<288x128xf32>,
    %c0_i32_92 = arith.constant 0 : i32
    %c0_i32_93 = arith.constant 0 : i32
    %c0_i32_94 = arith.constant 0 : i32
    %82 = tpu.memref_slice %arg2[%c0_i32_92, %c0_i32_93, %c0_i32_94] : memref<1x328x128xf32, #tpu.memory_space<vmem>> -> memref<1x328x128xf32, #tpu.memory_space<vmem>>
    %83 = tpu.memref_squeeze %82 : memref<1x328x128xf32, #tpu.memory_space<vmem>> -> memref<328x128xf32, #tpu.memory_space<vmem>>
    %c38 = arith.constant 38 : index
    %c0_95 = arith.constant 0 : index
    %84 = vector.load %83[%c38, %c0_95] : memref<328x128xf32, #tpu.memory_space<vmem>>, vector<288x128xf32>
    %85 = arith.truncf %84 : vector<288x128xf32> to vector<288x128xbf16>
    %c8 = arith.constant 8 : index
    %c0_96 = arith.constant 0 : index
    %c0_97 = arith.constant 0 : index
    %86 = vector.load %arg3[%c8, %c0_96, %c0_97] : memref<9x128x128xbf16, #tpu.memory_space<vmem>>, vector<1x128x128xbf16>
    %87 = vector.shape_cast %86 : vector<1x128x128xbf16> to vector<128x128xbf16>
    %cst_98 = arith.constant dense<0.000000e+00> : vector<288x128xf32>
    %88 = tpu.matmul %85, %87, %cst_98 {dimension_numbers = #tpu.dot_dimension_numbers<[1], [0], [0], [1], [0, 0, 1, 1], [], []>} : vector<288x128xbf16>, vector<128x128xbf16>, vector<288x128xf32> -> vector<288x128xf32>
    %c0_99 = arith.constant 0 : index
    %c0_100 = arith.constant 0 : index
    %89 = vector.load %arg6[%c0_99, %c0_100] : memref<288x128xf32, #tpu.memory_space<vmem>>, vector<288x128xf32>
    %90 = arith.addf %89, %88 : vector<288x128xf32>
    %c0_101 = arith.constant 0 : index
    %c0_102 = arith.constant 0 : index
    %91 = vector.load %arg6[%c0_101, %c0_102] : memref<288x128xf32, #tpu.memory_space<vmem>>, vector<288x128xf32>
    tpu.vector_store %arg6[%c0_101, %c0_102], %90 {strides = array<i32>} : memref<288x128xf32, #tpu.memory_space<vmem>>, vector<288x128xf32>,
    %c0_103 = arith.constant 0 : index
    %c0_104 = arith.constant 0 : index
    %92 = vector.load %arg6[%c0_103, %c0_104] : memref<288x128xf32, #tpu.memory_space<vmem>>, vector<288x128xf32>
    %c0_105 = arith.constant 0 : index
    %c0_106 = arith.constant 0 : index
    %93 = vector.load %arg1[%c0_105, %c0_106] : memref<288x1xf32, #tpu.memory_space<vmem>>, vector<288x1xf32>
    %94 = vector.broadcast %93 : vector<288x1xf32> to vector<288x128xf32>
    %95 = arith.mulf %92, %94 : vector<288x128xf32>
    %cst_107 = arith.constant dense<0.000000e+00> : vector<128xf32>
    %96 = vector.multi_reduction <add>, %95, %cst_107 [0] : vector<288x128xf32> to vector<128xf32>
    %97 = vector.shape_cast %96 : vector<128xf32> to vector<1x128xf32>
    %98 = arith.addf %2, %97 : vector<1x128xf32>
    %99 = arith.mulf %95, %95 : vector<288x128xf32>
    %cst_108 = arith.constant dense<0.000000e+00> : vector<128xf32>
    %100 = vector.multi_reduction <add>, %99, %cst_108 [0] : vector<288x128xf32> to vector<128xf32>
    %101 = vector.shape_cast %100 : vector<128xf32> to vector<1x128xf32>
    %102 = arith.addf %3, %101 : vector<1x128xf32>
    %cst_109 = arith.constant 3.906250e-03 : f32
    %103 = vector.broadcast %cst_109 : f32 to vector<1x128xf32>
    %104 = arith.mulf %98, %103 : vector<1x128xf32>
    %cst_110 = arith.constant 3.906250e-03 : f32
    %105 = vector.broadcast %cst_110 : f32 to vector<1x128xf32>
    %106 = arith.mulf %102, %105 : vector<1x128xf32>
    %107 = arith.mulf %104, %104 : vector<1x128xf32>
    %108 = arith.subf %106, %107 : vector<1x128xf32>
    %cst_111 = arith.constant 0.000000e+00 : f32
    %109 = vector.broadcast %cst_111 : f32 to vector<1x128xf32>
    %110 = arith.maximumf %108, %109 : vector<1x128xf32>
    %cst_112 = arith.constant 9.99999974E-6 : f32
    %111 = vector.broadcast %cst_112 : f32 to vector<1x128xf32>
    %112 = arith.addf %110, %111 : vector<1x128xf32>
    %113 = math.rsqrt %112 : vector<1x128xf32>
    %c0_113 = arith.constant 0 : index
    %c0_114 = arith.constant 0 : index
    %114 = vector.load %arg6[%c0_113, %c0_114] : memref<288x128xf32, #tpu.memory_space<vmem>>, vector<288x128xf32>
    %115 = vector.broadcast %104 : vector<1x128xf32> to vector<288x128xf32>
    %116 = arith.subf %114, %115 : vector<288x128xf32>
    %117 = vector.broadcast %113 : vector<1x128xf32> to vector<288x128xf32>
    %118 = arith.mulf %116, %117 : vector<288x128xf32>
    %cst_115 = arith.constant 0.000000e+00 : f32
    %119 = vector.broadcast %cst_115 : f32 to vector<288x128xf32>
    %120 = arith.maximumf %118, %119 : vector<288x128xf32>
    %c24 = arith.constant 24 : index
    %c0_116 = arith.constant 0 : index
    %121 = vector.load %arg7[%c24, %c0_116] : memref<336x128xf32, #tpu.memory_space<vmem>>, vector<288x128xf32>
    tpu.vector_store %arg7[%c24, %c0_116], %120 {strides = array<i32>} : memref<336x128xf32, #tpu.memory_space<vmem>>, vector<288x128xf32>,
    %c25 = arith.constant 25 : index
    %c0_117 = arith.constant 0 : index
    %122 = vector.load %arg7[%c25, %c0_117] : memref<336x128xf32, #tpu.memory_space<vmem>>, vector<1x128xf32>
    %c23 = arith.constant 23 : index
    %c0_118 = arith.constant 0 : index
    %123 = vector.load %arg7[%c23, %c0_118] : memref<336x128xf32, #tpu.memory_space<vmem>>, vector<1x128xf32>
    tpu.vector_store %arg7[%c23, %c0_118], %122 {strides = array<i32>} : memref<336x128xf32, #tpu.memory_space<vmem>>, vector<1x128xf32>,
    %c38_119 = arith.constant 38 : index
    %c0_120 = arith.constant 0 : index
    %124 = vector.load %arg7[%c38_119, %c0_120] : memref<336x128xf32, #tpu.memory_space<vmem>>, vector<1x128xf32>
    %c40 = arith.constant 40 : index
    %c0_121 = arith.constant 0 : index
    %125 = vector.load %arg7[%c40, %c0_121] : memref<336x128xf32, #tpu.memory_space<vmem>>, vector<1x128xf32>
    tpu.vector_store %arg7[%c40, %c0_121], %124 {strides = array<i32>} : memref<336x128xf32, #tpu.memory_space<vmem>>, vector<1x128xf32>,
    %c43 = arith.constant 43 : index
    %c0_122 = arith.constant 0 : index
    %126 = vector.load %arg7[%c43, %c0_122] : memref<336x128xf32, #tpu.memory_space<vmem>>, vector<1x128xf32>
    %c41 = arith.constant 41 : index
    %c0_123 = arith.constant 0 : index
    %127 = vector.load %arg7[%c41, %c0_123] : memref<336x128xf32, #tpu.memory_space<vmem>>, vector<1x128xf32>
    tpu.vector_store %arg7[%c41, %c0_123], %126 {strides = array<i32>} : memref<336x128xf32, #tpu.memory_space<vmem>>, vector<1x128xf32>,
    %c56 = arith.constant 56 : index
    %c0_124 = arith.constant 0 : index
    %128 = vector.load %arg7[%c56, %c0_124] : memref<336x128xf32, #tpu.memory_space<vmem>>, vector<1x128xf32>
    %c58 = arith.constant 58 : index
    %c0_125 = arith.constant 0 : index
    %129 = vector.load %arg7[%c58, %c0_125] : memref<336x128xf32, #tpu.memory_space<vmem>>, vector<1x128xf32>
    tpu.vector_store %arg7[%c58, %c0_125], %128 {strides = array<i32>} : memref<336x128xf32, #tpu.memory_space<vmem>>, vector<1x128xf32>,
    %c61 = arith.constant 61 : index
    %c0_126 = arith.constant 0 : index
    %130 = vector.load %arg7[%c61, %c0_126] : memref<336x128xf32, #tpu.memory_space<vmem>>, vector<1x128xf32>
    %c59 = arith.constant 59 : index
    %c0_127 = arith.constant 0 : index
    %131 = vector.load %arg7[%c59, %c0_127] : memref<336x128xf32, #tpu.memory_space<vmem>>, vector<1x128xf32>
    tpu.vector_store %arg7[%c59, %c0_127], %130 {strides = array<i32>} : memref<336x128xf32, #tpu.memory_space<vmem>>, vector<1x128xf32>,
    %c74 = arith.constant 74 : index
    %c0_128 = arith.constant 0 : index
    %132 = vector.load %arg7[%c74, %c0_128] : memref<336x128xf32, #tpu.memory_space<vmem>>, vector<1x128xf32>
    %c76 = arith.constant 76 : index
    %c0_129 = arith.constant 0 : index
    %133 = vector.load %arg7[%c76, %c0_129] : memref<336x128xf32, #tpu.memory_space<vmem>>, vector<1x128xf32>
    tpu.vector_store %arg7[%c76, %c0_129], %132 {strides = array<i32>} : memref<336x128xf32, #tpu.memory_space<vmem>>, vector<1x128xf32>,
    %c79 = arith.constant 79 : index
    %c0_130 = arith.constant 0 : index
    %134 = vector.load %arg7[%c79, %c0_130] : memref<336x128xf32, #tpu.memory_space<vmem>>, vector<1x128xf32>
    %c77 = arith.constant 77 : index
    %c0_131 = arith.constant 0 : index
    %135 = vector.load %arg7[%c77, %c0_131] : memref<336x128xf32, #tpu.memory_space<vmem>>, vector<1x128xf32>
    tpu.vector_store %arg7[%c77, %c0_131], %134 {strides = array<i32>} : memref<336x128xf32, #tpu.memory_space<vmem>>, vector<1x128xf32>,
    %c92 = arith.constant 92 : index
    %c0_132 = arith.constant 0 : index
    %136 = vector.load %arg7[%c92, %c0_132] : memref<336x128xf32, #tpu.memory_space<vmem>>, vector<1x128xf32>
    %c94 = arith.constant 94 : index
    %c0_133 = arith.constant 0 : index
    %137 = vector.load %arg7[%c94, %c0_133] : memref<336x128xf32, #tpu.memory_space<vmem>>, vector<1x128xf32>
    tpu.vector_store %arg7[%c94, %c0_133], %136 {strides = array<i32>} : memref<336x128xf32, #tpu.memory_space<vmem>>, vector<1x128xf32>,
    %c97 = arith.constant 97 : index
    %c0_134 = arith.constant 0 : index
    %138 = vector.load %arg7[%c97, %c0_134] : memref<336x128xf32, #tpu.memory_space<vmem>>, vector<1x128xf32>
    %c95 = arith.constant 95 : index
    %c0_135 = arith.constant 0 : index
    %139 = vector.load %arg7[%c95, %c0_135] : memref<336x128xf32, #tpu.memory_space<vmem>>, vector<1x128xf32>
    tpu.vector_store %arg7[%c95, %c0_135], %138 {strides = array<i32>} : memref<336x128xf32, #tpu.memory_space<vmem>>, vector<1x128xf32>,
    %c110 = arith.constant 110 : index
    %c0_136 = arith.constant 0 : index
    %140 = vector.load %arg7[%c110, %c0_136] : memref<336x128xf32, #tpu.memory_space<vmem>>, vector<1x128xf32>
    %c112 = arith.constant 112 : index
    %c0_137 = arith.constant 0 : index
    %141 = vector.load %arg7[%c112, %c0_137] : memref<336x128xf32, #tpu.memory_space<vmem>>, vector<1x128xf32>
    tpu.vector_store %arg7[%c112, %c0_137], %140 {strides = array<i32>} : memref<336x128xf32, #tpu.memory_space<vmem>>, vector<1x128xf32>,
    %c115 = arith.constant 115 : index
    %c0_138 = arith.constant 0 : index
    %142 = vector.load %arg7[%c115, %c0_138] : memref<336x128xf32, #tpu.memory_space<vmem>>, vector<1x128xf32>
    %c113 = arith.constant 113 : index
    %c0_139 = arith.constant 0 : index
    %143 = vector.load %arg7[%c113, %c0_139] : memref<336x128xf32, #tpu.memory_space<vmem>>, vector<1x128xf32>
    tpu.vector_store %arg7[%c113, %c0_139], %142 {strides = array<i32>} : memref<336x128xf32, #tpu.memory_space<vmem>>, vector<1x128xf32>,
    %c128 = arith.constant 128 : index
    %c0_140 = arith.constant 0 : index
    %144 = vector.load %arg7[%c128, %c0_140] : memref<336x128xf32, #tpu.memory_space<vmem>>, vector<1x128xf32>
    %c130 = arith.constant 130 : index
    %c0_141 = arith.constant 0 : index
    %145 = vector.load %arg7[%c130, %c0_141] : memref<336x128xf32, #tpu.memory_space<vmem>>, vector<1x128xf32>
    tpu.vector_store %arg7[%c130, %c0_141], %144 {strides = array<i32>} : memref<336x128xf32, #tpu.memory_space<vmem>>, vector<1x128xf32>,
    %c133 = arith.constant 133 : index
    %c0_142 = arith.constant 0 : index
    %146 = vector.load %arg7[%c133, %c0_142] : memref<336x128xf32, #tpu.memory_space<vmem>>, vector<1x128xf32>
    %c131 = arith.constant 131 : index
    %c0_143 = arith.constant 0 : index
    %147 = vector.load %arg7[%c131, %c0_143] : memref<336x128xf32, #tpu.memory_space<vmem>>, vector<1x128xf32>
    tpu.vector_store %arg7[%c131, %c0_143], %146 {strides = array<i32>} : memref<336x128xf32, #tpu.memory_space<vmem>>, vector<1x128xf32>,
    %c146 = arith.constant 146 : index
    %c0_144 = arith.constant 0 : index
    %148 = vector.load %arg7[%c146, %c0_144] : memref<336x128xf32, #tpu.memory_space<vmem>>, vector<1x128xf32>
    %c148 = arith.constant 148 : index
    %c0_145 = arith.constant 0 : index
    %149 = vector.load %arg7[%c148, %c0_145] : memref<336x128xf32, #tpu.memory_space<vmem>>, vector<1x128xf32>
    tpu.vector_store %arg7[%c148, %c0_145], %148 {strides = array<i32>} : memref<336x128xf32, #tpu.memory_space<vmem>>, vector<1x128xf32>,
    %c151 = arith.constant 151 : index
    %c0_146 = arith.constant 0 : index
    %150 = vector.load %arg7[%c151, %c0_146] : memref<336x128xf32, #tpu.memory_space<vmem>>, vector<1x128xf32>
    %c149 = arith.constant 149 : index
    %c0_147 = arith.constant 0 : index
    %151 = vector.load %arg7[%c149, %c0_147] : memref<336x128xf32, #tpu.memory_space<vmem>>, vector<1x128xf32>
    tpu.vector_store %arg7[%c149, %c0_147], %150 {strides = array<i32>} : memref<336x128xf32, #tpu.memory_space<vmem>>, vector<1x128xf32>,
    %c164 = arith.constant 164 : index
    %c0_148 = arith.constant 0 : index
    %152 = vector.load %arg7[%c164, %c0_148] : memref<336x128xf32, #tpu.memory_space<vmem>>, vector<1x128xf32>
    %c166 = arith.constant 166 : index
    %c0_149 = arith.constant 0 : index
    %153 = vector.load %arg7[%c166, %c0_149] : memref<336x128xf32, #tpu.memory_space<vmem>>, vector<1x128xf32>
    tpu.vector_store %arg7[%c166, %c0_149], %152 {strides = array<i32>} : memref<336x128xf32, #tpu.memory_space<vmem>>, vector<1x128xf32>,
    %c169 = arith.constant 169 : index
    %c0_150 = arith.constant 0 : index
    %154 = vector.load %arg7[%c169, %c0_150] : memref<336x128xf32, #tpu.memory_space<vmem>>, vector<1x128xf32>
    %c167 = arith.constant 167 : index
    %c0_151 = arith.constant 0 : index
    %155 = vector.load %arg7[%c167, %c0_151] : memref<336x128xf32, #tpu.memory_space<vmem>>, vector<1x128xf32>
    tpu.vector_store %arg7[%c167, %c0_151], %154 {strides = array<i32>} : memref<336x128xf32, #tpu.memory_space<vmem>>, vector<1x128xf32>,
    %c182 = arith.constant 182 : index
    %c0_152 = arith.constant 0 : index
    %156 = vector.load %arg7[%c182, %c0_152] : memref<336x128xf32, #tpu.memory_space<vmem>>, vector<1x128xf32>
    %c184 = arith.constant 184 : index
    %c0_153 = arith.constant 0 : index
    %157 = vector.load %arg7[%c184, %c0_153] : memref<336x128xf32, #tpu.memory_space<vmem>>, vector<1x128xf32>
    tpu.vector_store %arg7[%c184, %c0_153], %156 {strides = array<i32>} : memref<336x128xf32, #tpu.memory_space<vmem>>, vector<1x128xf32>,
    %c187 = arith.constant 187 : index
    %c0_154 = arith.constant 0 : index
    %158 = vector.load %arg7[%c187, %c0_154] : memref<336x128xf32, #tpu.memory_space<vmem>>, vector<1x128xf32>
    %c185 = arith.constant 185 : index
    %c0_155 = arith.constant 0 : index
    %159 = vector.load %arg7[%c185, %c0_155] : memref<336x128xf32, #tpu.memory_space<vmem>>, vector<1x128xf32>
    tpu.vector_store %arg7[%c185, %c0_155], %158 {strides = array<i32>} : memref<336x128xf32, #tpu.memory_space<vmem>>, vector<1x128xf32>,
    %c200 = arith.constant 200 : index
    %c0_156 = arith.constant 0 : index
    %160 = vector.load %arg7[%c200, %c0_156] : memref<336x128xf32, #tpu.memory_space<vmem>>, vector<1x128xf32>
    %c202 = arith.constant 202 : index
    %c0_157 = arith.constant 0 : index
    %161 = vector.load %arg7[%c202, %c0_157] : memref<336x128xf32, #tpu.memory_space<vmem>>, vector<1x128xf32>
    tpu.vector_store %arg7[%c202, %c0_157], %160 {strides = array<i32>} : memref<336x128xf32, #tpu.memory_space<vmem>>, vector<1x128xf32>,
    %c205 = arith.constant 205 : index
    %c0_158 = arith.constant 0 : index
    %162 = vector.load %arg7[%c205, %c0_158] : memref<336x128xf32, #tpu.memory_space<vmem>>, vector<1x128xf32>
    %c203 = arith.constant 203 : index
    %c0_159 = arith.constant 0 : index
    %163 = vector.load %arg7[%c203, %c0_159] : memref<336x128xf32, #tpu.memory_space<vmem>>, vector<1x128xf32>
    tpu.vector_store %arg7[%c203, %c0_159], %162 {strides = array<i32>} : memref<336x128xf32, #tpu.memory_space<vmem>>, vector<1x128xf32>,
    %c218 = arith.constant 218 : index
    %c0_160 = arith.constant 0 : index
    %164 = vector.load %arg7[%c218, %c0_160] : memref<336x128xf32, #tpu.memory_space<vmem>>, vector<1x128xf32>
    %c220 = arith.constant 220 : index
    %c0_161 = arith.constant 0 : index
    %165 = vector.load %arg7[%c220, %c0_161] : memref<336x128xf32, #tpu.memory_space<vmem>>, vector<1x128xf32>
    tpu.vector_store %arg7[%c220, %c0_161], %164 {strides = array<i32>} : memref<336x128xf32, #tpu.memory_space<vmem>>, vector<1x128xf32>,
    %c223 = arith.constant 223 : index
    %c0_162 = arith.constant 0 : index
    %166 = vector.load %arg7[%c223, %c0_162] : memref<336x128xf32, #tpu.memory_space<vmem>>, vector<1x128xf32>
    %c221 = arith.constant 221 : index
    %c0_163 = arith.constant 0 : index
    %167 = vector.load %arg7[%c221, %c0_163] : memref<336x128xf32, #tpu.memory_space<vmem>>, vector<1x128xf32>
    tpu.vector_store %arg7[%c221, %c0_163], %166 {strides = array<i32>} : memref<336x128xf32, #tpu.memory_space<vmem>>, vector<1x128xf32>,
    %c236 = arith.constant 236 : index
    %c0_164 = arith.constant 0 : index
    %168 = vector.load %arg7[%c236, %c0_164] : memref<336x128xf32, #tpu.memory_space<vmem>>, vector<1x128xf32>
    %c238 = arith.constant 238 : index
    %c0_165 = arith.constant 0 : index
    %169 = vector.load %arg7[%c238, %c0_165] : memref<336x128xf32, #tpu.memory_space<vmem>>, vector<1x128xf32>
    tpu.vector_store %arg7[%c238, %c0_165], %168 {strides = array<i32>} : memref<336x128xf32, #tpu.memory_space<vmem>>, vector<1x128xf32>,
    %c241 = arith.constant 241 : index
    %c0_166 = arith.constant 0 : index
    %170 = vector.load %arg7[%c241, %c0_166] : memref<336x128xf32, #tpu.memory_space<vmem>>, vector<1x128xf32>
    %c239 = arith.constant 239 : index
    %c0_167 = arith.constant 0 : index
    %171 = vector.load %arg7[%c239, %c0_167] : memref<336x128xf32, #tpu.memory_space<vmem>>, vector<1x128xf32>
    tpu.vector_store %arg7[%c239, %c0_167], %170 {strides = array<i32>} : memref<336x128xf32, #tpu.memory_space<vmem>>, vector<1x128xf32>,
    %c254 = arith.constant 254 : index
    %c0_168 = arith.constant 0 : index
    %172 = vector.load %arg7[%c254, %c0_168] : memref<336x128xf32, #tpu.memory_space<vmem>>, vector<1x128xf32>
    %c256 = arith.constant 256 : index
    %c0_169 = arith.constant 0 : index
    %173 = vector.load %arg7[%c256, %c0_169] : memref<336x128xf32, #tpu.memory_space<vmem>>, vector<1x128xf32>
    tpu.vector_store %arg7[%c256, %c0_169], %172 {strides = array<i32>} : memref<336x128xf32, #tpu.memory_space<vmem>>, vector<1x128xf32>,
    %c259 = arith.constant 259 : index
    %c0_170 = arith.constant 0 : index
    %174 = vector.load %arg7[%c259, %c0_170] : memref<336x128xf32, #tpu.memory_space<vmem>>, vector<1x128xf32>
    %c257 = arith.constant 257 : index
    %c0_171 = arith.constant 0 : index
    %175 = vector.load %arg7[%c257, %c0_171] : memref<336x128xf32, #tpu.memory_space<vmem>>, vector<1x128xf32>
    tpu.vector_store %arg7[%c257, %c0_171], %174 {strides = array<i32>} : memref<336x128xf32, #tpu.memory_space<vmem>>, vector<1x128xf32>,
    %c272 = arith.constant 272 : index
    %c0_172 = arith.constant 0 : index
    %176 = vector.load %arg7[%c272, %c0_172] : memref<336x128xf32, #tpu.memory_space<vmem>>, vector<1x128xf32>
    %c274 = arith.constant 274 : index
    %c0_173 = arith.constant 0 : index
    %177 = vector.load %arg7[%c274, %c0_173] : memref<336x128xf32, #tpu.memory_space<vmem>>, vector<1x128xf32>
    tpu.vector_store %arg7[%c274, %c0_173], %176 {strides = array<i32>} : memref<336x128xf32, #tpu.memory_space<vmem>>, vector<1x128xf32>,
    %c277 = arith.constant 277 : index
    %c0_174 = arith.constant 0 : index
    %178 = vector.load %arg7[%c277, %c0_174] : memref<336x128xf32, #tpu.memory_space<vmem>>, vector<1x128xf32>
    %c275 = arith.constant 275 : index
    %c0_175 = arith.constant 0 : index
    %179 = vector.load %arg7[%c275, %c0_175] : memref<336x128xf32, #tpu.memory_space<vmem>>, vector<1x128xf32>
    tpu.vector_store %arg7[%c275, %c0_175], %178 {strides = array<i32>} : memref<336x128xf32, #tpu.memory_space<vmem>>, vector<1x128xf32>,
    %c290 = arith.constant 290 : index
    %c0_176 = arith.constant 0 : index
    %180 = vector.load %arg7[%c290, %c0_176] : memref<336x128xf32, #tpu.memory_space<vmem>>, vector<1x128xf32>
    %c292 = arith.constant 292 : index
    %c0_177 = arith.constant 0 : index
    %181 = vector.load %arg7[%c292, %c0_177] : memref<336x128xf32, #tpu.memory_space<vmem>>, vector<1x128xf32>
    tpu.vector_store %arg7[%c292, %c0_177], %180 {strides = array<i32>} : memref<336x128xf32, #tpu.memory_space<vmem>>, vector<1x128xf32>,
    %c295 = arith.constant 295 : index
    %c0_178 = arith.constant 0 : index
    %182 = vector.load %arg7[%c295, %c0_178] : memref<336x128xf32, #tpu.memory_space<vmem>>, vector<1x128xf32>
    %c293 = arith.constant 293 : index
    %c0_179 = arith.constant 0 : index
    %183 = vector.load %arg7[%c293, %c0_179] : memref<336x128xf32, #tpu.memory_space<vmem>>, vector<1x128xf32>
    tpu.vector_store %arg7[%c293, %c0_179], %182 {strides = array<i32>} : memref<336x128xf32, #tpu.memory_space<vmem>>, vector<1x128xf32>,
    %c308 = arith.constant 308 : index
    %c0_180 = arith.constant 0 : index
    %184 = vector.load %arg7[%c308, %c0_180] : memref<336x128xf32, #tpu.memory_space<vmem>>, vector<1x128xf32>
    %c310 = arith.constant 310 : index
    %c0_181 = arith.constant 0 : index
    %185 = vector.load %arg7[%c310, %c0_181] : memref<336x128xf32, #tpu.memory_space<vmem>>, vector<1x128xf32>
    tpu.vector_store %arg7[%c310, %c0_181], %184 {strides = array<i32>} : memref<336x128xf32, #tpu.memory_space<vmem>>, vector<1x128xf32>,
    %c41_182 = arith.constant 41 : index
    %c0_183 = arith.constant 0 : index
    %186 = vector.load %arg7[%c41_182, %c0_183] : memref<336x128xf32, #tpu.memory_space<vmem>>, vector<18x128xf32>
    %c5_184 = arith.constant 5 : index
    %c0_185 = arith.constant 0 : index
    %187 = vector.load %arg7[%c5_184, %c0_185] : memref<336x128xf32, #tpu.memory_space<vmem>>, vector<18x128xf32>
    tpu.vector_store %arg7[%c5_184, %c0_185], %186 {strides = array<i32>} : memref<336x128xf32, #tpu.memory_space<vmem>>, vector<18x128xf32>,
    %c275_186 = arith.constant 275 : index
    %c0_187 = arith.constant 0 : index
    %188 = vector.load %arg7[%c275_186, %c0_187] : memref<336x128xf32, #tpu.memory_space<vmem>>, vector<18x128xf32>
    %c311 = arith.constant 311 : index
    %c0_188 = arith.constant 0 : index
    %189 = vector.load %arg7[%c311, %c0_188] : memref<336x128xf32, #tpu.memory_space<vmem>>, vector<18x128xf32>
    tpu.vector_store %arg7[%c311, %c0_188], %188 {strides = array<i32>} : memref<336x128xf32, #tpu.memory_space<vmem>>, vector<18x128xf32>,
    %cst_189 = arith.constant 0.000000e+00 : f32
    %190 = vector.broadcast %cst_189 : f32 to vector<1x128xf32>
    %cst_190 = arith.constant 0.000000e+00 : f32
    %191 = vector.broadcast %cst_190 : f32 to vector<1x128xf32>
    %c5_191 = arith.constant 5 : index
    %c0_192 = arith.constant 0 : index
    %192 = vector.load %arg7[%c5_191, %c0_192] : memref<336x128xf32, #tpu.memory_space<vmem>>, vector<288x128xf32>
    %193 = arith.truncf %192 : vector<288x128xf32> to vector<288x128xbf16>
    %c0_193 = arith.constant 0 : index
    %c0_194 = arith.constant 0 : index
    %c0_195 = arith.constant 0 : index
    %194 = vector.load %arg4[%c0_193, %c0_194, %c0_195] : memref<9x128x128xbf16, #tpu.memory_space<vmem>>, vector<1x128x128xbf16>
    %195 = vector.shape_cast %194 : vector<1x128x128xbf16> to vector<128x128xbf16>
    %cst_196 = arith.constant dense<0.000000e+00> : vector<288x128xf32>
    %196 = tpu.matmul %193, %195, %cst_196 {dimension_numbers = #tpu.dot_dimension_numbers<[1], [0], [0], [1], [0, 0, 1, 1], [], []>} : vector<288x128xbf16>, vector<128x128xbf16>, vector<288x128xf32> -> vector<288x128xf32>
    %c0_197 = arith.constant 0 : index
    %c0_198 = arith.constant 0 : index
    %197 = vector.load %arg6[%c0_197, %c0_198] : memref<288x128xf32, #tpu.memory_space<vmem>>, vector<288x128xf32>
    tpu.vector_store %arg6[%c0_197, %c0_198], %196 {strides = array<i32>} : memref<288x128xf32, #tpu.memory_space<vmem>>, vector<288x128xf32>,
    %c6_199 = arith.constant 6 : index
    %c0_200 = arith.constant 0 : index
    %198 = vector.load %arg7[%c6_199, %c0_200] : memref<336x128xf32, #tpu.memory_space<vmem>>, vector<288x128xf32>
    %199 = arith.truncf %198 : vector<288x128xf32> to vector<288x128xbf16>
    %c1_201 = arith.constant 1 : index
    %c0_202 = arith.constant 0 : index
    %c0_203 = arith.constant 0 : index
    %200 = vector.load %arg4[%c1_201, %c0_202, %c0_203] : memref<9x128x128xbf16, #tpu.memory_space<vmem>>, vector<1x128x128xbf16>
    %201 = vector.shape_cast %200 : vector<1x128x128xbf16> to vector<128x128xbf16>
    %cst_204 = arith.constant dense<0.000000e+00> : vector<288x128xf32>
    %202 = tpu.matmul %199, %201, %cst_204 {dimension_numbers = #tpu.dot_dimension_numbers<[1], [0], [0], [1], [0, 0, 1, 1], [], []>} : vector<288x128xbf16>, vector<128x128xbf16>, vector<288x128xf32> -> vector<288x128xf32>
    %c0_205 = arith.constant 0 : index
    %c0_206 = arith.constant 0 : index
    %203 = vector.load %arg6[%c0_205, %c0_206] : memref<288x128xf32, #tpu.memory_space<vmem>>, vector<288x128xf32>
    %204 = arith.addf %203, %202 : vector<288x128xf32>
    %c0_207 = arith.constant 0 : index
    %c0_208 = arith.constant 0 : index
    %205 = vector.load %arg6[%c0_207, %c0_208] : memref<288x128xf32, #tpu.memory_space<vmem>>, vector<288x128xf32>
    tpu.vector_store %arg6[%c0_207, %c0_208], %204 {strides = array<i32>} : memref<288x128xf32, #tpu.memory_space<vmem>>, vector<288x128xf32>,
    %c7_209 = arith.constant 7 : index
    %c0_210 = arith.constant 0 : index
    %206 = vector.load %arg7[%c7_209, %c0_210] : memref<336x128xf32, #tpu.memory_space<vmem>>, vector<288x128xf32>
    %207 = arith.truncf %206 : vector<288x128xf32> to vector<288x128xbf16>
    %c2_211 = arith.constant 2 : index
    %c0_212 = arith.constant 0 : index
    %c0_213 = arith.constant 0 : index
    %208 = vector.load %arg4[%c2_211, %c0_212, %c0_213] : memref<9x128x128xbf16, #tpu.memory_space<vmem>>, vector<1x128x128xbf16>
    %209 = vector.shape_cast %208 : vector<1x128x128xbf16> to vector<128x128xbf16>
    %cst_214 = arith.constant dense<0.000000e+00> : vector<288x128xf32>
    %210 = tpu.matmul %207, %209, %cst_214 {dimension_numbers = #tpu.dot_dimension_numbers<[1], [0], [0], [1], [0, 0, 1, 1], [], []>} : vector<288x128xbf16>, vector<128x128xbf16>, vector<288x128xf32> -> vector<288x128xf32>
    %c0_215 = arith.constant 0 : index
    %c0_216 = arith.constant 0 : index
    %211 = vector.load %arg6[%c0_215, %c0_216] : memref<288x128xf32, #tpu.memory_space<vmem>>, vector<288x128xf32>
    %212 = arith.addf %211, %210 : vector<288x128xf32>
    %c0_217 = arith.constant 0 : index
    %c0_218 = arith.constant 0 : index
    %213 = vector.load %arg6[%c0_217, %c0_218] : memref<288x128xf32, #tpu.memory_space<vmem>>, vector<288x128xf32>
    tpu.vector_store %arg6[%c0_217, %c0_218], %212 {strides = array<i32>} : memref<288x128xf32, #tpu.memory_space<vmem>>, vector<288x128xf32>,
    %c23_219 = arith.constant 23 : index
    %c0_220 = arith.constant 0 : index
    %214 = vector.load %arg7[%c23_219, %c0_220] : memref<336x128xf32, #tpu.memory_space<vmem>>, vector<288x128xf32>
    %215 = arith.truncf %214 : vector<288x128xf32> to vector<288x128xbf16>
    %c3_221 = arith.constant 3 : index
    %c0_222 = arith.constant 0 : index
    %c0_223 = arith.constant 0 : index
    %216 = vector.load %arg4[%c3_221, %c0_222, %c0_223] : memref<9x128x128xbf16, #tpu.memory_space<vmem>>, vector<1x128x128xbf16>
    %217 = vector.shape_cast %216 : vector<1x128x128xbf16> to vector<128x128xbf16>
    %cst_224 = arith.constant dense<0.000000e+00> : vector<288x128xf32>
    %218 = tpu.matmul %215, %217, %cst_224 {dimension_numbers = #tpu.dot_dimension_numbers<[1], [0], [0], [1], [0, 0, 1, 1], [], []>} : vector<288x128xbf16>, vector<128x128xbf16>, vector<288x128xf32> -> vector<288x128xf32>
    %c0_225 = arith.constant 0 : index
    %c0_226 = arith.constant 0 : index
    %219 = vector.load %arg6[%c0_225, %c0_226] : memref<288x128xf32, #tpu.memory_space<vmem>>, vector<288x128xf32>
    %220 = arith.addf %219, %218 : vector<288x128xf32>
    %c0_227 = arith.constant 0 : index
    %c0_228 = arith.constant 0 : index
    %221 = vector.load %arg6[%c0_227, %c0_228] : memref<288x128xf32, #tpu.memory_space<vmem>>, vector<288x128xf32>
    tpu.vector_store %arg6[%c0_227, %c0_228], %220 {strides = array<i32>} : memref<288x128xf32, #tpu.memory_space<vmem>>, vector<288x128xf32>,
    %c24_229 = arith.constant 24 : index
    %c0_230 = arith.constant 0 : index
    %222 = vector.load %arg7[%c24_229, %c0_230] : memref<336x128xf32, #tpu.memory_space<vmem>>, vector<288x128xf32>
    %223 = arith.truncf %222 : vector<288x128xf32> to vector<288x128xbf16>
    %c4_231 = arith.constant 4 : index
    %c0_232 = arith.constant 0 : index
    %c0_233 = arith.constant 0 : index
    %224 = vector.load %arg4[%c4_231, %c0_232, %c0_233] : memref<9x128x128xbf16, #tpu.memory_space<vmem>>, vector<1x128x128xbf16>
    %225 = vector.shape_cast %224 : vector<1x128x128xbf16> to vector<128x128xbf16>
    %cst_234 = arith.constant dense<0.000000e+00> : vector<288x128xf32>
    %226 = tpu.matmul %223, %225, %cst_234 {dimension_numbers = #tpu.dot_dimension_numbers<[1], [0], [0], [1], [0, 0, 1, 1], [], []>} : vector<288x128xbf16>, vector<128x128xbf16>, vector<288x128xf32> -> vector<288x128xf32>
    %c0_235 = arith.constant 0 : index
    %c0_236 = arith.constant 0 : index
    %227 = vector.load %arg6[%c0_235, %c0_236] : memref<288x128xf32, #tpu.memory_space<vmem>>, vector<288x128xf32>
    %228 = arith.addf %227, %226 : vector<288x128xf32>
    %c0_237 = arith.constant 0 : index
    %c0_238 = arith.constant 0 : index
    %229 = vector.load %arg6[%c0_237, %c0_238] : memref<288x128xf32, #tpu.memory_space<vmem>>, vector<288x128xf32>
    tpu.vector_store %arg6[%c0_237, %c0_238], %228 {strides = array<i32>} : memref<288x128xf32, #tpu.memory_space<vmem>>, vector<288x128xf32>,
    %c25_239 = arith.constant 25 : index
    %c0_240 = arith.constant 0 : index
    %230 = vector.load %arg7[%c25_239, %c0_240] : memref<336x128xf32, #tpu.memory_space<vmem>>, vector<288x128xf32>
    %231 = arith.truncf %230 : vector<288x128xf32> to vector<288x128xbf16>
    %c5_241 = arith.constant 5 : index
    %c0_242 = arith.constant 0 : index
    %c0_243 = arith.constant 0 : index
    %232 = vector.load %arg4[%c5_241, %c0_242, %c0_243] : memref<9x128x128xbf16, #tpu.memory_space<vmem>>, vector<1x128x128xbf16>
    %233 = vector.shape_cast %232 : vector<1x128x128xbf16> to vector<128x128xbf16>
    %cst_244 = arith.constant dense<0.000000e+00> : vector<288x128xf32>
    %234 = tpu.matmul %231, %233, %cst_244 {dimension_numbers = #tpu.dot_dimension_numbers<[1], [0], [0], [1], [0, 0, 1, 1], [], []>} : vector<288x128xbf16>, vector<128x128xbf16>, vector<288x128xf32> -> vector<288x128xf32>
    %c0_245 = arith.constant 0 : index
    %c0_246 = arith.constant 0 : index
    %235 = vector.load %arg6[%c0_245, %c0_246] : memref<288x128xf32, #tpu.memory_space<vmem>>, vector<288x128xf32>
    %236 = arith.addf %235, %234 : vector<288x128xf32>
    %c0_247 = arith.constant 0 : index
    %c0_248 = arith.constant 0 : index
    %237 = vector.load %arg6[%c0_247, %c0_248] : memref<288x128xf32, #tpu.memory_space<vmem>>, vector<288x128xf32>
    tpu.vector_store %arg6[%c0_247, %c0_248], %236 {strides = array<i32>} : memref<288x128xf32, #tpu.memory_space<vmem>>, vector<288x128xf32>,
    %c41_249 = arith.constant 41 : index
    %c0_250 = arith.constant 0 : index
    %238 = vector.load %arg7[%c41_249, %c0_250] : memref<336x128xf32, #tpu.memory_space<vmem>>, vector<288x128xf32>
    %239 = arith.truncf %238 : vector<288x128xf32> to vector<288x128xbf16>
    %c6_251 = arith.constant 6 : index
    %c0_252 = arith.constant 0 : index
    %c0_253 = arith.constant 0 : index
    %240 = vector.load %arg4[%c6_251, %c0_252, %c0_253] : memref<9x128x128xbf16, #tpu.memory_space<vmem>>, vector<1x128x128xbf16>
    %241 = vector.shape_cast %240 : vector<1x128x128xbf16> to vector<128x128xbf16>
    %cst_254 = arith.constant dense<0.000000e+00> : vector<288x128xf32>
    %242 = tpu.matmul %239, %241, %cst_254 {dimension_numbers = #tpu.dot_dimension_numbers<[1], [0], [0], [1], [0, 0, 1, 1], [], []>} : vector<288x128xbf16>, vector<128x128xbf16>, vector<288x128xf32> -> vector<288x128xf32>
    %c0_255 = arith.constant 0 : index
    %c0_256 = arith.constant 0 : index
    %243 = vector.load %arg6[%c0_255, %c0_256] : memref<288x128xf32, #tpu.memory_space<vmem>>, vector<288x128xf32>
    %244 = arith.addf %243, %242 : vector<288x128xf32>
    %c0_257 = arith.constant 0 : index
    %c0_258 = arith.constant 0 : index
    %245 = vector.load %arg6[%c0_257, %c0_258] : memref<288x128xf32, #tpu.memory_space<vmem>>, vector<288x128xf32>
    tpu.vector_store %arg6[%c0_257, %c0_258], %244 {strides = array<i32>} : memref<288x128xf32, #tpu.memory_space<vmem>>, vector<288x128xf32>,
    %c42 = arith.constant 42 : index
    %c0_259 = arith.constant 0 : index
    %246 = vector.load %arg7[%c42, %c0_259] : memref<336x128xf32, #tpu.memory_space<vmem>>, vector<288x128xf32>
    %247 = arith.truncf %246 : vector<288x128xf32> to vector<288x128xbf16>
    %c7_260 = arith.constant 7 : index
    %c0_261 = arith.constant 0 : index
    %c0_262 = arith.constant 0 : index
    %248 = vector.load %arg4[%c7_260, %c0_261, %c0_262] : memref<9x128x128xbf16, #tpu.memory_space<vmem>>, vector<1x128x128xbf16>
    %249 = vector.shape_cast %248 : vector<1x128x128xbf16> to vector<128x128xbf16>
    %cst_263 = arith.constant dense<0.000000e+00> : vector<288x128xf32>
    %250 = tpu.matmul %247, %249, %cst_263 {dimension_numbers = #tpu.dot_dimension_numbers<[1], [0], [0], [1], [0, 0, 1, 1], [], []>} : vector<288x128xbf16>, vector<128x128xbf16>, vector<288x128xf32> -> vector<288x128xf32>
    %c0_264 = arith.constant 0 : index
    %c0_265 = arith.constant 0 : index
    %251 = vector.load %arg6[%c0_264, %c0_265] : memref<288x128xf32, #tpu.memory_space<vmem>>, vector<288x128xf32>
    %252 = arith.addf %251, %250 : vector<288x128xf32>
    %c0_266 = arith.constant 0 : index
    %c0_267 = arith.constant 0 : index
    %253 = vector.load %arg6[%c0_266, %c0_267] : memref<288x128xf32, #tpu.memory_space<vmem>>, vector<288x128xf32>
    tpu.vector_store %arg6[%c0_266, %c0_267], %252 {strides = array<i32>} : memref<288x128xf32, #tpu.memory_space<vmem>>, vector<288x128xf32>,
    %c43_268 = arith.constant 43 : index
    %c0_269 = arith.constant 0 : index
    %254 = vector.load %arg7[%c43_268, %c0_269] : memref<336x128xf32, #tpu.memory_space<vmem>>, vector<288x128xf32>
    %255 = arith.truncf %254 : vector<288x128xf32> to vector<288x128xbf16>
    %c8_270 = arith.constant 8 : index
    %c0_271 = arith.constant 0 : index
    %c0_272 = arith.constant 0 : index
    %256 = vector.load %arg4[%c8_270, %c0_271, %c0_272] : memref<9x128x128xbf16, #tpu.memory_space<vmem>>, vector<1x128x128xbf16>
    %257 = vector.shape_cast %256 : vector<1x128x128xbf16> to vector<128x128xbf16>
    %cst_273 = arith.constant dense<0.000000e+00> : vector<288x128xf32>
    %258 = tpu.matmul %255, %257, %cst_273 {dimension_numbers = #tpu.dot_dimension_numbers<[1], [0], [0], [1], [0, 0, 1, 1], [], []>} : vector<288x128xbf16>, vector<128x128xbf16>, vector<288x128xf32> -> vector<288x128xf32>
    %c0_274 = arith.constant 0 : index
    %c0_275 = arith.constant 0 : index
    %259 = vector.load %arg6[%c0_274, %c0_275] : memref<288x128xf32, #tpu.memory_space<vmem>>, vector<288x128xf32>
    %260 = arith.addf %259, %258 : vector<288x128xf32>
    %c0_276 = arith.constant 0 : index
    %c0_277 = arith.constant 0 : index
    %261 = vector.load %arg6[%c0_276, %c0_277] : memref<288x128xf32, #tpu.memory_space<vmem>>, vector<288x128xf32>
    tpu.vector_store %arg6[%c0_276, %c0_277], %260 {strides = array<i32>} : memref<288x128xf32, #tpu.memory_space<vmem>>, vector<288x128xf32>,
    %c0_278 = arith.constant 0 : index
    %c0_279 = arith.constant 0 : index
    %262 = vector.load %arg6[%c0_278, %c0_279] : memref<288x128xf32, #tpu.memory_space<vmem>>, vector<288x128xf32>
    %c0_280 = arith.constant 0 : index
    %c0_281 = arith.constant 0 : index
    %263 = vector.load %arg1[%c0_280, %c0_281] : memref<288x1xf32, #tpu.memory_space<vmem>>, vector<288x1xf32>
    %264 = vector.broadcast %263 : vector<288x1xf32> to vector<288x128xf32>
    %265 = arith.mulf %262, %264 : vector<288x128xf32>
    %cst_282 = arith.constant dense<0.000000e+00> : vector<128xf32>
    %266 = vector.multi_reduction <add>, %265, %cst_282 [0] : vector<288x128xf32> to vector<128xf32>
    %267 = vector.shape_cast %266 : vector<128xf32> to vector<1x128xf32>
    %268 = arith.addf %190, %267 : vector<1x128xf32>
    %269 = arith.mulf %265, %265 : vector<288x128xf32>
    %cst_283 = arith.constant dense<0.000000e+00> : vector<128xf32>
    %270 = vector.multi_reduction <add>, %269, %cst_283 [0] : vector<288x128xf32> to vector<128xf32>
    %271 = vector.shape_cast %270 : vector<128xf32> to vector<1x128xf32>
    %272 = arith.addf %191, %271 : vector<1x128xf32>
    %cst_284 = arith.constant 3.906250e-03 : f32
    %273 = vector.broadcast %cst_284 : f32 to vector<1x128xf32>
    %274 = arith.mulf %268, %273 : vector<1x128xf32>
    %cst_285 = arith.constant 3.906250e-03 : f32
    %275 = vector.broadcast %cst_285 : f32 to vector<1x128xf32>
    %276 = arith.mulf %272, %275 : vector<1x128xf32>
    %277 = arith.mulf %274, %274 : vector<1x128xf32>
    %278 = arith.subf %276, %277 : vector<1x128xf32>
    %cst_286 = arith.constant 0.000000e+00 : f32
    %279 = vector.broadcast %cst_286 : f32 to vector<1x128xf32>
    %280 = arith.maximumf %278, %279 : vector<1x128xf32>
    %cst_287 = arith.constant 9.99999974E-6 : f32
    %281 = vector.broadcast %cst_287 : f32 to vector<1x128xf32>
    %282 = arith.addf %280, %281 : vector<1x128xf32>
    %283 = math.rsqrt %282 : vector<1x128xf32>
    %c0_288 = arith.constant 0 : index
    %c0_289 = arith.constant 0 : index
    %284 = vector.load %arg6[%c0_288, %c0_289] : memref<288x128xf32, #tpu.memory_space<vmem>>, vector<288x128xf32>
    %c0_i32_290 = arith.constant 0 : i32
    %c0_i32_291 = arith.constant 0 : i32
    %c0_i32_292 = arith.constant 0 : i32
    %285 = tpu.memref_slice %arg2[%c0_i32_290, %c0_i32_291, %c0_i32_292] : memref<1x328x128xf32, #tpu.memory_space<vmem>> -> memref<1x328x128xf32, #tpu.memory_space<vmem>>
    %286 = tpu.memref_squeeze %285 : memref<1x328x128xf32, #tpu.memory_space<vmem>> -> memref<328x128xf32, #tpu.memory_space<vmem>>
    %c19_293 = arith.constant 19 : index
    %c0_294 = arith.constant 0 : index
    %287 = vector.load %286[%c19_293, %c0_294] : memref<328x128xf32, #tpu.memory_space<vmem>>, vector<288x128xf32>
    %288 = vector.broadcast %274 : vector<1x128xf32> to vector<288x128xf32>
    %289 = arith.subf %284, %288 : vector<288x128xf32>
    %290 = vector.broadcast %283 : vector<1x128xf32> to vector<288x128xf32>
    %291 = arith.mulf %289, %290 : vector<288x128xf32>
    %292 = arith.addf %291, %287 : vector<288x128xf32>
    %c0_i32_295 = arith.constant 0 : i32
    %c0_i32_296 = arith.constant 0 : i32
    %c0_i32_297 = arith.constant 0 : i32
    %293 = tpu.memref_slice %arg5[%c0_i32_295, %c0_i32_296, %c0_i32_297] : memref<1x288x128xf32, #tpu.memory_space<vmem>> -> memref<1x288x128xf32, #tpu.memory_space<vmem>>
    %294 = tpu.memref_squeeze %293 : memref<1x288x128xf32, #tpu.memory_space<vmem>> -> memref<288x128xf32, #tpu.memory_space<vmem>>
    %c0_298 = arith.constant 0 : index
    %c0_299 = arith.constant 0 : index
    %295 = vector.load %294[%c0_298, %c0_299] : memref<288x128xf32, #tpu.memory_space<vmem>>, vector<288x128xf32>
    tpu.vector_store %294[%c0_298, %c0_299], %292 {strides = array<i32>} : memref<288x128xf32, #tpu.memory_space<vmem>>, vector<288x128xf32>,
    return
  }
  func.func @transform_0(%arg0: i32) -> (i32, i32) {
    %c0_i32 = arith.constant 0 : i32
    %c0_i32_0 = arith.constant 0 : i32
    %c0_i32_1 = arith.constant 0 : i32
    return %c0_i32, %c0_i32_0 : i32, i32
  }
  func.func @transform_1(%arg0: i32) -> (i32, i32, i32) {
    %c0_i32 = arith.constant 0 : i32
    %c0_i32_0 = arith.constant 0 : i32
    %c0_i32_1 = arith.constant 0 : i32
    return %arg0, %c0_i32, %c0_i32_0 : i32, i32, i32
  }
  func.func @transform_2(%arg0: i32) -> (i32, i32, i32) {
    %c0_i32 = arith.constant 0 : i32
    %c0_i32_0 = arith.constant 0 : i32
    %c0_i32_1 = arith.constant 0 : i32
    %c0_i32_2 = arith.constant 0 : i32
    return %c0_i32, %c0_i32_0, %c0_i32_1 : i32, i32, i32
  }
  func.func @transform_3(%arg0: i32) -> (i32, i32, i32) {
    %c0_i32 = arith.constant 0 : i32
    %c0_i32_0 = arith.constant 0 : i32
    %c0_i32_1 = arith.constant 0 : i32
    %c0_i32_2 = arith.constant 0 : i32
    return %c0_i32, %c0_i32_0, %c0_i32_1 : i32, i32, i32
  }
  func.func @transform_4(%arg0: i32) -> (i32, i32, i32) {
    %c0_i32 = arith.constant 0 : i32
    %c0_i32_0 = arith.constant 0 : i32
    %c0_i32_1 = arith.constant 0 : i32
    return %arg0, %c0_i32, %c0_i32_0 : i32, i32, i32
  }
}

</mosaic_0001>

<bundles_post_ra>
// kernel: forward.1
= control target key start
LH: loop header
LB: loop body
LE: loop exit
PB: predicated region body
PF: predicated region fallthrough
CT: control target
= control target key end

     0   :  { %s10663_s15 = smov 0   ;;  %s13685_s0 = inlined_call_operand.vmem [shape: f32[288,1], index: 0, kind: input, shape index: {}]   ;;  %s13686_s1 = inlined_call_operand.vmem [shape: f32[2,328,128], index: 1, kind: input, shape index: {}]   ;;  %s13687_s2 = inlined_call_operand.vmem [shape: bf16[9,128,128], index: 2, kind: input, shape index: {}]   ;;  %s13688_s3 = inlined_call_operand.vmem [shape: bf16[9,128,128], index: 3, kind: input, shape index: {}]   ;;  %s13689_s4 = inlined_call_operand.vmem [shape: f32[2,288,128], index: 4, kind: output, shape index: {}]  }
   0x1 LB: > { %s8652_s16 = sadd.s32 4294967295, %s10634_s15   ;;  %p8656_p0 = scmp.ge.s32.totalorder %s10634_s15, 1  ;;  %s10634_s15 = sphi %s10663_s15, %s14_s15  }
   0x2   : > { %p162_p1 = scmp.lt.s32.totalorder %s10634_s15, 3 }
   0x4   : > { %p163_p2 = pnand %p8656_p0, %p162_p1 }
   0x6   : > { %166 = sbr.rel (%p163_p2) target bundleno = 1320 (0x528), region = 36 }
   0xb   : > { %v10479_v0 = vld [vmem:[%s13687_s2 + $0x38] sm:$0xff]   ;;  %p188_p3 = scmp.lt.s32.totalorder %s8652_s16, 1  ;;  %v10481_v2 = vld [vmem:[%s13687_s2 + $0x30] sm:$0xff]   ;;  %v10483_v4 = vld [vmem:[%s13687_s2 + $0x28] sm:$0xff]  }
   0xc   : > { %v10480_v1 = vld [vmem:[%s13687_s2 + $0x78] sm:$0xff]   ;;  %9529 = vmatprep.subr.bf16.mxu0 %v10479_v0  ;;  %v10482_v3 = vld [vmem:[%s13687_s2 + $0x70] sm:$0xff]   ;;  %v10484_v5 = vld [vmem:[%s13687_s2 + $0x68] sm:$0xff]  }
   0xd   : > { %9581 = vmatprep.subr.bf16.mxu1 %v10480_v1  ;;  %9530 = vmatpush3.bf16.msra.mxu0 %v10479_v0  ;;  %s13851_s16 = smov (!%p188_p3, %s8652_s16), 1  ;;  %v10485_v6 = vld [vmem:[%s13687_s2 + $0x20] sm:$0xff]   ;;  %v10487_v8 = vld [vmem:[%s13687_s2 + $0x18] sm:$0xff]   ;;  %v10489_v10 = vld [vmem:[%s13687_s2 + $0x10] sm:$0xff]  }
   0xe   : > { %9582 = vmatpush3.bf16.msra.mxu1 %v10480_v1  ;;  %9531 = vmatprep.subr.bf16.mxu0 %v10481_v2  ;;  %v10486_v7 = vld [vmem:[%s13687_s2 + $0x60] sm:$0xff]   ;;  %s10465_s7 = smul.u32 328, %s13851_s16  ;;  %v10488_v9 = vld [vmem:[%s13687_s2 + $0x58] sm:$0xff]   ;;  %v10490_v14 = vld [vmem:[%s13687_s2 + $0x50] sm:$0xff]  }
   0xf   : > { %9583 = vmatprep.subr.bf16.mxu1 %v10482_v3  ;;  %v10491_v18 = vld [vmem:[%s13687_s2 + $0x8] sm:$0xff]   ;;  %v10493_v20 = vld [vmem:[%s13687_s2] sm:$0xff]   ;;  %v10495_v26 = vld [vmem:[%s13687_s2 + $0xb8] sm:$0xff]   ;;  %s10466_s9 = smul.u32 288, %s13851_s16 }
  0x10   : > { %s10707_s14 = scalar_lea.vmem %s13686_s1, %s10465_s7  ;;  %v10492_v19 = vld [vmem:[%s13687_s2 + $0x48] sm:$0xff]   ;;  %v10494_v21 = vld [vmem:[%s13687_s2 + $0x40] sm:$0xff]   ;;  %v10496_v35 = vld [vmem:[%s13687_s2 + $0xb0] sm:$0xff]  }
  0x11   : > { %9532 = vmatpush3.bf16.msra.mxu0 %v10481_v2  ;;  %v241_v11 = vld [vmem:[%s10707_s14] sm:$0xff]  ;;  %v242_v12 = vld [vmem:[%s10707_s14 + $0x8] sm:$0xff]  ;;  %v243_v22 = vld [vmem:[%s10707_s14 + $0x10] sm:$0xff]  ;;  %s13575_s12 = scalar_lea.vmem %s13689_s4, %s10466_s9 }
  0x12   : > { %9584 = vmatpush3.bf16.msra.mxu1 %v10482_v3  ;;  %9533 = vmatprep.subr.bf16.mxu0 %v10483_v4  ;;  %v572_v13 = vld [vmem:[%s10707_s14 + $0x1] sm:$0xff]  ;;  %v277_v15 = vpack.c.bf16 %v242_v12, %v241_v11  ;;  %v573_v16 = vld [vmem:[%s10707_s14 + $0x9] sm:$0xff]  ;;  %v244_v23 = vld [vmem:[%s10707_s14 + $0x18] sm:$0xff] }
  0x13   : > { %9585 = vmatprep.subr.bf16.mxu1 %v10484_v5  ;;  %v608_v17 = vpack.c.bf16 %v573_v16, %v572_v13  ;;  %v574_v24 = vld [vmem:[%s10707_s14 + $0x11] sm:$0xff]  ;;  %v575_v25 = vld [vmem:[%s10707_s14 + $0x19] sm:$0xff]  ;;  %v246_v28 = vld [vmem:[%s10707_s14 + $0x28] sm:$0xff]  ;;  %v278_v31 = vpack.c.bf16 %v244_v23, %v243_v22 }
  0x14   : > { %9545 = vmatprep.mubr.bf16.mxu0 %v277_v15  ;;  %v245_v27 = vld [vmem:[%s10707_s14 + $0x20] sm:$0xff]  ;;  %v577_v30 = vld [vmem:[%s10707_s14 + $0x29] sm:$0xff]  ;;  %v609_v32 = vpack.c.bf16 %v575_v25, %v574_v24  ;;  %v248_v37 = vld [vmem:[%s10707_s14 + $0x38] sm:$0xff] }
  0x15   : > { %9534 = vmatpush3.bf16.msra.mxu0 %v10483_v4  ;;  %9597 = vmatprep.mubr.bf16.mxu1 %v608_v17  ;;  %v576_v29 = vld [vmem:[%s10707_s14 + $0x21] sm:$0xff]  ;;  %v279_v33 = vpack.c.bf16 %v246_v28, %v245_v27  ;;  %v247_v36 = vld [vmem:[%s10707_s14 + $0x30] sm:$0xff]  ;;  %v579_v39 = vld [vmem:[%s10707_s14 + $0x39] sm:$0xff] }
  0x16   : > { %9586 = vmatpush3.bf16.msra.mxu1 %v10484_v5  ;;  %9535 = vmatprep.subr.bf16.mxu0 %v10485_v6  ;;  %v610_v34 = vpack.c.bf16 %v577_v30, %v576_v29  ;;  %v578_v38 = vld [vmem:[%s10707_s14 + $0x31] sm:$0xff]  ;;  %v249_v40 = vld [vmem:[%s10707_s14 + $0x40] sm:$0xff]  ;;  %v250_v41 = vld [vmem:[%s10707_s14 + $0x48] sm:$0xff]  ;;  %v280_v46 = vpack.c.bf16 %v248_v37, %v247_v36 }
  0x17   : > { %9587 = vmatprep.subr.bf16.mxu1 %v10486_v7  ;;  %v580_v42 = vld [vmem:[%s10707_s14 + $0x41] sm:$0xff]  ;;  %v581_v43 = vld [vmem:[%s10707_s14 + $0x49] sm:$0xff]  ;;  %v10500_v45 = vld [vmem:[%s13687_s2 + $0xf8] sm:$0xff]   ;;  %v611_v47 = vpack.c.bf16 %v579_v39, %v578_v38  ;;  %v281_v48 = vpack.c.bf16 %v250_v41, %v249_v40 }
  0x18   : > { %v10497_v44 = vld [vmem:[%s13687_s2 + $0xa8] sm:$0xff]   ;;  %v10502_v49 = vld [vmem:[%s13687_s2 + $0xf0] sm:$0xff]   ;;  %v612_v50 = vpack.c.bf16 %v581_v43, %v580_v42  ;;  %v252_v52 = vld [vmem:[%s10707_s14 + $0x58] sm:$0xff] }
  0x19   : > { %9536 = vmatpush3.bf16.msra.mxu0 %v10485_v6  ;;  %v251_v51 = vld [vmem:[%s10707_s14 + $0x50] sm:$0xff]  ;;  %v10498_v53 = vld [vmem:[%s13687_s2 + $0xa0] sm:$0xff]   ;;  %v254_v57 = vld [vmem:[%s10707_s14 + $0x68] sm:$0xff] }
  0x1a   : > { %9588 = vmatpush3.bf16.msra.mxu1 %v10486_v7  ;;  %9537 = vmatprep.subr.bf16.mxu0 %v10487_v8  ;;  %v582_v54 = vld [vmem:[%s10707_s14 + $0x51] sm:$0xff]  ;;  %v583_v55 = vld [vmem:[%s10707_s14 + $0x59] sm:$0xff]  ;;  %v10503_v58 = vld [vmem:[%s13687_s2 + $0xe8] sm:$0xff]   ;;  %v282_v62 = vpack.c.bf16 %v252_v52, %v251_v51 }
  0x1b   : > { %9589 = vmatprep.subr.bf16.mxu1 %v10488_v9  ;;  %v253_v56 = vld [vmem:[%s10707_s14 + $0x60] sm:$0xff]  ;;  %v585_v60 = vld [vmem:[%s10707_s14 + $0x69] sm:$0xff]  ;;  %v10499_v61 = vld [vmem:[%s13687_s2 + $0x98] sm:$0xff]   ;;  %v613_v0 = vpack.c.bf16 %v583_v55, %v582_v54 }
  0x1c   : > { %v584_v59 = vld [vmem:[%s10707_s14 + $0x61] sm:$0xff]  ;;  %v283_v1 = vpack.c.bf16 %v254_v57, %v253_v56  ;;  %v10501_v3 = vld [vmem:[%s13687_s2 + $0x90] sm:$0xff]   ;;  %v256_v5 = vld [vmem:[%s10707_s14 + $0x78] sm:$0xff] }
  0x1d   : > { %9538 = vmatpush3.bf16.msra.mxu0 %v10487_v8  ;;  %v10505_v63 = vld [vmem:[%s13687_s2 + $0xe0] sm:$0xff]   ;;  %v614_v2 = vpack.c.bf16 %v585_v60, %v584_v59  ;;  %v255_v4 = vld [vmem:[%s10707_s14 + $0x70] sm:$0xff]  ;;  %v10506_v6 = vld [vmem:[%s13687_s2 + $0xd8] sm:$0xff]  }
  0x1e   : > { %9590 = vmatpush3.bf16.msra.mxu1 %v10488_v9  ;;  %9539 = vmatprep.subr.bf16.mxu0 %v10489_v10  ;;  %v586_v7 = vld [vmem:[%s10707_s14 + $0x71] sm:$0xff]  ;;  %v587_v8 = vld [vmem:[%s10707_s14 + $0x79] sm:$0xff]  ;;  %v588_v11 = vld [vmem:[%s10707_s14 + $0x81] sm:$0xff] }
  0x1f   : > { %9591 = vmatprep.subr.bf16.mxu1 %v10490_v14  ;;  %v257_v9 = vld [vmem:[%s10707_s14 + $0x80] sm:$0xff]  ;;  %v589_v12 = vld [vmem:[%s10707_s14 + $0x89] sm:$0xff]  ;;  %v615_v16 = vpack.c.bf16 %v587_v8, %v586_v7  ;;  %v590_v23 = vld [vmem:[%s10707_s14 + $0x91] sm:$0xff] }
  0x20   : > { %v10504_v13 = vld [vmem:[%s13687_s2 + $0x88] sm:$0xff]   ;;  %v10507_v15 = vld [vmem:[%s13687_s2 + $0xd0] sm:$0xff]   ;;  %v591_v24 = vld [vmem:[%s10707_s14 + $0x99] sm:$0xff] }
  0x21   : > { %9540 = vmatpush3.bf16.msra.mxu0 %v10489_v10  ;;  %v258_v10 = vld [vmem:[%s10707_s14 + $0x88] sm:$0xff]  ;;  %v261_v25 = vld [vmem:[%s10707_s14 + $0xa0] sm:$0xff]  ;;  %v10819_v29 = vld [vmem:[%s13687_s2 + $0x138] sm:$0xff]  }
  0x22   : > { %9592 = vmatpush3.bf16.msra.mxu1 %v10490_v14  ;;  %9541 = vmatprep.subr.bf16.mxu0 %v10491_v18  ;;  %v284_v14 = vpack.c.bf16 %v256_v5, %v255_v4  ;;  %v285_v17 = vpack.c.bf16 %v258_v10, %v257_v9  ;;  %v10509_v22 = vld [vmem:[%s13687_s2 + $0xc8] sm:$0xff]   ;;  %v264_v36 = vld [vmem:[%s10707_s14 + $0xb8] sm:$0xff]  ;;  %v265_v39 = vld [vmem:[%s10707_s14 + $0xc0] sm:$0xff] }
  0x23   : > { %9593 = vmatprep.subr.bf16.mxu1 %v10492_v19  ;;  %v592_v27 = vld [vmem:[%s10707_s14 + $0xa1] sm:$0xff]  ;;  %v593_v28 = vld [vmem:[%s10707_s14 + $0xa9] sm:$0xff]  ;;  %v594_v37 = vld [vmem:[%s10707_s14 + $0xb1] sm:$0xff] }
  0x24   : > { %v595_v38 = vld [vmem:[%s10707_s14 + $0xb9] sm:$0xff]  ;;  %v266_v40 = vld [vmem:[%s10707_s14 + $0xc8] sm:$0xff]  ;;  %v271_v60 = vld [vmem:[%s10707_s14 + $0xf0] sm:$0xff] }
  0x25   : > { %9542 = vmatpush3.bf16.msra.mxu0 %v10491_v18  ;;  %v616_v18 = vpack.c.bf16 %v589_v12, %v588_v11  ;;  %v596_v41 = vld [vmem:[%s10707_s14 + $0xc1] sm:$0xff]  ;;  %v597_v42 = vld [vmem:[%s10707_s14 + $0xc9] sm:$0xff]  ;;  %v599_v51 = vld [vmem:[%s10707_s14 + $0xd9] sm:$0xff] }
  0x26   : > { %9594 = vmatpush3.bf16.msra.mxu1 %v10492_v19  ;;  %9543 = vmatprep.subr.bf16.mxu0 %v10493_v20  ;;  %v10508_v19 = vld [vmem:[%s13687_s2 + $0x80] sm:$0xff]   ;;  %v601_v55 = vld [vmem:[%s10707_s14 + $0xe9] sm:$0xff]  ;;  %v276_v9 = vld [vmem:[%s10707_s14 + $0x118] sm:$0xff] }
  0x27   : > { %9595 = vmatprep.subr.bf16.mxu1 %v10494_v21  ;;  %v269_v52 = vld [vmem:[%s10707_s14 + $0xe0] sm:$0xff]  ;;  %v275_v8 = vld [vmem:[%s10707_s14 + $0x110] sm:$0xff] }
  0x28   : > { %v600_v54 = vld [vmem:[%s10707_s14 + $0xe1] sm:$0xff]  ;;  %v606_v10 = vld [vmem:[%s10707_s14 + $0x111] sm:$0xff]  ;;  %v607_v11 = vld [vmem:[%s10707_s14 + $0x119] sm:$0xff] }
  0x29   : > { %9544 = vmatpush3.bf16.msra.mxu0 %v10493_v20  ;;  %v259_v20 = vld [vmem:[%s10707_s14 + $0x90] sm:$0xff]  ;;  %v622_v59 = vpack.c.bf16 %v601_v55, %v600_v54  ;;  %v976_v12 = vld [vmem:[%s10707_s14 + $0x2] sm:$0xff]  ;;  %v10636_v55 = vmov 0  }
  0x2a   : > { %9596 = vmatpush3.bf16.msra.mxu1 %v10494_v21  ;;  %9633 = vmatprep.subr.bf16.mxu0 %v10495_v26  ;;  %v260_v21 = vld [vmem:[%s10707_s14 + $0x98] sm:$0xff] }
  0x2b   : > { %9685 = vmatprep.subr.bf16.mxu1 %v10500_v45  ;;  %v286_v30 = vpack.c.bf16 %v260_v21, %v259_v20  ;;  %v1382_v20 = vld [vmem:[%s10707_s14 + $0x22] sm:$0xff]  ;;  %v1383_v21 = vld [vmem:[%s10707_s14 + $0x2a] sm:$0xff]  ;;  %10477 = vset.pattern.permute.xlu0 %v10636_v55 }
  0x2c   : > { %9546 = vmatmul.mubr.bf16.vlgmr.msra.gmra.mxu0 %v278_v31  ;;  %v10510_v31 = vld [vmem:[%s13687_s2 + $0xc0] sm:$0xff]   ;;  %10478 = vset.pattern.permute.xlu1 %v10636_v55  ;;  %v1788_v55 = vld [vmem:[%s10707_s14 + $0x33] sm:$0xff] }
  0x2d   : > { %9598 = vmatmul.mubr.bf16.vlgmr.msra.gmra.mxu1 %v609_v32  ;;  %9634 = vmatpush3.bf16.msra.mxu0 %v10495_v26  ;;  %v262_v26 = vld [vmem:[%s10707_s14 + $0xa8] sm:$0xff]  ;;  %v617_v32 = vpack.c.bf16 %v591_v24, %v590_v23  ;;  %v983_v23 = vld [vmem:[%s10707_s14 + $0x3a] sm:$0xff]  ;;  %v1417_v24 = vpack.c.bf16 %v1383_v21, %v1382_v20  ;;  %v1006_v20 = vld [vmem:[%s10707_s14 + $0xf2] sm:$0xff] }
  0x2e   : > { %9549 = vmatprep.mubr.bf16.mxu0 %v279_v33  ;;  %9601 = vmatprep.mubr.bf16.mxu1 %v610_v34  ;;  %v287_v33 = vpack.c.bf16 %v262_v26, %v261_v25  ;;  %v618_v34 = vpack.c.bf16 %v593_v28, %v592_v27  ;;  %v10512_v26 = vld [vmem:[%s13687_s2 + $0x130] sm:$0xff]   ;;  %v1386_v28 = vld [vmem:[%s10707_s14 + $0x42] sm:$0xff]  ;;  %v1007_v21 = vld [vmem:[%s10707_s14 + $0xfa] sm:$0xff] }
  0x2f   : > { %9635 = vmatprep.subr.bf16.mxu0 %v10496_v35  ;;  %9686 = vmatpush3.bf16.msra.mxu1 %v10500_v45  ;;  %v619_v45 = vpack.c.bf16 %v595_v38, %v594_v37  ;;  %v10518_v27 = vld [vmem:[%s13687_s2 + $0x170] sm:$0xff]   ;;  %v10521_v37 = vld [vmem:[%s13687_s2 + $0x160] sm:$0xff]  }
  0x30   : > { %9687 = vmatprep.subr.bf16.mxu1 %v10502_v49  ;;  %v1390_v38 = vld [vmem:[%s10707_s14 + $0x62] sm:$0xff] }
  0x31   : > { %9636 = vmatpush3.bf16.msra.mxu0 %v10496_v35  ;;  %v263_v35 = vld [vmem:[%s10707_s14 + $0xb0] sm:$0xff] }
  0x32   : > { %9637 = vmatprep.subr.bf16.mxu0 %v10497_v44  ;;  %v288_v43 = vpack.c.bf16 %v264_v36, %v263_v35  ;;  %v10514_v36 = vld [vmem:[%s13687_s2 + $0x120] sm:$0xff]  }
  0x33   : > { %9688 = vmatpush3.bf16.msra.mxu1 %v10502_v49  ;;  %v268_v49 = vld [vmem:[%s10707_s14 + $0xd8] sm:$0xff] }
  0x34   : > { %9550 = vmatmul.mubr.bf16.gmra.mxu0 %v280_v46  ;;  %9689 = vmatprep.subr.bf16.mxu1 %v10503_v58  ;;  %v289_v46 = vpack.c.bf16 %v266_v40, %v265_v39  ;;  %v1391_v39 = vld [vmem:[%s10707_s14 + $0x6a] sm:$0xff]  ;;  %v990_v40 = vld [vmem:[%s10707_s14 + $0x72] sm:$0xff] }
  0x35   : > { %9602 = vmatmul.mubr.bf16.gmra.mxu1 %v611_v47  ;;  %9553 = vmatprep.mubr.bf16.mxu0 %v281_v48  ;;  %v620_v47 = vpack.c.bf16 %v597_v42, %v596_v41  ;;  %v267_v48 = vld [vmem:[%s10707_s14 + $0xd0] sm:$0xff]  ;;  %v991_v41 = vld [vmem:[%s10707_s14 + $0x7a] sm:$0xff] }
  0x36   : > { %9605 = vmatprep.mubr.bf16.mxu1 %v612_v50  ;;  %9638 = vmatpush3.bf16.msra.mxu0 %v10497_v44  ;;  %v10836_v44 = vld [vmem:[%s13687_s2 + $0x178] sm:$0xff]   ;;  %v290_v56 = vpack.c.bf16 %v268_v49, %v267_v48  ;;  %v10523_v48 = vld [vmem:[%s13687_s2 + $0x150] sm:$0xff]  }
  0x37   : > { %9639 = vmatprep.subr.bf16.mxu0 %v10498_v53  ;;  %9690 = vmatpush3.bf16.msra.mxu1 %v10503_v58  ;;  %v598_v50 = vld [vmem:[%s10707_s14 + $0xd1] sm:$0xff] }
  0x38   : > { %9691 = vmatprep.subr.bf16.mxu1 %v10505_v63  ;;  %v621_v57 = vpack.c.bf16 %v599_v51, %v598_v50  ;;  %v10515_v42 = vld [vmem:[%s13687_s2 + $0x118] sm:$0xff]   ;;  %v1395_v49 = vld [vmem:[%s10707_s14 + $0x8a] sm:$0xff] }
  0x39   : > { %v994_v50 = vld [vmem:[%s10707_s14 + $0x92] sm:$0xff]  ;;  %v995_v51 = vld [vmem:[%s10707_s14 + $0x9a] sm:$0xff] }
  0x3a   : > { %9640 = vmatpush3.bf16.msra.mxu0 %v10498_v53  ;;  %v270_v53 = vld [vmem:[%s10707_s14 + $0xe8] sm:$0xff] }
  0x3b   : > { %9641 = vmatprep.subr.bf16.mxu0 %v10499_v61  ;;  %9692 = vmatpush3.bf16.msra.mxu1 %v10505_v63  ;;  %v291_v58 = vpack.c.bf16 %v270_v53, %v269_v52  ;;  %v603_v63 = vld [vmem:[%s10707_s14 + $0xf9] sm:$0xff]  ;;  %v10520_v52 = vld [vmem:[%s13687_s2 + $0x108] sm:$0xff]  }
  0x3c   : > { %9554 = vmatmul.mubr.bf16.gmra.mxu0 %v282_v62  ;;  %9693 = vmatprep.subr.bf16.mxu1 %v10506_v6  ;;  %v602_v62 = vld [vmem:[%s10707_s14 + $0xf1] sm:$0xff]  ;;  %v10525_v53 = vld [vmem:[%s13687_s2 + $0x148] sm:$0xff]  }
  0x3d   : > { %9606 = vmatmul.mubr.bf16.gmra.mxu1 %v613_v0  ;;  %9557 = vmatprep.mubr.bf16.mxu0 %v283_v1  ;;  %v273_v0 = vld [vmem:[%s10707_s14 + $0x100] sm:$0xff]  ;;  %v274_v1 = vld [vmem:[%s10707_s14 + $0x108] sm:$0xff]  ;;  %v623_v5 = vpack.c.bf16 %v603_v63, %v602_v62  ;;  %v998_v62 = vld [vmem:[%s10707_s14 + $0xb2] sm:$0xff] }
  0x3e   : > { %9609 = vmatprep.mubr.bf16.mxu1 %v614_v2  ;;  %9642 = vmatpush3.bf16.msra.mxu0 %v10499_v61  ;;  %v272_v61 = vld [vmem:[%s10707_s14 + $0xf8] sm:$0xff]  ;;  %v604_v2 = vld [vmem:[%s10707_s14 + $0x101] sm:$0xff] }
  0x3f   : > { %9643 = vmatprep.subr.bf16.mxu0 %v10501_v3  ;;  %9694 = vmatpush3.bf16.msra.mxu1 %v10506_v6  ;;  %v292_v4 = vpack.c.bf16 %v272_v61, %v271_v60  ;;  %v293_v6 = vpack.c.bf16 %v274_v1, %v273_v0  ;;  %v1399_v60 = vld [vmem:[%s10707_s14 + $0xaa] sm:$0xff]  ;;  %v10526_v61 = vld [vmem:[%s13687_s2 + $0x140] sm:$0xff]   ;;  %v10936_v0 = vld [vmem:[%s13687_s2 + $0x1b8] sm:$0xff]  }
  0x40   : > { %9695 = vmatprep.subr.bf16.mxu1 %v10507_v15  ;;  %v999_v63 = vld [vmem:[%s10707_s14 + $0xba] sm:$0xff]  ;;  %v10941_v1 = vld [vmem:[%s13685_s0 + $0x10] sm:$0xff] }
  0x41   : > { %3888 = vperm.xlu1 %10478, %v10941_v1  }
  0x42   : > { %9644 = vmatpush3.bf16.msra.mxu0 %v10501_v3  ;;  %v605_v3 = vld [vmem:[%s10707_s14 + $0x109] sm:$0xff] }
  0x43   : > { %9645 = vmatprep.subr.bf16.mxu0 %v10504_v13  ;;  %9696 = vmatpush3.bf16.msra.mxu1 %v10507_v15  ;;  %v624_v7 = vpack.c.bf16 %v605_v3, %v604_v2  ;;  %v979_v15 = vld [vmem:[%s10707_s14 + $0x1a] sm:$0xff]  ;;  %v10951_v3 = vld [vmem:[%s13685_s0 + $0x8] sm:$0xff] }
  0x44   : > { %9558 = vmatmul.mubr.bf16.gmra.mxu0 %v284_v14  ;;  %9697 = vmatprep.subr.bf16.mxu1 %v10509_v22  ;;  %v978_v14 = vld [vmem:[%s10707_s14 + $0x12] sm:$0xff] }
  0x45   : > { %9610 = vmatmul.mubr.bf16.gmra.mxu1 %v615_v16  ;;  %9561 = vmatprep.mubr.bf16.mxu0 %v285_v17  ;;  %v294_v16 = vpack.c.bf16 %v276_v9, %v275_v8  ;;  %v625_v17 = vpack.c.bf16 %v607_v11, %v606_v10  ;;  %v10946_v2 = vld [vmem:[%s13687_s2 + $0x1f8] sm:$0xff]   ;;  %v1403_v8 = vld [vmem:[%s10707_s14 + $0xca] sm:$0xff]  ;;  %v10967_v9 = vld [vmem:[%s13685_s0 + $0x20] sm:$0xff] }
  0x46   : > { %9613 = vmatprep.mubr.bf16.mxu1 %v616_v18  ;;  %9646 = vmatpush3.bf16.msra.mxu0 %v10504_v13  ;;  %v977_v13 = vld [vmem:[%s10707_s14 + $0xa] sm:$0xff]  ;;  %v1002_v10 = vld [vmem:[%s10707_s14 + $0xd2] sm:$0xff]  ;;  %v1003_v11 = vld [vmem:[%s10707_s14 + $0xda] sm:$0xff] }
  0x47   : > { %9647 = vmatprep.subr.bf16.mxu0 %v10508_v19  ;;  %9698 = vmatpush3.bf16.msra.mxu1 %v10509_v22  ;;  %v1012_v18 = vpack.c.bf16 %v977_v13, %v976_v12  ;;  %v982_v22 = vld [vmem:[%s10707_s14 + $0x32] sm:$0xff]  ;;  %v10974_v12 = vld [vmem:[%s13685_s0 + $0x28] sm:$0xff] }
  0x48   : > { %9699 = vmatprep.subr.bf16.mxu1 %v10510_v31  ;;  %v1015_v25 = vpack.c.bf16 %v983_v23, %v982_v22  ;;  %v10981_v13 = vld [vmem:[%s13685_s0 + $0x30] sm:$0xff]  ;;  %v11002_v22 = vld [vmem:[%s13685_s0 + $0x48] sm:$0xff] }
  0x49   : > { %v11009_v23 = vld [vmem:[%s13685_s0 + $0x50] sm:$0xff] }
  0x4a   : > { %9648 = vmatpush3.bf16.msra.mxu0 %v10508_v19  ;;  %v1013_v19 = vpack.c.bf16 %v979_v15, %v978_v14  ;;  %v1025_v15 = vpack.c.bf16 %v1003_v11, %v1002_v10  ;;  %v10528_v10 = vld [vmem:[%s13687_s2 + $0x1b0] sm:$0xff]   ;;  %v2194_v11 = vld [vmem:[%s10707_s14 + $0x44] sm:$0xff] }
  0x4b   : > { %9737 = vmatprep.subr.bf16.mxu0 %v10819_v29  ;;  %9700 = vmatpush3.bf16.msra.mxu1 %v10510_v31  ;;  %v10513_v31 = vld [vmem:[%s13687_s2 + $0x128] sm:$0xff]  }
  0x4c   : > { %9562 = vmatmul.mubr.bf16.gmra.mxu0 %v286_v30  ;;  %9789 = vmatprep.subr.bf16.mxu1 %v10836_v44  ;;  %v1387_v30 = vld [vmem:[%s10707_s14 + $0x4a] sm:$0xff] }
  0x4d   : > { %9614 = vmatmul.mubr.bf16.gmra.mxu1 %v617_v32  ;;  %9565 = vmatprep.mubr.bf16.mxu0 %v287_v33  ;;  %v986_v32 = vld [vmem:[%s10707_s14 + $0x52] sm:$0xff]  ;;  %v987_v33 = vld [vmem:[%s10707_s14 + $0x5a] sm:$0xff] }
  0x4e   : > { %9617 = vmatprep.mubr.bf16.mxu1 %v618_v34  ;;  %v1419_v34 = vpack.c.bf16 %v1387_v30, %v1386_v28  ;;  %v1017_v35 = vpack.c.bf16 %v987_v33, %v986_v32  ;;  %v1411_v28 = vld [vmem:[%s10707_s14 + $0x10a] sm:$0xff]  ;;  %v11023_v30 = vld [vmem:[%s13685_s0 + $0x60] sm:$0xff] }
  0x4f   : > { %v1011_v32 = vld [vmem:[%s10707_s14 + $0x11a] sm:$0xff]  ;;  %v11030_v33 = vld [vmem:[%s13685_s0 + $0x68] sm:$0xff] }
  0x54   : > { %9566 = vmatmul.mubr.bf16.gmra.mxu0 %v288_v43  ;;  %v10522_v43 = vld [vmem:[%s13687_s2 + $0x158] sm:$0xff]  }
  0x55   : > { %9618 = vmatmul.mubr.bf16.gmra.mxu1 %v619_v45  ;;  %9569 = vmatprep.mubr.bf16.mxu0 %v289_v46  ;;  %v1019_v45 = vpack.c.bf16 %v991_v41, %v990_v40  ;;  %v10517_v46 = vld [vmem:[%s13687_s2 + $0x110] sm:$0xff]   ;;  %v1785_v40 = vld [vmem:[%s10707_s14 + $0x1b] sm:$0xff] }
  0x56   : > { %9621 = vmatprep.mubr.bf16.mxu1 %v620_v47  ;;  %v1394_v47 = vld [vmem:[%s10707_s14 + $0x82] sm:$0xff] }
  0x57   : > { %v1423_v54 = vpack.c.bf16 %v1395_v49, %v1394_v47  ;;  %v11053_v41 = vld [vmem:[%s13685_s0 + $0x80] sm:$0xff] }
  0x58   : > { %v1786_v49 = vld [vmem:[%s10707_s14 + $0x23] sm:$0xff] }
  0x5c   : > { %9570 = vmatmul.mubr.bf16.gmra.mxu0 %v290_v56  ;;  %v10920_v56 = vld [vmem:[%s13685_s0] sm:$0xff] }
  0x5d   : > { %9622 = vmatmul.mubr.bf16.gmra.mxu1 %v621_v57  ;;  %9573 = vmatprep.mubr.bf16.mxu0 %v291_v58  ;;  %v1021_v57 = vpack.c.bf16 %v995_v51, %v994_v50  ;;  %v10524_v58 = vld [vmem:[%s13687_s2 + $0x100] sm:$0xff]   ;;  %v1787_v50 = vld [vmem:[%s10707_s14 + $0x2b] sm:$0xff]  ;;  %v11076_v51 = vld [vmem:[%s13685_s0 + $0x98] sm:$0xff] }
  0x5e   : > { %9625 = vmatprep.mubr.bf16.mxu1 %v622_v59  ;;  %3878 = vperm.xlu0 %10477, %v10920_v56   ;;  %v1398_v59 = vld [vmem:[%s10707_s14 + $0xa2] sm:$0xff] }
  0x62   : > { %3883 = vperm.xlu0 %10477, %v10951_v3  }
  0x64   : > { %9574 = vmatmul.mubr.bf16.gmra.mxu0 %v292_v4  ;;  %v1425_v4 = vpack.c.bf16 %v1399_v60, %v1398_v59  ;;  %v2193_v59 = vld [vmem:[%s10707_s14 + $0x3c] sm:$0xff]  ;;  %v11092_v60 = vld [vmem:[%s13685_s0 + $0xa8] sm:$0xff] }
  0x65   : > { %9626 = vmatmul.mubr.bf16.gmra.mxu1 %v623_v5  ;;  %9577 = vmatprep.mubr.bf16.mxu0 %v293_v6  ;;  %v1023_v5 = vpack.c.bf16 %v999_v63, %v998_v62  ;;  %v10959_v6 = vld [vmem:[%s13685_s0 + $0x18] sm:$0xff]  ;;  %v1821_v62 = vpack.c.bf16 %v1787_v50, %v1786_v49  ;;  %v11168_v49 = vld [vmem:[%s13685_s0 + $0xc8] sm:$0xff]  ;;  %v11173_v50 = vld [vmem:[%s13685_s0 + $0xd0] sm:$0xff] }
  0x66   : > { %9629 = vmatprep.mubr.bf16.mxu1 %v624_v7  ;;  %v1402_v7 = vld [vmem:[%s10707_s14 + $0xc2] sm:$0xff]  ;;  %3893 = vperm.xlu1 %10478, %v10959_v6  }
  0x67   : > { %3898 = vperm.xlu0 %10477, %v10967_v9   ;;  %v1427_v14 = vpack.c.bf16 %v1403_v8, %v1402_v7  ;;  %v1790_v7 = vld [vmem:[%s10707_s14 + $0x43] sm:$0xff]  ;;  %v1791_v8 = vld [vmem:[%s10707_s14 + $0x4b] sm:$0xff] }
  0x6a   : > { %3903 = vperm.xlu1 %10478, %v10974_v12  }
  0x6b   : > { %3908 = vperm.xlu0 %10477, %v10981_v13  }
  0x6c   : > { %9578 = vmatmul.mubr.bf16.gmra.mxu0 %v294_v16  ;;  %v10988_v16 = vld [vmem:[%s13685_s0 + $0x38] sm:$0xff] }
  0x6d   : > { %9630 = vmatmul.mubr.bf16.gmra.mxu1 %v625_v17  ;;  %9649 = vmatprep.mubr.bf16.mxu0 %v1012_v18  ;;  %v1406_v17 = vld [vmem:[%s10707_s14 + $0xe2] sm:$0xff]  ;;  %v1407_v18 = vld [vmem:[%s10707_s14 + $0xea] sm:$0xff] }
  0x6e   : > { %9701 = vmatprep.mubr.bf16.mxu1 %v1013_v19  ;;  %3913 = vperm.xlu1 %10478, %v10988_v16  }
  0x72   : > { %3923 = vperm.xlu1 %10478, %v11002_v22  }
  0x74   : > { %9650 = vmatmul.mubr.bf16.vlgmr.msra.gmra.mxu0 %v1013_v19  ;;  %v10995_v19 = vld [vmem:[%s13685_s0 + $0x40] sm:$0xff] }
  0x75   : > { %9738 = vmatpush3.bf16.msra.mxu0 %v10819_v29  ;;  %9702 = vmatmul.mubr.bf16.vlgmr.msra.gmra.mxu1 %v1417_v24  ;;  %v10519_v29 = vld [vmem:[%s13687_s2 + $0x168] sm:$0xff]  }
  0x76   : > { %9653 = vmatprep.mubr.bf16.mxu0 %v1417_v24  ;;  %9705 = vmatprep.mubr.bf16.mxu1 %v1015_v25  ;;  %v1429_v24 = vpack.c.bf16 %v1407_v18, %v1406_v17  ;;  %v1793_v17 = vld [vmem:[%s10707_s14 + $0x5b] sm:$0xff]  ;;  %v10529_v18 = vld [vmem:[%s13687_s2 + $0x1a8] sm:$0xff]  }
  0x77   : > { %9739 = vmatprep.subr.bf16.mxu0 %v10512_v26  ;;  %9790 = vmatpush3.bf16.msra.mxu1 %v10836_v44  ;;  %v1421_v44 = vpack.c.bf16 %v1391_v39, %v1390_v38  ;;  %v1415_v38 = vld [vmem:[%s10707_s14 + $0x12a] sm:$0xff]  ;;  %v1784_v39 = vld [vmem:[%s10707_s14 + $0x13] sm:$0xff] }
  0x78   : > { %9791 = vmatprep.subr.bf16.mxu1 %v10518_v27  ;;  %3918 = vperm.xlu0 %10477, %v10995_v19   ;;  %v1820_v47 = vpack.c.bf16 %v1785_v40, %v1784_v39  ;;  %v2199_v39 = vld [vmem:[%s10707_s14 + $0x6c] sm:$0xff] }
  0x79   : > { %9740 = vmatpush3.bf16.msra.mxu0 %v10512_v26  ;;  %v11016_v26 = vld [vmem:[%s13685_s0 + $0x58] sm:$0xff] }
  0x7a   : > { %9741 = vmatprep.subr.bf16.mxu0 %v10513_v31  ;;  %3933 = vperm.xlu1 %10478, %v11016_v26   ;;  %v1796_v40 = vld [vmem:[%s10707_s14 + $0x73] sm:$0xff] }
  0x7b   : > { %9792 = vmatpush3.bf16.msra.mxu1 %v10518_v27  ;;  %v1410_v27 = vld [vmem:[%s10707_s14 + $0x102] sm:$0xff] }
  0x7c   : > { %9654 = vmatmul.mubr.bf16.gmra.mxu0 %v1015_v25  ;;  %9793 = vmatprep.subr.bf16.mxu1 %v10519_v29  ;;  %v1027_v25 = vpack.c.bf16 %v1007_v21, %v1006_v20  ;;  %v10534_v20 = vld [vmem:[%s13687_s2 + $0x1f0] sm:$0xff]  }
  0x7d   : > { %9706 = vmatmul.mubr.bf16.gmra.mxu1 %v1419_v34  ;;  %9657 = vmatprep.mubr.bf16.mxu0 %v1419_v34  ;;  %v1431_v34 = vpack.c.bf16 %v1411_v28, %v1410_v27  ;;  %v2196_v21 = vld [vmem:[%s10707_s14 + $0x54] sm:$0xff]  ;;  %v11134_v27 = vld [vmem:[%s13685_s0 + $0xc0] sm:$0xff]  ;;  %v1823_v28 = vpack.c.bf16 %v1791_v8, %v1790_v7  ;;  %v1799_v7 = vld [vmem:[%s10707_s14 + $0x8b] sm:$0xff] }
  0x7e   : > { %9709 = vmatprep.mubr.bf16.mxu1 %v1017_v35  ;;  %9742 = vmatpush3.bf16.msra.mxu0 %v10513_v31  ;;  %v1010_v31 = vld [vmem:[%s10707_s14 + $0x112] sm:$0xff]  ;;  %v2202_v8 = vld [vmem:[%s10707_s14 + $0x84] sm:$0xff] }
  0x7f   : > { %9743 = vmatprep.subr.bf16.mxu0 %v10514_v36  ;;  %9794 = vmatpush3.bf16.msra.mxu1 %v10519_v29  ;;  %v11036_v29 = vld [vmem:[%s13685_s0 + $0x70] sm:$0xff] }
  0x80   : > { %9795 = vmatprep.subr.bf16.mxu1 %v10521_v37  ;;  %3928 = vperm.xlu0 %10477, %v11009_v23  }
  0x81   : > { %3943 = vperm.xlu1 %10478, %v11030_v33  }
  0x82   : > { %9744 = vmatpush3.bf16.msra.mxu0 %v10514_v36  ;;  %v11044_v36 = vld [vmem:[%s13685_s0 + $0x78] sm:$0xff] }
  0x83   : > { %9745 = vmatprep.subr.bf16.mxu0 %v10515_v42  ;;  %9796 = vmatpush3.bf16.msra.mxu1 %v10521_v37  ;;  %v1414_v37 = vld [vmem:[%s10707_s14 + $0x122] sm:$0xff] }
  0x84   : > { %9658 = vmatmul.mubr.bf16.gmra.mxu0 %v1017_v35  ;;  %9797 = vmatprep.subr.bf16.mxu1 %v10522_v43  ;;  %v1029_v35 = vpack.c.bf16 %v1011_v32, %v1010_v31 }
  0x85   : > { %9710 = vmatmul.mubr.bf16.gmra.mxu1 %v1421_v44  ;;  %9661 = vmatprep.mubr.bf16.mxu0 %v1421_v44  ;;  %v11060_v44 = vld [vmem:[%s13685_s0 + $0x88] sm:$0xff] }
  0x86   : > { %9713 = vmatprep.mubr.bf16.mxu1 %v1019_v45  ;;  %9746 = vmatpush3.bf16.msra.mxu0 %v10515_v42  ;;  %v2188_v42 = vld [vmem:[%s10707_s14 + $0x14] sm:$0xff] }
  0x87   : > { %9747 = vmatprep.subr.bf16.mxu0 %v10517_v46  ;;  %9798 = vmatpush3.bf16.msra.mxu1 %v10522_v43  ;;  %v2189_v43 = vld [vmem:[%s10707_s14 + $0x1c] sm:$0xff] }
  0x88   : > { %9799 = vmatprep.subr.bf16.mxu1 %v10523_v48  ;;  %3938 = vperm.xlu0 %10477, %v11023_v30  }
  0x89   : > { %3953 = vperm.xlu1 %10478, %v11044_v36  }
  0x8a   : > { %9748 = vmatpush3.bf16.msra.mxu0 %v10517_v46  ;;  %v1433_v46 = vpack.c.bf16 %v1415_v38, %v1414_v37  ;;  %v10530_v37 = vld [vmem:[%s13687_s2 + $0x1a0] sm:$0xff]  }
  0x8b   : > { %9749 = vmatprep.subr.bf16.mxu0 %v10520_v52  ;;  %9800 = vmatpush3.bf16.msra.mxu1 %v10523_v48  ;;  %v2224_v48 = vpack.c.bf16 %v2189_v43, %v2188_v42  ;;  %v2198_v38 = vld [vmem:[%s10707_s14 + $0x64] sm:$0xff]  ;;  %v1797_v42 = vld [vmem:[%s10707_s14 + $0x7b] sm:$0xff] }
  0x8c   : > { %9662 = vmatmul.mubr.bf16.gmra.mxu0 %v1019_v45  ;;  %9801 = vmatprep.subr.bf16.mxu1 %v10525_v53  ;;  %v11066_v45 = vld [vmem:[%s13685_s0 + $0x90] sm:$0xff]  ;;  %v10537_v43 = vld [vmem:[%s13687_s2 + $0x1e0] sm:$0xff]  }
  0x8d   : > { %9714 = vmatmul.mubr.bf16.gmra.mxu1 %v1423_v54  ;;  %9665 = vmatprep.mubr.bf16.mxu0 %v1423_v54  ;;  %v11083_v54 = vld [vmem:[%s13685_s0 + $0xa0] sm:$0xff] }
  0x8e   : > { %9717 = vmatprep.mubr.bf16.mxu1 %v1021_v57  ;;  %9750 = vmatpush3.bf16.msra.mxu0 %v10520_v52  ;;  %v2190_v52 = vld [vmem:[%s10707_s14 + $0x24] sm:$0xff] }
  0x8f   : > { %9751 = vmatprep.subr.bf16.mxu0 %v10524_v58  ;;  %9802 = vmatpush3.bf16.msra.mxu1 %v10525_v53  ;;  %v2191_v53 = vld [vmem:[%s10707_s14 + $0x2c] sm:$0xff] }
  0x90   : > { %9803 = vmatprep.subr.bf16.mxu1 %v10526_v61  ;;  %3948 = vperm.xlu0 %10477, %v11036_v29   ;;  %v11101_v63 = vpack.c.bf16 %v2191_v53, %v2190_v52  ;;  %v10538_v52 = vld [vmem:[%s13687_s2 + $0x1d8] sm:$0xff]  }
  0x91   : > { %3963 = vperm.xlu1 %10478, %v11060_v44  }
  0x92   : > { %9752 = vmatpush3.bf16.msra.mxu0 %v10524_v58  ;;  %v2192_v58 = vld [vmem:[%s10707_s14 + $0x34] sm:$0xff] }
  0x93   : > { %9804 = vmatpush3.bf16.msra.mxu1 %v10526_v61  ;;  %9841 = vmatprep.subr.bf16.mxu0 %v10936_v0  ;;  %v11098_v61 = vld [vmem:[%s13685_s0 + $0xb0] sm:$0xff] }
  0x94   : > { %9666 = vmatmul.mubr.bf16.gmra.mxu0 %v1021_v57  ;;  %9893 = vmatprep.subr.bf16.mxu1 %v10946_v2  ;;  %v1789_v57 = vld [vmem:[%s10707_s14 + $0x3b] sm:$0xff] }
  0x95   : > { %9718 = vmatmul.mubr.bf16.gmra.mxu1 %v1425_v4  ;;  %9669 = vmatprep.mubr.bf16.mxu0 %v1425_v4  ;;  %v1822_v4 = vpack.c.bf16 %v1789_v57, %v1788_v55  ;;  %v11180_v55 = vpack.c.bf16 %v2199_v39, %v2198_v38  ;;  %v1826_v57 = vpack.c.bf16 %v1797_v42, %v1796_v40  ;;  %v1802_v38 = vld [vmem:[%s10707_s14 + $0xa3] sm:$0xff]  ;;  %v1803_v39 = vld [vmem:[%s10707_s14 + $0xab] sm:$0xff] }
  0x96   : > { %9721 = vmatprep.mubr.bf16.mxu1 %v1023_v5  ;;  %3958 = vperm.xlu0 %10477, %v11053_v41   ;;  %v11234_v40 = vld [vmem:[%s13685_s0 + $0xe8] sm:$0xff] }
  0x97   : > { %3973 = vperm.xlu1 %10478, %v11076_v51   ;;  %v2206_v42 = vld [vmem:[%s10707_s14 + $0xa4] sm:$0xff] }
  0x9a   : > { %3968 = vperm.xlu0 %10477, %v11066_v45  }
  0x9b   : > { %3983 = vperm.xlu1 %10478, %v11092_v60  }
  0x9c   : > { %9670 = vmatmul.mubr.bf16.gmra.mxu0 %v1023_v5  ;;  %v11103_v5 = vpack.c.bf16 %v2193_v59, %v2192_v58  ;;  %v10533_v59 = vld [vmem:[%s13687_s2 + $0x190] sm:$0xff]  }
  0x9d   : > { %9722 = vmatmul.mubr.bf16.gmra.mxu1 %v1427_v14  ;;  %9673 = vmatprep.mubr.bf16.mxu0 %v1427_v14  ;;  %v2195_v14 = vld [vmem:[%s10707_s14 + $0x4c] sm:$0xff] }
  0x9e   : > { %9725 = vmatprep.mubr.bf16.mxu1 %v1025_v15  ;;  %3978 = vperm.xlu0 %10477, %v11083_v54   ;;  %v11142_v31 = vpack.c.bf16 %v2195_v14, %v2194_v11  ;;  %v1800_v11 = vld [vmem:[%s10707_s14 + $0x93] sm:$0xff]  ;;  %v1801_v14 = vld [vmem:[%s10707_s14 + $0x9b] sm:$0xff] }
  0xa2   : > { %3988 = vperm.xlu0 %10477, %v11098_v61  }
  0xa4   : > { %9674 = vmatmul.mubr.bf16.gmra.mxu0 %v1025_v15  ;;  %v1792_v15 = vld [vmem:[%s10707_s14 + $0x53] sm:$0xff] }
  0xa5   : > { %9726 = vmatmul.mubr.bf16.gmra.mxu1 %v1429_v24  ;;  %9677 = vmatprep.mubr.bf16.mxu0 %v1429_v24  ;;  %v2197_v24 = vld [vmem:[%s10707_s14 + $0x5c] sm:$0xff]  ;;  %v1824_v32 = vpack.c.bf16 %v1793_v17, %v1792_v15  ;;  %v2204_v15 = vld [vmem:[%s10707_s14 + $0x94] sm:$0xff] }
  0xa6   : > { %9729 = vmatprep.mubr.bf16.mxu1 %v1027_v25  ;;  %3998 = vperm.xlu0 %10477, %v11134_v27   ;;  %v2205_v17 = vld [vmem:[%s10707_s14 + $0x9c] sm:$0xff] }
  0xaa   : > { %4008 = vperm.xlu0 %10477, %v11173_v50  }
  0xac   : > { %9678 = vmatmul.mubr.bf16.gmra.mxu0 %v1027_v25  ;;  %v11129_v25 = vld [vmem:[%s13685_s0 + $0xb8] sm:$0xff] }
  0xad   : > { %9730 = vmatmul.mubr.bf16.gmra.mxu1 %v1431_v34  ;;  %9681 = vmatprep.mubr.bf16.mxu0 %v1431_v34  ;;  %v11145_v34 = vpack.c.bf16 %v2197_v24, %v2196_v21  ;;  %v11211_v21 = vld [vmem:[%s13685_s0 + $0xe0] sm:$0xff]  ;;  %v10541_v24 = vld [vmem:[%s13687_s2 + $0x1c8] sm:$0xff]  }
  0xae   : > { %9733 = vmatprep.mubr.bf16.mxu1 %v1029_v35  ;;  %3993 = vperm.xlu1 %10478, %v11129_v25  }
  0xaf   : > { %4018 = vperm.xlu0 %10477, %v11211_v21  }
  0xb2   : > { %4003 = vperm.xlu1 %10478, %v11168_v49  }
  0xb4   : > { %9682 = vmatmul.mubr.bf16.gmra.mxu0 %v1029_v35  ;;  %v1794_v35 = vld [vmem:[%s10707_s14 + $0x63] sm:$0xff] }
  0xb5   : > { %9734 = vmatmul.mubr.bf16.gmra.mxu1 %v1433_v46  ;;  %9753 = vmatprep.mubr.bf16.mxu0 %v1820_v47  ;;  %v2200_v46 = vld [vmem:[%s10707_s14 + $0x74] sm:$0xff]  ;;  %v2201_v47 = vld [vmem:[%s10707_s14 + $0x7c] sm:$0xff] }
  0xb6   : > { %9805 = vmatprep.mubr.bf16.mxu1 %v2224_v48  ;;  %v10531_v48 = vld [vmem:[%s13687_s2 + $0x198] sm:$0xff]   ;;  %v11183_v58 = vpack.c.bf16 %v2201_v47, %v2200_v46 }
  0xb7   : > { %v1804_v46 = vld [vmem:[%s10707_s14 + $0xb3] sm:$0xff]  ;;  %v1805_v47 = vld [vmem:[%s10707_s14 + $0xbb] sm:$0xff] }
  0xbc   : > { %9754 = vmatmul.mubr.bf16.vlgmr.msra.gmra.mxu0 %v1821_v62  ;;  %v10539_v62 = vld [vmem:[%s13687_s2 + $0x1d0] sm:$0xff]  }
  0xbd   : > { %9842 = vmatpush3.bf16.msra.mxu0 %v10936_v0  ;;  %9806 = vmatmul.mubr.bf16.vlgmr.msra.gmra.mxu1 %v11101_v63  ;;  %v10535_v0 = vld [vmem:[%s13687_s2 + $0x1e8] sm:$0xff]  }
  0xbe   : > { %9757 = vmatprep.mubr.bf16.mxu0 %v1822_v4  ;;  %9809 = vmatprep.mubr.bf16.mxu1 %v11103_v5  ;;  %v1798_v4 = vld [vmem:[%s10707_s14 + $0x83] sm:$0xff] }
  0xbf   : > { %9843 = vmatprep.subr.bf16.mxu0 %v10528_v10  ;;  %9894 = vmatpush3.bf16.msra.mxu1 %v10946_v2  ;;  %v1795_v2 = vld [vmem:[%s10707_s14 + $0x6b] sm:$0xff] }
  0xc0   : > { %9895 = vmatprep.subr.bf16.mxu1 %v10534_v20  ;;  %v1825_v53 = vpack.c.bf16 %v1795_v2, %v1794_v35  ;;  %v11221_v35 = vpack.c.bf16 %v2205_v17, %v2204_v15  ;;  %v10540_v2 = vld [vmem:[%s13687_s2 + $0x180] sm:$0xff]   ;;  %v11279_v17 = vld [vmem:[%s13685_s0 + $0x108] sm:$0xff] }
  0xc1   : > { %9844 = vmatpush3.bf16.msra.mxu0 %v10528_v10  ;;  %v2203_v10 = vld [vmem:[%s10707_s14 + $0x8c] sm:$0xff]  ;;  %v2210_v15 = vld [vmem:[%s10707_s14 + $0xc4] sm:$0xff] }
  0xc2   : > { %9845 = vmatprep.subr.bf16.mxu0 %v10529_v18 }
  0xc3   : > { %9896 = vmatpush3.bf16.msra.mxu1 %v10534_v20  ;;  %v11206_v20 = vld [vmem:[%s13685_s0 + $0xd8] sm:$0xff] }
  0xc4   : > { %9758 = vmatmul.mubr.bf16.gmra.mxu0 %v1823_v28  ;;  %9897 = vmatprep.subr.bf16.mxu1 %v10535_v0  ;;  %v11218_v28 = vpack.c.bf16 %v2203_v10, %v2202_v8  ;;  %v11269_v10 = vld [vmem:[%s13685_s0 + $0x100] sm:$0xff] }
  0xc5   : > { %9810 = vmatmul.mubr.bf16.gmra.mxu1 %v11142_v31  ;;  %9761 = vmatprep.mubr.bf16.mxu0 %v1824_v32  ;;  %v1828_v32 = vpack.c.bf16 %v1801_v14, %v1800_v11  ;;  %v1806_v11 = vld [vmem:[%s10707_s14 + $0xc3] sm:$0xff]  ;;  %v1807_v14 = vld [vmem:[%s10707_s14 + $0xcb] sm:$0xff] }
  0xc6   : > { %9813 = vmatprep.mubr.bf16.mxu1 %v11145_v34  ;;  %9846 = vmatpush3.bf16.msra.mxu0 %v10529_v18  ;;  %v10536_v18 = vld [vmem:[%s13687_s2 + $0x188] sm:$0xff]  }
  0xc7   : > { %9847 = vmatprep.subr.bf16.mxu0 %v10530_v37  ;;  %9898 = vmatpush3.bf16.msra.mxu1 %v10535_v0  ;;  %v1827_v0 = vpack.c.bf16 %v1799_v7, %v1798_v4  ;;  %v1830_v4 = vpack.c.bf16 %v1805_v47, %v1804_v46  ;;  %v11261_v7 = vld [vmem:[%s13685_s0 + $0xf8] sm:$0xff]  ;;  %v1810_v47 = vld [vmem:[%s10707_s14 + $0xe3] sm:$0xff] }
  0xc8   : > { %9899 = vmatprep.subr.bf16.mxu1 %v10537_v43  ;;  %4013 = vperm.xlu1 %10478, %v11206_v20  }
  0xca   : > { %9848 = vmatpush3.bf16.msra.mxu0 %v10530_v37  ;;  %v10542_v37 = vld [vmem:[%s13687_s2 + $0x1c0] sm:$0xff]  }
  0xcb   : > { %9849 = vmatprep.subr.bf16.mxu0 %v10531_v48  ;;  %9900 = vmatpush3.bf16.msra.mxu1 %v10537_v43  ;;  %v2207_v43 = vld [vmem:[%s10707_s14 + $0xac] sm:$0xff] }
  0xcc   : > { %9762 = vmatmul.mubr.bf16.gmra.mxu0 %v1825_v53  ;;  %9901 = vmatprep.subr.bf16.mxu1 %v10538_v52  ;;  %v2209_v53 = vld [vmem:[%s10707_s14 + $0xbc] sm:$0xff] }
  0xcd   : > { %9814 = vmatmul.mubr.bf16.gmra.mxu1 %v11180_v55  ;;  %9765 = vmatprep.mubr.bf16.mxu0 %v1826_v57  ;;  %v11251_v57 = vld [vmem:[%s13687_s2 + $0x238] sm:$0xff]  }
  0xce   : > { %9817 = vmatprep.mubr.bf16.mxu1 %v11183_v58  ;;  %9850 = vmatpush3.bf16.msra.mxu0 %v10531_v48  ;;  %v11243_v48 = vld [vmem:[%s13685_s0 + $0xf0] sm:$0xff] }
  0xcf   : > { %9851 = vmatprep.subr.bf16.mxu0 %v10533_v59  ;;  %9902 = vmatpush3.bf16.msra.mxu1 %v10538_v52  ;;  %v2208_v52 = vld [vmem:[%s10707_s14 + $0xb4] sm:$0xff] }
  0xd0   : > { %9903 = vmatprep.subr.bf16.mxu1 %v10539_v62  ;;  %4023 = vperm.xlu1 %10478, %v11234_v40   ;;  %v11263_v8 = vpack.c.bf16 %v2209_v53, %v2208_v52  ;;  %v1811_v52 = vld [vmem:[%s10707_s14 + $0xeb] sm:$0xff] }
  0xd1   : > { %4028 = vperm.xlu0 %10477, %v11243_v48   ;;  %v2214_v53 = vld [vmem:[%s10707_s14 + $0xe4] sm:$0xff] }
  0xd2   : > { %9852 = vmatpush3.bf16.msra.mxu0 %v10533_v59  ;;  %v1829_v59 = vpack.c.bf16 %v1803_v39, %v1802_v38  ;;  %v1831_v38 = vpack.c.bf16 %v1807_v14, %v1806_v11  ;;  %v1813_v11 = vld [vmem:[%s10707_s14 + $0xfb] sm:$0xff] }
  0xd3   : > { %9853 = vmatprep.subr.bf16.mxu0 %v10536_v18  ;;  %9904 = vmatpush3.bf16.msra.mxu1 %v10539_v62  ;;  %v11255_v62 = vpack.c.bf16 %v2207_v43, %v2206_v42  ;;  %v11299_v43 = vld [vmem:[%s13685_s0 + $0x118] sm:$0xff] }
  0xd4   : > { %9766 = vmatmul.mubr.bf16.gmra.mxu0 %v1827_v0  ;;  %9905 = vmatprep.subr.bf16.mxu1 %v10541_v24  ;;  %v1809_v0 = vld [vmem:[%s10707_s14 + $0xdb] sm:$0xff] }
  0xd5   : > { %9818 = vmatmul.mubr.bf16.gmra.mxu1 %v11218_v28  ;;  %9769 = vmatprep.mubr.bf16.mxu0 %v1828_v32  ;;  %v2212_v32 = vld [vmem:[%s10707_s14 + $0xd4] sm:$0xff] }
  0xd6   : > { %9821 = vmatprep.mubr.bf16.mxu1 %v11221_v35  ;;  %9854 = vmatpush3.bf16.msra.mxu0 %v10536_v18  ;;  %v2211_v18 = vld [vmem:[%s10707_s14 + $0xcc] sm:$0xff]  ;;  %v2216_v14 = vld [vmem:[%s10707_s14 + $0xf4] sm:$0xff] }
  0xd7   : > { %9855 = vmatprep.subr.bf16.mxu0 %v10540_v2  ;;  %9906 = vmatpush3.bf16.msra.mxu1 %v10541_v24  ;;  %v1808_v24 = vld [vmem:[%s10707_s14 + $0xd3] sm:$0xff]  ;;  %v11294_v39 = vpack.c.bf16 %v2211_v18, %v2210_v15  ;;  %v2217_v15 = vld [vmem:[%s10707_s14 + $0xfc] sm:$0xff]  ;;  %v1833_v18 = vpack.c.bf16 %v1811_v52, %v1810_v47 }
  0xd8   : > { %9907 = vmatprep.subr.bf16.mxu1 %v10542_v37  ;;  %4033 = vperm.xlu1 %10478, %v11261_v7   ;;  %v1832_v42 = vpack.c.bf16 %v1809_v0, %v1808_v24 }
  0xd9   : > { %4038 = vperm.xlu0 %10477, %v11269_v10  }
  0xda   : > { %9856 = vmatpush3.bf16.msra.mxu0 %v10540_v2  ;;  %v2213_v2 = vld [vmem:[%s10707_s14 + $0xdc] sm:$0xff] }
  0xdb   : > { %9908 = vmatpush3.bf16.msra.mxu1 %v10542_v37  ;;  %9945 = vmatprep.subr.bf16.mxu0 %v11251_v57  ;;  %v11291_v37 = vld [vmem:[%s13685_s0 + $0x110] sm:$0xff]  ;;  %v11301_v46 = vpack.c.bf16 %v2213_v2, %v2212_v32  ;;  %v11319_v32 = vpack.c.bf16 %v2217_v15, %v2216_v14 }
  0xdc   : > { %9770 = vmatmul.mubr.bf16.gmra.mxu0 %v1829_v59  ;;  %4043 = vperm.xlu1 %10478, %v11279_v17   ;;  %v2215_v59 = vld [vmem:[%s10707_s14 + $0xec] sm:$0xff] }
  0xdd   : > { %9822 = vmatmul.mubr.bf16.gmra.mxu1 %v11255_v62  ;;  %9773 = vmatprep.mubr.bf16.mxu0 %v1830_v4  ;;  %v1812_v4 = vld [vmem:[%s10707_s14 + $0xf3] sm:$0xff]  ;;  %v11317_v24 = vpack.c.bf16 %v2215_v59, %v2214_v53  ;;  %13697 = vst [vmem:[#allocation4_spill] sm:$0xff] %v11319_v32  ;;  %v1817_v59 = vld [vmem:[%s10707_s14 + $0x11b] sm:$0xff] }
  0xde   : > { %9825 = vmatprep.mubr.bf16.mxu1 %v11263_v8  ;;  %4048 = vperm.xlu0 %10477, %v11291_v37   ;;  %v1834_v0 = vpack.c.bf16 %v1813_v11, %v1812_v4  ;;  %v2219_v53 = vld [vmem:[%s10707_s14 + $0x10c] sm:$0xff]  ;;  %v2221_v11 = vld [vmem:[%s10707_s14 + $0x11c] sm:$0xff] }
  0xe0   : > { %4053 = vperm.xlu1 %10478, %v11299_v43  }
  0xe2   : > { %8076 = vperm.xlu0 %10477, %v10920_v56  }
  0xe4   : > { %9774 = vmatmul.mubr.bf16.gmra.mxu0 %v1831_v38  ;;  %8081 = vperm.xlu1 %10478, %v10951_v3   ;;  %v1814_v3 = vld [vmem:[%s10707_s14 + $0x103] sm:$0xff]  ;;  %v1815_v38 = vld [vmem:[%s10707_s14 + $0x10b] sm:$0xff] }
  0xe5   : > { %9826 = vmatmul.mubr.bf16.gmra.mxu1 %v11294_v39  ;;  %9777 = vmatprep.mubr.bf16.mxu0 %v1832_v42  ;;  %v2218_v42 = vld [vmem:[%s10707_s14 + $0x104] sm:$0xff] }
  0xe6   : > { %9829 = vmatprep.mubr.bf16.mxu1 %v11301_v46  ;;  %8086 = vperm.xlu0 %10477, %v10941_v1   ;;  %v1816_v1 = vld [vmem:[%s10707_s14 + $0x113] sm:$0xff] }
  0xe8   : > { %8091 = vperm.xlu1 %10478, %v10959_v6   ;;  %v2220_v6 = vld [vmem:[%s10707_s14 + $0x114] sm:$0xff] }
  0xea   : > { %8096 = vperm.xlu0 %10477, %v10967_v9   ;;  %v11343_v9 = vpack.c.bf16 %v2221_v11, %v2220_v6  ;;  %v2996_v6 = vld [vmem:[%s10707_s14 + $0x25] sm:$0xff]  ;;  %v2997_v11 = vld [vmem:[%s10707_s14 + $0x2d] sm:$0xff] }
  0xec   : > { %v9547_v2 = vpop.f32.mrf.mxu0  ;;  %9778 = vmatmul.mubr.bf16.gmra.mxu0 %v1833_v18  ;;  %v1835_v18 = vpack.c.bf16 %v1815_v38, %v1814_v3  ;;  %8101 = vperm.xlu1 %10478, %v10974_v12   ;;  %v1818_v38 = vld [vmem:[%s10707_s14 + $0x123] sm:$0xff] }
  0xed   : > { %v9599_v56 = vpop.f32.mrf.mxu1  ;;  %9830 = vmatmul.mubr.bf16.gmra.mxu1 %v11317_v24  ;;  %9781 = vmatprep.mubr.bf16.mxu0 %v1834_v0 }
  0xee   : > { %v11327_v47 = vadd.f32 %v9599_v56, %v9547_v2  ;;  %v393_v52 = vpop.f32.mrf.mxu0  ;;  %9833 = vmatprep.mubr.bf16.mxu1 %v11319_v32  ;;  %v11339_v2 = vpack.c.bf16 %v2219_v53, %v2218_v42  ;;  %v1836_v56 = vpack.c.bf16 %v1817_v59, %v1816_v1  ;;  %8106 = vperm.xlu0 %10477, %v10981_v13   ;;  %v1819_v42 = vld [vmem:[%s10707_s14 + $0x12b] sm:$0xff] }
  0xef   : > { %v725_v4 = vpop.f32.mrf.mxu1  ;;  %v2222_v13 = vld [vmem:[%s10707_s14 + $0x124] sm:$0xff] }
  0xf0   : > { %13698 = vst [vmem:[#allocation5_spill] sm:$0xff] %v11327_v47  ;;  %v11336_v14 = vadd.f32 %v725_v4, %v393_v52  ;;  %v9548_v15 = vpop.f32.mrf.mxu0  ;;  %8111 = vperm.xlu1 %10478, %v10988_v16  }
  0xf1   : > { %v9600_v0 = vpop.f32.mrf.mxu1 }
  0xf2   : > { %v11341_v47 = vadd.f32 %v9600_v0, %v9548_v15  ;;  %v396_v32 = vpop.f32.mrf.mxu0  ;;  %8116 = vperm.xlu0 %10477, %v10995_v19  }
  0xf3   : > { %v728_v52 = vpop.f32.mrf.mxu1 }
  0xf4   : > { %v11346_v4 = vadd.f32 %v728_v52, %v396_v32  ;;  %v9551_v12 = vpop.f32.mrf.mxu0  ;;  %9782 = vmatmul.mubr.bf16.gmra.mxu0 %v1835_v18  ;;  %v2223_v32 = vld [vmem:[%s10707_s14 + $0x12c] sm:$0xff]  ;;  %v1837_v18 = vpack.c.bf16 %v1819_v42, %v1818_v38  ;;  %8121 = vperm.xlu1 %10478, %v11002_v22  }
  0xf5   : > { %v9603_v3 = vpop.f32.mrf.mxu1  ;;  %9834 = vmatmul.mubr.bf16.gmra.mxu1 %v11339_v2  ;;  %9785 = vmatprep.mubr.bf16.mxu0 %v1836_v56  ;;  %v11363_v56 = vpack.c.bf16 %v2223_v32, %v2222_v13  ;;  %v2998_v13 = vld [vmem:[%s10707_s14 + $0x35] sm:$0xff] }
  0xf6   : > { %v11352_v53 = vadd.f32 %v9603_v3, %v9551_v12  ;;  %v409_v1 = vpop.f32.mrf.mxu0  ;;  %9837 = vmatprep.mubr.bf16.mxu1 %v11343_v9  ;;  %v3032_v3 = vpack.c.bf16 %v2997_v11, %v2996_v6  ;;  %8126 = vperm.xlu0 %10477, %v11009_v23   ;;  %v2999_v23 = vld [vmem:[%s10707_s14 + $0x3d] sm:$0xff]  ;;  %v3000_v6 = vld [vmem:[%s10707_s14 + $0x45] sm:$0xff]  ;;  %v3001_v11 = vld [vmem:[%s10707_s14 + $0x4d] sm:$0xff] }
  0xf7   : > { %v741_v59 = vpop.f32.mrf.mxu1 }
  0xf8   : > { %v11360_v15 = vadd.f32 %v741_v59, %v409_v1  ;;  %v9552_v16 = vpop.f32.mrf.mxu0  ;;  %8131 = vperm.xlu1 %10478, %v11016_v26  }
  0xf9   : > { %v9604_v0 = vpop.f32.mrf.mxu1 }
  0xfa   : > { %v11365_v52 = vadd.f32 %v9604_v0, %v9552_v16  ;;  %v412_v12 = vpop.f32.mrf.mxu0  ;;  %8136 = vperm.xlu0 %10477, %v11023_v30   ;;  %v3033_v0 = vpack.c.bf16 %v2999_v23, %v2998_v13  ;;  %v10544_v30 = vld [vmem:[%s13687_s2 + $0x230] sm:$0xff]   ;;  %v3003_v23 = vld [vmem:[%s10707_s14 + $0x5d] sm:$0xff] }
  0xfb   : > { %v744_v19 = vpop.f32.mrf.mxu1  ;;  %v3002_v13 = vld [vmem:[%s10707_s14 + $0x55] sm:$0xff] }
  0xfc   : > { %v11368_v1 = vadd.f32 %v744_v19, %v412_v12  ;;  %v9555_v59 = vpop.f32.mrf.mxu0  ;;  %9786 = vmatmul.mubr.bf16.gmra.mxu0 %v1837_v18  ;;  %8141 = vperm.xlu1 %10478, %v11030_v33   ;;  %v3034_v19 = vpack.c.bf16 %v3001_v11, %v3000_v6 }
  0xfd   : > { %v9607_v22 = vpop.f32.mrf.mxu1  ;;  %9838 = vmatmul.mubr.bf16.gmra.mxu1 %v11363_v56  ;;  %9857 = vmatprep.mubr.bf16.mxu0 %v11101_v63 }
  0xfe   : > { %v11373_v38 = vadd.f32 %v9607_v22, %v9555_v59  ;;  %v425_v42 = vpop.f32.mrf.mxu0  ;;  %9909 = vmatprep.mubr.bf16.mxu1 %v3032_v3  ;;  %8146 = vperm.xlu0 %10477, %v11036_v29  }
  0xff   : > { %v757_v32 = vpop.f32.mrf.mxu1 }
 0x100   : > { %v11380_v16 = vadd.f32 %v757_v32, %v425_v42  ;;  %v9556_v18 = vpop.f32.mrf.mxu0  ;;  %8151 = vperm.xlu1 %10478, %v11044_v36   ;;  %v10545_v32 = vld [vmem:[%s13687_s2 + $0x228] sm:$0xff]  }
 0x101   : > { %v9608_v26 = vpop.f32.mrf.mxu1  ;;  %v3005_v36 = vld [vmem:[%s10707_s14 + $0x6d] sm:$0xff] }
 0x102   : > { %v11383_v12 = vadd.f32 %v9608_v26, %v9556_v18  ;;  %v428_v63 = vpop.f32.mrf.mxu0  ;;  %8156 = vperm.xlu0 %10477, %v11053_v41   ;;  %v10546_v41 = vld [vmem:[%s13687_s2 + $0x220] sm:$0xff]  }
 0x103   : > { %v760_v3 = vpop.f32.mrf.mxu1 }
 0x104   : > { %v11389_v59 = vadd.f32 %v760_v3, %v428_v63  ;;  %v9559_v22 = vpop.f32.mrf.mxu0  ;;  %9858 = vmatmul.mubr.bf16.vlgmr.msra.gmra.mxu0 %v11103_v5  ;;  %v3004_v5 = vld [vmem:[%s10707_s14 + $0x65] sm:$0xff]  ;;  %8161 = vperm.xlu1 %10478, %v11060_v44  }
 0x105   : > { %v9611_v33 = vpop.f32.mrf.mxu1  ;;  %9946 = vmatpush3.bf16.msra.mxu0 %v11251_v57  ;;  %9910 = vmatmul.mubr.bf16.vlgmr.msra.gmra.mxu1 %v3033_v0  ;;  %v3036_v63 = vpack.c.bf16 %v3005_v36, %v3004_v5 }
 0x106   : > { %v11394_v42 = vadd.f32 %v9611_v33, %v9559_v22  ;;  %v441_v29 = vpop.f32.mrf.mxu0  ;;  %9861 = vmatprep.mubr.bf16.mxu0 %v11142_v31  ;;  %9913 = vmatprep.mubr.bf16.mxu1 %v3034_v19  ;;  %v3035_v31 = vpack.c.bf16 %v3003_v23, %v3002_v13  ;;  %v3007_v13 = vld [vmem:[%s10707_s14 + $0x7d] sm:$0xff]  ;;  %v3008_v23 = vld [vmem:[%s10707_s14 + $0x85] sm:$0xff] }
 0x107   : > { %v773_v6 = vpop.f32.mrf.mxu1  ;;  %9947 = vmatprep.subr.bf16.mxu0 %v10544_v30  ;;  %8166 = vperm.xlu0 %10477, %v11066_v45  }
 0x108   : > { %v11405_v57 = vadd.f32 %v773_v6, %v441_v29  ;;  %v9560_v11 = vpop.f32.mrf.mxu0  ;;  %8171 = vperm.xlu1 %10478, %v11076_v51   ;;  %v3006_v29 = vld [vmem:[%s10707_s14 + $0x75] sm:$0xff]  ;;  %v3009_v6 = vld [vmem:[%s10707_s14 + $0x8d] sm:$0xff] }
 0x109   : > { %v9612_v18 = vpop.f32.mrf.mxu1  ;;  %9948 = vmatpush3.bf16.msra.mxu0 %v10544_v30  ;;  %v3037_v36 = vpack.c.bf16 %v3007_v13, %v3006_v29  ;;  %v3013_v29 = vld [vmem:[%s10707_s14 + $0xad] sm:$0xff] }
 0x10a   : > { %v11408_v26 = vadd.f32 %v9612_v18, %v9560_v11  ;;  %v444_v0 = vpop.f32.mrf.mxu0  ;;  %9949 = vmatprep.subr.bf16.mxu0 %v10545_v32  ;;  %v3038_v18 = vpack.c.bf16 %v3009_v6, %v3008_v23 }
 0x10b   : > { %v776_v19 = vpop.f32.mrf.mxu1  ;;  %8176 = vperm.xlu0 %10477, %v11083_v54   ;;  %v10548_v54 = vld [vmem:[%s13687_s2 + $0x210] sm:$0xff]  }
 0x10c   : > { %v11414_v44 = vadd.f32 %v776_v19, %v444_v0  ;;  %v9563_v3 = vpop.f32.mrf.mxu0  ;;  %9862 = vmatmul.mubr.bf16.gmra.mxu0 %v11145_v34  ;;  %v10547_v34 = vld [vmem:[%s13687_s2 + $0x218] sm:$0xff]   ;;  %8181 = vperm.xlu1 %10478, %v11092_v60  }
 0x10d   : > { %v9615_v30 = vpop.f32.mrf.mxu1  ;;  %9914 = vmatmul.mubr.bf16.gmra.mxu1 %v3035_v31  ;;  %9865 = vmatprep.mubr.bf16.mxu0 %v11180_v55 }
 0x10e   : > { %v11419_v22 = vadd.f32 %v9615_v30, %v9563_v3  ;;  %v457_v33 = vpop.f32.mrf.mxu0  ;;  %9917 = vmatprep.mubr.bf16.mxu1 %v3036_v63  ;;  %9950 = vmatpush3.bf16.msra.mxu0 %v10545_v32  ;;  %v3010_v3 = vld [vmem:[%s10707_s14 + $0x95] sm:$0xff]  ;;  %v3011_v30 = vld [vmem:[%s10707_s14 + $0x9d] sm:$0xff] }
 0x10f   : > { %v789_v45 = vpop.f32.mrf.mxu1  ;;  %9951 = vmatprep.subr.bf16.mxu0 %v10546_v41  ;;  %8186 = vperm.xlu0 %10477, %v11098_v61  }
 0x110   : > { %v11429_v51 = vadd.f32 %v789_v45, %v457_v33  ;;  %v9564_v55 = vpop.f32.mrf.mxu0  ;;  %8191 = vperm.xlu1 %10478, %v11129_v25   ;;  %v3012_v33 = vld [vmem:[%s10707_s14 + $0xa5] sm:$0xff]  ;;  %v3039_v45 = vpack.c.bf16 %v3011_v30, %v3010_v3 }
 0x111   : > { %v9616_v5 = vpop.f32.mrf.mxu1 }
 0x112   : > { %v11432_v11 = vadd.f32 %v9616_v5, %v9564_v55  ;;  %v460_v32 = vpop.f32.mrf.mxu0  ;;  %9952 = vmatpush3.bf16.msra.mxu0 %v10546_v41 }
 0x113   : > { %v792_v31 = vpop.f32.mrf.mxu1  ;;  %9953 = vmatprep.subr.bf16.mxu0 %v10547_v34  ;;  %8196 = vperm.xlu0 %10477, %v11134_v27   ;;  %v10550_v27 = vld [vmem:[%s13687_s2 + $0x200] sm:$0xff]  }
 0x114   : > { %v11438_v60 = vadd.f32 %v792_v31, %v460_v32  ;;  %v9567_v0 = vpop.f32.mrf.mxu0  ;;  %9866 = vmatmul.mubr.bf16.gmra.mxu0 %v11183_v58  ;;  %v10549_v58 = vld [vmem:[%s13687_s2 + $0x208] sm:$0xff]   ;;  %8201 = vperm.xlu1 %10478, %v11168_v49   ;;  %v3014_v31 = vld [vmem:[%s10707_s14 + $0xb5] sm:$0xff] }
 0x115   : > { %v9619_v63 = vpop.f32.mrf.mxu1  ;;  %9918 = vmatmul.mubr.bf16.gmra.mxu1 %v3037_v36  ;;  %9869 = vmatprep.mubr.bf16.mxu0 %v11218_v28 }
 0x116   : > { %v11443_v19 = vadd.f32 %v9619_v63, %v9567_v0  ;;  %v473_v41 = vpop.f32.mrf.mxu0  ;;  %9921 = vmatprep.mubr.bf16.mxu1 %v3038_v18  ;;  %9954 = vmatpush3.bf16.msra.mxu0 %v10547_v34  ;;  %v3040_v34 = vpack.c.bf16 %v3013_v29, %v3012_v33  ;;  %v3016_v0 = vld [vmem:[%s10707_s14 + $0xc5] sm:$0xff]  ;;  %v3017_v63 = vld [vmem:[%s10707_s14 + $0xcd] sm:$0xff] }
 0x117   : > { %v805_v61 = vpop.f32.mrf.mxu1  ;;  %9955 = vmatprep.subr.bf16.mxu0 %v10548_v54  ;;  %8206 = vperm.xlu0 %10477, %v11173_v50  }
 0x118   : > { %v11453_v25 = vadd.f32 %v805_v61, %v473_v41  ;;  %v9568_v28 = vpop.f32.mrf.mxu0  ;;  %8211 = vperm.xlu1 %10478, %v11206_v20   ;;  %v3042_v61 = vpack.c.bf16 %v3017_v63, %v3016_v0  ;;  %v3022_v0 = vld [vmem:[%s10707_s14 + $0xf5] sm:$0xff]  ;;  %v3023_v63 = vld [vmem:[%s10707_s14 + $0xfd] sm:$0xff] }
 0x119   : > { %v9620_v13 = vpop.f32.mrf.mxu1 }
 0x11a   : > { %v11456_v23 = vadd.f32 %v9620_v13, %v9568_v28  ;;  %v476_v6 = vpop.f32.mrf.mxu0  ;;  %9956 = vmatpush3.bf16.msra.mxu0 %v10548_v54  ;;  %v3015_v54 = vld [vmem:[%s10707_s14 + $0xbd] sm:$0xff]  ;;  %v3018_v13 = vld [vmem:[%s10707_s14 + $0xd5] sm:$0xff] }
 0x11b   : > { %v808_v55 = vpop.f32.mrf.mxu1  ;;  %9957 = vmatprep.subr.bf16.mxu0 %v10549_v58  ;;  %8216 = vperm.xlu0 %10477, %v11211_v21  }
 0x11c   : > { %v11462_v49 = vadd.f32 %v808_v55, %v476_v6  ;;  %v9571_v5 = vpop.f32.mrf.mxu0  ;;  %9870 = vmatmul.mubr.bf16.gmra.mxu0 %v11221_v35  ;;  %8221 = vperm.xlu1 %10478, %v11234_v40  }
 0x11d   : > { %v9623_v36 = vpop.f32.mrf.mxu1  ;;  %9922 = vmatmul.mubr.bf16.gmra.mxu1 %v3039_v45  ;;  %9873 = vmatprep.mubr.bf16.mxu0 %v11255_v62  ;;  %v3041_v62 = vpack.c.bf16 %v3015_v54, %v3014_v31  ;;  %v3019_v45 = vld [vmem:[%s10707_s14 + $0xdd] sm:$0xff] }
 0x11e   : > { %v11467_v32 = vadd.f32 %v9623_v36, %v9571_v5  ;;  %v489_v18 = vpop.f32.mrf.mxu0  ;;  %9925 = vmatprep.mubr.bf16.mxu1 %v3040_v34  ;;  %9958 = vmatpush3.bf16.msra.mxu0 %v10549_v58  ;;  %v3020_v34 = vld [vmem:[%s10707_s14 + $0xe5] sm:$0xff] }
 0x11f   : > { %v821_v50 = vpop.f32.mrf.mxu1  ;;  %9959 = vmatprep.subr.bf16.mxu0 %v10550_v27  ;;  %8226 = vperm.xlu0 %10477, %v11243_v48   ;;  %v3021_v48 = vld [vmem:[%s10707_s14 + $0xed] sm:$0xff] }
 0x120   : > { %v11474_v35 = vadd.f32 %v821_v50, %v489_v18  ;;  %v9572_v20 = vpop.f32.mrf.mxu0  ;;  %8231 = vperm.xlu1 %10478, %v11261_v7   ;;  %v3044_v36 = vpack.c.bf16 %v3021_v48, %v3020_v34  ;;  %v3026_v48 = vld [vmem:[%s10707_s14 + $0x115] sm:$0xff] }
 0x121   : > { %v9624_v41 = vpop.f32.mrf.mxu1 }
 0x122   : > { %v11477_v3 = vadd.f32 %v9624_v41, %v9572_v20  ;;  %v492_v30 = vpop.f32.mrf.mxu0  ;;  %9960 = vmatpush3.bf16.msra.mxu0 %v10550_v27  ;;  %v3043_v27 = vpack.c.bf16 %v3019_v45, %v3018_v13  ;;  %v3024_v41 = vld [vmem:[%s10707_s14 + $0x105] sm:$0xff]  ;;  %v13702_v13 = vld [vmem:[#allocation5_spill] sm:$0xff] }
 0x123   : > { %v824_v33 = vpop.f32.mrf.mxu1  ;;  %8236 = vperm.xlu0 %10477, %v11269_v10  }
 0x124   : > { %v11480_v21 = vadd.f32 %v824_v33, %v492_v30  ;;  %v9575_v29 = vpop.f32.mrf.mxu0  ;;  %9874 = vmatmul.mubr.bf16.gmra.mxu0 %v11263_v8  ;;  %8241 = vperm.xlu1 %10478, %v11279_v17  }
 0x125   : > { %v9627_v40 = vpop.f32.mrf.mxu1  ;;  %9926 = vmatmul.mubr.bf16.gmra.mxu1 %v3041_v62  ;;  %9877 = vmatprep.mubr.bf16.mxu0 %v11294_v39 }
 0x126   : > { %v11485_v58 = vadd.f32 %v9627_v40, %v9575_v29  ;;  %v505_v28 = vpop.f32.mrf.mxu0  ;;  %9929 = vmatprep.mubr.bf16.mxu1 %v3042_v61 }
 0x127   : > { %v837_v6 = vpop.f32.mrf.mxu1  ;;  %8246 = vperm.xlu0 %10477, %v11291_v37   ;;  %v3025_v37 = vld [vmem:[%s10707_s14 + $0x10d] sm:$0xff] }
 0x128   : > { %v11492_v55 = vadd.f32 %v837_v6, %v505_v28  ;;  %v9576_v8 = vpop.f32.mrf.mxu0  ;;  %8251 = vperm.xlu1 %10478, %v11299_v43   ;;  %v3045_v43 = vpack.c.bf16 %v3023_v63, %v3022_v0  ;;  %v13701_v28 = vld [vmem:[#allocation4_spill] sm:$0xff] }
 0x129   : > { %v9628_v7 = vpop.f32.mrf.mxu1 }
 0x12a   : > { %v11495_v39 = vadd.f32 %v9628_v7, %v9576_v8  ;;  %v508_v5 = vpop.f32.mrf.mxu0  ;;  %v3027_v8 = vld [vmem:[%s10707_s14 + $0x11d] sm:$0xff] }
 0x12b   : > { %v840_v18 = vpop.f32.mrf.mxu1  ;;  %v3047_v0 = vpack.c.bf16 %v3027_v8, %v3026_v48 }
 0x12c   : > { %v11498_v31 = vadd.f32 %v840_v18, %v508_v5  ;;  %v9579_v10 = vpop.f32.mrf.mxu0  ;;  %9878 = vmatmul.mubr.bf16.gmra.mxu0 %v11301_v46  ;;  %v3029_v18 = vld [vmem:[%s10707_s14 + $0x12d] sm:$0xff] }
 0x12d   : > { %v9631_v17 = vpop.f32.mrf.mxu1  ;;  %9930 = vmatmul.mubr.bf16.gmra.mxu1 %v3043_v27  ;;  %9881 = vmatprep.mubr.bf16.mxu0 %v11317_v24  ;;  %v3046_v24 = vpack.c.bf16 %v3025_v37, %v3024_v41 }
 0x12e   : > { %v11503_v54 = vadd.f32 %v9631_v17, %v9579_v10  ;;  %v521_v50 = vpop.f32.mrf.mxu0  ;;  %9933 = vmatprep.mubr.bf16.mxu1 %v3044_v36  ;;  %v3028_v36 = vld [vmem:[%s10707_s14 + $0x125] sm:$0xff] }
 0x12f   : > { %v853_v20 = vpop.f32.mrf.mxu1 }
 0x130   : > { %v11509_v62 = vadd.f32 %v853_v20, %v521_v50  ;;  %v9580_v30 = vpop.f32.mrf.mxu0  ;;  %v3048_v20 = vpack.c.bf16 %v3029_v18, %v3028_v36 }
 0x131   : > { %v9632_v46 = vpop.f32.mrf.mxu1 }
 0x132   : > { %v11511_v61 = vadd.f32 %v9632_v46, %v9580_v30  ;;  %v11513_v33 = vpop.f32.mrf.mxu0 }
 0x133   : > { %13699 = vst [vmem:[#allocation6_spill] sm:$0xff] %v11513_v33  ;;  %v11515_v29 = vpop.f32.mrf.mxu1 }
 0x134   : > { %13700 = vst [vmem:[#allocation7_spill] sm:$0xff] %v11515_v29  ;;  %v9651_v40 = vpop.f32.mrf.mxu0  ;;  %9882 = vmatmul.mubr.bf16.gmra.mxu0 %v13701_v28 }
 0x135   : > { %v1310_v45 = vadd.f32 %v9651_v40, %v13702_v13  ;;  %v9703_v6 = vpop.f32.mrf.mxu1  ;;  %9934 = vmatmul.mubr.bf16.gmra.mxu1 %v3045_v43  ;;  %9885 = vmatprep.mubr.bf16.mxu0 %v11339_v2  ;;  %v2626_v43 = vld [vmem:[%s10707_s14 + $0x134] sm:$0xff]  ;;  %v3400_v13 = vld [vmem:[%s10707_s14 + $0x26] sm:$0xff] }
 0x136   : > { %v1129_v34 = vpop.f32.mrf.mxu0  ;;  %9937 = vmatprep.mubr.bf16.mxu1 %v3046_v24  ;;  %v2627_v24 = vld [vmem:[%s10707_s14 + $0x13c] sm:$0xff] }
 0x137   : > { %v1308_v7 = vadd.f32 %v1129_v34, %v11336_v14  ;;  %v11523_v27 = vadd.f32 %v9703_v6, %v1310_v45  ;;  %v1533_v5 = vpop.f32.mrf.mxu1  ;;  %v3030_v40 = vld [vmem:[%s10707_s14 + $0x135] sm:$0xff]  ;;  %v2645_v8 = vpack.c.bf16 %v2627_v24, %v2626_v43 }
 0x138   : > { %v9652_v10 = vpop.f32.mrf.mxu0  ;;  %v3401_v45 = vld [vmem:[%s10707_s14 + $0x2e] sm:$0xff] }
 0x139   : > { %v1311_v17 = vadd.f32 %v9652_v10, %v11341_v47  ;;  %v11528_v50 = vadd.f32 %v1533_v5, %v1308_v7  ;;  %v9704_v2 = vpop.f32.mrf.mxu1  ;;  %v3436_v36 = vpack.c.bf16 %v3401_v45, %v3400_v13 }
 0x13a   : > { %v1132_v63 = vpop.f32.mrf.mxu0 }
 0x13b   : > { %v11531_v14 = vadd.f32 %v1132_v63, %v11346_v4  ;;  %v11533_v41 = vadd.f32 %v9704_v2, %v1311_v17  ;;  %v11535_v37 = vpop.f32.mrf.mxu1  ;;  %v3031_v4 = vld [vmem:[%s10707_s14 + $0x13d] sm:$0xff] }
 0x13c   : > { %v9655_v30 = vpop.f32.mrf.mxu0  ;;  %9886 = vmatmul.mubr.bf16.gmra.mxu0 %v11343_v9  ;;  %v3049_v5 = vpack.c.bf16 %v3031_v4, %v3030_v40  ;;  %v3402_v63 = vld [vmem:[%s10707_s14 + $0x36] sm:$0xff] }
 0x13d   : > { %v1314_v47 = vadd.f32 %v9655_v30, %v11352_v53  ;;  %v9707_v46 = vpop.f32.mrf.mxu1  ;;  %9938 = vmatmul.mubr.bf16.gmra.mxu1 %v3047_v0  ;;  %9889 = vmatprep.mubr.bf16.mxu0 %v11363_v56 }
 0x13e   : > { %v1145_v28 = vpop.f32.mrf.mxu0  ;;  %9941 = vmatprep.mubr.bf16.mxu1 %v3048_v20  ;;  %v3403_v20 = vld [vmem:[%s10707_s14 + $0x3e] sm:$0xff] }
 0x13f   : > { %v1312_v6 = vadd.f32 %v1145_v28, %v11360_v15  ;;  %v11547_v34 = vadd.f32 %v9707_v46, %v1314_v47  ;;  %v1549_v48 = vpop.f32.mrf.mxu1  ;;  %v3404_v47 = vld [vmem:[%s10707_s14 + $0x46] sm:$0xff]  ;;  %v3405_v46 = vld [vmem:[%s10707_s14 + $0x4e] sm:$0xff]  ;;  %v3437_v28 = vpack.c.bf16 %v3403_v20, %v3402_v63 }
 0x140   : > { %v9656_v9 = vpop.f32.mrf.mxu0  ;;  %v3438_v45 = vpack.c.bf16 %v3405_v46, %v3404_v47 }
 0x141   : > { %v1315_v53 = vadd.f32 %v9656_v9, %v11365_v52  ;;  %v11550_v56 = vadd.f32 %v1549_v48, %v1312_v6  ;;  %v9708_v7 = vpop.f32.mrf.mxu1 }
 0x142   : > { %v1148_v18 = vpop.f32.mrf.mxu0 }
 0x143   : > { %v11553_v10 = vadd.f32 %v1148_v18, %v11368_v1  ;;  %v11555_v15 = vadd.f32 %v9708_v7, %v1315_v53  ;;  %v11557_v17 = vpop.f32.mrf.mxu1  ;;  %v3408_v18 = vld [vmem:[%s10707_s14 + $0x66] sm:$0xff] }
 0x144   : > { %v9659_v2 = vpop.f32.mrf.mxu0  ;;  %9890 = vmatmul.mubr.bf16.gmra.mxu0 %v2645_v8 }
 0x145   : > { %v1318_v52 = vadd.f32 %v9659_v2, %v11373_v38  ;;  %v9711_v0 = vpop.f32.mrf.mxu1  ;;  %9942 = vmatmul.mubr.bf16.gmra.mxu1 %v3049_v5  ;;  %9961 = vmatprep.mubr.bf16.mxu0 %v3436_v36  ;;  %v3407_v5 = vld [vmem:[%s10707_s14 + $0x5e] sm:$0xff]  ;;  %v3409_v2 = vld [vmem:[%s10707_s14 + $0x6e] sm:$0xff] }
 0x146   : > { %v1161_v30 = vpop.f32.mrf.mxu0  ;;  %v3440_v46 = vpack.c.bf16 %v3409_v2, %v3408_v18 }
 0x147   : > { %v1316_v43 = vadd.f32 %v1161_v30, %v11380_v16  ;;  %v11565_v1 = vadd.f32 %v9711_v0, %v1318_v52  ;;  %v1565_v24 = vpop.f32.mrf.mxu1 }
 0x148   : > { %v9660_v40 = vpop.f32.mrf.mxu0 }
 0x149   : > { %v1319_v4 = vadd.f32 %v9660_v40, %v11383_v12  ;;  %v11568_v38 = vadd.f32 %v1565_v24, %v1316_v43  ;;  %v9712_v13 = vpop.f32.mrf.mxu1  ;;  %v3406_v12 = vld [vmem:[%s10707_s14 + $0x56] sm:$0xff] }
 0x14a   : > { %v1164_v6 = vpop.f32.mrf.mxu0  ;;  %v3439_v20 = vpack.c.bf16 %v3407_v5, %v3406_v12 }
 0x14b   : > { %v11571_v48 = vadd.f32 %v1164_v6, %v11389_v59  ;;  %v11573_v16 = vadd.f32 %v9712_v13, %v1319_v4  ;;  %v11575_v9 = vpop.f32.mrf.mxu1 }
 0x14c   : > { %v9663_v8 = vpop.f32.mrf.mxu0  ;;  %9962 = vmatmul.mubr.bf16.vlgmr.msra.gmra.mxu0 %v3437_v28 }
 0x14d   : > { %v1322_v53 = vadd.f32 %v9663_v8, %v11394_v42  ;;  %v9715_v7 = vpop.f32.mrf.mxu1  ;;  %9965 = vmatprep.mubr.bf16.mxu0 %v3438_v45  ;;  %v3411_v45 = vld [vmem:[%s10707_s14 + $0x7e] sm:$0xff]  ;;  %v3412_v8 = vld [vmem:[%s10707_s14 + $0x86] sm:$0xff] }
 0x14e   : > { %v1177_v36 = vpop.f32.mrf.mxu0 }
 0x14f   : > { %v1320_v52 = vadd.f32 %v1177_v36, %v11405_v57  ;;  %v11583_v0 = vadd.f32 %v9715_v7, %v1322_v53  ;;  %v1581_v59 = vpop.f32.mrf.mxu1  ;;  %v3413_v53 = vld [vmem:[%s10707_s14 + $0x8e] sm:$0xff] }
 0x150   : > { %v9664_v63 = vpop.f32.mrf.mxu0 }
 0x151   : > { %v1323_v30 = vadd.f32 %v9664_v63, %v11408_v26  ;;  %v11586_v42 = vadd.f32 %v1581_v59, %v1320_v52  ;;  %v9716_v47 = vpop.f32.mrf.mxu1  ;;  %v3410_v26 = vld [vmem:[%s10707_s14 + $0x76] sm:$0xff]  ;;  %v3442_v52 = vpack.c.bf16 %v3413_v53, %v3412_v8 }
 0x152   : > { %v1180_v43 = vpop.f32.mrf.mxu0  ;;  %v3441_v36 = vpack.c.bf16 %v3411_v45, %v3410_v26 }
 0x153   : > { %v11589_v24 = vadd.f32 %v1180_v43, %v11414_v44  ;;  %v11591_v57 = vadd.f32 %v9716_v47, %v1323_v30  ;;  %v11593_v40 = vpop.f32.mrf.mxu1  ;;  %v3415_v43 = vld [vmem:[%s10707_s14 + $0x9e] sm:$0xff] }
 0x154   : > { %v9667_v28 = vpop.f32.mrf.mxu0  ;;  %9966 = vmatmul.mubr.bf16.gmra.mxu0 %v3439_v20 }
 0x155   : > { %v1326_v4 = vadd.f32 %v9667_v28, %v11419_v22  ;;  %v9719_v13 = vpop.f32.mrf.mxu1  ;;  %9969 = vmatprep.mubr.bf16.mxu0 %v3440_v46 }
 0x156   : > { %v1193_v6 = vpop.f32.mrf.mxu0 }
 0x157   : > { %v1324_v7 = vadd.f32 %v1193_v6, %v11429_v51  ;;  %v11601_v12 = vadd.f32 %v9719_v13, %v1326_v4  ;;  %v1597_v44 = vpop.f32.mrf.mxu1  ;;  %v3416_v4 = vld [vmem:[%s10707_s14 + $0xa6] sm:$0xff]  ;;  %v3417_v13 = vld [vmem:[%s10707_s14 + $0xae] sm:$0xff] }
 0x158   : > { %v9668_v5 = vpop.f32.mrf.mxu0 }
 0x159   : > { %v1327_v18 = vadd.f32 %v9668_v5, %v11432_v11  ;;  %v11604_v22 = vadd.f32 %v1597_v44, %v1324_v7  ;;  %v9720_v2 = vpop.f32.mrf.mxu1  ;;  %v3414_v11 = vld [vmem:[%s10707_s14 + $0x96] sm:$0xff]  ;;  %v3444_v44 = vpack.c.bf16 %v3417_v13, %v3416_v4 }
 0x15a   : > { %v1196_v59 = vpop.f32.mrf.mxu0  ;;  %v3443_v8 = vpack.c.bf16 %v3415_v43, %v3414_v11  ;;  %v3421_v11 = vld [vmem:[%s10707_s14 + $0xce] sm:$0xff] }
 0x15b   : > { %v11607_v63 = vadd.f32 %v1196_v59, %v11438_v60  ;;  %v11609_v51 = vadd.f32 %v9720_v2, %v1327_v18  ;;  %v11611_v20 = vpop.f32.mrf.mxu1 }
 0x15c   : > { %13703 = vst [vmem:[#allocation4_spill] sm:$0xff] %v11611_v20  ;;  %v9671_v30 = vpop.f32.mrf.mxu0  ;;  %9970 = vmatmul.mubr.bf16.gmra.mxu0 %v3441_v36 }
 0x15d   : > { %v1330_v47 = vadd.f32 %v9671_v30, %v11443_v19  ;;  %v9723_v46 = vpop.f32.mrf.mxu1  ;;  %9973 = vmatprep.mubr.bf16.mxu0 %v3442_v52  ;;  %v3419_v30 = vld [vmem:[%s10707_s14 + $0xbe] sm:$0xff] }
 0x15e   : > { %v1209_v28 = vpop.f32.mrf.mxu0 }
 0x15f   : > { %v1328_v26 = vadd.f32 %v1209_v28, %v11453_v25  ;;  %v11619_v45 = vadd.f32 %v9723_v46, %v1330_v47  ;;  %v1613_v60 = vpop.f32.mrf.mxu1  ;;  %v3420_v46 = vld [vmem:[%s10707_s14 + $0xc6] sm:$0xff] }
 0x160   : > { %v9672_v6 = vpop.f32.mrf.mxu0 }
 0x161   : > { %v1331_v53 = vadd.f32 %v9672_v6, %v11456_v23  ;;  %v11622_v19 = vadd.f32 %v1613_v60, %v1328_v26  ;;  %v9724_v7 = vpop.f32.mrf.mxu1  ;;  %v3418_v23 = vld [vmem:[%s10707_s14 + $0xb6] sm:$0xff]  ;;  %v3446_v6 = vpack.c.bf16 %v3421_v11, %v3420_v46 }
 0x162   : > { %v1212_v5 = vpop.f32.mrf.mxu0  ;;  %v3445_v13 = vpack.c.bf16 %v3419_v30, %v3418_v23  ;;  %v3424_v23 = vld [vmem:[%s10707_s14 + $0xe6] sm:$0xff]  ;;  %v3425_v30 = vld [vmem:[%s10707_s14 + $0xee] sm:$0xff] }
 0x163   : > { %v11625_v36 = vadd.f32 %v1212_v5, %v11462_v49  ;;  %v11627_v25 = vadd.f32 %v9724_v7, %v1331_v53  ;;  %v11629_v18 = vpop.f32.mrf.mxu1 }
 0x164   : > { %13705 = vst [vmem:[#allocation8_spill] sm:$0xff] %v11629_v18  ;;  %v9675_v2 = vpop.f32.mrf.mxu0  ;;  %9974 = vmatmul.mubr.bf16.gmra.mxu0 %v3443_v8 }
 0x165   : > { %13704 = vst [vmem:[#allocation5_spill] sm:$0xff] %v11625_v36  ;;  %v1334_v52 = vadd.f32 %v9675_v2, %v11467_v32  ;;  %v9727_v59 = vpop.f32.mrf.mxu1  ;;  %9977 = vmatprep.mubr.bf16.mxu0 %v3444_v44 }
 0x166   : > { %v1225_v47 = vpop.f32.mrf.mxu0 }
 0x167   : > { %v1332_v43 = vadd.f32 %v1225_v47, %v11474_v35  ;;  %v11637_v28 = vadd.f32 %v9727_v59, %v1334_v52  ;;  %v1629_v49 = vpop.f32.mrf.mxu1  ;;  %v3423_v52 = vld [vmem:[%s10707_s14 + $0xde] sm:$0xff] }
 0x168   : > { %v9676_v4 = vpop.f32.mrf.mxu0 }
 0x169   : > { %v1335_v26 = vadd.f32 %v9676_v4, %v11477_v3  ;;  %v11640_v32 = vadd.f32 %v1629_v49, %v1332_v43  ;;  %v9728_v60 = vpop.f32.mrf.mxu1  ;;  %v3422_v3 = vld [vmem:[%s10707_s14 + $0xd6] sm:$0xff] }
 0x16a   : > { %v1228_v8 = vpop.f32.mrf.mxu0  ;;  %v3447_v43 = vpack.c.bf16 %v3423_v52, %v3422_v3  ;;  %v3428_v52 = vld [vmem:[%s10707_s14 + $0x106] sm:$0xff] }
 0x16b   : > { %v11643_v53 = vadd.f32 %v1228_v8, %v11480_v21  ;;  %v11645_v35 = vadd.f32 %v9728_v60, %v1335_v26  ;;  %v11647_v7 = vpop.f32.mrf.mxu1 }
 0x16c   : > { %13707 = vst [vmem:[#allocation10_spill] sm:$0xff] %v11647_v7  ;;  %v9679_v44 = vpop.f32.mrf.mxu0  ;;  %9978 = vmatmul.mubr.bf16.gmra.mxu0 %v3445_v13  ;;  %v3448_v13 = vpack.c.bf16 %v3425_v30, %v3424_v23 }
 0x16d   : > { %13706 = vst [vmem:[#allocation9_spill] sm:$0xff] %v11643_v53  ;;  %v1338_v5 = vadd.f32 %v9679_v44, %v11485_v58  ;;  %v9731_v2 = vpop.f32.mrf.mxu1  ;;  %9981 = vmatprep.mubr.bf16.mxu0 %v3446_v6 }
 0x16e   : > { %v1241_v59 = vpop.f32.mrf.mxu0 }
 0x16f   : > { %v1336_v47 = vadd.f32 %v1241_v59, %v11492_v55  ;;  %v11655_v46 = vadd.f32 %v9731_v2, %v1338_v5  ;;  %v1645_v21 = vpop.f32.mrf.mxu1  ;;  %v3427_v2 = vld [vmem:[%s10707_s14 + $0xfe] sm:$0xff]  ;;  %v3429_v59 = vld [vmem:[%s10707_s14 + $0x10e] sm:$0xff] }
 0x170   : > { %v9680_v11 = vpop.f32.mrf.mxu0 }
 0x171   : > { %v1339_v49 = vadd.f32 %v9680_v11, %v11495_v39  ;;  %v11658_v58 = vadd.f32 %v1645_v21, %v1336_v47  ;;  %v9732_v4 = vpop.f32.mrf.mxu1  ;;  %v3426_v39 = vld [vmem:[%s10707_s14 + $0xf6] sm:$0xff] }
 0x172   : > { %v1244_v26 = vpop.f32.mrf.mxu0  ;;  %v3449_v21 = vpack.c.bf16 %v3427_v2, %v3426_v39  ;;  %v3431_v39 = vld [vmem:[%s10707_s14 + $0x11e] sm:$0xff]  ;;  %v3432_v2 = vld [vmem:[%s10707_s14 + $0x126] sm:$0xff] }
 0x173   : > { %v11661_v60 = vadd.f32 %v1244_v26, %v11498_v31  ;;  %v11663_v55 = vadd.f32 %v9732_v4, %v1339_v49  ;;  %v11665_v6 = vpop.f32.mrf.mxu1  ;;  %v3450_v49 = vpack.c.bf16 %v3429_v59, %v3428_v52 }
 0x174   : > { %13709 = vst [vmem:[#allocation12_spill] sm:$0xff] %v11665_v6  ;;  %v9683_v8 = vpop.f32.mrf.mxu0  ;;  %9982 = vmatmul.mubr.bf16.gmra.mxu0 %v3447_v43 }
 0x175   : > { %13708 = vst [vmem:[#allocation11_spill] sm:$0xff] %v11661_v60  ;;  %v1342_v44 = vadd.f32 %v9683_v8, %v11503_v54  ;;  %v9735_v5 = vpop.f32.mrf.mxu1  ;;  %9985 = vmatprep.mubr.bf16.mxu0 %v3448_v13 }
 0x176   : > { %v1257_v3 = vpop.f32.mrf.mxu0 }
 0x177   : > { %v1340_v23 = vadd.f32 %v1257_v3, %v11509_v62  ;;  %v11673_v30 = vadd.f32 %v9735_v5, %v1342_v44  ;;  %v1661_v31 = vpop.f32.mrf.mxu1  ;;  %v3430_v5 = vld [vmem:[%s10707_s14 + $0x116] sm:$0xff]  ;;  %v3433_v3 = vld [vmem:[%s10707_s14 + $0x12e] sm:$0xff] }
 0x178   : > { %v9684_v47 = vpop.f32.mrf.mxu0 }
 0x179   : > { %v1343_v11 = vadd.f32 %v9684_v47, %v11511_v61  ;;  %v11676_v54 = vadd.f32 %v1661_v31, %v1340_v23  ;;  %v9736_v43 = vpop.f32.mrf.mxu1  ;;  %v3451_v47 = vpack.c.bf16 %v3431_v39, %v3430_v5  ;;  %v3435_v5 = vld [vmem:[%s10707_s14 + $0x13e] sm:$0xff] }
 0x17a   : > { %v11678_v4 = vpop.f32.mrf.mxu0 }
 0x17b   : > { %13710 = vst [vmem:[#allocation13_spill] sm:$0xff] %v11678_v4  ;;  %v11680_v13 = vadd.f32 %v9736_v43, %v1343_v11  ;;  %v11682_v62 = vpop.f32.mrf.mxu1  ;;  %v3452_v43 = vpack.c.bf16 %v3433_v3, %v3432_v2 }
 0x17c   : > { %13711 = vst [vmem:[#allocation14_spill] sm:$0xff] %v11682_v62  ;;  %v9755_v26 = vpop.f32.mrf.mxu0  ;;  %9986 = vmatmul.mubr.bf16.gmra.mxu0 %v3449_v21 }
 0x17d   : > { %v2118_v8 = vadd.f32 %v9755_v26, %v11523_v27  ;;  %v9807_v44 = vpop.f32.mrf.mxu1  ;;  %9989 = vmatprep.mubr.bf16.mxu0 %v3450_v49 }
 0x17e   : > { %v1937_v61 = vpop.f32.mrf.mxu0 }
 0x17f   : > { %v2116_v23 = vadd.f32 %v1937_v61, %v11528_v50  ;;  %v11690_v52 = vadd.f32 %v9807_v44, %v2118_v8  ;;  %v2341_v59 = vpop.f32.mrf.mxu1  ;;  %v3434_v61 = vld [vmem:[%s10707_s14 + $0x136] sm:$0xff] }
 0x180   : > { %v9756_v31 = vpop.f32.mrf.mxu0 }
 0x181   : > { %v2119_v21 = vadd.f32 %v9756_v31, %v11533_v41  ;;  %v11693_v11 = vadd.f32 %v2341_v59, %v2116_v23  ;;  %v9808_v27 = vpop.f32.mrf.mxu1  ;;  %v3453_v59 = vpack.c.bf16 %v3435_v5, %v3434_v61 }
 0x182   : > { %v11695_v49 = vpop.f32.mrf.mxu0 }
 0x183   : > { %v11697_v26 = vadd.f32 %v9808_v27, %v2119_v21  ;;  %v11699_v62 = vpop.f32.mrf.mxu1 }
 0x184   : > { %v9759_v50 = vpop.f32.mrf.mxu0  ;;  %9990 = vmatmul.mubr.bf16.gmra.mxu0 %v3451_v47 }
 0x185   : > { %v2122_v8 = vadd.f32 %v9759_v50, %v11547_v34  ;;  %v9811_v44 = vpop.f32.mrf.mxu1  ;;  %9993 = vmatprep.mubr.bf16.mxu0 %v3452_v43 }
 0x186   : > { %v1953_v39 = vpop.f32.mrf.mxu0 }
 0x187   : > { %v2120_v41 = vadd.f32 %v1953_v39, %v11550_v56  ;;  %v11705_v23 = vadd.f32 %v9811_v44, %v2122_v8  ;;  %v2357_v2 = vpop.f32.mrf.mxu1  ;;  %v10637_v39 = vmov 0.0  }
 0x188   : > { %v9760_v3 = vpop.f32.mrf.mxu0  ;;  %199 = vst [vmem:[#allocation3] sm:$0xff] %v10637_v39  ;;  %200 = vst [vmem:[#allocation3 + $0x8] sm:$0xff] %v10637_v39 }
 0x189   : > { %v2123_v31 = vadd.f32 %v9760_v3, %v11555_v15  ;;  %v11708_v21 = vadd.f32 %v2357_v2, %v2120_v41  ;;  %v9812_v27 = vpop.f32.mrf.mxu1  ;;  %201 = vst [vmem:[#allocation3 + $0x10] sm:$0xff] %v10637_v39  ;;  %238 = vst [vmem:[#allocation3 + $0x138] sm:$0xff] %v10637_v39 }
 0x18a   : > { %v11710_v47 = vpop.f32.mrf.mxu0  ;;  %239 = vst [vmem:[#allocation3 + $0x140] sm:$0xff] %v10637_v39  ;;  %240 = vst [vmem:[#allocation3 + $0x148] sm:$0xff] %v10637_v39 }
 0x18b   : > { %v11712_v34 = vadd.f32 %v9812_v27, %v2123_v31  ;;  %v11714_v43 = vpop.f32.mrf.mxu1 }
 0x18c   : > { %v9763_v50 = vpop.f32.mrf.mxu0  ;;  %9994 = vmatmul.mubr.bf16.gmra.mxu0 %v3453_v59 }
 0x18d   : > { %v2126_v56 = vadd.f32 %v9763_v50, %v11565_v1  ;;  %v9815_v8 = vpop.f32.mrf.mxu1 }
 0x18e   : > { %v1969_v44 = vpop.f32.mrf.mxu0 }
 0x18f   : > { %v2124_v15 = vadd.f32 %v1969_v44, %v11568_v38  ;;  %v11718_v61 = vadd.f32 %v9815_v8, %v2126_v56  ;;  %v2373_v5 = vpop.f32.mrf.mxu1 }
 0x190   : > { %v9764_v41 = vpop.f32.mrf.mxu0 }
 0x191   : > { %v2127_v2 = vadd.f32 %v9764_v41, %v11573_v16  ;;  %v11721_v3 = vadd.f32 %v2373_v5, %v2124_v15  ;;  %v9816_v1 = vpop.f32.mrf.mxu1 }
 0x192   : > { %v11723_v59 = vpop.f32.mrf.mxu0 }
 0x193   : > { %v11725_v31 = vadd.f32 %v9816_v1, %v2127_v2  ;;  %v11727_v27 = vpop.f32.mrf.mxu1 }
 0x194   : > { %v9767_v50 = vpop.f32.mrf.mxu0 }
 0x195   : > { %v2130_v39 = vadd.f32 %v9767_v50, %v11583_v0  ;;  %v9819_v4 = vpop.f32.mrf.mxu1 }
 0x196   : > { %v1985_v38 = vpop.f32.mrf.mxu0 }
 0x197   : > { %v2128_v56 = vadd.f32 %v1985_v38, %v11586_v42  ;;  %v11731_v8 = vadd.f32 %v9819_v4, %v2130_v39  ;;  %v2389_v44 = vpop.f32.mrf.mxu1 }
 0x198   : > { %v9768_v16 = vpop.f32.mrf.mxu0 }
 0x199   : > { %v2131_v15 = vadd.f32 %v9768_v16, %v11591_v57  ;;  %v11734_v5 = vadd.f32 %v2389_v44, %v2128_v56  ;;  %v9820_v41 = vpop.f32.mrf.mxu1 }
 0x19a   : > { %v11736_v2 = vpop.f32.mrf.mxu0 }
 0x19b   : > { %v11738_v1 = vadd.f32 %v9820_v41, %v2131_v15  ;;  %v11740_v29 = vpop.f32.mrf.mxu1 }
 0x19c   : > { %13712 = vst [vmem:[#allocation15_spill] sm:$0xff] %v11740_v29  ;;  %v9771_v0 = vpop.f32.mrf.mxu0 }
 0x19d   : > { %v2134_v50 = vadd.f32 %v9771_v0, %v11601_v12  ;;  %v9823_v33 = vpop.f32.mrf.mxu1 }
 0x19e   : > { %v2001_v42 = vpop.f32.mrf.mxu0 }
 0x19f   : > { %v2132_v4 = vadd.f32 %v2001_v42, %v11604_v22  ;;  %v11744_v39 = vadd.f32 %v9823_v33, %v2134_v50  ;;  %v2405_v38 = vpop.f32.mrf.mxu1 }
 0x1a0   : > { %v9772_v57 = vpop.f32.mrf.mxu0 }
 0x1a1   : > { %v2135_v56 = vadd.f32 %v9772_v57, %v11609_v51  ;;  %v11747_v44 = vadd.f32 %v2405_v38, %v2132_v4  ;;  %v9824_v16 = vpop.f32.mrf.mxu1 }
 0x1a2   : > { %v11749_v15 = vpop.f32.mrf.mxu0 }
 0x1a3   : > { %13713 = vst [vmem:[#allocation16_spill] sm:$0xff] %v11749_v15  ;;  %v11751_v41 = vadd.f32 %v9824_v16, %v2135_v56  ;;  %v11753_v6 = vpop.f32.mrf.mxu1 }
 0x1a4   : > { %13714 = vst [vmem:[#allocation17_spill] sm:$0xff] %v11753_v6  ;;  %v9775_v12 = vpop.f32.mrf.mxu0 }
 0x1a5   : > { %v2138_v0 = vadd.f32 %v9775_v12, %v11619_v45  ;;  %v9827_v60 = vpop.f32.mrf.mxu1 }
 0x1a6   : > { %v2017_v22 = vpop.f32.mrf.mxu0 }
 0x1a7   : > { %v2136_v33 = vadd.f32 %v2017_v22, %v11622_v19  ;;  %v11757_v50 = vadd.f32 %v9827_v60, %v2138_v0  ;;  %v2421_v42 = vpop.f32.mrf.mxu1 }
 0x1a8   : > { %v9776_v51 = vpop.f32.mrf.mxu0 }
 0x1a9   : > { %v2139_v4 = vadd.f32 %v9776_v51, %v11627_v25  ;;  %v11760_v38 = vadd.f32 %v2421_v42, %v2136_v33  ;;  %v9828_v57 = vpop.f32.mrf.mxu1 }
 0x1aa   : > { %v11762_v56 = vpop.f32.mrf.mxu0 }
 0x1ab   : > { %13715 = vst [vmem:[#allocation18_spill] sm:$0xff] %v11762_v56  ;;  %v11764_v16 = vadd.f32 %v9828_v57, %v2139_v4  ;;  %v11766_v7 = vpop.f32.mrf.mxu1 }
 0x1ac   : > { %13716 = vst [vmem:[#allocation19_spill] sm:$0xff] %v11766_v7  ;;  %v9779_v45 = vpop.f32.mrf.mxu0 }
 0x1ad   : > { %v2142_v12 = vadd.f32 %v9779_v45, %v11637_v28  ;;  %v9831_v53 = vpop.f32.mrf.mxu1 }
 0x1ae   : > { %v2033_v19 = vpop.f32.mrf.mxu0 }
 0x1af   : > { %v2140_v60 = vadd.f32 %v2033_v19, %v11640_v32  ;;  %v11770_v0 = vadd.f32 %v9831_v53, %v2142_v12  ;;  %v2437_v22 = vpop.f32.mrf.mxu1 }
 0x1b0   : > { %v9780_v25 = vpop.f32.mrf.mxu0 }
 0x1b1   : > { %v2143_v33 = vadd.f32 %v9780_v25, %v11645_v35  ;;  %v11773_v42 = vadd.f32 %v2437_v22, %v2140_v60  ;;  %v9832_v51 = vpop.f32.mrf.mxu1 }
 0x1b2   : > { %v11775_v4 = vpop.f32.mrf.mxu0 }
 0x1b3   : > { %13717 = vst [vmem:[#allocation20_spill] sm:$0xff] %v11775_v4  ;;  %v11777_v57 = vadd.f32 %v9832_v51, %v2143_v33  ;;  %v11779_v7 = vpop.f32.mrf.mxu1 }
 0x1b4   : > { %13718 = vst [vmem:[#allocation21_spill] sm:$0xff] %v11779_v7  ;;  %v9783_v28 = vpop.f32.mrf.mxu0 }
 0x1b5   : > { %v2146_v45 = vadd.f32 %v9783_v28, %v11655_v46  ;;  %v9835_v56 = vpop.f32.mrf.mxu1 }
 0x1b6   : > { %v2049_v32 = vpop.f32.mrf.mxu0 }
 0x1b7   : > { %v2144_v53 = vadd.f32 %v2049_v32, %v11658_v58  ;;  %v11783_v12 = vadd.f32 %v9835_v56, %v2146_v45  ;;  %v2453_v19 = vpop.f32.mrf.mxu1 }
 0x1b8   : > { %v9784_v35 = vpop.f32.mrf.mxu0 }
 0x1b9   : > { %v2147_v60 = vadd.f32 %v9784_v35, %v11663_v55  ;;  %v11786_v22 = vadd.f32 %v2453_v19, %v2144_v53  ;;  %v9836_v25 = vpop.f32.mrf.mxu1 }
 0x1ba   : > { %v11788_v33 = vpop.f32.mrf.mxu0 }
 0x1bb   : > { %13719 = vst [vmem:[#allocation22_spill] sm:$0xff] %v11788_v33  ;;  %v11790_v51 = vadd.f32 %v9836_v25, %v2147_v60  ;;  %v11792_v7 = vpop.f32.mrf.mxu1 }
 0x1bc   : > { %13720 = vst [vmem:[#allocation23_spill] sm:$0xff] %v11792_v7  ;;  %v9787_v46 = vpop.f32.mrf.mxu0 }
 0x1bd   : > { %v2150_v28 = vadd.f32 %v9787_v46, %v11673_v30  ;;  %v9839_v4 = vpop.f32.mrf.mxu1 }
 0x1be   : > { %v2065_v58 = vpop.f32.mrf.mxu0 }
 0x1bf   : > { %v2148_v56 = vadd.f32 %v2065_v58, %v11676_v54  ;;  %v11796_v45 = vadd.f32 %v9839_v4, %v2150_v28  ;;  %v2469_v32 = vpop.f32.mrf.mxu1 }
 0x1c0   : > { %v9788_v55 = vpop.f32.mrf.mxu0 }
 0x1c1   : > { %v2151_v53 = vadd.f32 %v9788_v55, %v11680_v13  ;;  %v11799_v19 = vadd.f32 %v2469_v32, %v2148_v56  ;;  %v9840_v35 = vpop.f32.mrf.mxu1 }
 0x1c2   : > { %v11801_v60 = vpop.f32.mrf.mxu0 }
 0x1c3   : > { %13721 = vst [vmem:[#allocation24_spill] sm:$0xff] %v11801_v60  ;;  %v11803_v25 = vadd.f32 %v9840_v35, %v2151_v53  ;;  %v11805_v7 = vpop.f32.mrf.mxu1 }
 0x1c4   : > { %13722 = vst [vmem:[#allocation25_spill] sm:$0xff] %v11805_v7  ;;  %v9859_v30 = vpop.f32.mrf.mxu0 }
 0x1c5   : > { %v11808_v46 = vadd.f32 %v9859_v30, %v11690_v52  ;;  %v11810_v54 = vpop.f32.mrf.mxu1 }
 0x1c6   : > { %v2745_v4 = vpop.f32.mrf.mxu0 }
 0x1c7   : > { %v11813_v28 = vadd.f32 %v2745_v4, %v11693_v11  ;;  %v11815_v13 = vpop.f32.mrf.mxu1 }
 0x1c8   : > { %v9860_v58 = vpop.f32.mrf.mxu0 }
 0x1c9   : > { %v11818_v56 = vadd.f32 %v9860_v58, %v11697_v26  ;;  %v11822_v55 = vpop.f32.mrf.mxu1 }
 0x1ca   : > { %v11820_v32 = vpop.f32.mrf.mxu0 }
 0x1cb   : > { %v11827_v35 = vpop.f32.mrf.mxu1 }
 0x1cc   : > { %v9863_v53 = vpop.f32.mrf.mxu0 }
 0x1cd   : > { %v11825_v52 = vadd.f32 %v9863_v53, %v11705_v23  ;;  %v11835_v26 = vpop.f32.mrf.mxu1 }
 0x1ce   : > { %v2761_v30 = vpop.f32.mrf.mxu0 }
 0x1cf   : > { %v11830_v11 = vadd.f32 %v2761_v30, %v11708_v21  ;;  %v11842_v23 = vpop.f32.mrf.mxu1 }
 0x1d0   : > { %v9864_v4 = vpop.f32.mrf.mxu0 }
 0x1d1   : > { %v11833_v7 = vadd.f32 %v9864_v4, %v11712_v34  ;;  %v11850_v34 = vpop.f32.mrf.mxu1 }
 0x1d2   : > { %v11837_v58 = vpop.f32.mrf.mxu0 }
 0x1d4   : > { %v9867_v60 = vpop.f32.mrf.mxu0 }
 0x1d5   : > { %v11840_v33 = vadd.f32 %v9867_v60, %v11718_v61  ;;  %v11857_v61 = vpop.f32.mrf.mxu1 }
 0x1d6   : > { %v2777_v53 = vpop.f32.mrf.mxu0 }
 0x1d7   : > { %v11845_v18 = vadd.f32 %v2777_v53, %v11721_v3 }
 0x1d8   : > { %v9868_v21 = vpop.f32.mrf.mxu0 }
 0x1d9   : > { %v11848_v30 = vadd.f32 %v9868_v21, %v11725_v31  ;;  %v11865_v31 = vpop.f32.mrf.mxu1 }
 0x1da   : > { %v11852_v4 = vpop.f32.mrf.mxu0 }
 0x1dc   : > { %v9871_v36 = vpop.f32.mrf.mxu0 }
 0x1dd   : > { %v11855_v6 = vadd.f32 %v9871_v36, %v11731_v8  ;;  %v11872_v36 = vpop.f32.mrf.mxu1 }
 0x1de   : > { %v2793_v60 = vpop.f32.mrf.mxu0 }
 0x1df   : > { %13723 = vst [vmem:[#allocation26_spill] sm:$0xff] %v11855_v6  ;;  %v11860_v15 = vadd.f32 %v2793_v60, %v11734_v5 }
 0x1e0   : > { %v9872_v3 = vpop.f32.mrf.mxu0 }
 0x1e1   : > { %v11863_v53 = vadd.f32 %v9872_v3, %v11738_v1  ;;  %v11880_v1 = vpop.f32.mrf.mxu1 }
 0x1e2   : > { %v11867_v21 = vpop.f32.mrf.mxu0 }
 0x1e3   : > { %13724 = vst [vmem:[#allocation27_spill] sm:$0xff] %v11863_v53  ;;  %13725 = vst [vmem:[#allocation28_spill] sm:$0xff] %v11867_v21 }
 0x1e4   : > { %v9875_v29 = vpop.f32.mrf.mxu0 }
 0x1e5   : > { %v11870_v20 = vadd.f32 %v9875_v29, %v11744_v39  ;;  %v11887_v29 = vpop.f32.mrf.mxu1 }
 0x1e6   : > { %v2809_v8 = vpop.f32.mrf.mxu0 }
 0x1e7   : > { %13726 = vst [vmem:[#allocation29_spill] sm:$0xff] %v11870_v20  ;;  %v11875_v6 = vadd.f32 %v2809_v8, %v11747_v44  ;;  %v11889_v20 = vpop.permute.xlu0 %3878 }
 0x1e8   : > { %v9876_v5 = vpop.f32.mrf.mxu0 }
 0x1e9   : > { %13727 = vst [vmem:[#allocation30_spill] sm:$0xff] %v11875_v6  ;;  %v11878_v60 = vadd.f32 %v9876_v5, %v11751_v41  ;;  %v11894_v6 = vpop.permute.xlu1 %3888  ;;  %v11899_v5 = vpop.f32.mrf.mxu1 }
 0x1ea   : > { %v11882_v3 = vpop.f32.mrf.mxu0  ;;  %13733 = vst [vmem:[#allocation36_spill] sm:$0xff] %v11899_v5 }
 0x1eb   : > { %13728 = vst [vmem:[#allocation31_spill] sm:$0xff] %v11878_v60  ;;  %13729 = vst [vmem:[#allocation32_spill] sm:$0xff] %v11882_v3  ;;  %v11908_v3 = vpop.f32.mrf.mxu1 }
 0x1ec   : > { %v9879_v53 = vpop.f32.mrf.mxu0  ;;  %13736 = vst [vmem:[#allocation39_spill] sm:$0xff] %v11908_v3 }
 0x1ed   : > { %v11885_v21 = vadd.f32 %v9879_v53, %v11757_v50  ;;  %v11903_v53 = vpop.permute.xlu0 %3883 }
 0x1ee   : > { %v2825_v39 = vpop.f32.mrf.mxu0 }
 0x1ef   : > { %13730 = vst [vmem:[#allocation33_spill] sm:$0xff] %v11885_v21  ;;  %v11892_v44 = vadd.f32 %v2825_v39, %v11760_v38  ;;  %v11910_v39 = vpop.permute.xlu1 %3893 }
 0x1f0   : > { %v9880_v8 = vpop.f32.mrf.mxu0 }
 0x1f1   : > { %13731 = vst [vmem:[#allocation34_spill] sm:$0xff] %v11892_v44  ;;  %v11897_v41 = vadd.f32 %v9880_v8, %v11764_v16  ;;  %v11922_v5 = vpop.permute.xlu0 %3898 }
 0x1f2   : > { %v11901_v60 = vpop.f32.mrf.mxu0 }
 0x1f3   : > { %13732 = vst [vmem:[#allocation35_spill] sm:$0xff] %v11897_v41  ;;  %13734 = vst [vmem:[#allocation37_spill] sm:$0xff] %v11901_v60  ;;  %v11918_v41 = vpop.f32.mrf.mxu1 }
 0x1f4   : > { %v9883_v50 = vpop.f32.mrf.mxu0  ;;  %13739 = vst [vmem:[#allocation42_spill] sm:$0xff] %v11918_v41 }
 0x1f5   : > { %v11906_v21 = vadd.f32 %v9883_v50, %v11770_v0  ;;  %v11924_v50 = vpop.permute.xlu1 %3903  ;;  %v11929_v3 = vpop.f32.mrf.mxu1 }
 0x1f6   : > { %v2841_v38 = vpop.f32.mrf.mxu0 }
 0x1f7   : > { %13735 = vst [vmem:[#allocation38_spill] sm:$0xff] %v11906_v21  ;;  %v11913_v44 = vadd.f32 %v2841_v38, %v11773_v42 }
 0x1f8   : > { %v9884_v16 = vpop.f32.mrf.mxu0 }
 0x1f9   : > { %13737 = vst [vmem:[#allocation40_spill] sm:$0xff] %v11913_v44  ;;  %v11916_v8 = vadd.f32 %v9884_v16, %v11777_v57  ;;  %v11934_v16 = vpop.permute.xlu0 %3908  ;;  %v11943_v41 = vpop.permute.xlu1 %3913 }
 0x1fa   : > { %v11920_v60 = vpop.f32.mrf.mxu0 }
 0x1fb   : > { %13738 = vst [vmem:[#allocation41_spill] sm:$0xff] %v11916_v8  ;;  %13740 = vst [vmem:[#allocation43_spill] sm:$0xff] %v11920_v60  ;;  %v11939_v60 = vpop.f32.mrf.mxu1 }
 0x1fc   : > { %v9887_v0 = vpop.f32.mrf.mxu0  ;;  %13744 = vst [vmem:[#allocation47_spill] sm:$0xff] %v11939_v60 }
 0x1fd   : > { %v11927_v21 = vadd.f32 %v9887_v0, %v11783_v12  ;;  %v1713_v0 = vadd.f32 %v11535_v37, %v11531_v14 }
 0x1fe   : > { %v2857_v42 = vpop.f32.mrf.mxu0 }
 0x1ff   : > { %13741 = vst [vmem:[#allocation44_spill] sm:$0xff] %v11927_v21  ;;  %v11932_v38 = vadd.f32 %v2857_v42, %v11786_v22  ;;  %v11950_v22 = vpop.f32.mrf.mxu1 }
 0x200   : > { %v9888_v57 = vpop.f32.mrf.mxu0 }
 0x201   : > { %13742 = vst [vmem:[#allocation45_spill] sm:$0xff] %v11932_v38  ;;  %v11937_v8 = vadd.f32 %v9888_v57, %v11790_v51  ;;  %v2117_v38 = vadd.f32 %v11695_v49, %v1713_v0  ;;  %v11953_v51 = vpop.permute.xlu0 %3918  ;;  %v11963_v14 = vpop.f32.mrf.mxu1  ;;  %v1717_v49 = vadd.f32 %v11557_v17, %v11553_v10  ;;  %v3330_v10 = vadd.f32 %v11810_v54, %v11808_v46 }
 0x202   : > { %v11941_v44 = vpop.f32.mrf.mxu0 }
 0x203   : > { %13743 = vst [vmem:[#allocation46_spill] sm:$0xff] %v11937_v8  ;;  %13745 = vst [vmem:[#allocation48_spill] sm:$0xff] %v11941_v44  ;;  %v11958_v44 = vpop.permute.xlu1 %3923 }
 0x204   : > { %v9891_v12 = vpop.f32.mrf.mxu0 }
 0x205   : > { %v11948_v21 = vadd.f32 %v9891_v12, %v11796_v45  ;;  %v2521_v45 = vadd.f32 %v11699_v62, %v2117_v38  ;;  %v11970_v0 = vpop.permute.xlu0 %3928  ;;  %v10551_v62 = vld [vmem:[%s13688_s3 + $0x38] sm:$0xff]  }
 0x206   : > { %v2873_v42 = vpop.f32.mrf.mxu0  ;;  %9997 = vmatprep.subr.bf16.mxu1 %v10551_v62 }
 0x207   : > { %v11956_v57 = vadd.f32 %v2873_v42, %v11799_v19  ;;  %v3328_v19 = vadd.f32 %v11815_v13, %v11813_v28  ;;  %v2925_v42 = vadd.f32 %v11820_v32, %v2521_v45  ;;  %v11981_v38 = vpop.permute.xlu1 %3933  ;;  %v10556_v28 = vld [vmem:[%s13688_s3 + $0x78] sm:$0xff]   ;;  %9998 = vmatpush3.bf16.msra.mxu1 %v10551_v62 }
 0x208   : > { %v9892_v8 = vpop.f32.mrf.mxu0  ;;  %10049 = vmatprep.subr.bf16.mxu0 %v10556_v28 }
 0x209   : > { %v11961_v60 = vadd.f32 %v9892_v8, %v11803_v25  ;;  %v2121_v25 = vadd.f32 %v11710_v47, %v1717_v49  ;;  %v11976_v8 = vpop.f32.mrf.mxu1  ;;  %v3331_v47 = vadd.f32 %v11822_v55, %v11818_v56  ;;  %v3329_v32 = vadd.f32 %v11827_v35, %v2925_v42  ;;  %10050 = vmatpush3.bf16.msra.mxu0 %v10556_v28  ;;  %v12003_v56 = vpop.permute.xlu0 %3938 }
 0x20a   : > { %v11965_v37 = vpop.f32.mrf.mxu0 }
 0x20b   : > { %13746 = vst [vmem:[#allocation49_spill] sm:$0xff] %v11961_v60  ;;  %v2525_v49 = vadd.f32 %v11714_v43, %v2121_v25  ;;  %v11996_v46 = vpop.f32.mrf.mxu1  ;;  %v10557_v43 = vld [vmem:[%s13688_s3 + $0x70] sm:$0xff]   ;;  %v12015_v62 = vpop.permute.xlu1 %3943 }
 0x20c   : > { %v9963_v12 = vpop.f32.mrf.mxu0  ;;  %10051 = vmatprep.subr.bf16.mxu0 %v10557_v43 }
 0x20d   : > { %v11993_v45 = vadd.f32 %v9963_v12, %v3330_v10  ;;  %v1721_v12 = vadd.f32 %v11575_v9, %v11571_v48  ;;  %v2929_v42 = vadd.f32 %v11837_v58, %v2525_v49  ;;  %v3332_v10 = vadd.f32 %v11842_v23, %v11830_v11  ;;  %v12026_v9 = vpop.f32.mrf.mxu1  ;;  %10052 = vmatpush3.bf16.msra.mxu0 %v10557_v43 }
 0x20e   : > { %v3553_v60 = vpop.f32.mrf.mxu0  ;;  %v3334_v48 = vadd.f32 %v11835_v26, %v11825_v52  ;;  %v3335_v52 = vadd.f32 %v11850_v34, %v11833_v7 }
 0x20f   : > { %v11985_v17 = vadd.f32 %v3553_v60, %v3328_v19  ;;  %v10552_v19 = vld [vmem:[%s13688_s3 + $0x30] sm:$0xff]   ;;  %v3333_v26 = vadd.f32 %v11857_v61, %v2929_v42  ;;  %v10554_v61 = vld [vmem:[%s13688_s3 + $0x20] sm:$0xff]   ;;  %v12053_v42 = vpop.permute.xlu1 %3953 }
 0x210   : > { %v9964_v13 = vpop.f32.mrf.mxu0  ;;  %9999 = vmatprep.subr.bf16.mxu1 %v10552_v19 }
 0x211   : > { %v11998_v54 = vadd.f32 %v9964_v13, %v3331_v47  ;;  %v4056_v55 = vmul.f32 %v11889_v20, %v11985_v17  ;;  %v4058_v20 = vmul.f32 %v11894_v6, %v11993_v45  ;;  %10000 = vmatpush3.bf16.msra.mxu1 %v10552_v19  ;;  %v2125_v47 = vadd.f32 %v11723_v59, %v1721_v12  ;;  %v10553_v6 = vld [vmem:[%s13688_s3 + $0x28] sm:$0xff]  }
 0x212   : > { %v3556_v60 = vpop.f32.mrf.mxu0  ;;  %v10559_v59 = vld [vmem:[%s13688_s3 + $0x68] sm:$0xff]   ;;  %10001 = vmatprep.subr.bf16.mxu1 %v10553_v6 }
 0x213   : > { %v12007_v35 = vadd.f32 %v3556_v60, %v3329_v32  ;;  %v4059_v58 = vmul.f32 %v11910_v39, %v11998_v54  ;;  %v4134_v11 = vmul.f32 %v4056_v55, %v4056_v55  ;;  %v12043_v60 = vpop.permute.xlu0 %3948  ;;  %v4136_v19 = vmul.f32 %v4058_v20, %v4058_v20  ;;  %10053 = vmatprep.subr.bf16.mxu0 %v10559_v59 }
 0x214   : > { %v9967_v25 = vpop.f32.mrf.mxu0  ;;  %10054 = vmatpush3.bf16.msra.mxu0 %v10559_v59  ;;  %v1725_v59 = vadd.f32 %v11593_v40, %v11589_v24 }
 0x215   : > { %v4057_v28 = vmul.f32 %v11903_v53, %v12007_v35  ;;  %v12041_v39 = vadd.f32 %v9967_v25, %v3334_v48  ;;  %10002 = vmatpush3.bf16.msra.mxu1 %v10553_v6  ;;  %v4137_v7 = vmul.f32 %v4059_v58, %v4059_v58 }
 0x216   : > { %v3569_v13 = vpop.f32.mrf.mxu0  ;;  %10003 = vmatprep.subr.bf16.mxu1 %v10554_v61 }
 0x217   : > { %v4092_v23 = vadd.f32 %v4057_v28, %v4056_v55  ;;  %v4135_v53 = vmul.f32 %v4057_v28, %v4057_v28  ;;  %v12033_v32 = vadd.f32 %v3569_v13, %v3332_v10  ;;  %v2529_v10 = vadd.f32 %v11727_v27, %v2125_v47  ;;  %v12048_v28 = vpop.f32.mrf.mxu1  ;;  %v10560_v27 = vld [vmem:[%s13688_s3 + $0x60] sm:$0xff]  }
 0x218   : > { %v9968_v49 = vpop.f32.mrf.mxu0  ;;  %v4062_v47 = vmul.f32 %v11934_v16, %v12041_v39  ;;  %10055 = vmatprep.subr.bf16.mxu0 %v10560_v27 }
 0x219   : > { %v4093_v55 = vadd.f32 %v4092_v23, %v4058_v20  ;;  %v4170_v43 = vadd.f32 %v4135_v53, %v4134_v11  ;;  %v4060_v12 = vmul.f32 %v11922_v5, %v12033_v32  ;;  %v12055_v48 = vadd.f32 %v9968_v49, %v3335_v52  ;;  %10004 = vmatpush3.bf16.msra.mxu1 %v10554_v61  ;;  %v10555_v49 = vld [vmem:[%s13688_s3 + $0x18] sm:$0xff]  }
 0x21a   : > { %v3572_v34 = vpop.f32.mrf.mxu0  ;;  %v2933_v5 = vadd.f32 %v11852_v4, %v2529_v10  ;;  %v3338_v52 = vadd.f32 %v11865_v31, %v11840_v33  ;;  %v3336_v4 = vadd.f32 %v11872_v36, %v11845_v18  ;;  %10056 = vmatpush3.bf16.msra.mxu0 %v10560_v27  ;;  %v10562_v31 = vld [vmem:[%s13688_s3 + $0x58] sm:$0xff]   ;;  %v2129_v36 = vadd.f32 %v11736_v2, %v1725_v59  ;;  %v13749_v59 = vld [vmem:[#allocation39_spill] sm:$0xff] }
 0x21b   : > { %v4171_v25 = vadd.f32 %v4170_v43, %v4136_v19  ;;  %v4094_v20 = vadd.f32 %v4093_v55, %v4059_v58  ;;  %v12057_v13 = vadd.f32 %v3572_v34, %v3333_v26  ;;  %v4138_v23 = vmul.f32 %v4060_v12, %v4060_v12  ;;  %v12073_v26 = vpop.f32.mrf.mxu1  ;;  %v12081_v19 = vpop.permute.xlu0 %3958  ;;  %10005 = vmatprep.subr.bf16.mxu1 %v10555_v49 }
 0x21c   : > { %v9971_v6 = vpop.f32.mrf.mxu0  ;;  %v4063_v40 = vmul.f32 %v11943_v41, %v12055_v48  ;;  %v3339_v55 = vadd.f32 %v11880_v1, %v11848_v30  ;;  %v10563_v41 = vld [vmem:[%s13688_s3 + $0x50] sm:$0xff]   ;;  %v3337_v34 = vadd.f32 %v11887_v29, %v2933_v5  ;;  %v4140_v61 = vmul.f32 %v4062_v47, %v4062_v47  ;;  %10057 = vmatprep.subr.bf16.mxu0 %v10562_v31 }
 0x21d   : > { %v4095_v11 = vadd.f32 %v4094_v20, %v4060_v12  ;;  %v4172_v53 = vadd.f32 %v4171_v25, %v4137_v7  ;;  %v4061_v58 = vmul.f32 %v11924_v50, %v12057_v13  ;;  %v10558_v50 = vld [vmem:[%s13688_s3 + $0x10] sm:$0xff]   ;;  %v12091_v43 = vadd.f32 %v9971_v6, %v3338_v52  ;;  %v12098_v7 = vpop.permute.xlu1 %3963  ;;  %10006 = vmatpush3.bf16.msra.mxu1 %v10555_v49  ;;  %v12101_v20 = vpop.f32.mrf.mxu1  ;;  %v10561_v6 = vld [vmem:[%s13688_s3 + $0x8] sm:$0xff]  }
 0x21e   : > { %v3585_v16 = vpop.f32.mrf.mxu0  ;;  %10007 = vmatprep.subr.bf16.mxu1 %v10558_v50  ;;  %10058 = vmatpush3.bf16.msra.mxu0 %v10562_v31  ;;  %v3340_v52 = vadd.f32 %v13749_v59, %v11860_v15  ;;  %v10565_v49 = vld [vmem:[%s13688_s3 + $0x48] sm:$0xff]   ;;  %v13750_v31 = vld [vmem:[#allocation16_spill] sm:$0xff] }
 0x21f   : > { %v4173_v24 = vadd.f32 %v4172_v53, %v4138_v23  ;;  %v4096_v33 = vadd.f32 %v4095_v11, %v4061_v58  ;;  %v4139_v18 = vmul.f32 %v4061_v58, %v4061_v58  ;;  %v12093_v12 = vadd.f32 %v3585_v16, %v3336_v4  ;;  %v13747_v23 = vld [vmem:[#allocation4_spill] sm:$0xff]  ;;  %v13748_v58 = vld [vmem:[#allocation15_spill] sm:$0xff]  ;;  %10059 = vmatprep.subr.bf16.mxu0 %v10563_v41 }
 0x220   : > { %v9972_v10 = vpop.f32.mrf.mxu0  ;;  %v4141_v11 = vmul.f32 %v4063_v40, %v4063_v40  ;;  %v1729_v53 = vadd.f32 %v13747_v23, %v11607_v63  ;;  %v4066_v4 = vmul.f32 %v11970_v0, %v12091_v43 }
 0x221   : > { %v4097_v25 = vadd.f32 %v4096_v33, %v4062_v47  ;;  %v4174_v2 = vadd.f32 %v4173_v24, %v4139_v18  ;;  %v4064_v30 = vmul.f32 %v11953_v51, %v12093_v12  ;;  %v12105_v1 = vadd.f32 %v9972_v10, %v3339_v55  ;;  %v12122_v24 = vpop.permute.xlu0 %3968  ;;  %10008 = vmatpush3.bf16.msra.mxu1 %v10558_v50  ;;  %v13752_v55 = vld [vmem:[#allocation36_spill] sm:$0xff] }
 0x222   : > { %v3588_v27 = vpop.f32.mrf.mxu0  ;;  %v2533_v51 = vadd.f32 %v13748_v58, %v2129_v36  ;;  %v2133_v15 = vadd.f32 %v13750_v31, %v1729_v53  ;;  %v13751_v36 = vld [vmem:[#allocation26_spill] sm:$0xff]  ;;  %v13753_v10 = vld [vmem:[#allocation28_spill] sm:$0xff]  ;;  %10009 = vmatprep.subr.bf16.mxu1 %v10561_v6  ;;  %10060 = vmatpush3.bf16.msra.mxu0 %v10563_v41 }
 0x223   : > { %v4175_v29 = vadd.f32 %v4174_v2, %v4140_v61  ;;  %v4098_v5 = vadd.f32 %v4097_v25, %v4063_v40  ;;  %v12110_v47 = vadd.f32 %v3588_v27, %v3337_v34  ;;  %v4142_v33 = vmul.f32 %v4064_v30, %v4064_v30  ;;  %v12130_v61 = vpop.f32.mrf.mxu1  ;;  %10061 = vmatprep.subr.bf16.mxu0 %v10565_v49 }
 0x224   : > { %v9975_v16 = vpop.f32.mrf.mxu0  ;;  %v3342_v0 = vadd.f32 %v13752_v55, %v13751_v36  ;;  %v2937_v34 = vadd.f32 %v13753_v10, %v2533_v51  ;;  %v4067_v25 = vmul.f32 %v11981_v38, %v12105_v1  ;;  %v10566_v38 = vld [vmem:[%s13688_s3 + $0x40] sm:$0xff]   ;;  %v13760_v55 = vld [vmem:[#allocation8_spill] sm:$0xff] }
 0x225   : > { %v4099_v40 = vadd.f32 %v4098_v5, %v4064_v30  ;;  %v4176_v18 = vadd.f32 %v4175_v29, %v4141_v11  ;;  %v4065_v63 = vmul.f32 %v11958_v44, %v12110_v47  ;;  %v10564_v30 = vld [vmem:[%s13688_s3] sm:$0xff]   ;;  %v12137_v44 = vpop.permute.xlu1 %3973  ;;  %v4144_v5 = vmul.f32 %v4066_v4, %v4066_v4  ;;  %10010 = vmatpush3.bf16.msra.mxu1 %v10561_v6  ;;  %v12152_v31 = vpop.f32.mrf.mxu1 }
 0x226   : > { %v3601_v2 = vpop.f32.mrf.mxu0  ;;  %v12144_v51 = vadd.f32 %v9975_v16, %v3342_v0  ;;  %10011 = vmatprep.subr.bf16.mxu1 %v10564_v30  ;;  %v13759_v16 = vld [vmem:[#allocation5_spill] sm:$0xff]  ;;  %v12161_v6 = vpop.permute.xlu0 %3978  ;;  %10062 = vmatpush3.bf16.msra.mxu0 %v10565_v49 }
 0x227   : > { %v4177_v50 = vadd.f32 %v4176_v18, %v4142_v33  ;;  %v4100_v27 = vadd.f32 %v4099_v40, %v4065_v63  ;;  %v4143_v11 = vmul.f32 %v4065_v63, %v4065_v63  ;;  %v12139_v29 = vadd.f32 %v3601_v2, %v3340_v52  ;;  %v13755_v40 = vld [vmem:[#allocation17_spill] sm:$0xff]  ;;  %v13756_v52 = vld [vmem:[#allocation27_spill] sm:$0xff]  ;;  %v13757_v18 = vld [vmem:[#allocation42_spill] sm:$0xff]  ;;  %10063 = vmatprep.subr.bf16.mxu0 %v10566_v38  ;;  %v12174_v49 = vpop.f32.mrf.mxu1 }
 0x228   : > { %v9976_v23 = vpop.f32.mrf.mxu0  ;;  %13754 = vst [vmem:[#allocation4_spill] sm:$0xff] %v12144_v51  ;;  %v2537_v33 = vadd.f32 %v13755_v40, %v2133_v15  ;;  %v3343_v41 = vadd.f32 %v13757_v18, %v13756_v52  ;;  %v3341_v63 = vadd.f32 %v11929_v3, %v2937_v34  ;;  %v4145_v15 = vmul.f32 %v4067_v25, %v4067_v25  ;;  %v13761_v2 = vld [vmem:[#allocation30_spill] sm:$0xff]  ;;  %v13762_v34 = vld [vmem:[#allocation32_spill] sm:$0xff] }
 0x229   : > { %v4101_v53 = vadd.f32 %v4100_v27, %v4066_v4  ;;  %v4178_v58 = vadd.f32 %v4177_v50, %v4143_v11  ;;  %v4068_v59 = vmul.f32 %v12003_v56, %v12139_v29  ;;  %v12157_v4 = vld [vmem:[%s13688_s3 + $0xb8] sm:$0xff]   ;;  %v1733_v56 = vadd.f32 %v13760_v55, %v13759_v16  ;;  %v12170_v52 = vpop.permute.xlu1 %3983  ;;  %10012 = vmatpush3.bf16.msra.mxu1 %v10564_v30 }
 0x22a   : > { %v3604_v36 = vpop.f32.mrf.mxu0  ;;  %13758 = vst [vmem:[#allocation15_spill] sm:$0xff] %v12157_v4  ;;  %v3344_v3 = vadd.f32 %v11950_v22, %v13761_v2  ;;  %v2941_v50 = vadd.f32 %v13762_v34, %v2537_v33  ;;  %v12166_v27 = vadd.f32 %v9976_v23, %v3343_v41  ;;  %v4070_v18 = vmul.f32 %v12043_v60, %v12144_v51  ;;  %v13766_v60 = vld [vmem:[#allocation47_spill] sm:$0xff]  ;;  %v12189_v34 = vpop.f32.mrf.mxu1 }
 0x22b   : > { %v4179_v0 = vadd.f32 %v4178_v58, %v4144_v5  ;;  %v4102_v10 = vadd.f32 %v4101_v53, %v4067_v25  ;;  %v12168_v11 = vadd.f32 %v3604_v36, %v3341_v63  ;;  %v4146_v5 = vmul.f32 %v4068_v59, %v4068_v59  ;;  %10101 = vmatprep.subr.bf16.mxu1 %v12157_v4  ;;  %v13764_v53 = vld [vmem:[#allocation18_spill] sm:$0xff]  ;;  %v13765_v63 = vld [vmem:[#allocation29_spill] sm:$0xff] }
 0x22c   : > { %13763 = vst [vmem:[#allocation39_spill] sm:$0xff] %v12166_v27  ;;  %v9979_v40 = vpop.f32.mrf.mxu0  ;;  %v2137_v58 = vadd.f32 %v13764_v53, %v1733_v56  ;;  %10064 = vmatpush3.bf16.msra.mxu0 %v10566_v38  ;;  %v3346_v36 = vadd.f32 %v13766_v60, %v13765_v63  ;;  %v4071_v30 = vmul.f32 %v12053_v42, %v12166_v27 }
 0x22d   : > { %v4103_v16 = vadd.f32 %v4102_v10, %v4068_v59  ;;  %v4180_v25 = vadd.f32 %v4179_v0, %v4145_v15  ;;  %v4069_v22 = vmul.f32 %v12015_v62, %v12168_v11  ;;  %v3989_v0 = vpop.permute.xlu0 %3988  ;;  %v13767_v62 = vld [vmem:[#allocation31_spill] sm:$0xff]  ;;  %v3345_v2 = vadd.f32 %v11976_v8, %v2941_v50 }
 0x22e   : > { %v3617_v23 = vpop.f32.mrf.mxu0  ;;  %v3347_v10 = vadd.f32 %v11963_v14, %v13767_v62  ;;  %v4148_v56 = vmul.f32 %v4070_v18, %v4070_v18  ;;  %v4149_v63 = vmul.f32 %v4071_v30, %v4071_v30  ;;  %v13770_v62 = vld [vmem:[#allocation9_spill] sm:$0xff] }
 0x22f   : > { %v4181_v33 = vadd.f32 %v4180_v25, %v4146_v5  ;;  %v12180_v41 = vadd.f32 %v3617_v23, %v3344_v3  ;;  %v4104_v59 = vadd.f32 %v4103_v16, %v4069_v22  ;;  %v4147_v55 = vmul.f32 %v4069_v22, %v4069_v22  ;;  %v13769_v16 = vld [vmem:[#allocation19_spill] sm:$0xff]  ;;  %v3994_v23 = vpop.permute.xlu1 %3993 }
 0x230   : > { %v9980_v15 = vpop.f32.mrf.mxu0  ;;  %v12191_v5 = vadd.f32 %v9979_v40, %v3346_v36  ;;  %v2541_v22 = vadd.f32 %v13769_v16, %v2137_v58  ;;  %v13772_v40 = vld [vmem:[#allocation34_spill] sm:$0xff]  ;;  %v13775_v16 = vld [vmem:[#allocation33_spill] sm:$0xff] }
 0x231   : > { %v4105_v3 = vadd.f32 %v4104_v59, %v4070_v18  ;;  %v4182_v38 = vadd.f32 %v4181_v33, %v4147_v55  ;;  %v4072_v25 = vmul.f32 %v12081_v19, %v12180_v41  ;;  %v12198_v8 = vadd.f32 %v9980_v15, %v3347_v10  ;;  %v13771_v18 = vld [vmem:[#allocation10_spill] sm:$0xff]  ;;  %v13773_v59 = vld [vmem:[#allocation37_spill] sm:$0xff]  ;;  %v12207_v55 = vpop.f32.mrf.mxu1 }
 0x232   : > { %13768 = vst [vmem:[#allocation16_spill] sm:$0xff] %v12191_v5  ;;  %v3620_v42 = vpop.f32.mrf.mxu0  ;;  %v1737_v33 = vadd.f32 %v13771_v18, %v13770_v62  ;;  %v3348_v36 = vadd.f32 %v12026_v9, %v13772_v40  ;;  %v2945_v19 = vadd.f32 %v13773_v59, %v2541_v22  ;;  %v3350_v9 = vadd.f32 %v11996_v46, %v13775_v16 }
 0x233   : > { %v12196_v53 = vadd.f32 %v3620_v42, %v3345_v2  ;;  %v4183_v14 = vadd.f32 %v4182_v38, %v4148_v56  ;;  %v4106_v60 = vadd.f32 %v4105_v3, %v4071_v30  ;;  %v4074_v2 = vmul.f32 %v12122_v24, %v12191_v5  ;;  %v13774_v3 = vld [vmem:[#allocation20_spill] sm:$0xff]  ;;  %v3999_v42 = vpop.permute.xlu0 %3998  ;;  %v4004_v24 = vpop.permute.xlu1 %4003 }
 0x234   : > { %v9983_v50 = vpop.f32.mrf.mxu0  ;;  %v4150_v15 = vmul.f32 %v4072_v25, %v4072_v25  ;;  %v2141_v38 = vadd.f32 %v13774_v3, %v1737_v33  ;;  %v12223_v33 = vpop.f32.mrf.mxu1 }
 0x235   : > { %v4073_v58 = vmul.f32 %v12098_v7, %v12196_v53  ;;  %v4107_v30 = vadd.f32 %v4106_v60, %v4072_v25  ;;  %v4184_v10 = vadd.f32 %v4183_v14, %v4149_v63  ;;  %v4075_v7 = vmul.f32 %v12137_v44, %v12198_v8  ;;  %v13776_v60 = vld [vmem:[#allocation35_spill] sm:$0xff] }
 0x236   : > { %v3633_v56 = vpop.f32.mrf.mxu0  ;;  %v3351_v25 = vadd.f32 %v12048_v28, %v13776_v60  ;;  %v3349_v63 = vadd.f32 %v12073_v26, %v2945_v19  ;;  %v12221_v14 = vadd.f32 %v9983_v50, %v3350_v9  ;;  %v4152_v46 = vmul.f32 %v4074_v2, %v4074_v2  ;;  %v13777_v44 = vld [vmem:[#allocation11_spill] sm:$0xff] }
 0x237   : > { %v4151_v62 = vmul.f32 %v4073_v58, %v4073_v58  ;;  %v12214_v22 = vadd.f32 %v3633_v56, %v3348_v36  ;;  %v4185_v18 = vadd.f32 %v4184_v10, %v4150_v15  ;;  %v4108_v40 = vadd.f32 %v4107_v30, %v4073_v58  ;;  %v13778_v58 = vld [vmem:[#allocation12_spill] sm:$0xff]  ;;  %v13779_v56 = vld [vmem:[#allocation21_spill] sm:$0xff]  ;;  %v4009_v60 = vpop.permute.xlu0 %4008 }
 0x238   : > { %v9984_v59 = vpop.f32.mrf.mxu0  ;;  %v1741_v30 = vadd.f32 %v13778_v58, %v13777_v44  ;;  %v2545_v16 = vadd.f32 %v13779_v56, %v2141_v38  ;;  %v4153_v28 = vmul.f32 %v4075_v7, %v4075_v7  ;;  %v3264_v38 = vpop.f32.mrf.mxu1 }
 0x239   : > { %v4109_v3 = vadd.f32 %v4108_v40, %v4074_v2  ;;  %v4186_v36 = vadd.f32 %v4185_v18, %v4151_v62  ;;  %v4076_v15 = vmul.f32 %v12161_v6, %v12214_v22  ;;  %v12232_v19 = vadd.f32 %v9984_v59, %v3351_v25  ;;  %v13780_v2 = vld [vmem:[#allocation40_spill] sm:$0xff]  ;;  %v13781_v18 = vld [vmem:[#allocation43_spill] sm:$0xff]  ;;  %v4014_v56 = vpop.permute.xlu1 %4013 }
 0x23a   : > { %v3636_v10 = vpop.f32.mrf.mxu0  ;;  %v3352_v62 = vadd.f32 %v12130_v61, %v13780_v2  ;;  %v2949_v6 = vadd.f32 %v13781_v18, %v2545_v16  ;;  %v4078_v40 = vmul.f32 %v3989_v0, %v12221_v14  ;;  %v13783_v59 = vld [vmem:[#allocation7_spill] sm:$0xff]  ;;  %v13785_v16 = vld [vmem:[#allocation38_spill] sm:$0xff] }
 0x23b   : > { %v12230_v4 = vadd.f32 %v3636_v10, %v3349_v63  ;;  %v4187_v26 = vadd.f32 %v4186_v36, %v4152_v46  ;;  %v4110_v50 = vadd.f32 %v4109_v3, %v4075_v7  ;;  %v4154_v10 = vmul.f32 %v4076_v15, %v4076_v15  ;;  %v13782_v7 = vld [vmem:[#allocation6_spill] sm:$0xff] }
 0x23c   : > { %v9987_v9 = vpop.f32.mrf.mxu0  ;;  %v937_v25 = vadd.f32 %v13783_v59, %v13782_v7  ;;  %v13784_v3 = vld [vmem:[#allocation22_spill] sm:$0xff]  ;;  %v3354_v0 = vadd.f32 %v12101_v20, %v13785_v16  ;;  %v3353_v7 = vadd.f32 %v12174_v49, %v2949_v6  ;;  %v12252_v59 = vpop.f32.mrf.mxu1 }
 0x23d   : > { %v4077_v44 = vmul.f32 %v12170_v52, %v12230_v4  ;;  %v4111_v63 = vadd.f32 %v4110_v50, %v4076_v15  ;;  %v4188_v58 = vadd.f32 %v4187_v26, %v4153_v28  ;;  %v2145_v36 = vadd.f32 %v13784_v3, %v1741_v30  ;;  %v13786_v15 = vld [vmem:[#allocation13_spill] sm:$0xff]  ;;  %v13789_v6 = vld [vmem:[#allocation14_spill] sm:$0xff] }
 0x23e   : > { %v3649_v46 = vpop.f32.mrf.mxu0  ;;  %v4079_v52 = vmul.f32 %v3994_v23, %v12232_v19  ;;  %v1341_v28 = vadd.f32 %v13786_v15, %v937_v25  ;;  %v13787_v26 = vld [vmem:[#allocation41_spill] sm:$0xff]  ;;  %v4156_v30 = vmul.f32 %v4078_v40, %v4078_v40  ;;  %v12254_v3 = vadd.f32 %v9987_v9, %v3354_v0  ;;  %v13788_v23 = vld [vmem:[#allocation23_spill] sm:$0xff]  ;;  %v13791_v0 = vld [vmem:[#allocation48_spill] sm:$0xff] }
 0x23f   : > { %v4155_v5 = vmul.f32 %v4077_v44, %v4077_v44  ;;  %v12243_v61 = vadd.f32 %v3649_v46, %v3352_v62  ;;  %v4189_v2 = vadd.f32 %v4188_v58, %v4154_v10  ;;  %v4112_v18 = vadd.f32 %v4111_v63, %v4077_v44  ;;  %v4019_v63 = vpop.permute.xlu0 %4018 }
 0x240   : > { %v9988_v50 = vpop.f32.mrf.mxu0  ;;  %v3355_v27 = vadd.f32 %v12152_v31, %v13787_v26  ;;  %v2549_v44 = vadd.f32 %v13788_v23, %v2145_v36  ;;  %v4157_v25 = vmul.f32 %v4079_v52, %v4079_v52  ;;  %v1745_v26 = vadd.f32 %v13789_v6, %v1341_v28  ;;  %v3277_v36 = vpop.f32.mrf.mxu1 }
 0x241   : > { %v4113_v62 = vadd.f32 %v4112_v18, %v4078_v40  ;;  %v4190_v46 = vadd.f32 %v4189_v2, %v4155_v5  ;;  %v4080_v20 = vmul.f32 %v3999_v42, %v12243_v61  ;;  %v4024_v40 = vpop.permute.xlu1 %4023  ;;  %v13790_v5 = vld [vmem:[#allocation45_spill] sm:$0xff]  ;;  %v4082_v18 = vmul.f32 %v4009_v60, %v12254_v3 }
 0x242   : > { %v3652_v10 = vpop.f32.mrf.mxu0  ;;  %v12260_v15 = vadd.f32 %v9988_v50, %v3355_v27  ;;  %v3356_v9 = vadd.f32 %v12207_v55, %v13790_v5  ;;  %v2953_v42 = vadd.f32 %v13791_v0, %v2549_v44  ;;  %v13792_v27 = vld [vmem:[#allocation24_spill] sm:$0xff]  ;;  %v13794_v0 = vld [vmem:[#allocation46_spill] sm:$0xff] }
 0x243   : > { %v12258_v58 = vadd.f32 %v3652_v10, %v3353_v7  ;;  %v4191_v16 = vadd.f32 %v4190_v46, %v4156_v30  ;;  %v4114_v31 = vadd.f32 %v4113_v62, %v4079_v52  ;;  %v4158_v10 = vmul.f32 %v4080_v20, %v4080_v20  ;;  %v13793_v62 = vld [vmem:[#allocation44_spill] sm:$0xff]  ;;  %v4029_v5 = vpop.permute.xlu0 %4028 }
 0x244   : > { %v9991_v49 = vpop.f32.mrf.mxu0  ;;  %v2149_v50 = vadd.f32 %v13792_v27, %v1745_v26  ;;  %v3358_v28 = vadd.f32 %v12189_v34, %v13793_v62  ;;  %v4083_v44 = vmul.f32 %v4014_v56, %v12260_v15  ;;  %v3359_v60 = vadd.f32 %v12223_v33, %v13794_v0 }
 0x245   : > { %v4081_v2 = vmul.f32 %v4004_v24, %v12258_v58  ;;  %v4115_v7 = vadd.f32 %v4114_v31, %v4080_v20  ;;  %v4192_v30 = vadd.f32 %v4191_v16, %v4157_v25  ;;  %v3357_v20 = vadd.f32 %v3264_v38, %v2953_v42  ;;  %v9944_v16 = vpop.f32.mrf.mxu1 }
 0x246   : > { %v3665_v52 = vpop.f32.mrf.mxu0  ;;  %v12276_v25 = vadd.f32 %v9991_v49, %v3358_v28  ;;  %v4160_v31 = vmul.f32 %v4082_v18, %v4082_v18  ;;  %v3360_v38 = vadd.f32 %v3277_v36, %v11956_v57 }
 0x247   : > { %v4159_v46 = vmul.f32 %v4081_v2, %v4081_v2  ;;  %v12271_v23 = vadd.f32 %v3665_v52, %v3356_v9  ;;  %v4193_v55 = vadd.f32 %v4192_v30, %v4158_v10  ;;  %v4116_v6 = vadd.f32 %v4115_v7, %v4081_v2  ;;  %v13795_v52 = vld [vmem:[#allocation25_spill] sm:$0xff]  ;;  %v4034_v30 = vpop.permute.xlu1 %4033 }
 0x248   : > { %v9992_v24 = vpop.f32.mrf.mxu0  ;;  %v2553_v10 = vadd.f32 %v13795_v52, %v2149_v50  ;;  %v4161_v2 = vmul.f32 %v4083_v44, %v4083_v44  ;;  %v4086_v42 = vmul.f32 %v4029_v5, %v12276_v25 }
 0x249   : > { %v4117_v26 = vadd.f32 %v4116_v6, %v4082_v18  ;;  %v4194_v27 = vadd.f32 %v4193_v55, %v4159_v46  ;;  %v4084_v34 = vmul.f32 %v4019_v63, %v12271_v23  ;;  %v12282_v51 = vadd.f32 %v9992_v24, %v3359_v60  ;;  %v3280_v18 = vpop.f32.mrf.mxu1  ;;  %v4039_v6 = vpop.permute.xlu0 %4038  ;;  %v13796_v60 = vld [vmem:[#allocation49_spill] sm:$0xff] }
 0x24a   : > { %v3668_v9 = vpop.f32.mrf.mxu0  ;;  %v2957_v49 = vadd.f32 %v11965_v37, %v2553_v10 }
 0x24b   : > { %v12280_v56 = vadd.f32 %v3668_v9, %v3357_v20  ;;  %v4195_v7 = vadd.f32 %v4194_v27, %v4160_v31  ;;  %v4118_v62 = vadd.f32 %v4117_v26, %v4083_v44  ;;  %v4162_v50 = vmul.f32 %v4084_v34, %v4084_v34  ;;  %v4044_v5 = vpop.permute.xlu1 %4043  ;;  %v12297_v27 = vld [vmem:[%s13688_s3 + $0xf8] sm:$0xff]  }
 0x24c   : > { %v9995_v33 = vpop.f32.mrf.mxu0  ;;  %v3362_v44 = vadd.f32 %v12252_v59, %v11948_v21  ;;  %v4087_v57 = vmul.f32 %v4034_v30, %v12282_v51  ;;  %v3361_v31 = vadd.f32 %v3280_v18, %v2957_v49  ;;  %v4164_v26 = vmul.f32 %v4086_v42, %v4086_v42  ;;  %10153 = vmatprep.subr.bf16.mxu0 %v12297_v27 }
 0x24d   : > { %v4085_v63 = vmul.f32 %v4024_v40, %v12280_v56  ;;  %v4119_v28 = vadd.f32 %v4118_v62, %v4084_v34  ;;  %v4196_v46 = vadd.f32 %v4195_v7, %v4161_v2  ;;  %v3363_v40 = vadd.f32 %v9944_v16, %v13796_v60  ;;  %v4049_v62 = vpop.permute.xlu0 %4048 }
 0x24e   : > { %v3681_v55 = vpop.f32.mrf.mxu0  ;;  %v12299_v52 = vadd.f32 %v9995_v33, %v3362_v44  ;;  %v4165_v30 = vmul.f32 %v4087_v57, %v4087_v57 }
 0x24f   : > { %v4163_v0 = vmul.f32 %v4085_v63, %v4085_v63  ;;  %v12288_v20 = vadd.f32 %v3681_v55, %v3360_v38  ;;  %v4197_v24 = vadd.f32 %v4196_v46, %v4162_v50  ;;  %v4120_v37 = vadd.f32 %v4119_v28, %v4085_v63  ;;  %v4054_v18 = vpop.permute.xlu1 %4053 }
 0x250   : > { %v9996_v36 = vpop.f32.mrf.mxu0  ;;  %v4090_v49 = vmul.f32 %v4049_v62, %v12299_v52 }
 0x251   : > { %v4121_v34 = vadd.f32 %v4120_v37, %v4086_v42  ;;  %v4198_v9 = vadd.f32 %v4197_v24, %v4163_v0  ;;  %v4088_v21 = vmul.f32 %v4039_v6, %v12288_v20  ;;  %v12305_v7 = vadd.f32 %v9996_v36, %v3363_v40 }
 0x252   : > { %v3684_v59 = vpop.f32.mrf.mxu0  ;;  %v4168_v6 = vmul.f32 %v4090_v49, %v4090_v49 }
 0x253   : > { %v12302_v10 = vadd.f32 %v3684_v59, %v3361_v31  ;;  %v4199_v16 = vadd.f32 %v4198_v9, %v4164_v26  ;;  %v4122_v2 = vadd.f32 %v4121_v34, %v4087_v57  ;;  %v4166_v33 = vmul.f32 %v4088_v21, %v4088_v21 }
 0x254   : > { %v4091_v46 = vmul.f32 %v4054_v18, %v12305_v7 }
 0x255   : > { %v4089_v38 = vmul.f32 %v4044_v5, %v12302_v10  ;;  %v4123_v42 = vadd.f32 %v4122_v2, %v4088_v21  ;;  %v4200_v63 = vadd.f32 %v4199_v16, %v4165_v30 }
 0x256   : > { %v4169_v24 = vmul.f32 %v4091_v46, %v4091_v46 }
 0x257   : > { %v4167_v28 = vmul.f32 %v4089_v38, %v4089_v38  ;;  %v4201_v50 = vadd.f32 %v4200_v63, %v4166_v33  ;;  %v4124_v55 = vadd.f32 %v4123_v42, %v4089_v38 }
 0x259   : > { %v4125_v0 = vadd.f32 %v4124_v55, %v4090_v49  ;;  %v4202_v44 = vadd.f32 %v4201_v50, %v4167_v28 }
 0x25b   : > { %v4126_v57 = vadd.f32 %v4125_v0, %v4091_v46  ;;  %v4203_v37 = vadd.f32 %v4202_v44, %v4168_v6 }
 0x25d   : > { %v4127_v36 = vrot.slane %v4126_v57, 4  ;;  %v4204_v60 = vadd.f32 %v4203_v37, %v4169_v24 }
 0x25f   : > { %v4128_v5 = vadd.f32 %v4127_v36, %v4126_v57  ;;  %v4205_v40 = vrot.slane %v4204_v60, 4 }
 0x261   : > { %v4129_v31 = vrot.slane %v4128_v5, 2  ;;  %v4206_v26 = vadd.f32 %v4205_v40, %v4204_v60 }
 0x263   : > { %v4130_v34 = vadd.f32 %v4129_v31, %v4128_v5  ;;  %v4207_v9 = vrot.slane %v4206_v26, 2 }
 0x265   : > { %v4131_v21 = vrot.slane %v4130_v34, 1  ;;  %v4208_v59 = vadd.f32 %v4207_v9, %v4206_v26 }
 0x267   : > { %v4132_v30 = vadd.f32 %v4131_v21, %v4130_v34  ;;  %v4209_v16 = vrot.slane %v4208_v59, 1 }
 0x269   : > { %v4210_v2 = vadd.f32 %v4209_v16, %v4208_v59  ;;  %v12310_v62 = vmul.f32 0.00390625, %v4132_v30 }
 0x26b   : > { %v4213_v38 = vmul.f32 0.00390625, %v4210_v2  ;;  %v4214_v49 = vmul.f32 %v12310_v62, %v12310_v62  ;;  %v4251_v42 = vsub.f32 %v12288_v20, %v12310_v62  ;;  %v4252_v33 = vsub.f32 %v12302_v10, %v12310_v62 }
 0x26c   : > { %v4235_v28 = vsub.f32 %v12180_v41, %v12310_v62  ;;  %v4236_v50 = vsub.f32 %v12196_v53, %v12310_v62  ;;  %v4238_v55 = vsub.f32 %v12198_v8, %v12310_v62  ;;  %v4239_v6 = vsub.f32 %v12214_v22, %v12310_v62 }
 0x26d   : > { %v4215_v63 = vsub.f32 %v4213_v38, %v4214_v49  ;;  %v4240_v20 = vsub.f32 %v12230_v4, %v12310_v62  ;;  %v4241_v10 = vsub.f32 %v12221_v14, %v12310_v62  ;;  %v4242_v0 = vsub.f32 %v12232_v19, %v12310_v62 }
 0x26e   : > { %v4243_v41 = vsub.f32 %v12243_v61, %v12310_v62  ;;  %v4244_v53 = vsub.f32 %v12258_v58, %v12310_v62  ;;  %v4245_v8 = vsub.f32 %v12254_v3, %v12310_v62  ;;  %v4246_v22 = vsub.f32 %v12260_v15, %v12310_v62 }
 0x26f   : > { %v4216_v18 = vmax.f32 %v4215_v63, 0.0  ;;  %v4247_v4 = vsub.f32 %v12271_v23, %v12310_v62  ;;  %v4248_v14 = vsub.f32 %v12280_v56, %v12310_v62  ;;  %v4249_v19 = vsub.f32 %v12276_v25, %v12310_v62 }
 0x270   : > { %v4250_v61 = vsub.f32 %v12282_v51, %v12310_v62  ;;  %v4253_v58 = vsub.f32 %v12299_v52, %v12310_v62  ;;  %v4254_v3 = vsub.f32 %v12305_v7, %v12310_v62  ;;  %v4219_v15 = vsub.f32 %v11985_v17, %v12310_v62 }
 0x271   : > { %v4217_v46 = vadd.f32 1e-05, %v4216_v18  ;;  %v4220_v23 = vsub.f32 %v12007_v35, %v12310_v62  ;;  %v4221_v56 = vsub.f32 %v11993_v45, %v12310_v62  ;;  %v4222_v25 = vsub.f32 %v11998_v54, %v12310_v62 }
 0x272   : > { %v4223_v51 = vsub.f32 %v12033_v32, %v12310_v62  ;;  %v4224_v52 = vsub.f32 %v12057_v13, %v12310_v62  ;;  %v4225_v7 = vsub.f32 %v12041_v39, %v12310_v62  ;;  %v4226_v17 = vsub.f32 %v12055_v48, %v12310_v62  ;;  %v13797_v48 = vld [vmem:[#allocation4_spill] sm:$0xff] }
 0x273   : > { %10623 = vrsqrt.f32 %v4217_v46  ;;  %v4227_v35 = vsub.f32 %v12093_v12, %v12310_v62  ;;  %v4228_v45 = vsub.f32 %v12110_v47, %v12310_v62  ;;  %v4229_v54 = vsub.f32 %v12091_v43, %v12310_v62  ;;  %v13798_v12 = vld [vmem:[#allocation39_spill] sm:$0xff]  ;;  %v13799_v47 = vld [vmem:[#allocation16_spill] sm:$0xff] }
 0x274   : > { %v4230_v32 = vsub.f32 %v12105_v1, %v12310_v62  ;;  %v4231_v13 = vsub.f32 %v12139_v29, %v12310_v62  ;;  %v4232_v39 = vsub.f32 %v12168_v11, %v12310_v62  ;;  %v4233_v24 = vsub.f32 %v13797_v48, %v12310_v62 }
 0x275   : > { %v4234_v57 = vsub.f32 %v13798_v12, %v12310_v62  ;;  %v4237_v37 = vsub.f32 %v13799_v47, %v12310_v62 }
 0x280   : > { %v10624_v44 = vpop.eup %10623 }
 0x281   : > { %v4287_v43 = vmul.f32 %v10624_v44, %v4251_v42  ;;  %v4288_v36 = vmul.f32 %v10624_v44, %v4252_v33  ;;  %v4255_v60 = vmul.f32 %v10624_v44, %v4219_v15  ;;  %v4256_v1 = vmul.f32 %v10624_v44, %v4220_v23 }
 0x282   : > { %v4257_v5 = vmul.f32 %v10624_v44, %v4221_v56  ;;  %v4258_v40 = vmul.f32 %v10624_v44, %v4222_v25  ;;  %v4259_v29 = vmul.f32 %v10624_v44, %v4223_v51  ;;  %v4260_v31 = vmul.f32 %v10624_v44, %v4224_v52 }
 0x283   : > { %v4323_v26 = vmax.f32 %v4287_v43, 0.0  ;;  %v4324_v34 = vmax.f32 %v4288_v36, 0.0  ;;  %v4261_v11 = vmul.f32 %v10624_v44, %v4225_v7  ;;  %v4262_v9 = vmul.f32 %v10624_v44, %v4226_v17 }
 0x284   : > { %v4263_v21 = vmul.f32 %v10624_v44, %v4227_v35  ;;  %v4264_v59 = vmul.f32 %v10624_v44, %v4228_v45  ;;  %v4265_v30 = vmul.f32 %v10624_v44, %v4229_v54  ;;  %v12386_v16 = vmul.f32 %v10624_v44, %v4230_v32 }
 0x285   : > { %4359 = vst [vmem:[#allocation3 + $0x118] sm:$0xff] %v4323_v26  ;;  %4360 = vst [vmem:[#allocation3 + $0x120] sm:$0xff] %v4324_v34  ;;  %v12388_v2 = vmul.f32 %v10624_v44, %v4231_v13  ;;  %v12390_v62 = vmul.f32 %v10624_v44, %v4232_v39  ;;  %v12392_v38 = vmul.f32 %v10624_v44, %v4233_v24  ;;  %v4292_v7 = vmax.f32 %v4256_v1, 0.0 }
 0x286   : > { %v12394_v49 = vmul.f32 %v10624_v44, %v4234_v57  ;;  %v12396_v42 = vmul.f32 %v10624_v44, %v4235_v28  ;;  %v12398_v33 = vmul.f32 %v10624_v44, %v4236_v50  ;;  %v12400_v63 = vmul.f32 %v10624_v44, %v4237_v37 }
 0x287   : > { %v12402_v18 = vmul.f32 %v10624_v44, %v4238_v55  ;;  %v12404_v46 = vmul.f32 %v10624_v44, %v4239_v6  ;;  %v12406_v15 = vmul.f32 %v10624_v44, %v4240_v20  ;;  %v12408_v23 = vmul.f32 %v10624_v44, %v4241_v10  ;;  %4328 = vst [vmem:[#allocation3 + $0x20] sm:$0xff] %v4292_v7 }
 0x288   : > { %v12410_v56 = vmul.f32 %v10624_v44, %v4242_v0  ;;  %v12412_v25 = vmul.f32 %v10624_v44, %v4243_v41  ;;  %v12414_v51 = vmul.f32 %v10624_v44, %v4244_v53  ;;  %v12416_v28 = vmul.f32 %v10624_v44, %v4245_v8 }
 0x289   : > { %v12418_v50 = vmul.f32 %v10624_v44, %v4246_v22  ;;  %v12420_v52 = vmul.f32 %v10624_v44, %v4247_v4  ;;  %v12422_v55 = vmul.f32 %v10624_v44, %v4248_v14  ;;  %v12424_v6 = vmul.f32 %v10624_v44, %v4249_v19 }
 0x28a   : > { %v12426_v20 = vmul.f32 %v10624_v44, %v4250_v61  ;;  %v12428_v10 = vmul.f32 %v10624_v44, %v4253_v58  ;;  %v12430_v0 = vmul.f32 %v10624_v44, %v4254_v3  ;;  %v4291_v41 = vmax.f32 %v4255_v60, 0.0 }
 0x28b   : > { %v4293_v53 = vmax.f32 %v4257_v5, 0.0  ;;  %v4294_v17 = vmax.f32 %v4258_v40, 0.0  ;;  %v4295_v8 = vmax.f32 %v4259_v29, 0.0  ;;  %v4296_v35 = vmax.f32 %v4260_v31, 0.0 }
 0x28c   : > { %v4421_v22 = vld [vmem:[#allocation3 + $0x122] sm:$0x1]  ;;  %v4423_v45 = vld [vmem:[#allocation3 + $0x127] sm:$0x1]  ;;  %v4297_v54 = vmax.f32 %v4261_v11, 0.0  ;;  %4327 = vst [vmem:[#allocation3 + $0x18] sm:$0xff] %v4291_v41 }
 0x28d   : > { %v4434_v4 = vld [vmem:[#allocation3 + $0x11b] sm:$0xff]  ;;  %4422 = vst [vmem:[#allocation3 + $0x124] sm:$0x1] %v4421_v22  ;;  %4424 = vst [vmem:[#allocation3 + $0x125] sm:$0x1] %v4423_v45  ;;  %v4298_v14 = vmax.f32 %v4262_v9, 0.0 }
 0x28e   : > { %4437 = vst [vmem:[#allocation3 + $0x13f] sm:$0xff] %v4434_v4  ;;  %v4299_v19 = vmax.f32 %v4263_v21, 0.0  ;;  %v4300_v61 = vmax.f32 %v4264_v59, 0.0  ;;  %v4301_v58 = vmax.f32 %v4265_v30, 0.0  ;;  %4329 = vst [vmem:[#allocation3 + $0x28] sm:$0xff] %v4293_v53  ;;  %v4302_v3 = vmax.f32 %v12386_v16, 0.0 }
 0x28f   : > { %4330 = vst [vmem:[#allocation3 + $0x30] sm:$0xff] %v4294_v17  ;;  %4331 = vst [vmem:[#allocation3 + $0x38] sm:$0xff] %v4295_v8  ;;  %v4303_v32 = vmax.f32 %v12388_v2, 0.0  ;;  %v4304_v13 = vmax.f32 %v12390_v62, 0.0  ;;  %v4305_v44 = vmax.f32 %v12392_v38, 0.0  ;;  %v4306_v39 = vmax.f32 %v12394_v49, 0.0 }
 0x290   : > { %4332 = vst [vmem:[#allocation3 + $0x40] sm:$0xff] %v4296_v35  ;;  %4333 = vst [vmem:[#allocation3 + $0x48] sm:$0xff] %v4297_v54  ;;  %v4307_v48 = vmax.f32 %v12396_v42, 0.0  ;;  %v4308_v24 = vmax.f32 %v12398_v33, 0.0  ;;  %v4309_v12 = vmax.f32 %v12400_v63, 0.0  ;;  %v4310_v57 = vmax.f32 %v12402_v18, 0.0 }
 0x291   : > { %4334 = vst [vmem:[#allocation3 + $0x50] sm:$0xff] %v4298_v14  ;;  %4335 = vst [vmem:[#allocation3 + $0x58] sm:$0xff] %v4299_v19  ;;  %v4311_v47 = vmax.f32 %v12404_v46, 0.0  ;;  %v4312_v37 = vmax.f32 %v12406_v15, 0.0  ;;  %v4313_v43 = vmax.f32 %v12408_v23, 0.0  ;;  %v4314_v36 = vmax.f32 %v12410_v56, 0.0 }
 0x292   : > { %4336 = vst [vmem:[#allocation3 + $0x60] sm:$0xff] %v4300_v61  ;;  %4337 = vst [vmem:[#allocation3 + $0x68] sm:$0xff] %v4301_v58  ;;  %v4315_v60 = vmax.f32 %v12412_v25, 0.0  ;;  %v4316_v1 = vmax.f32 %v12414_v51, 0.0  ;;  %v4317_v5 = vmax.f32 %v12416_v28, 0.0  ;;  %v4318_v40 = vmax.f32 %v12418_v50, 0.0 }
 0x293   : > { %4338 = vst [vmem:[#allocation3 + $0x70] sm:$0xff] %v4302_v3  ;;  %4339 = vst [vmem:[#allocation3 + $0x78] sm:$0xff] %v4303_v32  ;;  %v4319_v29 = vmax.f32 %v12420_v52, 0.0  ;;  %v4320_v31 = vmax.f32 %v12422_v55, 0.0  ;;  %v4321_v26 = vmax.f32 %v12424_v6, 0.0  ;;  %v4322_v34 = vmax.f32 %v12426_v20, 0.0 }
 0x294   : > { %4340 = vst [vmem:[#allocation3 + $0x80] sm:$0xff] %v4304_v13  ;;  %4341 = vst [vmem:[#allocation3 + $0x88] sm:$0xff] %v4305_v44  ;;  %v4325_v11 = vmax.f32 %v12428_v10, 0.0  ;;  %v4326_v9 = vmax.f32 %v12430_v0, 0.0  ;;  %v4363_v21 = vld [vmem:[#allocation3 + $0x19] sm:$0x1] }
 0x295   : > { %4342 = vst [vmem:[#allocation3 + $0x90] sm:$0xff] %v4306_v39  ;;  %4343 = vst [vmem:[#allocation3 + $0x98] sm:$0xff] %v4307_v48  ;;  %v4435_v59 = vld [vmem:[#allocation3 + $0x123] sm:$0x3]  ;;  %v4367_v30 = vld [vmem:[#allocation3 + $0x2b] sm:$0x1] }
 0x296   : > { %4344 = vst [vmem:[#allocation3 + $0xa0] sm:$0xff] %v4308_v24  ;;  %4345 = vst [vmem:[#allocation3 + $0xa8] sm:$0xff] %v4309_v12  ;;  %v4369_v16 = vld [vmem:[#allocation3 + $0x38] sm:$0x1]  ;;  %v4371_v2 = vld [vmem:[#allocation3 + $0x3d] sm:$0x1] }
 0x297   : > { %4346 = vst [vmem:[#allocation3 + $0xb0] sm:$0xff] %v4310_v57  ;;  %4347 = vst [vmem:[#allocation3 + $0xb8] sm:$0xff] %v4311_v47  ;;  %v4428_v62 = vld [vmem:[#allocation3 + $0x31] sm:$0xff]  ;;  %v4365_v42 = vld [vmem:[#allocation3 + $0x26] sm:$0x1] }
 0x298   : > { %4348 = vst [vmem:[#allocation3 + $0xc0] sm:$0xff] %v4312_v37  ;;  %4349 = vst [vmem:[#allocation3 + $0xc8] sm:$0xff] %v4313_v43  ;;  %v4377_v38 = vld [vmem:[#allocation3 + $0x5c] sm:$0x1]  ;;  %v4373_v15 = vld [vmem:[#allocation3 + $0x4a] sm:$0x1] }
 0x299   : > { %4350 = vst [vmem:[#allocation3 + $0xd0] sm:$0xff] %v4314_v36  ;;  %4351 = vst [vmem:[#allocation3 + $0xd8] sm:$0xff] %v4315_v60  ;;  %v4379_v49 = vld [vmem:[#allocation3 + $0x61] sm:$0x1]  ;;  %v4375_v25 = vld [vmem:[#allocation3 + $0x4f] sm:$0x1] }
 0x29a   : > { %4352 = vst [vmem:[#allocation3 + $0xe0] sm:$0xff] %v4316_v1  ;;  %4353 = vst [vmem:[#allocation3 + $0xe8] sm:$0xff] %v4317_v5  ;;  %v4381_v20 = vld [vmem:[#allocation3 + $0x6e] sm:$0x1]  ;;  %v4383_v10 = vld [vmem:[#allocation3 + $0x73] sm:$0x1] }
 0x29b   : > { %4354 = vst [vmem:[#allocation3 + $0xf0] sm:$0xff] %v4318_v40  ;;  %4355 = vst [vmem:[#allocation3 + $0xf8] sm:$0xff] %v4319_v29  ;;  %v4385_v33 = vld [vmem:[#allocation3 + $0x80] sm:$0x1]  ;;  %v4387_v63 = vld [vmem:[#allocation3 + $0x85] sm:$0x1] }
 0x29c   : > { %4356 = vst [vmem:[#allocation3 + $0x100] sm:$0xff] %v4320_v31  ;;  %4357 = vst [vmem:[#allocation3 + $0x108] sm:$0xff] %v4321_v26  ;;  %v4442_v0 = vld [vmem:[#allocation3 + $0x1d] sm:$0xff]  ;;  %v4389_v17 = vld [vmem:[#allocation3 + $0x92] sm:$0x1] }
 0x29d   : > { %4364 = vst [vmem:[#allocation3 + $0x17] sm:$0x1] %v4363_v21  ;;  %4438 = vst [vmem:[#allocation3 + $0x147] sm:$0x3] %v4435_v59  ;;  %v4773_v41 = vld [vmem:[#allocation3 + $0x1e] sm:$0xff]  ;;  %v4444_v14 = vld [vmem:[#allocation3 + $0x2d] sm:$0xff] }
 0x29e   : > { %4358 = vst [vmem:[#allocation3 + $0x110] sm:$0xff] %v4322_v34  ;;  %4361 = vst [vmem:[#allocation3 + $0x128] sm:$0xff] %v4325_v11  ;;  %v4397_v18 = vld [vmem:[#allocation3 + $0xb6] sm:$0x1]  ;;  %v4399_v46 = vld [vmem:[#allocation3 + $0xbb] sm:$0x1] }
 0x29f   : > { %4362 = vst [vmem:[#allocation3 + $0x130] sm:$0xff] %v4326_v9  ;;  %4368 = vst [vmem:[#allocation3 + $0x29] sm:$0x1] %v4367_v30  ;;  %v4391_v19 = vld [vmem:[#allocation3 + $0x97] sm:$0x1]  ;;  %v4775_v3 = vld [vmem:[#allocation3 + $0x2e] sm:$0xff] }
 0x2a0   : > { %4370 = vst [vmem:[#allocation3 + $0x3a] sm:$0x1] %v4369_v16  ;;  %4372 = vst [vmem:[#allocation3 + $0x3b] sm:$0x1] %v4371_v2  ;;  %v4405_v23 = vld [vmem:[#allocation3 + $0xda] sm:$0x1] }
 0x2a1   : > { %4431 = vst [vmem:[#allocation3 + $0xd] sm:$0xff] %v4428_v62  ;;  %4378 = vst [vmem:[#allocation3 + $0x5e] sm:$0x1] %v4377_v38  ;;  %v4407_v56 = vld [vmem:[#allocation3 + $0xdf] sm:$0x1]  ;;  %v10568_v32 = vld [vmem:[%s13688_s3 + $0xb0] sm:$0xff]  }
 0x2a2   : > { %4380 = vst [vmem:[#allocation3 + $0x5f] sm:$0x1] %v4379_v49  ;;  %4366 = vst [vmem:[#allocation3 + $0x28] sm:$0x1] %v4365_v42  ;;  %v4413_v51 = vld [vmem:[#allocation3 + $0xfe] sm:$0x1] }
 0x2a3   : > { %4386 = vst [vmem:[#allocation3 + $0x82] sm:$0x1] %v4385_v33  ;;  %4388 = vst [vmem:[#allocation3 + $0x83] sm:$0x1] %v4387_v63  ;;  %v4415_v28 = vld [vmem:[#allocation3 + $0x103] sm:$0x1] }
 0x2a4   : > { %4400 = vst [vmem:[#allocation3 + $0xb9] sm:$0x1] %v4399_v46  ;;  %4398 = vst [vmem:[#allocation3 + $0xb8] sm:$0x1] %v4397_v18  ;;  %v4393_v44 = vld [vmem:[#allocation3 + $0xa4] sm:$0x1] }
 0x2a5   : > { %4374 = vst [vmem:[#allocation3 + $0x4c] sm:$0x1] %v4373_v15  ;;  %4406 = vst [vmem:[#allocation3 + $0xdc] sm:$0x1] %v4405_v23  ;;  %v4395_v39 = vld [vmem:[#allocation3 + $0xa9] sm:$0x1] }
 0x2a6   : > { %4408 = vst [vmem:[#allocation3 + $0xdd] sm:$0x1] %v4407_v56  ;;  %4376 = vst [vmem:[#allocation3 + $0x4d] sm:$0x1] %v4375_v25  ;;  %v4425_v50 = vld [vmem:[#allocation3 + $0x134] sm:$0x1] }
 0x2a7   : > { %v4427_v52 = vld [vmem:[#allocation3 + $0x29] sm:$0xff]  ;;  %4414 = vst [vmem:[#allocation3 + $0x100] sm:$0x1] %v4413_v51  ;;  %4416 = vst [vmem:[#allocation3 + $0x101] sm:$0x1] %v4415_v28  ;;  %v4445_v47 = vld [vmem:[#allocation3 + $0x35] sm:$0xff] }
 0x2a8   : > { %v4429_v55 = vld [vmem:[#allocation3 + $0x39] sm:$0x3]  ;;  %4426 = vst [vmem:[#allocation3 + $0x136] sm:$0x1] %v4425_v50  ;;  %4430 = vst [vmem:[#allocation3 + $0x5] sm:$0xff] %v4427_v52  ;;  %v4475_v6 = vpack.c.bf16 %v4428_v62, %v4427_v52  ;;  %v10573_v48 = vld [vmem:[%s13688_s3 + $0xf0] sm:$0xff]  }
 0x2a9   : > { %4432 = vst [vmem:[#allocation3 + $0x15] sm:$0x3] %v4429_v55  ;;  %4382 = vst [vmem:[#allocation3 + $0x70] sm:$0x1] %v4381_v20  ;;  %v4443_v7 = vld [vmem:[#allocation3 + $0x25] sm:$0xff]  ;;  %v4776_v36 = vld [vmem:[#allocation3 + $0x36] sm:$0xff] }
 0x2aa   : > { %10013 = vmatprep.mubr.bf16.mxu1 %v4475_v6  ;;  %4384 = vst [vmem:[#allocation3 + $0x71] sm:$0x1] %v4383_v10  ;;  %v4774_v53 = vld [vmem:[#allocation3 + $0x26] sm:$0xff]  ;;  %4390 = vst [vmem:[#allocation3 + $0x94] sm:$0x1] %v4389_v17  ;;  %v4477_v58 = vpack.c.bf16 %v4444_v14, %v4443_v7  ;;  %v4446_v5 = vld [vmem:[#allocation3 + $0x3d] sm:$0xff] }
 0x2ab   : > { %4392 = vst [vmem:[#allocation3 + $0x95] sm:$0x1] %v4391_v19  ;;  %v4808_v13 = vpack.c.bf16 %v4775_v3, %v4774_v53  ;;  %4394 = vst [vmem:[#allocation3 + $0xa6] sm:$0x1] %v4393_v44  ;;  %v13800_v24 = vld [vmem:[#allocation15_spill] sm:$0xff]  ;;  %v4478_v29 = vpack.c.bf16 %v4446_v5, %v4445_v47  ;;  %v4777_v31 = vld [vmem:[#allocation3 + $0x3e] sm:$0xff] }
 0x2ac   : > { %4396 = vst [vmem:[#allocation3 + $0xa7] sm:$0x1] %v4395_v39  ;;  %v10569_v12 = vld [vmem:[%s13688_s3 + $0xa8] sm:$0xff]   ;;  %v10570_v26 = vld [vmem:[%s13688_s3 + $0xa0] sm:$0xff]   ;;  %v4809_v34 = vpack.c.bf16 %v4777_v31, %v4776_v36  ;;  %v4411_v21 = vld [vmem:[#allocation3 + $0xf1] sm:$0x1] }
 0x2ad   : > { %v10575_v57 = vld [vmem:[%s13688_s3 + $0xe8] sm:$0xff]   ;;  %4412 = vst [vmem:[#allocation3 + $0xef] sm:$0x1] %v4411_v21  ;;  %v10576_v30 = vld [vmem:[%s13688_s3 + $0xe0] sm:$0xff]   ;;  %v4417_v16 = vld [vmem:[#allocation3 + $0x110] sm:$0x1] }
 0x2ae   : > { %v4401_v37 = vld [vmem:[#allocation3 + $0xc8] sm:$0x1]  ;;  %v4403_v43 = vld [vmem:[#allocation3 + $0xcd] sm:$0x1]  ;;  %v4779_v9 = vld [vmem:[#allocation3 + $0x4e] sm:$0xff] }
 0x2af   : > { %v4770_v8 = vld [vmem:[#allocation3 + $0x6] sm:$0xff]  ;;  %4402 = vst [vmem:[#allocation3 + $0xca] sm:$0x1] %v4401_v37  ;;  %4404 = vst [vmem:[#allocation3 + $0xcb] sm:$0x1] %v4403_v43  ;;  %v4450_v62 = vld [vmem:[#allocation3 + $0x5d] sm:$0xff] }
 0x2b0   : > { %v4771_v35 = vld [vmem:[#allocation3 + $0xe] sm:$0xff]  ;;  %v4772_v54 = vld [vmem:[#allocation3 + $0x16] sm:$0xff]  ;;  %v4447_v60 = vld [vmem:[#allocation3 + $0x45] sm:$0xff]  ;;  %4418 = vst [vmem:[#allocation3 + $0x112] sm:$0x1] %v4417_v16 }
 0x2b1   : > { %v4441_v22 = vld [vmem:[#allocation3 + $0x15] sm:$0xff]  ;;  %v4806_v45 = vpack.c.bf16 %v4771_v35, %v4770_v8  ;;  %v4807_v61 = vpack.c.bf16 %v4773_v41, %v4772_v54  ;;  %v4448_v1 = vld [vmem:[#allocation3 + $0x4d] sm:$0xff]  ;;  %v4781_v49 = vld [vmem:[#allocation3 + $0x5e] sm:$0xff] }
 0x2b2   : > { %v4476_v4 = vpack.c.bf16 %v4442_v0, %v4441_v22  ;;  %v4778_v40 = vld [vmem:[#allocation3 + $0x46] sm:$0xff]  ;;  %v4479_v11 = vpack.c.bf16 %v4448_v1, %v4447_v60  ;;  %v4419_v2 = vld [vmem:[#allocation3 + $0x115] sm:$0x1]  ;;  %v10571_v38 = vld [vmem:[%s13688_s3 + $0x98] sm:$0xff]  }
 0x2b3   : > { %10065 = vmatprep.mubr.bf16.mxu0 %v4806_v45  ;;  %v4810_v59 = vpack.c.bf16 %v4779_v9, %v4778_v40  ;;  %4420 = vst [vmem:[#allocation3 + $0x113] sm:$0x1] %v4419_v2  ;;  %v4452_v42 = vld [vmem:[#allocation3 + $0x6d] sm:$0xff]  ;;  %v10578_v33 = vld [vmem:[%s13688_s3 + $0xd8] sm:$0xff]   ;;  %v4451_v23 = vld [vmem:[#allocation3 + $0x65] sm:$0xff] }
 0x2b4   : > { %10014 = vmatmul.mubr.bf16.vlgmr.msra.gmra.mxu1 %v4476_v4  ;;  %10066 = vmatmul.mubr.bf16.vlgmr.msra.gmra.mxu0 %v4807_v61  ;;  %v4449_v63 = vld [vmem:[#allocation3 + $0x55] sm:$0xff]  ;;  %v4481_v25 = vpack.c.bf16 %v4452_v42, %v4451_v23  ;;  %v4782_v51 = vld [vmem:[#allocation3 + $0x66] sm:$0xff]  ;;  %v4454_v55 = vld [vmem:[#allocation3 + $0x7d] sm:$0xff] }
 0x2b5   : > { %10017 = vmatprep.mubr.bf16.mxu1 %v4477_v58  ;;  %10069 = vmatprep.mubr.bf16.mxu0 %v4808_v13  ;;  %v4783_v18 = vld [vmem:[#allocation3 + $0x6e] sm:$0xff]  ;;  %v4480_v46 = vpack.c.bf16 %v4450_v62, %v4449_v63  ;;  %v4780_v15 = vld [vmem:[#allocation3 + $0x56] sm:$0xff]  ;;  %v4785_v20 = vld [vmem:[#allocation3 + $0x7e] sm:$0xff] }
 0x2b6   : > { %10102 = vmatpush3.bf16.msra.mxu1 %v13800_v24  ;;  %10154 = vmatpush3.bf16.msra.mxu0 %v12297_v27  ;;  %v4409_v27 = vld [vmem:[#allocation3 + $0xec] sm:$0x1]  ;;  %v4811_v56 = vpack.c.bf16 %v4781_v49, %v4780_v15  ;;  %v10574_v28 = vld [vmem:[%s13688_s3 + $0x90] sm:$0xff]   ;;  %v4812_v50 = vpack.c.bf16 %v4783_v18, %v4782_v51  ;;  %v10580_v4 = vld [vmem:[%s13688_s3 + $0x80] sm:$0xff]  }
 0x2b7   : > { %10103 = vmatprep.subr.bf16.mxu1 %v10568_v32  ;;  %10155 = vmatprep.subr.bf16.mxu0 %v10573_v48  ;;  %4410 = vst [vmem:[#allocation3 + $0xee] sm:$0x1] %v4409_v27  ;;  %v10579_v52 = vld [vmem:[%s13688_s3 + $0xd0] sm:$0xff]   ;;  %v10577_v6 = vld [vmem:[%s13688_s3 + $0x88] sm:$0xff]   ;;  %v10582_v14 = vld [vmem:[%s13688_s3 + $0xc0] sm:$0xff]  }
 0x2b8   : > { %v4456_v10 = vld [vmem:[#allocation3 + $0x8d] sm:$0xff]  ;;  %v4453_v41 = vld [vmem:[#allocation3 + $0x75] sm:$0xff]  ;;  %v4455_v8 = vld [vmem:[#allocation3 + $0x85] sm:$0xff] }
 0x2b9   : > { %v10581_v0 = vld [vmem:[%s13688_s3 + $0xc8] sm:$0xff]   ;;  %v4482_v53 = vpack.c.bf16 %v4454_v55, %v4453_v41  ;;  %v4784_v17 = vld [vmem:[#allocation3 + $0x76] sm:$0xff]  ;;  %v4483_v22 = vpack.c.bf16 %v4456_v10, %v4455_v8  ;;  %v4789_v3 = vld [vmem:[#allocation3 + $0x9e] sm:$0xff] }
 0x2ba   : > { %10104 = vmatpush3.bf16.msra.mxu1 %v10568_v32  ;;  %10156 = vmatpush3.bf16.msra.mxu0 %v10573_v48  ;;  %v4787_v7 = vld [vmem:[#allocation3 + $0x8e] sm:$0xff]  ;;  %v4813_v35 = vpack.c.bf16 %v4785_v20, %v4784_v17  ;;  %v4786_v45 = vld [vmem:[#allocation3 + $0x86] sm:$0xff]  ;;  %v4788_v61 = vld [vmem:[#allocation3 + $0x96] sm:$0xff] }
 0x2bb   : > { %10105 = vmatprep.subr.bf16.mxu1 %v10569_v12  ;;  %10157 = vmatprep.subr.bf16.mxu0 %v10575_v57  ;;  %v4814_v54 = vpack.c.bf16 %v4787_v7, %v4786_v45  ;;  %v4457_v19 = vld [vmem:[#allocation3 + $0x95] sm:$0xff]  ;;  %v4459_v32 = vld [vmem:[#allocation3 + $0xa5] sm:$0xff]  ;;  %v4458_v44 = vld [vmem:[#allocation3 + $0x9d] sm:$0xff] }
 0x2bc   : > { %10018 = vmatmul.mubr.bf16.gmra.mxu1 %v4478_v29  ;;  %10070 = vmatmul.mubr.bf16.gmra.mxu0 %v4809_v34  ;;  %v12502_v58 = vld [vmem:[%s13688_s3 + $0x138] sm:$0xff]   ;;  %v4790_v39 = vld [vmem:[#allocation3 + $0xa6] sm:$0xff]  ;;  %v4484_v48 = vpack.c.bf16 %v4458_v44, %v4457_v19  ;;  %v4791_v47 = vld [vmem:[#allocation3 + $0xae] sm:$0xff] }
 0x2bd   : > { %10021 = vmatprep.mubr.bf16.mxu1 %v4479_v11  ;;  %10073 = vmatprep.mubr.bf16.mxu0 %v4810_v59  ;;  %v12507_v13 = vld [vmem:[%s13688_s3 + $0x178] sm:$0xff]   ;;  %v4460_v24 = vld [vmem:[#allocation3 + $0xad] sm:$0xff]  ;;  %v4816_v37 = vpack.c.bf16 %v4791_v47, %v4790_v39  ;;  %v4463_v60 = vld [vmem:[#allocation3 + $0xc5] sm:$0xff] }
 0x2be   : > { %10106 = vmatpush3.bf16.msra.mxu1 %v10569_v12  ;;  %10158 = vmatpush3.bf16.msra.mxu0 %v10575_v57  ;;  %v4815_v12 = vpack.c.bf16 %v4789_v3, %v4788_v61  ;;  %v4485_v57 = vpack.c.bf16 %v4460_v24, %v4459_v32  ;;  %v4461_v43 = vld [vmem:[#allocation3 + $0xb5] sm:$0xff]  ;;  %v4462_v1 = vld [vmem:[#allocation3 + $0xbd] sm:$0xff]  ;;  %v4794_v5 = vld [vmem:[#allocation3 + $0xc6] sm:$0xff] }
 0x2bf   : > { %10107 = vmatprep.subr.bf16.mxu1 %v10570_v26  ;;  %10159 = vmatprep.subr.bf16.mxu0 %v10576_v30  ;;  %v4792_v36 = vld [vmem:[#allocation3 + $0xb6] sm:$0xff]  ;;  %v4486_v40 = vpack.c.bf16 %v4462_v1, %v4461_v43  ;;  %v4793_v29 = vld [vmem:[#allocation3 + $0xbe] sm:$0xff]  ;;  %v4464_v31 = vld [vmem:[#allocation3 + $0xcd] sm:$0xff] }
 0x2c0   : > { %v4487_v34 = vpack.c.bf16 %v4464_v31, %v4463_v60  ;;  %v4795_v11 = vld [vmem:[#allocation3 + $0xce] sm:$0xff]  ;;  %v4466_v21 = vld [vmem:[#allocation3 + $0xdd] sm:$0xff]  ;;  %v4802_v55 = vld [vmem:[#allocation3 + $0x106] sm:$0xff] }
 0x2c1   : > { %v4818_v9 = vpack.c.bf16 %v4795_v11, %v4794_v5  ;;  %v4465_v27 = vld [vmem:[#allocation3 + $0xd5] sm:$0xff]  ;;  %v4797_v62 = vld [vmem:[#allocation3 + $0xde] sm:$0xff]  ;;  %v4472_v15 = vld [vmem:[#allocation3 + $0x10d] sm:$0xff] }
 0x2c2   : > { %10108 = vmatpush3.bf16.msra.mxu1 %v10570_v26  ;;  %10160 = vmatpush3.bf16.msra.mxu0 %v10576_v30  ;;  %v4817_v26 = vpack.c.bf16 %v4793_v29, %v4792_v36  ;;  %v4796_v59 = vld [vmem:[#allocation3 + $0xd6] sm:$0xff]  ;;  %v4468_v30 = vld [vmem:[#allocation3 + $0xed] sm:$0xff]  ;;  %v4488_v2 = vpack.c.bf16 %v4466_v21, %v4465_v27  ;;  %v5583_v32 = vld [vmem:[#allocation3 + $0x3f] sm:$0xff] }
 0x2c3   : > { %10109 = vmatprep.subr.bf16.mxu1 %v10571_v38  ;;  %10161 = vmatprep.subr.bf16.mxu0 %v10578_v33  ;;  %v4799_v16 = vld [vmem:[#allocation3 + $0xee] sm:$0xff]  ;;  %v4819_v49 = vpack.c.bf16 %v4797_v62, %v4796_v59  ;;  %v4470_v18 = vld [vmem:[#allocation3 + $0xfd] sm:$0xff] }
 0x2c4   : > { %10022 = vmatmul.mubr.bf16.gmra.mxu1 %v4480_v46  ;;  %10074 = vmatmul.mubr.bf16.gmra.mxu0 %v4811_v56  ;;  %v4801_v46 = vld [vmem:[#allocation3 + $0xfe] sm:$0xff]  ;;  %v4469_v23 = vld [vmem:[#allocation3 + $0xf5] sm:$0xff]  ;;  %v5174_v41 = vld [vmem:[#allocation3 + $0x7] sm:$0xff] }
 0x2c5   : > { %10025 = vmatprep.mubr.bf16.mxu1 %v4481_v25  ;;  %10077 = vmatprep.mubr.bf16.mxu0 %v4812_v50  ;;  %v4803_v56 = vld [vmem:[#allocation3 + $0x10e] sm:$0xff]  ;;  %v4490_v25 = vpack.c.bf16 %v4470_v18, %v4469_v23  ;;  %v4800_v51 = vld [vmem:[#allocation3 + $0xf6] sm:$0xff]  ;;  %v5591_v29 = vld [vmem:[#allocation3 + $0x7f] sm:$0xff] }
 0x2c6   : > { %10110 = vmatpush3.bf16.msra.mxu1 %v10571_v38  ;;  %10162 = vmatpush3.bf16.msra.mxu0 %v10578_v33  ;;  %v4467_v38 = vld [vmem:[#allocation3 + $0xe5] sm:$0xff]  ;;  %v4821_v50 = vpack.c.bf16 %v4801_v46, %v4800_v51  ;;  %v4822_v20 = vpack.c.bf16 %v4803_v56, %v4802_v55  ;;  %v4474_v10 = vld [vmem:[#allocation3 + $0x11d] sm:$0xff]  ;;  %v5175_v7 = vld [vmem:[#allocation3 + $0xf] sm:$0xff] }
 0x2c7   : > { %10111 = vmatprep.subr.bf16.mxu1 %v10574_v28  ;;  %10163 = vmatprep.subr.bf16.mxu0 %v10579_v52  ;;  %v4489_v42 = vpack.c.bf16 %v4468_v30, %v4467_v38  ;;  %v4798_v33 = vld [vmem:[#allocation3 + $0xe6] sm:$0xff]  ;;  %v5578_v17 = vld [vmem:[#allocation3 + $0x17] sm:$0xff]  ;;  %v5210_v45 = vpack.c.bf16 %v5175_v7, %v5174_v41  ;;  %v5581_v61 = vld [vmem:[#allocation3 + $0x2f] sm:$0xff] }
 0x2c8   : > { %v4820_v63 = vpack.c.bf16 %v4799_v16, %v4798_v33  ;;  %v5582_v19 = vld [vmem:[#allocation3 + $0x37] sm:$0xff]  ;;  %v10585_v24 = vld [vmem:[%s13688_s3 + $0x128] sm:$0xff]   ;;  %v5595_v16 = vld [vmem:[#allocation3 + $0x9f] sm:$0xff] }
 0x2c9   : > { %v10584_v44 = vld [vmem:[%s13688_s3 + $0x130] sm:$0xff]   ;;  %v5616_v39 = vpack.c.bf16 %v5583_v32, %v5582_v19  ;;  %v10587_v1 = vld [vmem:[%s13688_s3 + $0x118] sm:$0xff]   ;;  %v5588_v31 = vld [vmem:[#allocation3 + $0x67] sm:$0xff] }
 0x2ca   : > { %10112 = vmatpush3.bf16.msra.mxu1 %v10574_v28  ;;  %10164 = vmatpush3.bf16.msra.mxu0 %v10579_v52  ;;  %v4471_v28 = vld [vmem:[#allocation3 + $0x105] sm:$0xff]  ;;  %v5586_v47 = vld [vmem:[#allocation3 + $0x57] sm:$0xff]  ;;  %v5585_v43 = vld [vmem:[#allocation3 + $0x4f] sm:$0xff] }
 0x2cb   : > { %10113 = vmatprep.subr.bf16.mxu1 %v10577_v6  ;;  %10165 = vmatprep.subr.bf16.mxu0 %v10581_v0  ;;  %v4491_v52 = vpack.c.bf16 %v4472_v15, %v4471_v28  ;;  %v5589_v5 = vld [vmem:[#allocation3 + $0x6f] sm:$0xff]  ;;  %v5594_v38 = vld [vmem:[#allocation3 + $0x97] sm:$0xff]  ;;  %v10598_v33 = vld [vmem:[%s13688_s3 + $0x140] sm:$0xff]  }
 0x2cc   : > { %10026 = vmatmul.mubr.bf16.gmra.mxu1 %v4482_v53  ;;  %10078 = vmatmul.mubr.bf16.gmra.mxu0 %v4813_v35  ;;  %v4473_v53 = vld [vmem:[#allocation3 + $0x115] sm:$0xff]  ;;  %v10593_v21 = vld [vmem:[%s13688_s3 + $0x108] sm:$0xff]   ;;  %v5607_v41 = vld [vmem:[#allocation3 + $0xff] sm:$0xff] }
 0x2cd   : > { %10029 = vmatprep.mubr.bf16.mxu1 %v4483_v22  ;;  %10081 = vmatprep.mubr.bf16.mxu0 %v4814_v54  ;;  %v4492_v8 = vpack.c.bf16 %v4474_v10, %v4473_v53  ;;  %v4804_v35 = vld [vmem:[#allocation3 + $0x116] sm:$0xff]  ;;  %v10597_v30 = vld [vmem:[%s13688_s3 + $0x148] sm:$0xff]  }
 0x2ce   : > { %10114 = vmatpush3.bf16.msra.mxu1 %v10577_v6  ;;  %10166 = vmatpush3.bf16.msra.mxu0 %v10581_v0  ;;  %v4433_v6 = vld [vmem:[#allocation3 + $0x113] sm:$0xff]  ;;  %v4805_v0 = vld [vmem:[#allocation3 + $0x11e] sm:$0xff]  ;;  %v5596_v18 = vld [vmem:[#allocation3 + $0xa7] sm:$0xff] }
 0x2cf   : > { %10115 = vmatprep.subr.bf16.mxu1 %v10580_v4  ;;  %10167 = vmatprep.subr.bf16.mxu0 %v10582_v14  ;;  %4436 = vst [vmem:[#allocation3 + $0x137] sm:$0xff] %v4433_v6  ;;  %v4823_v22 = vpack.c.bf16 %v4805_v0, %v4804_v35  ;;  %v10590_v11 = vld [vmem:[%s13688_s3 + $0x110] sm:$0xff]   ;;  %v12563_v46 = vld [vmem:[%s13688_s3 + $0x1f8] sm:$0xff]   ;;  %v5600_v28 = vld [vmem:[#allocation3 + $0xc7] sm:$0xff] }
 0x2d0   : > { %v10595_v27 = vld [vmem:[%s13688_s3 + $0x150] sm:$0xff]   ;;  %v5603_v6 = vld [vmem:[#allocation3 + $0xdf] sm:$0xff]  ;;  %v5604_v10 = vld [vmem:[#allocation3 + $0xe7] sm:$0xff] }
 0x2d1   : > { %v5593_v59 = vld [vmem:[#allocation3 + $0x8f] sm:$0xff]  ;;  %v5598_v15 = vld [vmem:[#allocation3 + $0xb7] sm:$0xff]  ;;  %v5611_v35 = vld [vmem:[#allocation3 + $0x11f] sm:$0xff] }
 0x2d2   : > { %10116 = vmatpush3.bf16.msra.mxu1 %v10580_v4  ;;  %10168 = vmatpush3.bf16.msra.mxu0 %v10582_v14  ;;  %v5579_v4 = vld [vmem:[#allocation3 + $0x1f] sm:$0xff]  ;;  %v5580_v14 = vld [vmem:[#allocation3 + $0x27] sm:$0xff]  ;;  %v5597_v23 = vld [vmem:[#allocation3 + $0xaf] sm:$0xff] }
 0x2d3   : > { %10205 = vmatprep.subr.bf16.mxu1 %v12502_v58  ;;  %10257 = vmatprep.subr.bf16.mxu0 %v12507_v13  ;;  %v5614_v54 = vpack.c.bf16 %v5579_v4, %v5578_v17  ;;  %v5615_v3 = vpack.c.bf16 %v5581_v61, %v5580_v14  ;;  %v5623_v56 = vpack.c.bf16 %v5597_v23, %v5596_v18  ;;  %v5605_v0 = vld [vmem:[#allocation3 + $0xef] sm:$0xff]  ;;  %v5606_v53 = vld [vmem:[#allocation3 + $0xf7] sm:$0xff]  ;;  %v5983_v61 = vld [vmem:[#allocation3 + $0x20] sm:$0xff] }
 0x2d4   : > { %10030 = vmatmul.mubr.bf16.gmra.mxu1 %v4484_v48  ;;  %10082 = vmatmul.mubr.bf16.gmra.mxu0 %v4815_v12  ;;  %v10589_v48 = vld [vmem:[%s13688_s3 + $0x170] sm:$0xff]   ;;  %v5584_v12 = vld [vmem:[#allocation3 + $0x47] sm:$0xff]  ;;  %v5627_v7 = vpack.c.bf16 %v5605_v0, %v5604_v10  ;;  %v5628_v17 = vpack.c.bf16 %v5607_v41, %v5606_v53  ;;  %v5982_v19 = vld [vmem:[#allocation3 + $0x18] sm:$0xff] }
 0x2d5   : > { %10033 = vmatprep.mubr.bf16.mxu1 %v4485_v57  ;;  %10085 = vmatprep.mubr.bf16.mxu0 %v4816_v37  ;;  %v10591_v57 = vld [vmem:[%s13688_s3 + $0x168] sm:$0xff]   ;;  %v5587_v37 = vld [vmem:[#allocation3 + $0x5f] sm:$0xff]  ;;  %v5617_v36 = vpack.c.bf16 %v5585_v43, %v5584_v12  ;;  %v5610_v4 = vld [vmem:[#allocation3 + $0x117] sm:$0xff] }
 0x2d6   : > { %v5618_v60 = vpack.c.bf16 %v5587_v37, %v5586_v47  ;;  %v5613_v14 = vld [vmem:[#allocation3 + $0x12f] sm:$0xff]  ;;  %v5612_v32 = vld [vmem:[#allocation3 + $0x127] sm:$0xff]  ;;  %v5986_v47 = vld [vmem:[#allocation3 + $0x38] sm:$0xff] }
 0x2d7   : > { %v5984_v12 = vld [vmem:[#allocation3 + $0x28] sm:$0xff]  ;;  %v5985_v37 = vld [vmem:[#allocation3 + $0x30] sm:$0xff]  ;;  %v6390_v43 = vld [vmem:[#allocation3 + $0x39] sm:$0xff] }
 0x2d8   : > { %v5993_v18 = vld [vmem:[#allocation3 + $0x70] sm:$0xff]  ;;  %v10609_v53 = vld [vmem:[%s13688_s3 + $0x188] sm:$0xff]  }
 0x2d9   : > { %v6397_v23 = vld [vmem:[#allocation3 + $0x71] sm:$0xff] }
 0x2da   : > { %v10606_v10 = vld [vmem:[%s13688_s3 + $0x190] sm:$0xff]  }
 0x2db   : > { %v10611_v41 = vld [vmem:[%s13688_s3 + $0x1d0] sm:$0xff]  }
 0x2dc   : > { %10034 = vmatmul.mubr.bf16.gmra.mxu1 %v4486_v40  ;;  %10086 = vmatmul.mubr.bf16.gmra.mxu0 %v4817_v26  ;;  %v10594_v40 = vld [vmem:[%s13688_s3 + $0x158] sm:$0xff]   ;;  %v5619_v26 = vpack.c.bf16 %v5589_v5, %v5588_v31  ;;  %v6391_v5 = vld [vmem:[#allocation3 + $0x41] sm:$0xff]  ;;  %v10605_v31 = vld [vmem:[%s13688_s3 + $0x1f0] sm:$0xff]  }
 0x2dd   : > { %10037 = vmatprep.mubr.bf16.mxu1 %v4487_v34  ;;  %10089 = vmatprep.mubr.bf16.mxu0 %v4818_v9  ;;  %v5590_v34 = vld [vmem:[#allocation3 + $0x77] sm:$0xff] }
 0x2de   : > { %v5620_v9 = vpack.c.bf16 %v5591_v29, %v5590_v34  ;;  %v12572_v29 = vpack.c.bf16 %v6391_v5, %v6390_v43  ;;  %v10601_v34 = vld [vmem:[%s13688_s3 + $0x1a8] sm:$0xff]  }
 0x2df   : > { %v6407_v5 = vld [vmem:[#allocation3 + $0xc1] sm:$0xff] }
 0x2e4   : > { %10038 = vmatmul.mubr.bf16.gmra.mxu1 %v4488_v2  ;;  %10090 = vmatmul.mubr.bf16.gmra.mxu0 %v4819_v49  ;;  %v5592_v2 = vld [vmem:[#allocation3 + $0x87] sm:$0xff] }
 0x2e5   : > { %10041 = vmatprep.mubr.bf16.mxu1 %v4489_v42  ;;  %10093 = vmatprep.mubr.bf16.mxu0 %v4820_v63  ;;  %v5621_v62 = vpack.c.bf16 %v5593_v59, %v5592_v2  ;;  %v10596_v49 = vld [vmem:[%s13688_s3 + $0x100] sm:$0xff]   ;;  %v5622_v42 = vpack.c.bf16 %v5595_v16, %v5594_v38  ;;  %v12558_v63 = vld [vmem:[%s13688_s3 + $0x1b8] sm:$0xff]  }
 0x2e6   : > { %v6394_v59 = vld [vmem:[#allocation3 + $0x59] sm:$0xff]  ;;  %v6393_v16 = vld [vmem:[#allocation3 + $0x51] sm:$0xff] }
 0x2e7   : > { %v5991_v2 = vld [vmem:[#allocation3 + $0x60] sm:$0xff] }
 0x2ec   : > { %10042 = vmatmul.mubr.bf16.gmra.mxu1 %v4490_v25  ;;  %10094 = vmatmul.mubr.bf16.gmra.mxu0 %v4821_v50  ;;  %v5599_v25 = vld [vmem:[#allocation3 + $0xbf] sm:$0xff]  ;;  %v5602_v50 = vld [vmem:[#allocation3 + $0xd7] sm:$0xff] }
 0x2ed   : > { %10045 = vmatprep.mubr.bf16.mxu1 %v4491_v52  ;;  %10097 = vmatprep.mubr.bf16.mxu0 %v4822_v20  ;;  %v5624_v51 = vpack.c.bf16 %v5599_v25, %v5598_v15  ;;  %v5601_v52 = vld [vmem:[#allocation3 + $0xcf] sm:$0xff]  ;;  %v5626_v20 = vpack.c.bf16 %v5603_v6, %v5602_v50  ;;  %v10603_v15 = vld [vmem:[%s13688_s3 + $0x198] sm:$0xff]  }
 0x2ee   : > { %v5625_v55 = vpack.c.bf16 %v5601_v52, %v5600_v28  ;;  %v10610_v25 = vld [vmem:[%s13688_s3 + $0x1d8] sm:$0xff]   ;;  %v6399_v28 = vld [vmem:[#allocation3 + $0x81] sm:$0xff] }
 0x2ef   : > { %v5994_v52 = vld [vmem:[#allocation3 + $0x78] sm:$0xff] }
 0x2f4   : > { %10046 = vmatmul.mubr.bf16.gmra.mxu1 %v4492_v8  ;;  %10098 = vmatmul.mubr.bf16.gmra.mxu0 %v4823_v22  ;;  %v5609_v8 = vld [vmem:[#allocation3 + $0x10f] sm:$0xff]  ;;  %v5608_v22 = vld [vmem:[#allocation3 + $0x107] sm:$0xff] }
 0x2f5   : > { %10117 = vmatprep.mubr.bf16.mxu1 %v5210_v45  ;;  %10169 = vmatprep.mubr.bf16.mxu0 %v5614_v54  ;;  %v5629_v45 = vpack.c.bf16 %v5609_v8, %v5608_v22  ;;  %v5999_v8 = vld [vmem:[#allocation3 + $0xa0] sm:$0xff]  ;;  %v5996_v22 = vld [vmem:[#allocation3 + $0x88] sm:$0xff] }
 0x2fc   : > { %10118 = vmatmul.mubr.bf16.vlgmr.msra.gmra.mxu1 %v5614_v54  ;;  %10170 = vmatmul.mubr.bf16.vlgmr.msra.gmra.mxu0 %v5615_v3  ;;  %v5630_v54 = vpack.c.bf16 %v5611_v35, %v5610_v4  ;;  %v10613_v35 = vld [vmem:[%s13688_s3 + $0x1c8] sm:$0xff]  }
 0x2fd   : > { %10121 = vmatprep.mubr.bf16.mxu1 %v5615_v3  ;;  %10173 = vmatprep.mubr.bf16.mxu0 %v5616_v39  ;;  %v6387_v3 = vld [vmem:[#allocation3 + $0x21] sm:$0xff] }
 0x2fe   : > { %10206 = vmatpush3.bf16.msra.mxu1 %v12502_v58  ;;  %10258 = vmatpush3.bf16.msra.mxu0 %v12507_v13  ;;  %v10586_v58 = vld [vmem:[%s13688_s3 + $0x120] sm:$0xff]  }
 0x2ff   : > { %10207 = vmatprep.subr.bf16.mxu1 %v10584_v44  ;;  %10259 = vmatprep.subr.bf16.mxu0 %v10589_v48  ;;  %v10592_v13 = vld [vmem:[%s13688_s3 + $0x160] sm:$0xff]  }
 0x302   : > { %10208 = vmatpush3.bf16.msra.mxu1 %v10584_v44  ;;  %10260 = vmatpush3.bf16.msra.mxu0 %v10589_v48  ;;  %v5631_v44 = vpack.c.bf16 %v5613_v14, %v5612_v32  ;;  %v6386_v48 = vld [vmem:[#allocation3 + $0x19] sm:$0xff] }
 0x303   : > { %10209 = vmatprep.subr.bf16.mxu1 %v10585_v24  ;;  %10261 = vmatprep.subr.bf16.mxu0 %v10591_v57  ;;  %v5998_v14 = vld [vmem:[#allocation3 + $0x98] sm:$0xff]  ;;  %v10612_v32 = vld [vmem:[%s13688_s3 + $0x180] sm:$0xff]  }
 0x304   : > { %10122 = vmatmul.mubr.bf16.gmra.mxu1 %v5616_v39  ;;  %10174 = vmatmul.mubr.bf16.gmra.mxu0 %v5617_v36  ;;  %v6018_v39 = vpack.c.bf16 %v5983_v61, %v5982_v19  ;;  %v6026_v61 = vpack.c.bf16 %v5999_v8, %v5998_v14  ;;  %v6417_v8 = vld [vmem:[#allocation3 + $0x111] sm:$0xff] }
 0x305   : > { %10125 = vmatprep.mubr.bf16.mxu1 %v5617_v36  ;;  %10177 = vmatprep.mubr.bf16.mxu0 %v5618_v60  ;;  %v6019_v36 = vpack.c.bf16 %v5985_v37, %v5984_v12  ;;  %v12638_v12 = vld [vmem:[%s13688_s3 + $0x238] sm:$0xff]  }
 0x306   : > { %10210 = vmatpush3.bf16.msra.mxu1 %v10585_v24  ;;  %10262 = vmatpush3.bf16.msra.mxu0 %v10591_v57  ;;  %v6422_v24 = vpack.c.bf16 %v6387_v3, %v6386_v48  ;;  %v6388_v57 = vld [vmem:[#allocation3 + $0x29] sm:$0xff]  ;;  %v6402_v3 = vld [vmem:[#allocation3 + $0x99] sm:$0xff] }
 0x307   : > { %10211 = vmatprep.subr.bf16.mxu1 %v10586_v58  ;;  %10263 = vmatprep.subr.bf16.mxu0 %v10592_v13  ;;  %v6000_v48 = vld [vmem:[#allocation3 + $0xa8] sm:$0xff]  ;;  %v6406_v37 = vld [vmem:[#allocation3 + $0xb9] sm:$0xff] }
 0x30a   : > { %10212 = vmatpush3.bf16.msra.mxu1 %v10586_v58  ;;  %10264 = vmatpush3.bf16.msra.mxu0 %v10592_v13  ;;  %v6389_v58 = vld [vmem:[#allocation3 + $0x31] sm:$0xff] }
 0x30b   : > { %10213 = vmatprep.subr.bf16.mxu1 %v10587_v1  ;;  %10265 = vmatprep.subr.bf16.mxu0 %v10594_v40  ;;  %v12567_v13 = vpack.c.bf16 %v6389_v58, %v6388_v57  ;;  %v6405_v57 = vld [vmem:[#allocation3 + $0xb1] sm:$0xff]  ;;  %v6003_v58 = vld [vmem:[#allocation3 + $0xc0] sm:$0xff] }
 0x30c   : > { %10126 = vmatmul.mubr.bf16.gmra.mxu1 %v5618_v60  ;;  %10178 = vmatmul.mubr.bf16.gmra.mxu0 %v5619_v26  ;;  %v5987_v60 = vld [vmem:[#allocation3 + $0x40] sm:$0xff] }
 0x30d   : > { %10129 = vmatprep.mubr.bf16.mxu1 %v5619_v26  ;;  %10181 = vmatprep.mubr.bf16.mxu0 %v5620_v9  ;;  %v5988_v26 = vld [vmem:[#allocation3 + $0x48] sm:$0xff] }
 0x30e   : > { %10214 = vmatpush3.bf16.msra.mxu1 %v10587_v1  ;;  %10266 = vmatpush3.bf16.msra.mxu0 %v10594_v40  ;;  %v6020_v1 = vpack.c.bf16 %v5987_v60, %v5986_v47  ;;  %v10600_v40 = vld [vmem:[%s13688_s3 + $0x1b0] sm:$0xff]   ;;  %v6002_v47 = vld [vmem:[#allocation3 + $0xb8] sm:$0xff] }
 0x30f   : > { %10215 = vmatprep.subr.bf16.mxu1 %v10590_v11  ;;  %10267 = vmatprep.subr.bf16.mxu0 %v10595_v27 }
 0x312   : > { %10216 = vmatpush3.bf16.msra.mxu1 %v10590_v11  ;;  %10268 = vmatpush3.bf16.msra.mxu0 %v10595_v27  ;;  %v6392_v11 = vld [vmem:[#allocation3 + $0x49] sm:$0xff] }
 0x313   : > { %10217 = vmatprep.subr.bf16.mxu1 %v10593_v21  ;;  %10269 = vmatprep.subr.bf16.mxu0 %v10597_v30  ;;  %v10607_v27 = vld [vmem:[%s13688_s3 + $0x1e8] sm:$0xff]  }
 0x314   : > { %10130 = vmatmul.mubr.bf16.gmra.mxu1 %v5620_v9  ;;  %10182 = vmatmul.mubr.bf16.gmra.mxu0 %v5621_v62  ;;  %v5990_v9 = vld [vmem:[#allocation3 + $0x58] sm:$0xff] }
 0x315   : > { %10133 = vmatprep.mubr.bf16.mxu1 %v5621_v62  ;;  %10185 = vmatprep.mubr.bf16.mxu0 %v5622_v42  ;;  %v12587_v62 = vpack.c.bf16 %v6393_v16, %v6392_v11  ;;  %v6022_v38 = vpack.c.bf16 %v5991_v2, %v5990_v9  ;;  %v6005_v11 = vld [vmem:[#allocation3 + $0xd0] sm:$0xff]  ;;  %v6410_v9 = vld [vmem:[#allocation3 + $0xd9] sm:$0xff]  ;;  %v6411_v2 = vld [vmem:[#allocation3 + $0xe1] sm:$0xff] }
 0x316   : > { %10218 = vmatpush3.bf16.msra.mxu1 %v10593_v21  ;;  %10270 = vmatpush3.bf16.msra.mxu0 %v10597_v30  ;;  %v5989_v21 = vld [vmem:[#allocation3 + $0x50] sm:$0xff] }
 0x317   : > { %10219 = vmatprep.subr.bf16.mxu1 %v10596_v49  ;;  %10271 = vmatprep.subr.bf16.mxu0 %v10598_v33  ;;  %v6021_v30 = vpack.c.bf16 %v5989_v21, %v5988_v26  ;;  %v6408_v26 = vld [vmem:[#allocation3 + $0xc9] sm:$0xff]  ;;  %v6409_v21 = vld [vmem:[#allocation3 + $0xd1] sm:$0xff] }
 0x31a   : > { %10220 = vmatpush3.bf16.msra.mxu1 %v10596_v49  ;;  %10272 = vmatpush3.bf16.msra.mxu0 %v10598_v33  ;;  %v6395_v49 = vld [vmem:[#allocation3 + $0x61] sm:$0xff] }
 0x31b   : > { %10309 = vmatprep.subr.bf16.mxu1 %v12558_v63  ;;  %10361 = vmatprep.subr.bf16.mxu0 %v12563_v46  ;;  %v12592_v33 = vpack.c.bf16 %v6395_v49, %v6394_v59  ;;  %v6007_v59 = vld [vmem:[#allocation3 + $0xe0] sm:$0xff]  ;;  %v6008_v49 = vld [vmem:[#allocation3 + $0xe8] sm:$0xff] }
 0x31c   : > { %10134 = vmatmul.mubr.bf16.gmra.mxu1 %v5622_v42  ;;  %10186 = vmatmul.mubr.bf16.gmra.mxu0 %v5623_v56  ;;  %v10602_v42 = vld [vmem:[%s13688_s3 + $0x1a0] sm:$0xff]  }
 0x31d   : > { %10137 = vmatprep.mubr.bf16.mxu1 %v5623_v56  ;;  %10189 = vmatprep.mubr.bf16.mxu0 %v5624_v51  ;;  %v5995_v56 = vld [vmem:[#allocation3 + $0x80] sm:$0xff] }
 0x31e   : > { %v6024_v6 = vpack.c.bf16 %v5995_v56, %v5994_v52  ;;  %v6413_v56 = vld [vmem:[#allocation3 + $0xf1] sm:$0xff] }
 0x324   : > { %10138 = vmatmul.mubr.bf16.gmra.mxu1 %v5624_v51  ;;  %10190 = vmatmul.mubr.bf16.gmra.mxu0 %v5625_v55  ;;  %v5992_v51 = vld [vmem:[#allocation3 + $0x68] sm:$0xff] }
 0x325   : > { %10141 = vmatprep.mubr.bf16.mxu1 %v5625_v55  ;;  %10193 = vmatprep.mubr.bf16.mxu0 %v5626_v20  ;;  %v6023_v50 = vpack.c.bf16 %v5993_v18, %v5992_v51  ;;  %v6009_v18 = vld [vmem:[#allocation3 + $0xf0] sm:$0xff] }
 0x32c   : > { %10142 = vmatmul.mubr.bf16.gmra.mxu1 %v5626_v20  ;;  %10194 = vmatmul.mubr.bf16.gmra.mxu0 %v5627_v7  ;;  %v6398_v20 = vld [vmem:[#allocation3 + $0x79] sm:$0xff] }
 0x32d   : > { %10145 = vmatprep.mubr.bf16.mxu1 %v5627_v7  ;;  %10197 = vmatprep.mubr.bf16.mxu0 %v5628_v17  ;;  %v12610_v0 = vpack.c.bf16 %v6399_v28, %v6398_v20  ;;  %v5997_v7 = vld [vmem:[#allocation3 + $0x90] sm:$0xff] }
 0x32e   : > { %v6025_v4 = vpack.c.bf16 %v5997_v7, %v5996_v22  ;;  %v6013_v7 = vld [vmem:[#allocation3 + $0x110] sm:$0xff] }
 0x334   : > { %10146 = vmatmul.mubr.bf16.gmra.mxu1 %v5628_v17  ;;  %10198 = vmatmul.mubr.bf16.gmra.mxu0 %v5629_v45  ;;  %v6401_v17 = vld [vmem:[#allocation3 + $0x91] sm:$0xff] }
 0x335   : > { %10149 = vmatprep.mubr.bf16.mxu1 %v5629_v45  ;;  %10201 = vmatprep.mubr.bf16.mxu0 %v5630_v54  ;;  %v6403_v45 = vld [vmem:[#allocation3 + $0xa1] sm:$0xff] }
 0x33c   : > { %10150 = vmatmul.mubr.bf16.gmra.mxu1 %v5630_v54  ;;  %10202 = vmatmul.mubr.bf16.gmra.mxu0 %v5631_v44  ;;  %v6400_v54 = vld [vmem:[#allocation3 + $0x89] sm:$0xff]  ;;  %v12628_v44 = vpack.c.bf16 %v6403_v45, %v6402_v3 }
 0x33d   : > { %10221 = vmatprep.mubr.bf16.mxu1 %v6018_v39  ;;  %10273 = vmatprep.mubr.bf16.mxu0 %v6422_v24  ;;  %v12623_v19 = vpack.c.bf16 %v6401_v17, %v6400_v54  ;;  %v10614_v39 = vld [vmem:[%s13688_s3 + $0x1c0] sm:$0xff]   ;;  %v6001_v24 = vld [vmem:[#allocation3 + $0xb0] sm:$0xff]  ;;  %v6012_v45 = vld [vmem:[#allocation3 + $0x108] sm:$0xff] }
 0x33e   : > { %v6027_v43 = vpack.c.bf16 %v6001_v24, %v6000_v48  ;;  %v6416_v3 = vld [vmem:[#allocation3 + $0x109] sm:$0xff] }
 0x33f   : > { %v12665_v48 = vpack.c.bf16 %v6417_v8, %v6416_v3 }
 0x344   : > { %10222 = vmatmul.mubr.bf16.vlgmr.msra.gmra.mxu1 %v6019_v36  ;;  %10274 = vmatmul.mubr.bf16.vlgmr.msra.gmra.mxu0 %v12567_v13  ;;  %v6404_v36 = vld [vmem:[#allocation3 + $0xa9] sm:$0xff] }
 0x345   : > { %10225 = vmatprep.mubr.bf16.mxu1 %v6020_v1  ;;  %10277 = vmatprep.mubr.bf16.mxu0 %v12572_v29  ;;  %v12640_v60 = vpack.c.bf16 %v6405_v57, %v6404_v36  ;;  %v6028_v1 = vpack.c.bf16 %v6003_v58, %v6002_v47  ;;  %v6418_v57 = vld [vmem:[#allocation3 + $0x119] sm:$0xff] }
 0x346   : > { %10310 = vmatpush3.bf16.msra.mxu1 %v12558_v63  ;;  %10362 = vmatpush3.bf16.msra.mxu0 %v12563_v46  ;;  %v10608_v63 = vld [vmem:[%s13688_s3 + $0x1e0] sm:$0xff]   ;;  %v6396_v46 = vld [vmem:[#allocation3 + $0x69] sm:$0xff] }
 0x347   : > { %10311 = vmatprep.subr.bf16.mxu1 %v10600_v40  ;;  %10363 = vmatprep.subr.bf16.mxu0 %v10605_v31  ;;  %v12605_v55 = vpack.c.bf16 %v6397_v23, %v6396_v46  ;;  %v6414_v46 = vld [vmem:[#allocation3 + $0xf9] sm:$0xff]  ;;  %v6031_v23 = vpack.c.bf16 %v6009_v18, %v6008_v49 }
 0x34a   : > { %10312 = vmatpush3.bf16.msra.mxu1 %v10600_v40  ;;  %10364 = vmatpush3.bf16.msra.mxu0 %v10605_v31  ;;  %v12643_v40 = vpack.c.bf16 %v6407_v5, %v6406_v37  ;;  %v6004_v31 = vld [vmem:[#allocation3 + $0xc8] sm:$0xff] }
 0x34b   : > { %10313 = vmatprep.subr.bf16.mxu1 %v10601_v34  ;;  %10365 = vmatprep.subr.bf16.mxu0 %v10607_v27 }
 0x34c   : > { %10226 = vmatmul.mubr.bf16.gmra.mxu1 %v6021_v30  ;;  %10278 = vmatmul.mubr.bf16.gmra.mxu0 %v12587_v62  ;;  %v12647_v30 = vpack.c.bf16 %v6409_v21, %v6408_v26  ;;  %v7194_v21 = vld [vmem:[#allocation3 + $0x2a] sm:$0xff] }
 0x34d   : > { %10229 = vmatprep.mubr.bf16.mxu1 %v6022_v38  ;;  %10281 = vmatprep.mubr.bf16.mxu0 %v12592_v33  ;;  %v12649_v38 = vpack.c.bf16 %v6411_v2, %v6410_v9 }
 0x34e   : > { %10314 = vmatpush3.bf16.msra.mxu1 %v10601_v34  ;;  %10366 = vmatpush3.bf16.msra.mxu0 %v10607_v27  ;;  %v6006_v34 = vld [vmem:[#allocation3 + $0xd8] sm:$0xff]  ;;  %v6029_v27 = vpack.c.bf16 %v6005_v11, %v6004_v31  ;;  %v6017_v31 = vld [vmem:[#allocation3 + $0x130] sm:$0xff] }
 0x34f   : > { %10315 = vmatprep.subr.bf16.mxu1 %v10602_v42  ;;  %10367 = vmatprep.subr.bf16.mxu0 %v10608_v63  ;;  %v6030_v16 = vpack.c.bf16 %v6007_v59, %v6006_v34  ;;  %v6421_v11 = vld [vmem:[#allocation3 + $0x131] sm:$0xff] }
 0x350   : > { %v7195_v59 = vld [vmem:[#allocation3 + $0x32] sm:$0xff] }
 0x352   : > { %10316 = vmatpush3.bf16.msra.mxu1 %v10602_v42  ;;  %10368 = vmatpush3.bf16.msra.mxu0 %v10608_v63  ;;  %v6412_v42 = vld [vmem:[#allocation3 + $0xe9] sm:$0xff]  ;;  %v6011_v63 = vld [vmem:[#allocation3 + $0x100] sm:$0xff] }
 0x353   : > { %10317 = vmatprep.subr.bf16.mxu1 %v10603_v15  ;;  %10369 = vmatprep.subr.bf16.mxu0 %v10610_v25  ;;  %v12653_v51 = vpack.c.bf16 %v6413_v56, %v6412_v42  ;;  %v6420_v42 = vld [vmem:[#allocation3 + $0x129] sm:$0xff] }
 0x354   : > { %10230 = vmatmul.mubr.bf16.gmra.mxu1 %v6023_v50  ;;  %10282 = vmatmul.mubr.bf16.gmra.mxu0 %v12605_v55  ;;  %v12679_v18 = vpack.c.bf16 %v6421_v11, %v6420_v42 }
 0x355   : > { %10233 = vmatprep.mubr.bf16.mxu1 %v6024_v6  ;;  %10285 = vmatprep.mubr.bf16.mxu0 %v12610_v0 }
 0x356   : > { %10318 = vmatpush3.bf16.msra.mxu1 %v10603_v15  ;;  %10370 = vmatpush3.bf16.msra.mxu0 %v10610_v25  ;;  %v6415_v15 = vld [vmem:[#allocation3 + $0x101] sm:$0xff]  ;;  %v6010_v25 = vld [vmem:[#allocation3 + $0xf8] sm:$0xff] }
 0x357   : > { %10319 = vmatprep.subr.bf16.mxu1 %v10606_v10  ;;  %10371 = vmatprep.subr.bf16.mxu0 %v10611_v41  ;;  %v6032_v28 = vpack.c.bf16 %v6011_v63, %v6010_v25  ;;  %v12655_v52 = vpack.c.bf16 %v6415_v15, %v6414_v46 }
 0x35a   : > { %10320 = vmatpush3.bf16.msra.mxu1 %v10606_v10  ;;  %10372 = vmatpush3.bf16.msra.mxu0 %v10611_v41 }
 0x35b   : > { %10321 = vmatprep.subr.bf16.mxu1 %v10609_v53  ;;  %10373 = vmatprep.subr.bf16.mxu0 %v10613_v35 }
 0x35c   : > { %10234 = vmatmul.mubr.bf16.gmra.mxu1 %v6025_v4  ;;  %10286 = vmatmul.mubr.bf16.gmra.mxu0 %v12623_v19  ;;  %v6419_v4 = vld [vmem:[#allocation3 + $0x121] sm:$0xff] }
 0x35d   : > { %10237 = vmatprep.mubr.bf16.mxu1 %v6026_v61  ;;  %10289 = vmatprep.mubr.bf16.mxu0 %v12628_v44  ;;  %v6033_v61 = vpack.c.bf16 %v6013_v7, %v6012_v45 }
 0x35e   : > { %10322 = vmatpush3.bf16.msra.mxu1 %v10609_v53  ;;  %10374 = vmatpush3.bf16.msra.mxu0 %v10613_v35  ;;  %v6015_v35 = vld [vmem:[#allocation3 + $0x120] sm:$0xff] }
 0x35f   : > { %10323 = vmatprep.subr.bf16.mxu1 %v10612_v32  ;;  %10375 = vmatprep.subr.bf16.mxu0 %v10614_v39 }
 0x362   : > { %10324 = vmatpush3.bf16.msra.mxu1 %v10612_v32  ;;  %10376 = vmatpush3.bf16.msra.mxu0 %v10614_v39  ;;  %v6014_v32 = vld [vmem:[#allocation3 + $0x118] sm:$0xff] }
 0x363   : > { %10413 = vmatprep.subr.bf16.mxu1 %v12638_v12  ;;  %v6034_v24 = vpack.c.bf16 %v6015_v35, %v6014_v32 }
 0x364   : > { %10238 = vmatmul.mubr.bf16.gmra.mxu1 %v6027_v43  ;;  %10290 = vmatmul.mubr.bf16.gmra.mxu0 %v12640_v60  ;;  %v12669_v43 = vpack.c.bf16 %v6419_v4, %v6418_v57 }
 0x365   : > { %10241 = vmatprep.mubr.bf16.mxu1 %v6028_v1  ;;  %10293 = vmatprep.mubr.bf16.mxu0 %v12643_v40 }
 0x36c   : > { %10242 = vmatmul.mubr.bf16.gmra.mxu1 %v6029_v27  ;;  %10294 = vmatmul.mubr.bf16.gmra.mxu0 %v12647_v30  ;;  %v6016_v27 = vld [vmem:[#allocation3 + $0x128] sm:$0xff] }
 0x36d   : > { %10245 = vmatprep.mubr.bf16.mxu1 %v6030_v16  ;;  %10297 = vmatprep.mubr.bf16.mxu0 %v12649_v38  ;;  %v6035_v49 = vpack.c.bf16 %v6017_v31, %v6016_v27 }
 0x374   : > { %v10015_v50 = vpop.f32.mrf.mxu1  ;;  %10246 = vmatmul.mubr.bf16.gmra.mxu1 %v6031_v23  ;;  %v10067_v6 = vpop.f32.mrf.mxu0  ;;  %10298 = vmatmul.mubr.bf16.gmra.mxu0 %v12653_v51  ;;  %v7230_v23 = vpack.c.bf16 %v7195_v59, %v7194_v21  ;;  %v7203_v21 = vld [vmem:[#allocation3 + $0x72] sm:$0xff]  ;;  %v10618_v59 = vld [vmem:[%s13688_s3 + $0x220] sm:$0xff]  }
 0x375   : > { %10249 = vmatprep.mubr.bf16.mxu1 %v6032_v28  ;;  %v12658_v20 = vadd.f32 %v10067_v6, %v10015_v50  ;;  %10301 = vmatprep.mubr.bf16.mxu0 %v12655_v52 }
 0x376   : > { %v4591_v10 = vpop.f32.mrf.mxu1  ;;  %v4923_v41 = vpop.f32.mrf.mxu0 }
 0x377   : > { %v12661_v53 = vadd.f32 %v4923_v41, %v4591_v10  ;;  %v7196_v41 = vld [vmem:[#allocation3 + $0x3a] sm:$0xff] }
 0x378   : > { %v10016_v17 = vpop.f32.mrf.mxu1  ;;  %v10068_v22 = vpop.f32.mrf.mxu0 }
 0x379   : > { %v12663_v54 = vadd.f32 %v10068_v22, %v10016_v17  ;;  %v7198_v17 = vld [vmem:[#allocation3 + $0x4a] sm:$0xff]  ;;  %v7197_v22 = vld [vmem:[#allocation3 + $0x42] sm:$0xff] }
 0x37a   : > { %v4594_v14 = vpop.f32.mrf.mxu1  ;;  %v4926_v39 = vpop.f32.mrf.mxu0  ;;  %v7231_v4 = vpack.c.bf16 %v7197_v22, %v7196_v41 }
 0x37b   : > { %v12667_v47 = vadd.f32 %v4926_v39, %v4594_v14  ;;  %v7199_v14 = vld [vmem:[#allocation3 + $0x52] sm:$0xff] }
 0x37c   : > { %v10019_v37 = vpop.f32.mrf.mxu1  ;;  %10250 = vmatmul.mubr.bf16.gmra.mxu1 %v6033_v61  ;;  %v10071_v36 = vpop.f32.mrf.mxu0  ;;  %10302 = vmatmul.mubr.bf16.gmra.mxu0 %v12665_v48  ;;  %v7232_v32 = vpack.c.bf16 %v7199_v14, %v7198_v17  ;;  %v10620_v14 = vld [vmem:[%s13688_s3 + $0x210] sm:$0xff]  }
 0x37d   : > { %10253 = vmatprep.mubr.bf16.mxu1 %v6034_v24  ;;  %v12672_v58 = vadd.f32 %v10071_v36, %v10019_v37  ;;  %10305 = vmatprep.mubr.bf16.mxu0 %v12669_v43  ;;  %v10617_v36 = vld [vmem:[%s13688_s3 + $0x228] sm:$0xff]  }
 0x37e   : > { %v4607_v1 = vpop.f32.mrf.mxu1  ;;  %v4939_v5 = vpop.f32.mrf.mxu0 }
 0x37f   : > { %v12675_v26 = vadd.f32 %v4939_v5, %v4607_v1  ;;  %v7200_v5 = vld [vmem:[#allocation3 + $0x5a] sm:$0xff] }
 0x380   : > { %v10020_v34 = vpop.f32.mrf.mxu1  ;;  %v10072_v9 = vpop.f32.mrf.mxu0 }
 0x381   : > { %v12677_v16 = vadd.f32 %v10072_v9, %v10020_v34  ;;  %v7202_v34 = vld [vmem:[#allocation3 + $0x6a] sm:$0xff]  ;;  %v7201_v9 = vld [vmem:[#allocation3 + $0x62] sm:$0xff] }
 0x382   : > { %v4610_v2 = vpop.f32.mrf.mxu1  ;;  %v4942_v63 = vpop.f32.mrf.mxu0  ;;  %v7234_v42 = vpack.c.bf16 %v7203_v21, %v7202_v34 }
 0x383   : > { %v12681_v46 = vadd.f32 %v4942_v63, %v4610_v2 }
 0x384   : > { %v10023_v15 = vpop.f32.mrf.mxu1  ;;  %10254 = vmatmul.mubr.bf16.gmra.mxu1 %v6035_v49  ;;  %v10075_v56 = vpop.f32.mrf.mxu0  ;;  %10306 = vmatmul.mubr.bf16.gmra.mxu0 %v12679_v18 }
 0x385   : > { %10325 = vmatprep.mubr.bf16.mxu1 %v12567_v13  ;;  %v12685_v25 = vadd.f32 %v10075_v56, %v10023_v15  ;;  %10377 = vmatprep.mubr.bf16.mxu0 %v7230_v23  ;;  %v10616_v13 = vld [vmem:[%s13688_s3 + $0x230] sm:$0xff]  }
 0x386   : > { %v4623_v28 = vpop.f32.mrf.mxu1  ;;  %v4955_v50 = vpop.f32.mrf.mxu0 }
 0x387   : > { %v12687_v6 = vadd.f32 %v4955_v50, %v4623_v28  ;;  %v10619_v28 = vld [vmem:[%s13688_s3 + $0x218] sm:$0xff]  }
 0x388   : > { %v10024_v10 = vpop.f32.mrf.mxu1  ;;  %v10076_v7 = vpop.f32.mrf.mxu0 }
 0x389   : > { %v12689_v8 = vadd.f32 %v10076_v7, %v10024_v10  ;;  %v7207_v7 = vld [vmem:[#allocation3 + $0x92] sm:$0xff] }
 0x38a   : > { %v4626_v35 = vpop.f32.mrf.mxu1  ;;  %v4958_v45 = vpop.f32.mrf.mxu0 }
 0x38b   : > { %v12694_v61 = vadd.f32 %v4958_v45, %v4626_v35  ;;  %v7204_v35 = vld [vmem:[#allocation3 + $0x7a] sm:$0xff] }
 0x38c   : > { %v10027_v3 = vpop.f32.mrf.mxu1  ;;  %10326 = vmatmul.mubr.bf16.vlgmr.msra.gmra.mxu1 %v12572_v29  ;;  %v10079_v39 = vpop.f32.mrf.mxu0  ;;  %10378 = vmatmul.mubr.bf16.vlgmr.msra.gmra.mxu0 %v7231_v4  ;;  %v7206_v4 = vld [vmem:[#allocation3 + $0x8a] sm:$0xff] }
 0x38d   : > { %10329 = vmatprep.mubr.bf16.mxu1 %v12587_v62  ;;  %v12698_v24 = vadd.f32 %v10079_v39, %v10027_v3  ;;  %10381 = vmatprep.mubr.bf16.mxu0 %v7232_v32  ;;  %v7236_v32 = vpack.c.bf16 %v7207_v7, %v7206_v4 }
 0x38e   : > { %10414 = vmatpush3.bf16.msra.mxu1 %v12638_v12  ;;  %v4639_v57 = vpop.f32.mrf.mxu1  ;;  %v4971_v37 = vpop.f32.mrf.mxu0  ;;  %v7233_v12 = vpack.c.bf16 %v7201_v9, %v7200_v5 }
 0x38f   : > { %10415 = vmatprep.subr.bf16.mxu1 %v10616_v13  ;;  %v12704_v1 = vadd.f32 %v4971_v37, %v4639_v57 }
 0x390   : > { %v10028_v29 = vpop.f32.mrf.mxu1  ;;  %v10080_v31 = vpop.f32.mrf.mxu0 }
 0x391   : > { %v12706_v11 = vadd.f32 %v10080_v31, %v10028_v29  ;;  %v10621_v29 = vld [vmem:[%s13688_s3 + $0x208] sm:$0xff]  }
 0x392   : > { %v4642_v62 = vpop.f32.mrf.mxu1  ;;  %10416 = vmatpush3.bf16.msra.mxu1 %v10616_v13  ;;  %v4974_v27 = vpop.f32.mrf.mxu0 }
 0x393   : > { %10417 = vmatprep.subr.bf16.mxu1 %v10617_v36  ;;  %v12711_v2 = vadd.f32 %v4974_v27, %v4642_v62  ;;  %v7211_v62 = vld [vmem:[#allocation3 + $0xb2] sm:$0xff]  ;;  %v7208_v27 = vld [vmem:[#allocation3 + $0x9a] sm:$0xff] }
 0x394   : > { %v10031_v49 = vpop.f32.mrf.mxu1  ;;  %10330 = vmatmul.mubr.bf16.gmra.mxu1 %v12592_v33  ;;  %v10083_v63 = vpop.f32.mrf.mxu0  ;;  %10382 = vmatmul.mubr.bf16.gmra.mxu0 %v7233_v12  ;;  %v7205_v33 = vld [vmem:[#allocation3 + $0x82] sm:$0xff] }
 0x395   : > { %10333 = vmatprep.mubr.bf16.mxu1 %v12605_v55  ;;  %v12715_v15 = vadd.f32 %v10083_v63, %v10031_v49  ;;  %10385 = vmatprep.mubr.bf16.mxu0 %v7234_v42  ;;  %v7235_v45 = vpack.c.bf16 %v7205_v33, %v7204_v35  ;;  %v10622_v49 = vld [vmem:[%s13688_s3 + $0x200] sm:$0xff]  }
 0x396   : > { %v4655_v23 = vpop.f32.mrf.mxu1  ;;  %10418 = vmatpush3.bf16.msra.mxu1 %v10617_v36  ;;  %v4987_v56 = vpop.f32.mrf.mxu0  ;;  %v7213_v35 = vld [vmem:[#allocation3 + $0xc2] sm:$0xff] }
 0x397   : > { %10419 = vmatprep.subr.bf16.mxu1 %v10618_v59  ;;  %v12720_v50 = vadd.f32 %v4987_v56, %v4655_v23 }
 0x398   : > { %v10032_v10 = vpop.f32.mrf.mxu1  ;;  %v10084_v41 = vpop.f32.mrf.mxu0 }
 0x399   : > { %v12722_v17 = vadd.f32 %v10084_v41, %v10032_v10 }
 0x39a   : > { %v4658_v55 = vpop.f32.mrf.mxu1  ;;  %10420 = vmatpush3.bf16.msra.mxu1 %v10618_v59  ;;  %v4990_v22 = vpop.f32.mrf.mxu0  ;;  %v7210_v59 = vld [vmem:[#allocation3 + $0xaa] sm:$0xff] }
 0x39b   : > { %10421 = vmatprep.subr.bf16.mxu1 %v10619_v28  ;;  %v12727_v13 = vadd.f32 %v4990_v22, %v4658_v55  ;;  %v7238_v23 = vpack.c.bf16 %v7211_v62, %v7210_v59  ;;  %v7212_v55 = vld [vmem:[#allocation3 + $0xba] sm:$0xff] }
 0x39c   : > { %v10035_v3 = vpop.f32.mrf.mxu1  ;;  %10334 = vmatmul.mubr.bf16.gmra.mxu1 %v12610_v0  ;;  %v10087_v39 = vpop.f32.mrf.mxu0  ;;  %10386 = vmatmul.mubr.bf16.gmra.mxu0 %v7235_v45  ;;  %v7209_v0 = vld [vmem:[#allocation3 + $0xa2] sm:$0xff]  ;;  %v7214_v45 = vld [vmem:[#allocation3 + $0xca] sm:$0xff] }
 0x39d   : > { %10337 = vmatprep.mubr.bf16.mxu1 %v12623_v19  ;;  %v12731_v57 = vadd.f32 %v10087_v39, %v10035_v3  ;;  %10389 = vmatprep.mubr.bf16.mxu0 %v7236_v32  ;;  %v7237_v21 = vpack.c.bf16 %v7209_v0, %v7208_v27  ;;  %v7215_v3 = vld [vmem:[#allocation3 + $0xd2] sm:$0xff] }
 0x39e   : > { %v4671_v37 = vpop.f32.mrf.mxu1  ;;  %10422 = vmatpush3.bf16.msra.mxu1 %v10619_v28  ;;  %v5003_v36 = vpop.f32.mrf.mxu0 }
 0x39f   : > { %10423 = vmatprep.subr.bf16.mxu1 %v10620_v14  ;;  %v12736_v5 = vadd.f32 %v5003_v36, %v4671_v37  ;;  %v7240_v37 = vpack.c.bf16 %v7215_v3, %v7214_v45 }
 0x3a0   : > { %v10036_v31 = vpop.f32.mrf.mxu1  ;;  %v10088_v34 = vpop.f32.mrf.mxu0 }
 0x3a1   : > { %v12738_v9 = vadd.f32 %v10088_v34, %v10036_v31 }
 0x3a2   : > { %v4674_v19 = vpop.f32.mrf.mxu1  ;;  %10424 = vmatpush3.bf16.msra.mxu1 %v10620_v14  ;;  %v5006_v12 = vpop.f32.mrf.mxu0 }
 0x3a3   : > { %10425 = vmatprep.subr.bf16.mxu1 %v10621_v29  ;;  %v12743_v42 = vadd.f32 %v5006_v12, %v4674_v19  ;;  %v7216_v19 = vld [vmem:[#allocation3 + $0xda] sm:$0xff]  ;;  %v7218_v12 = vld [vmem:[#allocation3 + $0xea] sm:$0xff] }
 0x3a4   : > { %v10039_v63 = vpop.f32.mrf.mxu1  ;;  %10338 = vmatmul.mubr.bf16.gmra.mxu1 %v12628_v44  ;;  %v10091_v56 = vpop.f32.mrf.mxu0  ;;  %10390 = vmatmul.mubr.bf16.gmra.mxu0 %v7237_v21 }
 0x3a5   : > { %10341 = vmatprep.mubr.bf16.mxu1 %v12640_v60  ;;  %v12747_v28 = vadd.f32 %v10091_v56, %v10039_v63  ;;  %10393 = vmatprep.mubr.bf16.mxu0 %v7238_v23  ;;  %v7239_v60 = vpack.c.bf16 %v7213_v35, %v7212_v55  ;;  %v7219_v23 = vld [vmem:[#allocation3 + $0xf2] sm:$0xff] }
 0x3a6   : > { %v4687_v10 = vpop.f32.mrf.mxu1  ;;  %10426 = vmatpush3.bf16.msra.mxu1 %v10621_v29  ;;  %v5019_v33 = vpop.f32.mrf.mxu0 }
 0x3a7   : > { %10427 = vmatprep.subr.bf16.mxu1 %v10622_v49  ;;  %v12749_v41 = vadd.f32 %v5019_v33, %v4687_v10  ;;  %v7242_v10 = vpack.c.bf16 %v7219_v23, %v7218_v12  ;;  %v7225_v23 = vld [vmem:[#allocation3 + $0x122] sm:$0xff] }
 0x3a8   : > { %v10040_v7 = vpop.f32.mrf.mxu1  ;;  %v10092_v22 = vpop.f32.mrf.mxu0 }
 0x3a9   : > { %v12751_v44 = vadd.f32 %v10092_v22, %v10040_v7 }
 0x3aa   : > { %v4690_v4 = vpop.f32.mrf.mxu1  ;;  %10428 = vmatpush3.bf16.msra.mxu1 %v10622_v49  ;;  %v5022_v14 = vpop.f32.mrf.mxu0 }
 0x3ab   : > { %v12753_v32 = vadd.f32 %v5022_v14, %v4690_v4  ;;  %v7220_v4 = vld [vmem:[#allocation3 + $0xfa] sm:$0xff] }
 0x3ac   : > { %v10043_v39 = vpop.f32.mrf.mxu1  ;;  %10342 = vmatmul.mubr.bf16.gmra.mxu1 %v12643_v40  ;;  %v10095_v36 = vpop.f32.mrf.mxu0  ;;  %10394 = vmatmul.mubr.bf16.gmra.mxu0 %v7239_v60  ;;  %v7217_v40 = vld [vmem:[#allocation3 + $0xe2] sm:$0xff]  ;;  %v7223_v60 = vld [vmem:[#allocation3 + $0x112] sm:$0xff] }
 0x3ad   : > { %10345 = vmatprep.mubr.bf16.mxu1 %v12647_v30  ;;  %v12757_v29 = vadd.f32 %v10095_v36, %v10043_v39  ;;  %10397 = vmatprep.mubr.bf16.mxu0 %v7240_v37  ;;  %v7241_v63 = vpack.c.bf16 %v7217_v40, %v7216_v19 }
 0x3ae   : > { %v4703_v31 = vpop.f32.mrf.mxu1  ;;  %v5035_v0 = vpop.f32.mrf.mxu0 }
 0x3af   : > { %v12759_v34 = vadd.f32 %v5035_v0, %v4703_v31  ;;  %v7222_v31 = vld [vmem:[#allocation3 + $0x10a] sm:$0xff] }
 0x3b0   : > { %v10044_v62 = vpop.f32.mrf.mxu1  ;;  %v10096_v27 = vpop.f32.mrf.mxu0 }
 0x3b1   : > { %v12761_v21 = vadd.f32 %v10096_v27, %v10044_v62  ;;  %v7244_v62 = vpack.c.bf16 %v7223_v60, %v7222_v31 }
 0x3b2   : > { %v4706_v59 = vpop.f32.mrf.mxu1  ;;  %v5038_v49 = vpop.f32.mrf.mxu0 }
 0x3b3   : > { %v12763_v56 = vadd.f32 %v5038_v49, %v4706_v59 }
 0x3b4   : > { %v10047_v30 = vpop.f32.mrf.mxu1  ;;  %10346 = vmatmul.mubr.bf16.gmra.mxu1 %v12649_v38  ;;  %v10099_v33 = vpop.f32.mrf.mxu0  ;;  %10398 = vmatmul.mubr.bf16.gmra.mxu0 %v7241_v63  ;;  %v7221_v38 = vld [vmem:[#allocation3 + $0x102] sm:$0xff] }
 0x3b5   : > { %10349 = vmatprep.mubr.bf16.mxu1 %v12653_v51  ;;  %v12767_v7 = vadd.f32 %v10099_v33, %v10047_v30  ;;  %10401 = vmatprep.mubr.bf16.mxu0 %v7242_v10  ;;  %v7243_v36 = vpack.c.bf16 %v7221_v38, %v7220_v4  ;;  %v7227_v33 = vld [vmem:[#allocation3 + $0x132] sm:$0xff] }
 0x3b6   : > { %v4719_v55 = vpop.f32.mrf.mxu1  ;;  %v5051_v35 = vpop.f32.mrf.mxu0 }
 0x3b7   : > { %v12769_v22 = vadd.f32 %v5051_v35, %v4719_v55  ;;  %v7224_v55 = vld [vmem:[#allocation3 + $0x11a] sm:$0xff] }
 0x3b8   : > { %v10048_v45 = vpop.f32.mrf.mxu1  ;;  %v10100_v14 = vpop.f32.mrf.mxu0  ;;  %v7245_v4 = vpack.c.bf16 %v7225_v23, %v7224_v55  ;;  %v7598_v23 = vld [vmem:[#allocation3 + $0x2b] sm:$0xff] }
 0x3b9   : > { %v12771_v3 = vadd.f32 %v10100_v14, %v10048_v45  ;;  %v7226_v14 = vld [vmem:[#allocation3 + $0x12a] sm:$0xff] }
 0x3ba   : > { %v4722_v39 = vpop.f32.mrf.mxu1  ;;  %v5054_v37 = vpop.f32.mrf.mxu0 }
 0x3bb   : > { %v12773_v0 = vadd.f32 %v5054_v37, %v4722_v39 }
 0x3bc   : > { %v10119_v51 = vpop.f32.mrf.mxu1  ;;  %10350 = vmatmul.mubr.bf16.gmra.mxu1 %v12655_v52  ;;  %v10171_v27 = vpop.f32.mrf.mxu0  ;;  %10402 = vmatmul.mubr.bf16.gmra.mxu0 %v7243_v36 }
 0x3bd   : > { %v5508_v19 = vadd.f32 %v10119_v51, %v12658_v20  ;;  %10353 = vmatprep.mubr.bf16.mxu1 %v12665_v48  ;;  %10405 = vmatprep.mubr.bf16.mxu0 %v7244_v62  ;;  %v6824_v51 = vld [vmem:[#allocation3 + $0x139] sm:$0xff]  ;;  %v6825_v62 = vld [vmem:[#allocation3 + $0x141] sm:$0xff] }
 0x3be   : > { %v5327_v12 = vpop.f32.mrf.mxu1  ;;  %v5731_v49 = vpop.f32.mrf.mxu0 }
 0x3bf   : > { %v12778_v59 = vadd.f32 %v10171_v27, %v5508_v19  ;;  %v5506_v40 = vadd.f32 %v5327_v12, %v12661_v53  ;;  %v7246_v53 = vpack.c.bf16 %v7227_v33, %v7226_v14  ;;  %v7229_v27 = vld [vmem:[#allocation3 + $0x142] sm:$0xff]  ;;  %v7599_v12 = vld [vmem:[#allocation3 + $0x33] sm:$0xff] }
 0x3c0   : > { %v10120_v63 = vpop.f32.mrf.mxu1  ;;  %v10172_v10 = vpop.f32.mrf.mxu0 }
 0x3c1   : > { %v12781_v30 = vadd.f32 %v5731_v49, %v5506_v40  ;;  %v5509_v52 = vadd.f32 %v10120_v63, %v12663_v54 }
 0x3c2   : > { %v5330_v20 = vpop.f32.mrf.mxu1  ;;  %v5734_v45 = vpop.f32.mrf.mxu0 }
 0x3c3   : > { %v12784_v35 = vadd.f32 %v10172_v10, %v5509_v52  ;;  %v5507_v48 = vadd.f32 %v5330_v20, %v12667_v47  ;;  %v7634_v20 = vpack.c.bf16 %v7599_v12, %v7598_v23 }
 0x3c4   : > { %v10123_v60 = vpop.f32.mrf.mxu1  ;;  %10354 = vmatmul.mubr.bf16.gmra.mxu1 %v12669_v43  ;;  %v10175_v54 = vpop.f32.mrf.mxu0  ;;  %10406 = vmatmul.mubr.bf16.gmra.mxu0 %v7245_v4  ;;  %v7228_v43 = vld [vmem:[#allocation3 + $0x13a] sm:$0xff] }
 0x3c5   : > { %v12788_v39 = vadd.f32 %v5734_v45, %v5507_v48  ;;  %v5512_v38 = vadd.f32 %v10123_v60, %v12672_v58  ;;  %10357 = vmatprep.mubr.bf16.mxu1 %v12679_v18  ;;  %10409 = vmatprep.mubr.bf16.mxu0 %v7246_v53  ;;  %v6843_v18 = vpack.c.bf16 %v6825_v62, %v6824_v51  ;;  %v7601_v51 = vld [vmem:[#allocation3 + $0x43] sm:$0xff] }
 0x3c6   : > { %v5343_v37 = vpop.f32.mrf.mxu1  ;;  %v5747_v31 = vpop.f32.mrf.mxu0  ;;  %v7247_v33 = vpack.c.bf16 %v7229_v27, %v7228_v43 }
 0x3c7   : > { %v12792_v36 = vadd.f32 %v10175_v54, %v5512_v38  ;;  %v5510_v47 = vadd.f32 %v5343_v37, %v12675_v26  ;;  %v7600_v38 = vld [vmem:[#allocation3 + $0x3b] sm:$0xff]  ;;  %v7602_v54 = vld [vmem:[#allocation3 + $0x4b] sm:$0xff] }
 0x3c8   : > { %v10124_v19 = vpop.f32.mrf.mxu1  ;;  %v10176_v49 = vpop.f32.mrf.mxu0 }
 0x3c9   : > { %v12795_v40 = vadd.f32 %v5747_v31, %v5510_v47  ;;  %v5513_v58 = vadd.f32 %v10124_v19, %v12677_v16  ;;  %v7603_v19 = vld [vmem:[#allocation3 + $0x53] sm:$0xff] }
 0x3ca   : > { %v5346_v63 = vpop.f32.mrf.mxu1  ;;  %v5750_v26 = vpop.f32.mrf.mxu0 }
 0x3cb   : > { %v12798_v52 = vadd.f32 %v10176_v49, %v5513_v58  ;;  %v5511_v10 = vadd.f32 %v5346_v63, %v12681_v46  ;;  %v7636_v58 = vpack.c.bf16 %v7603_v19, %v7602_v54 }
 0x3cc   : > { %v10127_v55 = vpop.f32.mrf.mxu1  ;;  %10358 = vmatmul.mubr.bf16.gmra.mxu1 %v6843_v18  ;;  %v10179_v4 = vpop.f32.mrf.mxu0  ;;  %10410 = vmatmul.mubr.bf16.gmra.mxu0 %v7247_v33  ;;  %v7604_v33 = vld [vmem:[#allocation3 + $0x5b] sm:$0xff] }
 0x3cd   : > { %v12801_v48 = vadd.f32 %v5750_v26, %v5511_v10  ;;  %v5516_v45 = vadd.f32 %v10127_v55, %v12685_v25  ;;  %10429 = vmatprep.mubr.bf16.mxu1 %v7634_v20  ;;  %v7635_v25 = vpack.c.bf16 %v7601_v51, %v7600_v38  ;;  %v7606_v55 = vld [vmem:[#allocation3 + $0x6b] sm:$0xff] }
 0x3ce   : > { %v5359_v16 = vpop.f32.mrf.mxu1  ;;  %v5763_v53 = vpop.f32.mrf.mxu0 }
 0x3cf   : > { %v12804_v14 = vadd.f32 %v10179_v4, %v5516_v45  ;;  %v5514_v60 = vadd.f32 %v5359_v16, %v12687_v6  ;;  %v7605_v16 = vld [vmem:[#allocation3 + $0x63] sm:$0xff] }
 0x3d0   : > { %v10128_v46 = vpop.f32.mrf.mxu1  ;;  %v10180_v31 = vpop.f32.mrf.mxu0 }
 0x3d1   : > { %v12807_v37 = vadd.f32 %v5763_v53, %v5514_v60  ;;  %v5517_v47 = vadd.f32 %v10128_v46, %v12689_v8  ;;  %v7637_v53 = vpack.c.bf16 %v7605_v16, %v7604_v33 }
 0x3d2   : > { %v5362_v62 = vpop.f32.mrf.mxu1  ;;  %v5766_v12 = vpop.f32.mrf.mxu0 }
 0x3d3   : > { %v12810_v43 = vadd.f32 %v10180_v31, %v5517_v47  ;;  %v5515_v27 = vadd.f32 %v5362_v62, %v12694_v61 }
 0x3d4   : > { %v10131_v6 = vpop.f32.mrf.mxu1  ;;  %10430 = vmatmul.mubr.bf16.vlgmr.msra.gmra.mxu1 %v7635_v25  ;;  %v10183_v18 = vpop.f32.mrf.mxu0 }
 0x3d5   : > { %v12813_v49 = vadd.f32 %v5766_v12, %v5515_v27  ;;  %v5520_v63 = vadd.f32 %v10131_v6, %v12698_v24  ;;  %10433 = vmatprep.mubr.bf16.mxu1 %v7636_v58  ;;  %v7607_v24 = vld [vmem:[#allocation3 + $0x73] sm:$0xff]  ;;  %v7608_v12 = vld [vmem:[#allocation3 + $0x7b] sm:$0xff]  ;;  %v7609_v58 = vld [vmem:[#allocation3 + $0x83] sm:$0xff] }
 0x3d6   : > { %v5375_v8 = vpop.f32.mrf.mxu1  ;;  %v5779_v26 = vpop.f32.mrf.mxu0  ;;  %v7638_v47 = vpack.c.bf16 %v7607_v24, %v7606_v55 }
 0x3d7   : > { %v12816_v23 = vadd.f32 %v10183_v18, %v5520_v63  ;;  %v5518_v10 = vadd.f32 %v5375_v8, %v12704_v1 }
 0x3d8   : > { %v10132_v20 = vpop.f32.mrf.mxu1  ;;  %v10184_v4 = vpop.f32.mrf.mxu0 }
 0x3d9   : > { %v12819_v61 = vadd.f32 %v5779_v26, %v5518_v10  ;;  %v5521_v45 = vadd.f32 %v10132_v20, %v12706_v11  ;;  %v7639_v26 = vpack.c.bf16 %v7609_v58, %v7608_v12 }
 0x3da   : > { %v5378_v60 = vpop.f32.mrf.mxu1  ;;  %v5782_v54 = vpop.f32.mrf.mxu0 }
 0x3db   : > { %v12822_v38 = vadd.f32 %v10184_v4, %v5521_v45  ;;  %v5519_v46 = vadd.f32 %v5378_v60, %v12711_v2  ;;  %v7611_v2 = vld [vmem:[#allocation3 + $0x93] sm:$0xff] }
 0x3dc   : > { %v10135_v1 = vpop.f32.mrf.mxu1  ;;  %10434 = vmatmul.mubr.bf16.gmra.mxu1 %v7637_v53  ;;  %v10187_v62 = vpop.f32.mrf.mxu0 }
 0x3dd   : > { %v12825_v31 = vadd.f32 %v5782_v54, %v5519_v46  ;;  %v5524_v51 = vadd.f32 %v10135_v1, %v12715_v15  ;;  %10437 = vmatprep.mubr.bf16.mxu1 %v7638_v47  ;;  %v7610_v15 = vld [vmem:[#allocation3 + $0x8b] sm:$0xff]  ;;  %v7613_v54 = vld [vmem:[#allocation3 + $0xa3] sm:$0xff]  ;;  %v7615_v1 = vld [vmem:[#allocation3 + $0xb3] sm:$0xff] }
 0x3de   : > { %v5391_v11 = vpop.f32.mrf.mxu1  ;;  %v5795_v27 = vpop.f32.mrf.mxu0  ;;  %v7640_v45 = vpack.c.bf16 %v7611_v2, %v7610_v15 }
 0x3df   : > { %v12828_v25 = vadd.f32 %v10187_v62, %v5524_v51  ;;  %v5522_v19 = vadd.f32 %v5391_v11, %v12720_v50  ;;  %v7612_v11 = vld [vmem:[#allocation3 + $0x9b] sm:$0xff] }
 0x3e0   : > { %v10136_v6 = vpop.f32.mrf.mxu1  ;;  %v10188_v8 = vpop.f32.mrf.mxu0 }
 0x3e1   : > { %v12831_v63 = vadd.f32 %v5795_v27, %v5522_v19  ;;  %v5525_v18 = vadd.f32 %v10136_v6, %v12722_v17  ;;  %v7641_v27 = vpack.c.bf16 %v7613_v54, %v7612_v11 }
 0x3e2   : > { %v5394_v10 = vpop.f32.mrf.mxu1  ;;  %v5798_v55 = vpop.f32.mrf.mxu0 }
 0x3e3   : > { %v12834_v33 = vadd.f32 %v10188_v8, %v5525_v18  ;;  %v5523_v20 = vadd.f32 %v5394_v10, %v12727_v13 }
 0x3e4   : > { %v10139_v50 = vpop.f32.mrf.mxu1  ;;  %10438 = vmatmul.mubr.bf16.gmra.mxu1 %v7639_v26  ;;  %v10191_v60 = vpop.f32.mrf.mxu0 }
 0x3e5   : > { %v12837_v4 = vadd.f32 %v5798_v55, %v5523_v20  ;;  %v5528_v16 = vadd.f32 %v10139_v50, %v12731_v57  ;;  %10441 = vmatprep.mubr.bf16.mxu1 %v7640_v45  ;;  %v7614_v57 = vld [vmem:[#allocation3 + $0xab] sm:$0xff]  ;;  %v7617_v55 = vld [vmem:[#allocation3 + $0xc3] sm:$0xff] }
 0x3e6   : > { %v5407_v53 = vpop.f32.mrf.mxu1  ;;  %v5811_v46 = vpop.f32.mrf.mxu0  ;;  %v7642_v2 = vpack.c.bf16 %v7615_v1, %v7614_v57  ;;  %v7618_v50 = vld [vmem:[#allocation3 + $0xcb] sm:$0xff] }
 0x3e7   : > { %v12840_v17 = vadd.f32 %v10191_v60, %v5528_v16  ;;  %v5526_v24 = vadd.f32 %v5407_v53, %v12736_v5  ;;  %v7616_v53 = vld [vmem:[#allocation3 + $0xbb] sm:$0xff] }
 0x3e8   : > { %v10140_v47 = vpop.f32.mrf.mxu1  ;;  %v10192_v62 = vpop.f32.mrf.mxu0 }
 0x3e9   : > { %v12843_v13 = vadd.f32 %v5811_v46, %v5526_v24  ;;  %v5529_v51 = vadd.f32 %v10140_v47, %v12738_v9  ;;  %v7643_v46 = vpack.c.bf16 %v7617_v55, %v7616_v53 }
 0x3ea   : > { %v5410_v19 = vpop.f32.mrf.mxu1  ;;  %v5814_v6 = vpop.f32.mrf.mxu0 }
 0x3eb   : > { %v12846_v12 = vadd.f32 %v10192_v62, %v5529_v51  ;;  %v5527_v58 = vadd.f32 %v5410_v19, %v12743_v42 }
 0x3ec   : > { %v10143_v5 = vpop.f32.mrf.mxu1  ;;  %10442 = vmatmul.mubr.bf16.gmra.mxu1 %v7641_v27  ;;  %v10195_v10 = vpop.f32.mrf.mxu0 }
 0x3ed   : > { %v12849_v18 = vadd.f32 %v5814_v6, %v5527_v58  ;;  %v5532_v8 = vadd.f32 %v10143_v5, %v12747_v28  ;;  %10445 = vmatprep.mubr.bf16.mxu1 %v7642_v2  ;;  %v7619_v28 = vld [vmem:[#allocation3 + $0xd3] sm:$0xff]  ;;  %v7620_v6 = vld [vmem:[#allocation3 + $0xdb] sm:$0xff]  ;;  %v7622_v5 = vld [vmem:[#allocation3 + $0xeb] sm:$0xff] }
 0x3ee   : > { %v5423_v9 = vpop.f32.mrf.mxu1  ;;  %v5827_v20 = vpop.f32.mrf.mxu0  ;;  %v7644_v51 = vpack.c.bf16 %v7619_v28, %v7618_v50 }
 0x3ef   : > { %v12852_v26 = vadd.f32 %v10195_v10, %v5532_v8  ;;  %v5530_v15 = vadd.f32 %v5423_v9, %v12749_v41  ;;  %v7621_v9 = vld [vmem:[#allocation3 + $0xe3] sm:$0xff] }
 0x3f0   : > { %v10144_v45 = vpop.f32.mrf.mxu1  ;;  %v10196_v60 = vpop.f32.mrf.mxu0 }
 0x3f1   : > { %v12855_v42 = vadd.f32 %v5827_v20, %v5530_v15  ;;  %v5533_v16 = vadd.f32 %v10144_v45, %v12751_v44  ;;  %v7645_v20 = vpack.c.bf16 %v7621_v9, %v7620_v6 }
 0x3f2   : > { %v5426_v24 = vpop.f32.mrf.mxu1  ;;  %v5830_v1 = vpop.f32.mrf.mxu0 }
 0x3f3   : > { %v12858_v54 = vadd.f32 %v10196_v60, %v5533_v16  ;;  %v5531_v47 = vadd.f32 %v5426_v24, %v12753_v32 }
 0x3f4   : > { %v10147_v41 = vpop.f32.mrf.mxu1  ;;  %10446 = vmatmul.mubr.bf16.gmra.mxu1 %v7643_v46  ;;  %v10199_v19 = vpop.f32.mrf.mxu0 }
 0x3f5   : > { %v12861_v62 = vadd.f32 %v5830_v1, %v5531_v47  ;;  %v5536_v11 = vadd.f32 %v10147_v41, %v12757_v29  ;;  %10449 = vmatprep.mubr.bf16.mxu1 %v7644_v51  ;;  %v7623_v29 = vld [vmem:[#allocation3 + $0xf3] sm:$0xff]  ;;  %v7624_v1 = vld [vmem:[#allocation3 + $0xfb] sm:$0xff]  ;;  %v7626_v41 = vld [vmem:[#allocation3 + $0x10b] sm:$0xff] }
 0x3f6   : > { %v5439_v44 = vpop.f32.mrf.mxu1  ;;  %v5843_v58 = vpop.f32.mrf.mxu0  ;;  %v7646_v16 = vpack.c.bf16 %v7623_v29, %v7622_v5  ;;  %v10627_v5 = vld [vmem:[#allocation3 + $0x137] sm:$0xff] }
 0x3f7   : > { %v12864_v27 = vadd.f32 %v10199_v19, %v5536_v11  ;;  %v5534_v57 = vadd.f32 %v5439_v44, %v12759_v34  ;;  %v7625_v44 = vld [vmem:[#allocation3 + $0x103] sm:$0xff] }
 0x3f8   : > { %v10148_v2 = vpop.f32.mrf.mxu1  ;;  %v10200_v10 = vpop.f32.mrf.mxu0 }
 0x3f9   : > { %v12867_v32 = vadd.f32 %v5843_v58, %v5534_v57  ;;  %v5537_v8 = vadd.f32 %v10148_v2, %v12761_v21  ;;  %v7647_v58 = vpack.c.bf16 %v7625_v44, %v7624_v1 }
 0x3fa   : > { %v5442_v15 = vpop.f32.mrf.mxu1  ;;  %v5846_v50 = vpop.f32.mrf.mxu0 }
 0x3fb   : > { %v12870_v55 = vadd.f32 %v10200_v10, %v5537_v8  ;;  %v5535_v45 = vadd.f32 %v5442_v15, %v12763_v56  ;;  %v7648_v8 = vpack.c.bf16 %v10627_v5, %v7626_v41  ;;  %v7632_v5 = vld [vmem:[#allocation3 + $0x13b] sm:$0xff] }
 0x3fc   : > { %v10151_v34 = vpop.f32.mrf.mxu1  ;;  %10450 = vmatmul.mubr.bf16.gmra.mxu1 %v7645_v20  ;;  %v10203_v24 = vpop.f32.mrf.mxu0 }
 0x3fd   : > { %v12873_v60 = vadd.f32 %v5846_v50, %v5535_v45  ;;  %v5540_v53 = vadd.f32 %v10151_v34, %v12767_v7  ;;  %10453 = vmatprep.mubr.bf16.mxu1 %v7646_v16  ;;  %v7629_v50 = vld [vmem:[#allocation3 + $0x123] sm:$0xff] }
 0x3fe   : > { %v5455_v21 = vpop.f32.mrf.mxu1  ;;  %v5859_v47 = vpop.f32.mrf.mxu0 }
 0x3ff   : > { %v12876_v46 = vadd.f32 %v10203_v24, %v5540_v53  ;;  %v5538_v28 = vadd.f32 %v5455_v21, %v12769_v22  ;;  %v7628_v21 = vld [vmem:[#allocation3 + $0x11b] sm:$0xff] }
 0x400   : > { %v10152_v51 = vpop.f32.mrf.mxu1  ;;  %v10204_v19 = vpop.f32.mrf.mxu0 }
 0x401   : > { %v12879_v56 = vadd.f32 %v5859_v47, %v5538_v28  ;;  %v5541_v11 = vadd.f32 %v10152_v51, %v12771_v3  ;;  %v7649_v47 = vpack.c.bf16 %v7629_v50, %v7628_v21 }
 0x402   : > { %v5458_v57 = vpop.f32.mrf.mxu1  ;;  %v5862_v2 = vpop.f32.mrf.mxu0 }
 0x403   : > { %v12882_v7 = vadd.f32 %v10204_v19, %v5541_v11  ;;  %v5539_v6 = vadd.f32 %v5458_v57, %v12773_v0  ;;  %v7631_v0 = vld [vmem:[#allocation3 + $0x133] sm:$0xff] }
 0x404   : > { %v10223_v22 = vpop.f32.mrf.mxu1  ;;  %10454 = vmatmul.mubr.bf16.gmra.mxu1 %v7647_v58  ;;  %v10275_v15 = vpop.f32.mrf.mxu0 }
 0x405   : > { %v12885_v10 = vadd.f32 %v5862_v2, %v5539_v6  ;;  %v6316_v9 = vadd.f32 %v10223_v22, %v12778_v59  ;;  %10457 = vmatprep.mubr.bf16.mxu1 %v7648_v8  ;;  %v7630_v59 = vld [vmem:[#allocation3 + $0x12b] sm:$0xff]  ;;  %v7633_v8 = vld [vmem:[#allocation3 + $0x143] sm:$0xff] }
 0x406   : > { %v6135_v3 = vpop.f32.mrf.mxu1  ;;  %v6539_v45 = vpop.f32.mrf.mxu0  ;;  %v7650_v11 = vpack.c.bf16 %v7631_v0, %v7630_v59 }
 0x407   : > { %v12888_v20 = vadd.f32 %v10275_v15, %v6316_v9  ;;  %v6314_v29 = vadd.f32 %v6135_v3, %v12781_v30 }
 0x408   : > { %v10224_v16 = vpop.f32.mrf.mxu1  ;;  %v10276_v24 = vpop.f32.mrf.mxu0 }
 0x409   : > { %v12891_v34 = vadd.f32 %v6539_v45, %v6314_v29  ;;  %v6317_v53 = vadd.f32 %v10224_v16, %v12784_v35  ;;  %v7651_v29 = vpack.c.bf16 %v7633_v8, %v7632_v5 }
 0x40a   : > { %v6138_v28 = vpop.f32.mrf.mxu1  ;;  %v6542_v41 = vpop.f32.mrf.mxu0 }
 0x40b   : > { %v12894_v1 = vadd.f32 %v10276_v24, %v6317_v53  ;;  %v6315_v51 = vadd.f32 %v6138_v28, %v12788_v39 }
 0x40c   : > { %v10227_v30 = vpop.f32.mrf.mxu1  ;;  %10458 = vmatmul.mubr.bf16.gmra.mxu1 %v7649_v47  ;;  %v10279_v57 = vpop.f32.mrf.mxu0 }
 0x40d   : > { %v12897_v19 = vadd.f32 %v6542_v41, %v6315_v51  ;;  %v6320_v44 = vadd.f32 %v10227_v30, %v12792_v36  ;;  %10461 = vmatprep.mubr.bf16.mxu1 %v7650_v11 }
 0x40e   : > { %v6151_v35 = vpop.f32.mrf.mxu1  ;;  %v6555_v2 = vpop.f32.mrf.mxu0 }
 0x40f   : > { %v12900_v58 = vadd.f32 %v10279_v57, %v6320_v44  ;;  %v6318_v6 = vadd.f32 %v6151_v35, %v12795_v40 }
 0x410   : > { %v10228_v22 = vpop.f32.mrf.mxu1  ;;  %v10280_v15 = vpop.f32.mrf.mxu0 }
 0x411   : > { %v12903_v39 = vadd.f32 %v6555_v2, %v6318_v6  ;;  %v6321_v9 = vadd.f32 %v10228_v22, %v12798_v52 }
 0x412   : > { %v6154_v3 = vpop.f32.mrf.mxu1  ;;  %v6558_v50 = vpop.f32.mrf.mxu0 }
 0x413   : > { %v12906_v45 = vadd.f32 %v10280_v15, %v6321_v9  ;;  %v6319_v36 = vadd.f32 %v6154_v3, %v12801_v48 }
 0x414   : > { %v10231_v16 = vpop.f32.mrf.mxu1  ;;  %10462 = vmatmul.mubr.bf16.gmra.mxu1 %v7651_v29  ;;  %v10283_v53 = vpop.f32.mrf.mxu0 }
 0x415   : > { %v12909_v0 = vadd.f32 %v6558_v50, %v6319_v36  ;;  %v6324_v40 = vadd.f32 %v10231_v16, %v12804_v14 }
 0x416   : > { %v6167_v24 = vpop.f32.mrf.mxu1  ;;  %v6571_v28 = vpop.f32.mrf.mxu0 }
 0x417   : > { %v12912_v21 = vadd.f32 %v10283_v53, %v6324_v40  ;;  %v6322_v52 = vadd.f32 %v6167_v24, %v12807_v37 }
 0x418   : > { %v10232_v47 = vpop.f32.mrf.mxu1  ;;  %v10284_v48 = vpop.f32.mrf.mxu0 }
 0x419   : > { %v12915_v59 = vadd.f32 %v6571_v28, %v6322_v52  ;;  %v6325_v51 = vadd.f32 %v10232_v47, %v12810_v43 }
 0x41a   : > { %v6170_v41 = vpop.f32.mrf.mxu1  ;;  %v6574_v44 = vpop.f32.mrf.mxu0 }
 0x41b   : > { %v12918_v11 = vadd.f32 %v10284_v48, %v6325_v51  ;;  %v6323_v30 = vadd.f32 %v6170_v41, %v12813_v49 }
 0x41c   : > { %v10235_v14 = vpop.f32.mrf.mxu1  ;;  %v10287_v6 = vpop.f32.mrf.mxu0 }
 0x41d   : > { %v12921_v57 = vadd.f32 %v6574_v44, %v6323_v30  ;;  %v6328_v35 = vadd.f32 %v10235_v14, %v12816_v23 }
 0x41e   : > { %v6183_v37 = vpop.f32.mrf.mxu1  ;;  %v6587_v8 = vpop.f32.mrf.mxu0 }
 0x41f   : > { %v12924_v2 = vadd.f32 %v10287_v6, %v6328_v35  ;;  %v6326_v5 = vadd.f32 %v6183_v37, %v12819_v61 }
 0x420   : > { %v10236_v43 = vpop.f32.mrf.mxu1  ;;  %v10288_v15 = vpop.f32.mrf.mxu0 }
 0x421   : > { %v12927_v22 = vadd.f32 %v6587_v8, %v6326_v5  ;;  %v6329_v9 = vadd.f32 %v10236_v43, %v12822_v38 }
 0x422   : > { %v6186_v49 = vpop.f32.mrf.mxu1  ;;  %v6590_v36 = vpop.f32.mrf.mxu0 }
 0x423   : > { %v12930_v3 = vadd.f32 %v10288_v15, %v6329_v9  ;;  %v6327_v29 = vadd.f32 %v6186_v49, %v12825_v31 }
 0x424   : > { %v10239_v23 = vpop.f32.mrf.mxu1  ;;  %v10291_v40 = vpop.f32.mrf.mxu0 }
 0x425   : > { %v12933_v50 = vadd.f32 %v6590_v36, %v6327_v29  ;;  %v6332_v16 = vadd.f32 %v10239_v23, %v12828_v25 }
 0x426   : > { %v6199_v61 = vpop.f32.mrf.mxu1  ;;  %v6603_v52 = vpop.f32.mrf.mxu0 }
 0x427   : > { %v12936_v53 = vadd.f32 %v10291_v40, %v6332_v16  ;;  %v6330_v24 = vadd.f32 %v6199_v61, %v12831_v63 }
 0x428   : > { %v10240_v38 = vpop.f32.mrf.mxu1  ;;  %v10292_v51 = vpop.f32.mrf.mxu0 }
 0x429   : > { %v12939_v28 = vadd.f32 %v6603_v52, %v6330_v24  ;;  %v6333_v47 = vadd.f32 %v10240_v38, %v12834_v33 }
 0x42a   : > { %v6202_v31 = vpop.f32.mrf.mxu1  ;;  %v6606_v30 = vpop.f32.mrf.mxu0 }
 0x42b   : > { %v12942_v48 = vadd.f32 %v10292_v51, %v6333_v47  ;;  %v6331_v41 = vadd.f32 %v6202_v31, %v12837_v4 }
 0x42c   : > { %v10243_v25 = vpop.f32.mrf.mxu1  ;;  %v10295_v35 = vpop.f32.mrf.mxu0 }
 0x42d   : > { %v12945_v44 = vadd.f32 %v6606_v30, %v6331_v41  ;;  %v6336_v14 = vadd.f32 %v10243_v25, %v12840_v17 }
 0x42e   : > { %v6215_v63 = vpop.f32.mrf.mxu1  ;;  %v6619_v5 = vpop.f32.mrf.mxu0 }
 0x42f   : > { %v12948_v6 = vadd.f32 %v10295_v35, %v6336_v14  ;;  %v6334_v37 = vadd.f32 %v6215_v63, %v12843_v13 }
 0x430   : > { %v10244_v33 = vpop.f32.mrf.mxu1  ;;  %v10296_v9 = vpop.f32.mrf.mxu0 }
 0x431   : > { %v12951_v8 = vadd.f32 %v6619_v5, %v6334_v37  ;;  %v6337_v43 = vadd.f32 %v10244_v33, %v12846_v12 }
 0x432   : > { %v6218_v4 = vpop.f32.mrf.mxu1  ;;  %v6622_v29 = vpop.f32.mrf.mxu0 }
 0x433   : > { %v12954_v15 = vadd.f32 %v10296_v9, %v6337_v43  ;;  %v6335_v49 = vadd.f32 %v6218_v4, %v12849_v18 }
 0x434   : > { %v10247_v17 = vpop.f32.mrf.mxu1  ;;  %v10299_v16 = vpop.f32.mrf.mxu0 }
 0x435   : > { %v12957_v36 = vadd.f32 %v6622_v29, %v6335_v49  ;;  %v6340_v23 = vadd.f32 %v10247_v17, %v12852_v26 }
 0x436   : > { %v6231_v13 = vpop.f32.mrf.mxu1  ;;  %v6635_v24 = vpop.f32.mrf.mxu0 }
 0x437   : > { %v12960_v40 = vadd.f32 %v10299_v16, %v6340_v23  ;;  %v6338_v61 = vadd.f32 %v6231_v13, %v12855_v42 }
 0x438   : > { %v10248_v12 = vpop.f32.mrf.mxu1  ;;  %v10300_v47 = vpop.f32.mrf.mxu0 }
 0x439   : > { %v12963_v52 = vadd.f32 %v6635_v24, %v6338_v61  ;;  %v6341_v38 = vadd.f32 %v10248_v12, %v12858_v54 }
 0x43a   : > { %v6234_v18 = vpop.f32.mrf.mxu1  ;;  %v6638_v41 = vpop.f32.mrf.mxu0 }
 0x43b   : > { %v12966_v51 = vadd.f32 %v10300_v47, %v6341_v38  ;;  %v6339_v31 = vadd.f32 %v6234_v18, %v12861_v62 }
 0x43c   : > { %v10251_v26 = vpop.f32.mrf.mxu1  ;;  %v10303_v14 = vpop.f32.mrf.mxu0 }
 0x43d   : > { %v12969_v30 = vadd.f32 %v6638_v41, %v6339_v31  ;;  %v6344_v25 = vadd.f32 %v10251_v26, %v12864_v27 }
 0x43e   : > { %v6247_v42 = vpop.f32.mrf.mxu1  ;;  %v6651_v37 = vpop.f32.mrf.mxu0 }
 0x43f   : > { %v12972_v35 = vadd.f32 %v10303_v14, %v6344_v25  ;;  %v6342_v63 = vadd.f32 %v6247_v42, %v12867_v32 }
 0x440   : > { %v10252_v54 = vpop.f32.mrf.mxu1  ;;  %v10304_v43 = vpop.f32.mrf.mxu0 }
 0x441   : > { %v12975_v5 = vadd.f32 %v6651_v37, %v6342_v63  ;;  %v6345_v33 = vadd.f32 %v10252_v54, %v12870_v55 }
 0x442   : > { %v6250_v62 = vpop.f32.mrf.mxu1  ;;  %v6654_v49 = vpop.f32.mrf.mxu0 }
 0x443   : > { %v12978_v9 = vadd.f32 %v10304_v43, %v6345_v33  ;;  %v6343_v4 = vadd.f32 %v6250_v62, %v12873_v60 }
 0x444   : > { %v10255_v27 = vpop.f32.mrf.mxu1  ;;  %v10307_v23 = vpop.f32.mrf.mxu0 }
 0x445   : > { %v12981_v29 = vadd.f32 %v6654_v49, %v6343_v4  ;;  %v6348_v17 = vadd.f32 %v10255_v27, %v12876_v46 }
 0x446   : > { %v6263_v32 = vpop.f32.mrf.mxu1  ;;  %v6667_v61 = vpop.f32.mrf.mxu0 }
 0x447   : > { %v12984_v16 = vadd.f32 %v10307_v23, %v6348_v17  ;;  %v6346_v13 = vadd.f32 %v6263_v32, %v12879_v56 }
 0x448   : > { %v10256_v55 = vpop.f32.mrf.mxu1  ;;  %v10308_v38 = vpop.f32.mrf.mxu0 }
 0x449   : > { %v12987_v24 = vadd.f32 %v6667_v61, %v6346_v13  ;;  %v6349_v12 = vadd.f32 %v10256_v55, %v12882_v7 }
 0x44a   : > { %v6266_v60 = vpop.f32.mrf.mxu1  ;;  %v6670_v31 = vpop.f32.mrf.mxu0 }
 0x44b   : > { %v12990_v47 = vadd.f32 %v10308_v38, %v6349_v12  ;;  %v6347_v18 = vadd.f32 %v6266_v60, %v12885_v10 }
 0x44c   : > { %v10327_v46 = vpop.f32.mrf.mxu1  ;;  %v12998_v56 = vpop.f32.mrf.mxu0 }
 0x44d   : > { %v12993_v41 = vadd.f32 %v6670_v31, %v6347_v18  ;;  %v12996_v26 = vadd.f32 %v10327_v46, %v12888_v20 }
 0x44e   : > { %v6943_v25 = vpop.f32.mrf.mxu1  ;;  %v13003_v7 = vpop.f32.mrf.mxu0 }
 0x44f   : > { %v13001_v14 = vadd.f32 %v6943_v25, %v12891_v34 }
 0x450   : > { %v10328_v42 = vpop.f32.mrf.mxu1  ;;  %v13008_v10 = vpop.f32.mrf.mxu0 }
 0x451   : > { %v13006_v63 = vadd.f32 %v10328_v42, %v12894_v1 }
 0x452   : > { %v6946_v37 = vpop.f32.mrf.mxu1  ;;  %v13016_v43 = vpop.f32.mrf.mxu0 }
 0x453   : > { %v13011_v54 = vadd.f32 %v6946_v37, %v12897_v19 }
 0x454   : > { %v10331_v20 = vpop.f32.mrf.mxu1  ;;  %v13024_v49 = vpop.f32.mrf.mxu0 }
 0x455   : > { %v13014_v33 = vadd.f32 %v10331_v20, %v12900_v58 }
 0x456   : > { %v6959_v34 = vpop.f32.mrf.mxu1  ;;  %v13032_v23 = vpop.f32.mrf.mxu0 }
 0x457   : > { %v13019_v62 = vadd.f32 %v6959_v34, %v12903_v39 }
 0x458   : > { %v10332_v4 = vpop.f32.mrf.mxu1  ;;  %v13040_v61 = vpop.f32.mrf.mxu0 }
 0x459   : > { %v13022_v1 = vadd.f32 %v10332_v4, %v12906_v45 }
 0x45a   : > { %v6962_v27 = vpop.f32.mrf.mxu1  ;;  %v13048_v38 = vpop.f32.mrf.mxu0 }
 0x45b   : > { %v13027_v19 = vadd.f32 %v6962_v27, %v12909_v0 }
 0x45c   : > { %v10335_v17 = vpop.f32.mrf.mxu1  ;;  %v13056_v31 = vpop.f32.mrf.mxu0 }
 0x45d   : > { %v13030_v58 = vadd.f32 %v10335_v17, %v12912_v21 }
 0x45e   : > { %v6975_v32 = vpop.f32.mrf.mxu1  ;;  %v13064_v42 = vpop.f32.mrf.mxu0 }
 0x45f   : > { %v13035_v39 = vadd.f32 %v6975_v32, %v12915_v59 }
 0x460   : > { %v10336_v13 = vpop.f32.mrf.mxu1  ;;  %v13072_v34 = vpop.f32.mrf.mxu0 }
 0x461   : > { %v13038_v45 = vadd.f32 %v10336_v13, %v12918_v11  ;;  %v8077_v13 = vpop.permute.xlu0 %8076 }
 0x462   : > { %v6978_v55 = vpop.f32.mrf.mxu1  ;;  %v13080_v17 = vpop.f32.mrf.mxu0 }
 0x463   : > { %v13043_v0 = vadd.f32 %v6978_v55, %v12921_v57 }
 0x464   : > { %v10339_v12 = vpop.f32.mrf.mxu1 }
 0x465   : > { %v13046_v21 = vadd.f32 %v10339_v12, %v12924_v2 }
 0x466   : > { %v6991_v60 = vpop.f32.mrf.mxu1 }
 0x467   : > { %v13051_v59 = vadd.f32 %v6991_v60, %v12927_v22  ;;  %v13090_v60 = vpop.f32.mrf.mxu0 }
 0x468   : > { %v10340_v18 = vpop.f32.mrf.mxu1 }
 0x469   : > { %v13054_v11 = vadd.f32 %v10340_v18, %v12930_v3 }
 0x46a   : > { %v6994_v46 = vpop.f32.mrf.mxu1 }
 0x46b   : > { %v13059_v57 = vadd.f32 %v6994_v46, %v12933_v50  ;;  %v8087_v46 = vpop.permute.xlu0 %8086 }
 0x46c   : > { %v10343_v25 = vpop.f32.mrf.mxu1 }
 0x46d   : > { %v13062_v2 = vadd.f32 %v10343_v25, %v12936_v53 }
 0x46e   : > { %v7007_v37 = vpop.f32.mrf.mxu1 }
 0x46f   : > { %v13067_v22 = vadd.f32 %v7007_v37, %v12939_v28  ;;  %v13098_v37 = vpop.f32.mrf.mxu0 }
 0x470   : > { %v10344_v20 = vpop.f32.mrf.mxu1 }
 0x471   : > { %v13070_v3 = vadd.f32 %v10344_v20, %v12942_v48  ;;  %v13085_v48 = vpop.permute.xlu1 %8081 }
 0x472   : > { %v7010_v4 = vpop.f32.mrf.mxu1 }
 0x473   : > { %v13075_v50 = vadd.f32 %v7010_v4, %v12945_v44 }
 0x474   : > { %v10347_v27 = vpop.f32.mrf.mxu1 }
 0x475   : > { %v13078_v53 = vadd.f32 %v10347_v27, %v12948_v6  ;;  %v8092_v20 = vpop.permute.xlu1 %8091 }
 0x476   : > { %v7023_v32 = vpop.f32.mrf.mxu1 }
 0x477   : > { %13801 = vst [vmem:[#allocation26_spill] sm:$0xff] %v13078_v53  ;;  %v13083_v28 = vadd.f32 %v7023_v32, %v12951_v8  ;;  %v13106_v32 = vpop.f32.mrf.mxu0 }
 0x478   : > { %v10348_v55 = vpop.f32.mrf.mxu1 }
 0x479   : > { %v13088_v12 = vadd.f32 %v10348_v55, %v12954_v15  ;;  %v13108_v55 = vpop.permute.xlu0 %8096 }
 0x47a   : > { %v7026_v44 = vpop.f32.mrf.mxu1 }
 0x47b   : > { %13802 = vst [vmem:[#allocation36_spill] sm:$0xff] %v13088_v12  ;;  %v13093_v18 = vadd.f32 %v7026_v44, %v12957_v36 }
 0x47c   : > { %v10351_v6 = vpop.f32.mrf.mxu1 }
 0x47d   : > { %13803 = vst [vmem:[#allocation28_spill] sm:$0xff] %v13093_v18  ;;  %v13096_v25 = vadd.f32 %v10351_v6, %v12960_v40  ;;  %v13113_v6 = vpop.permute.xlu1 %8101 }
 0x47e   : > { %v7039_v8 = vpop.f32.mrf.mxu1 }
 0x47f   : > { %13804 = vst [vmem:[#allocation17_spill] sm:$0xff] %v13096_v25  ;;  %v13101_v4 = vadd.f32 %v7039_v8, %v12963_v52  ;;  %v13118_v52 = vpop.f32.mrf.mxu0 }
 0x480   : > { %v10352_v15 = vpop.f32.mrf.mxu1 }
 0x481   : > { %13805 = vst [vmem:[#allocation27_spill] sm:$0xff] %v13101_v4  ;;  %v13104_v27 = vadd.f32 %v10352_v15, %v12966_v51 }
 0x482   : > { %v7042_v36 = vpop.f32.mrf.mxu1 }
 0x483   : > { %13806 = vst [vmem:[#allocation42_spill] sm:$0xff] %v13104_v27  ;;  %v13111_v44 = vadd.f32 %v7042_v36, %v12969_v30  ;;  %v13123_v27 = vpop.permute.xlu0 %8106  ;;  %v13128_v30 = vpop.f32.mrf.mxu0 }
 0x484   : > { %v10355_v40 = vpop.f32.mrf.mxu1 }
 0x485   : > { %13807 = vst [vmem:[#allocation5_spill] sm:$0xff] %v13111_v44  ;;  %v13116_v25 = vadd.f32 %v10355_v40, %v12972_v35  ;;  %v13130_v44 = vpop.permute.xlu1 %8111 }
 0x486   : > { %v7055_v8 = vpop.f32.mrf.mxu1 }
 0x487   : > { %13808 = vst [vmem:[#allocation8_spill] sm:$0xff] %v13116_v25  ;;  %v13121_v51 = vadd.f32 %v7055_v8, %v12975_v5  ;;  %v13138_v5 = vpop.f32.mrf.mxu0 }
 0x488   : > { %v10356_v15 = vpop.f32.mrf.mxu1 }
 0x489   : > { %13809 = vst [vmem:[#allocation30_spill] sm:$0xff] %v13121_v51  ;;  %v13126_v4 = vadd.f32 %v10356_v15, %v12978_v9  ;;  %v13140_v51 = vpop.permute.xlu0 %8116 }
 0x48a   : > { %v7058_v36 = vpop.f32.mrf.mxu1 }
 0x48b   : > { %13810 = vst [vmem:[#allocation32_spill] sm:$0xff] %v13126_v4  ;;  %v13133_v35 = vadd.f32 %v7058_v36, %v12981_v29  ;;  %v13145_v4 = vpop.permute.xlu1 %8121  ;;  %v13150_v29 = vpop.f32.mrf.mxu0 }
 0x48c   : > { %v10359_v40 = vpop.f32.mrf.mxu1 }
 0x48d   : > { %13811 = vst [vmem:[#allocation18_spill] sm:$0xff] %v13133_v35  ;;  %v13136_v25 = vadd.f32 %v10359_v40, %v12984_v16  ;;  %v7526_v35 = vadd.f32 %v13003_v7, %v13001_v14 }
 0x48e   : > { %v7071_v8 = vpop.f32.mrf.mxu1 }
 0x48f   : > { %13812 = vst [vmem:[#allocation29_spill] sm:$0xff] %v13136_v25  ;;  %v13143_v9 = vadd.f32 %v7071_v8, %v12987_v24  ;;  %v13155_v25 = vpop.permute.xlu0 %8126  ;;  %v13159_v24 = vpop.f32.mrf.mxu0 }
 0x490   : > { %v10360_v15 = vpop.f32.mrf.mxu1 }
 0x491   : > { %13813 = vst [vmem:[#allocation47_spill] sm:$0xff] %v13143_v9  ;;  %v13148_v18 = vadd.f32 %v10360_v15, %v12990_v47  ;;  %v13161_v9 = vpop.permute.xlu1 %8131  ;;  %v7528_v47 = vadd.f32 %v12998_v56, %v12996_v26  ;;  %v13173_v14 = vpop.f32.mrf.mxu0 }
 0x492   : > { %v7074_v36 = vpop.f32.mrf.mxu1 }
 0x493   : > { %13814 = vst [vmem:[#allocation31_spill] sm:$0xff] %v13148_v18  ;;  %v13153_v16 = vadd.f32 %v7074_v36, %v12993_v41  ;;  %v7529_v41 = vadd.f32 %v13008_v10, %v13006_v63  ;;  %v13177_v53 = vpop.permute.xlu0 %8136  ;;  %v7530_v63 = vadd.f32 %v13032_v23, %v13019_v62  ;;  %v7533_v62 = vadd.f32 %v13040_v61, %v13022_v1 }
 0x494   : > { %v10431_v40 = vpop.f32.mrf.mxu1  ;;  %v7531_v23 = vadd.f32 %v13048_v38, %v13027_v19 }
 0x495   : > { %13815 = vst [vmem:[#allocation19_spill] sm:$0xff] %v13153_v16  ;;  %v7527_v16 = vadd.f32 %v13016_v43, %v13011_v54  ;;  %v13171_v18 = vadd.f32 %v10431_v40, %v7528_v47  ;;  %v7532_v43 = vadd.f32 %v13024_v49, %v13014_v33  ;;  %v13191_v40 = vpop.f32.mrf.mxu0 }
 0x496   : > { %v7751_v8 = vpop.f32.mrf.mxu1 }
 0x497   : > { %v13165_v15 = vadd.f32 %v7751_v8, %v7526_v35  ;;  %13816 = vst [vmem:[#allocation9_spill] sm:$0xff] %v13171_v18  ;;  %v13182_v8 = vpop.permute.xlu1 %8141  ;;  %v8256_v10 = vmul.f32 %v8087_v46, %v13171_v18  ;;  %v13202_v33 = vpop.permute.xlu0 %8146 }
 0x498   : > { %v10432_v36 = vpop.f32.mrf.mxu1 }
 0x499   : > { %v13175_v7 = vadd.f32 %v10432_v36, %v7529_v41  ;;  %v8254_v26 = vmul.f32 %v8077_v13, %v13165_v15  ;;  %v8334_v49 = vmul.f32 %v8256_v10, %v8256_v10 }
 0x49a   : > { %v7754_v12 = vpop.f32.mrf.mxu1 }
 0x49b   : > { %13817 = vst [vmem:[#allocation10_spill] sm:$0xff] %v13175_v7  ;;  %v13180_v56 = vadd.f32 %v7754_v12, %v7527_v16  ;;  %v8257_v13 = vmul.f32 %v8092_v20, %v13175_v7  ;;  %v8332_v16 = vmul.f32 %v8254_v26, %v8254_v26  ;;  %v13208_v7 = vpop.permute.xlu1 %8151 }
 0x49c   : > { %v10435_v35 = vpop.f32.mrf.mxu1 }
 0x49d   : > { %v8255_v54 = vmul.f32 %v13085_v48, %v13180_v56  ;;  %v13200_v48 = vadd.f32 %v10435_v35, %v7532_v43 }
 0x49e   : > { %v7767_v12 = vpop.f32.mrf.mxu1 }
 0x49f   : > { %v8290_v47 = vadd.f32 %v8255_v54, %v8254_v26  ;;  %v8333_v41 = vmul.f32 %v8255_v54, %v8255_v54  ;;  %v13194_v36 = vadd.f32 %v7767_v12, %v7530_v63  ;;  %v13206_v54 = vpop.f32.mrf.mxu0  ;;  %v8335_v63 = vmul.f32 %v8257_v13, %v8257_v13 }
 0x4a0   : > { %v10436_v46 = vpop.f32.mrf.mxu1  ;;  %v8260_v35 = vmul.f32 %v13123_v27, %v13200_v48 }
 0x4a1   : > { %v8291_v18 = vadd.f32 %v8290_v47, %v8256_v10  ;;  %v8368_v20 = vadd.f32 %v8333_v41, %v8332_v16  ;;  %v8258_v26 = vmul.f32 %v13108_v55, %v13194_v36  ;;  %v13210_v19 = vadd.f32 %v10436_v46, %v7533_v62 }
 0x4a2   : > { %v7770_v12 = vpop.f32.mrf.mxu1  ;;  %v7536_v41 = vadd.f32 %v13056_v31, %v13030_v58 }
 0x4a3   : > { %v8369_v1 = vadd.f32 %v8368_v20, %v8334_v49  ;;  %v8292_v61 = vadd.f32 %v8291_v18, %v8257_v13  ;;  %v13212_v38 = vadd.f32 %v7770_v12, %v7531_v23  ;;  %v8336_v16 = vmul.f32 %v8258_v26, %v8258_v26  ;;  %v13222_v13 = vpop.f32.mrf.mxu0  ;;  %v13224_v23 = vpop.permute.xlu0 %8156 }
 0x4a4   : > { %v10439_v10 = vpop.f32.mrf.mxu1  ;;  %v7534_v18 = vadd.f32 %v13064_v42, %v13035_v39  ;;  %v8261_v27 = vmul.f32 %v13130_v44, %v13210_v19  ;;  %v13234_v39 = vpop.permute.xlu1 %8161  ;;  %v7535_v42 = vadd.f32 %v13080_v17, %v13043_v0 }
 0x4a5   : > { %v8293_v43 = vadd.f32 %v8292_v61, %v8258_v26  ;;  %v8370_v47 = vadd.f32 %v8369_v1, %v8335_v63  ;;  %v8259_v55 = vmul.f32 %v13113_v6, %v13212_v38  ;;  %v7537_v6 = vadd.f32 %v13072_v34, %v13038_v45  ;;  %v13238_v61 = vpop.f32.mrf.mxu0 }
 0x4a6   : > { %v7783_v62 = vpop.f32.mrf.mxu1  ;;  %v13230_v26 = vadd.f32 %v10439_v10, %v7536_v41  ;;  %v8338_v63 = vmul.f32 %v8260_v35, %v8260_v35  ;;  %v8339_v34 = vmul.f32 %v8261_v27, %v8261_v27 }
 0x4a7   : > { %v8371_v46 = vadd.f32 %v8370_v47, %v8336_v16  ;;  %v8294_v49 = vadd.f32 %v8293_v43, %v8259_v55  ;;  %v8337_v20 = vmul.f32 %v8259_v55, %v8259_v55  ;;  %v13232_v58 = vadd.f32 %v7783_v62, %v7534_v18 }
 0x4a8   : > { %v10440_v31 = vpop.f32.mrf.mxu1  ;;  %v7538_v55 = vadd.f32 %v13098_v37, %v13051_v59  ;;  %v8264_v0 = vmul.f32 %v13155_v25, %v13230_v26 }
 0x4a9   : > { %v8295_v12 = vadd.f32 %v8294_v49, %v8260_v35  ;;  %v8372_v1 = vadd.f32 %v8371_v46, %v8337_v20  ;;  %v8262_v44 = vmul.f32 %v13140_v51, %v13232_v58  ;;  %v13242_v43 = vadd.f32 %v10440_v31, %v7537_v6  ;;  %v13250_v35 = vpop.permute.xlu0 %8166  ;;  %v13260_v49 = vpop.permute.xlu1 %8171 }
 0x4aa   : > { %v7786_v45 = vpop.f32.mrf.mxu1  ;;  %v7540_v46 = vadd.f32 %v13090_v60, %v13046_v21  ;;  %v7541_v60 = vadd.f32 %v13106_v32, %v13054_v11 }
 0x4ab   : > { %v8373_v10 = vadd.f32 %v8372_v1, %v8338_v63  ;;  %v8296_v16 = vadd.f32 %v8295_v12, %v8261_v27  ;;  %v13244_v47 = vadd.f32 %v7786_v45, %v7535_v42  ;;  %v8340_v18 = vmul.f32 %v8262_v44, %v8262_v44  ;;  %v13256_v27 = vpop.f32.mrf.mxu0 }
 0x4ac   : > { %v10443_v17 = vpop.f32.mrf.mxu1  ;;  %v8265_v59 = vmul.f32 %v13161_v9, %v13242_v43  ;;  %v8342_v42 = vmul.f32 %v8264_v0, %v8264_v0  ;;  %v7539_v9 = vadd.f32 %v13118_v52, %v13059_v57 }
 0x4ad   : > { %v8297_v41 = vadd.f32 %v8296_v16, %v8262_v44  ;;  %v8374_v51 = vadd.f32 %v8373_v10, %v8339_v34  ;;  %v8263_v62 = vmul.f32 %v13145_v4, %v13244_v47  ;;  %v13264_v1 = vadd.f32 %v10443_v17, %v7540_v46  ;;  %v13272_v44 = vpop.f32.mrf.mxu0  ;;  %v13274_v34 = vpop.permute.xlu0 %8176 }
 0x4ae   : > { %v7799_v37 = vpop.f32.mrf.mxu1  ;;  %v8343_v10 = vmul.f32 %v8265_v59, %v8265_v59  ;;  %v13282_v11 = vpop.permute.xlu1 %8181 }
 0x4af   : > { %v8375_v25 = vadd.f32 %v8374_v51, %v8340_v18  ;;  %v8298_v20 = vadd.f32 %v8297_v41, %v8263_v62  ;;  %v8341_v6 = vmul.f32 %v8263_v62, %v8263_v62  ;;  %v13262_v31 = vadd.f32 %v7799_v37, %v7538_v55  ;;  %v13286_v51 = vpop.f32.mrf.mxu0 }
 0x4b0   : > { %v10444_v63 = vpop.f32.mrf.mxu1  ;;  %v8268_v57 = vmul.f32 %v13202_v33, %v13264_v1 }
 0x4b1   : > { %v8299_v12 = vadd.f32 %v8298_v20, %v8264_v0  ;;  %v8376_v4 = vadd.f32 %v8375_v25, %v8341_v6  ;;  %v8266_v21 = vmul.f32 %v13177_v53, %v13262_v31  ;;  %v7542_v0 = vadd.f32 %v13138_v5, %v13067_v22  ;;  %v8187_v6 = vpop.permute.xlu0 %8186 }
 0x4b2   : > { %v7802_v45 = vpop.f32.mrf.mxu1  ;;  %v13278_v17 = vadd.f32 %v10444_v63, %v7541_v60  ;;  %v8346_v63 = vmul.f32 %v8268_v57, %v8268_v57 }
 0x4b3   : > { %v8377_v16 = vadd.f32 %v8376_v4, %v8342_v42  ;;  %v8300_v55 = vadd.f32 %v8299_v12, %v8265_v59  ;;  %v13280_v53 = vadd.f32 %v7802_v45, %v7539_v9  ;;  %v8344_v52 = vmul.f32 %v8266_v21, %v8266_v21  ;;  %v13300_v12 = vpop.f32.mrf.mxu0 }
 0x4b4   : > { %v10447_v41 = vpop.f32.mrf.mxu1  ;;  %v7544_v59 = vadd.f32 %v13128_v30, %v13062_v2  ;;  %v8269_v37 = vmul.f32 %v13208_v7, %v13278_v17  ;;  %v7545_v42 = vadd.f32 %v13150_v29, %v13070_v3  ;;  %v8192_v7 = vpop.permute.xlu1 %8191 }
 0x4b5   : > { %v8301_v32 = vadd.f32 %v8300_v55, %v8266_v21  ;;  %v8378_v18 = vadd.f32 %v8377_v16, %v8343_v10  ;;  %v8267_v62 = vmul.f32 %v13182_v8, %v13280_v53  ;;  %v7543_v8 = vadd.f32 %v13159_v24, %v13075_v50  ;;  %v13314_v55 = vpop.f32.mrf.mxu0 }
 0x4b6   : > { %v7815_v46 = vpop.f32.mrf.mxu1  ;;  %v13302_v60 = vadd.f32 %v10447_v41, %v7544_v59  ;;  %v8347_v45 = vmul.f32 %v8269_v37, %v8269_v37  ;;  %v7546_v24 = vadd.f32 %v13191_v40, %v13083_v28 }
 0x4b7   : > { %v8379_v22 = vadd.f32 %v8378_v18, %v8344_v52  ;;  %v13290_v5 = vadd.f32 %v7815_v46, %v7542_v0  ;;  %v8302_v25 = vadd.f32 %v8301_v32, %v8267_v62  ;;  %v8345_v33 = vmul.f32 %v8267_v62, %v8267_v62  ;;  %v8197_v52 = vpop.permute.xlu0 %8196  ;;  %v13818_v18 = vld [vmem:[#allocation26_spill] sm:$0xff] }
 0x4b8   : > { %v10448_v20 = vpop.f32.mrf.mxu1  ;;  %v7548_v62 = vadd.f32 %v13173_v14, %v13818_v18 }
 0x4b9   : > { %v8303_v4 = vadd.f32 %v8302_v25, %v8268_v57  ;;  %v8380_v21 = vadd.f32 %v8379_v22, %v8345_v33  ;;  %v8270_v2 = vmul.f32 %v13224_v23, %v13290_v5  ;;  %v13308_v29 = vadd.f32 %v10448_v20, %v7545_v42  ;;  %v13819_v25 = vld [vmem:[#allocation36_spill] sm:$0xff] }
 0x4ba   : > { %v7818_v30 = vpop.f32.mrf.mxu1  ;;  %v8272_v23 = vmul.f32 %v13250_v35, %v13302_v60  ;;  %v7549_v35 = vadd.f32 %v13206_v54, %v13819_v25  ;;  %v13820_v33 = vld [vmem:[#allocation28_spill] sm:$0xff]  ;;  %v13823_v25 = vld [vmem:[#allocation42_spill] sm:$0xff] }
 0x4bb   : > { %v13306_v9 = vadd.f32 %v7818_v30, %v7543_v8  ;;  %v8381_v10 = vadd.f32 %v8380_v21, %v8346_v63  ;;  %v8304_v3 = vadd.f32 %v8303_v4, %v8269_v37  ;;  %v8348_v41 = vmul.f32 %v8270_v2, %v8270_v2  ;;  %v8202_v37 = vpop.permute.xlu1 %8201  ;;  %v10408_v8 = vpop.f32.mrf.mxu0 }
 0x4bc   : > { %v10451_v50 = vpop.f32.mrf.mxu1  ;;  %v8273_v40 = vmul.f32 %v13260_v49, %v13308_v29  ;;  %v7547_v20 = vadd.f32 %v13222_v13, %v13820_v33  ;;  %v8350_v14 = vmul.f32 %v8272_v23, %v8272_v23  ;;  %v13821_v13 = vld [vmem:[#allocation27_spill] sm:$0xff] }
 0x4bd   : > { %v8271_v16 = vmul.f32 %v13234_v39, %v13306_v9  ;;  %v8305_v0 = vadd.f32 %v8304_v3, %v8270_v2  ;;  %v8382_v57 = vadd.f32 %v8381_v10, %v8347_v45  ;;  %v13328_v42 = vadd.f32 %v10451_v50, %v7548_v62 }
 0x4be   : > { %v7831_v32 = vpop.f32.mrf.mxu1  ;;  %v8351_v30 = vmul.f32 %v8273_v40, %v8273_v40  ;;  %v7550_v50 = vadd.f32 %v13256_v27, %v13821_v13 }
 0x4bf   : > { %v8349_v46 = vmul.f32 %v8271_v16, %v8271_v16  ;;  %v13320_v22 = vadd.f32 %v7831_v32, %v7546_v24  ;;  %v8383_v28 = vadd.f32 %v8382_v57, %v8348_v41  ;;  %v8306_v39 = vadd.f32 %v8305_v0, %v8271_v16  ;;  %v8207_v24 = vpop.permute.xlu0 %8206  ;;  %v7462_v0 = vpop.f32.mrf.mxu0 }
 0x4c0   : > { %v10452_v59 = vpop.f32.mrf.mxu1  ;;  %v8276_v16 = vmul.f32 %v8187_v6, %v13328_v42  ;;  %v8212_v18 = vpop.permute.xlu1 %8211 }
 0x4c1   : > { %v8307_v63 = vadd.f32 %v8306_v39, %v8272_v23  ;;  %v8384_v4 = vadd.f32 %v8383_v28, %v8349_v46  ;;  %v8274_v21 = vmul.f32 %v13274_v34, %v13320_v22  ;;  %v13334_v3 = vadd.f32 %v10452_v59, %v7549_v35  ;;  %v13822_v28 = vld [vmem:[#allocation17_spill] sm:$0xff] }
 0x4c2   : > { %v7834_v2 = vpop.f32.mrf.mxu1  ;;  %v13824_v35 = vld [vmem:[#allocation5_spill] sm:$0xff] }
 0x4c3   : > { %v13332_v49 = vadd.f32 %v7834_v2, %v7547_v20  ;;  %v8385_v45 = vadd.f32 %v8384_v4, %v8350_v14  ;;  %v8308_v10 = vadd.f32 %v8307_v63, %v8273_v40  ;;  %v8352_v41 = vmul.f32 %v8274_v21, %v8274_v21  ;;  %v10411_v14 = vpop.f32.mrf.mxu0 }
 0x4c4   : > { %v10455_v54 = vpop.f32.mrf.mxu1  ;;  %v7552_v40 = vadd.f32 %v13238_v61, %v13822_v28  ;;  %v8277_v27 = vmul.f32 %v8192_v7, %v13334_v3  ;;  %v7551_v33 = vadd.f32 %v13286_v51, %v13824_v35  ;;  %v8354_v20 = vmul.f32 %v8276_v16, %v8276_v16  ;;  %v13825_v51 = vld [vmem:[#allocation30_spill] sm:$0xff]  ;;  %v13826_v28 = vld [vmem:[#allocation8_spill] sm:$0xff] }
 0x4c5   : > { %v8275_v23 = vmul.f32 %v13282_v11, %v13332_v49  ;;  %v8309_v34 = vadd.f32 %v8308_v10, %v8274_v21  ;;  %v8386_v57 = vadd.f32 %v8385_v45, %v8351_v30  ;;  %v7553_v11 = vadd.f32 %v13272_v44, %v13823_v25  ;;  %v8217_v30 = vpop.permute.xlu0 %8216 }
 0x4c6   : > { %v7847_v32 = vpop.f32.mrf.mxu1  ;;  %v13350_v21 = vadd.f32 %v10455_v54, %v7552_v40  ;;  %v8355_v7 = vmul.f32 %v8277_v27, %v8277_v27  ;;  %v7475_v54 = vpop.f32.mrf.mxu0  ;;  %v7556_v40 = vadd.f32 %v13300_v12, %v13826_v28 }
 0x4c7   : > { %v8353_v62 = vmul.f32 %v8275_v23, %v8275_v23  ;;  %v13341_v46 = vadd.f32 %v7847_v32, %v7550_v50  ;;  %v8387_v39 = vadd.f32 %v8386_v57, %v8352_v41  ;;  %v8310_v59 = vadd.f32 %v8309_v34, %v8275_v23  ;;  %v8222_v23 = vpop.permute.xlu1 %8221 }
 0x4c8   : > { %v10456_v6 = vpop.f32.mrf.mxu1  ;;  %v7554_v34 = vadd.f32 %v13314_v55, %v13825_v51  ;;  %v8280_v41 = vmul.f32 %v8207_v24, %v13350_v21 }
 0x4c9   : > { %v8311_v63 = vadd.f32 %v8310_v59, %v8276_v16  ;;  %v8388_v4 = vadd.f32 %v8387_v39, %v8353_v62  ;;  %v8278_v2 = vmul.f32 %v8197_v52, %v13341_v46  ;;  %v13355_v50 = vadd.f32 %v10456_v6, %v7553_v11  ;;  %v8227_v11 = vpop.permute.xlu0 %8226 }
 0x4ca   : > { %v7850_v61 = vpop.f32.mrf.mxu1 }
 0x4cb   : > { %v13353_v45 = vadd.f32 %v7850_v61, %v7551_v33  ;;  %v8389_v10 = vadd.f32 %v8388_v4, %v8354_v20  ;;  %v8312_v13 = vadd.f32 %v8311_v63, %v8277_v27  ;;  %v8356_v57 = vmul.f32 %v8278_v2, %v8278_v2  ;;  %v13828_v33 = vld [vmem:[#allocation18_spill] sm:$0xff]  ;;  %v10412_v63 = vpop.f32.mrf.mxu0 }
 0x4cc   : > { %v10459_v44 = vpop.f32.mrf.mxu1  ;;  %v8281_v6 = vmul.f32 %v8212_v18, %v13355_v50  ;;  %v7555_v24 = vadd.f32 %v7462_v0, %v13828_v33  ;;  %v8358_v4 = vmul.f32 %v8280_v41, %v8280_v41 }
 0x4cd   : > { %v8279_v16 = vmul.f32 %v8202_v37, %v13353_v45  ;;  %v8313_v52 = vadd.f32 %v8312_v13, %v8278_v2  ;;  %v8390_v32 = vadd.f32 %v8389_v10, %v8355_v7  ;;  %v13827_v37 = vld [vmem:[#allocation32_spill] sm:$0xff]  ;;  %v13368_v20 = vadd.f32 %v10459_v44, %v7556_v40  ;;  %v8232_v10 = vpop.permute.xlu1 %8231  ;;  %v8237_v40 = vpop.permute.xlu0 %8236 }
 0x4ce   : > { %v7863_v62 = vpop.f32.mrf.mxu1  ;;  %v7557_v35 = vadd.f32 %v10408_v8, %v13827_v37  ;;  %v8359_v18 = vmul.f32 %v8281_v6, %v8281_v6 }
 0x4cf   : > { %v8357_v39 = vmul.f32 %v8279_v16, %v8279_v16  ;;  %v13363_v27 = vadd.f32 %v7863_v62, %v7554_v34  ;;  %v8391_v59 = vadd.f32 %v8390_v32, %v8356_v57  ;;  %v8314_v25 = vadd.f32 %v8313_v52, %v8279_v16  ;;  %v13829_v52 = vld [vmem:[#allocation47_spill] sm:$0xff] }
 0x4d0   : > { %v10460_v55 = vpop.f32.mrf.mxu1  ;;  %v7558_v0 = vadd.f32 %v7475_v54, %v13829_v52  ;;  %v8284_v44 = vmul.f32 %v8227_v11, %v13368_v20  ;;  %v13831_v11 = vld [vmem:[#allocation31_spill] sm:$0xff] }
 0x4d1   : > { %v8315_v2 = vadd.f32 %v8314_v25, %v8280_v41  ;;  %v8392_v61 = vadd.f32 %v8391_v59, %v8357_v39  ;;  %v8282_v12 = vmul.f32 %v8217_v30, %v13363_v27  ;;  %v13373_v16 = vadd.f32 %v10460_v55, %v7557_v35  ;;  %v7478_v41 = vpop.f32.mrf.mxu0  ;;  %v13830_v25 = vld [vmem:[#allocation29_spill] sm:$0xff]  ;;  %v8242_v33 = vpop.permute.xlu1 %8241 }
 0x4d2   : > { %v7866_v7 = vpop.f32.mrf.mxu1 }
 0x4d3   : > { %v13371_v13 = vadd.f32 %v7866_v7, %v7555_v24  ;;  %v8393_v51 = vadd.f32 %v8392_v61, %v8358_v4  ;;  %v8316_v34 = vadd.f32 %v8315_v2, %v8281_v6  ;;  %v8360_v62 = vmul.f32 %v8282_v12, %v8282_v12 }
 0x4d4   : > { %v10463_v8 = vpop.f32.mrf.mxu1  ;;  %v7560_v6 = vadd.f32 %v10411_v14, %v13830_v25  ;;  %v8285_v37 = vmul.f32 %v8232_v10, %v13373_v16  ;;  %v7561_v24 = vadd.f32 %v10412_v63, %v13831_v11  ;;  %v8362_v2 = vmul.f32 %v8284_v44, %v8284_v44 }
 0x4d5   : > { %v8283_v57 = vmul.f32 %v8222_v23, %v13371_v13  ;;  %v8317_v32 = vadd.f32 %v8316_v34, %v8282_v12  ;;  %v8394_v30 = vadd.f32 %v8393_v51, %v8359_v18  ;;  %v13832_v23 = vld [vmem:[#allocation19_spill] sm:$0xff] }
 0x4d6   : > { %v7879_v28 = vpop.f32.mrf.mxu1  ;;  %v7559_v4 = vadd.f32 %v7478_v41, %v13832_v23  ;;  %v13384_v7 = vadd.f32 %v10463_v8, %v7560_v6  ;;  %v8363_v14 = vmul.f32 %v8285_v37, %v8285_v37  ;;  %v8252_v8 = vpop.permute.xlu1 %8251 }
 0x4d7   : > { %v8361_v39 = vmul.f32 %v8283_v57, %v8283_v57  ;;  %v13378_v59 = vadd.f32 %v7879_v28, %v7558_v0  ;;  %v8395_v55 = vadd.f32 %v8394_v30, %v8360_v62  ;;  %v8318_v35 = vadd.f32 %v8317_v32, %v8283_v57  ;;  %v8247_v57 = vpop.permute.xlu0 %8246 }
 0x4d8   : > { %v10464_v54 = vpop.f32.mrf.mxu1  ;;  %v8288_v41 = vmul.f32 %v8247_v57, %v13384_v7 }
 0x4d9   : > { %v8319_v61 = vadd.f32 %v8318_v35, %v8284_v44  ;;  %v8396_v12 = vadd.f32 %v8395_v55, %v8361_v39  ;;  %v8286_v18 = vmul.f32 %v8237_v40, %v13378_v59  ;;  %v13389_v0 = vadd.f32 %v10464_v54, %v7561_v24 }
 0x4da   : > { %v7882_v51 = vpop.f32.mrf.mxu1  ;;  %v8366_v25 = vmul.f32 %v8288_v41, %v8288_v41 }
 0x4db   : > { %v13387_v34 = vadd.f32 %v7882_v51, %v7559_v4  ;;  %v8397_v52 = vadd.f32 %v8396_v12, %v8362_v2  ;;  %v8320_v10 = vadd.f32 %v8319_v61, %v8285_v37  ;;  %v8364_v44 = vmul.f32 %v8286_v18, %v8286_v18 }
 0x4dc   : > { %v8289_v40 = vmul.f32 %v8252_v8, %v13389_v0 }
 0x4dd   : > { %v8287_v63 = vmul.f32 %v8242_v33, %v13387_v34  ;;  %v8321_v32 = vadd.f32 %v8320_v10, %v8286_v18  ;;  %v8398_v62 = vadd.f32 %v8397_v52, %v8363_v14 }
 0x4de   : > { %v8367_v37 = vmul.f32 %v8289_v40, %v8289_v40 }
 0x4df   : > { %v8365_v30 = vmul.f32 %v8287_v63, %v8287_v63  ;;  %v8399_v28 = vadd.f32 %v8398_v62, %v8364_v44  ;;  %v8322_v39 = vadd.f32 %v8321_v32, %v8287_v63 }
 0x4e1   : > { %v8323_v6 = vadd.f32 %v8322_v39, %v8288_v41  ;;  %v8400_v55 = vadd.f32 %v8399_v28, %v8365_v30 }
 0x4e3   : > { %v8324_v35 = vadd.f32 %v8323_v6, %v8289_v40  ;;  %v8401_v54 = vadd.f32 %v8400_v55, %v8366_v25 }
 0x4e5   : > { %v8325_v11 = vrot.slane %v8324_v35, 4  ;;  %v8402_v24 = vadd.f32 %v8401_v54, %v8367_v37 }
 0x4e7   : > { %v8326_v33 = vadd.f32 %v8325_v11, %v8324_v35  ;;  %v8403_v23 = vrot.slane %v8402_v24, 4 }
 0x4e9   : > { %v8327_v4 = vrot.slane %v8326_v33, 2  ;;  %v8404_v2 = vadd.f32 %v8403_v23, %v8402_v24 }
 0x4eb   : > { %v8328_v61 = vadd.f32 %v8327_v4, %v8326_v33  ;;  %v8405_v12 = vrot.slane %v8404_v2, 2 }
 0x4ed   : > { %v8329_v18 = vrot.slane %v8328_v61, 1  ;;  %v8406_v51 = vadd.f32 %v8405_v12, %v8404_v2  ;;  %v13833_v12 = vld [vmem:[#allocation9_spill] sm:$0xff] }
 0x4ef   : > { %v8330_v14 = vadd.f32 %v8329_v18, %v8328_v61  ;;  %v8407_v52 = vrot.slane %v8406_v51, 1 }
 0x4f1   : > { %v8408_v10 = vadd.f32 %v8407_v52, %v8406_v51  ;;  %v13394_v57 = vmul.f32 0.00390625, %v8330_v14  ;;  %v13834_v51 = vld [vmem:[#allocation10_spill] sm:$0xff] }
 0x4f3   : > { %v8411_v63 = vmul.f32 0.00390625, %v8408_v10  ;;  %v8412_v41 = vmul.f32 %v13394_v57, %v13394_v57  ;;  %v8469_v62 = vsub.f32 %v13290_v5, %v13394_v57  ;;  %v8470_v8 = vsub.f32 %v13306_v9, %v13394_v57 }
 0x4f4   : > { %v8472_v30 = vsub.f32 %v13308_v29, %v13394_v57  ;;  %v8473_v40 = vsub.f32 %v13320_v22, %v13394_v57  ;;  %v8474_v39 = vsub.f32 %v13332_v49, %v13394_v57  ;;  %v8475_v25 = vsub.f32 %v13328_v42, %v13394_v57  ;;  %v8426_v22 = vld [vmem:[%s10707_s14 + $0x5b] sm:$0xff]  ;;  %v8428_v49 = vld [vmem:[%s10707_s14 + $0x6b] sm:$0xff] }
 0x4f5   : > { %v8413_v32 = vsub.f32 %v8411_v63, %v8412_v41  ;;  %v8476_v6 = vsub.f32 %v13334_v3, %v13394_v57  ;;  %v8477_v5 = vsub.f32 %v13341_v46, %v13394_v57  ;;  %v8478_v9 = vsub.f32 %v13353_v45, %v13394_v57  ;;  %v8430_v46 = vld [vmem:[%s10707_s14 + $0x7b] sm:$0xff] }
 0x4f6   : > { %v8479_v29 = vsub.f32 %v13350_v21, %v13394_v57  ;;  %v8480_v55 = vsub.f32 %v13355_v50, %v13394_v57  ;;  %v8481_v37 = vsub.f32 %v13363_v27, %v13394_v57  ;;  %v8482_v35 = vsub.f32 %v13371_v13, %v13394_v57  ;;  %v8432_v27 = vld [vmem:[%s10707_s14 + $0x8b] sm:$0xff]  ;;  %v8433_v13 = vld [vmem:[%s10707_s14 + $0x93] sm:$0xff] }
 0x4f7   : > { %v8414_v44 = vmax.f32 %v8413_v32, 0.0  ;;  %v8483_v54 = vsub.f32 %v13368_v20, %v13394_v57  ;;  %v8484_v11 = vsub.f32 %v13373_v16, %v13394_v57  ;;  %v8485_v24 = vsub.f32 %v13378_v59, %v13394_v57  ;;  %v8435_v59 = vld [vmem:[%s10707_s14 + $0xa3] sm:$0xff] }
 0x4f8   : > { %v8453_v2 = vsub.f32 %v13165_v15, %v13394_v57  ;;  %v8454_v61 = vsub.f32 %v13180_v56, %v13394_v57  ;;  %v8455_v18 = vsub.f32 %v13833_v12, %v13394_v57  ;;  %v8456_v14 = vsub.f32 %v13834_v51, %v13394_v57 }
 0x4f9   : > { %v8415_v28 = vadd.f32 1e-05, %v8414_v44  ;;  %v8457_v52 = vsub.f32 %v13194_v36, %v13394_v57  ;;  %v8458_v10 = vsub.f32 %v13212_v38, %v13394_v57  ;;  %v8459_v63 = vsub.f32 %v13200_v48, %v13394_v57 }
 0x4fa   : > { %v8460_v15 = vsub.f32 %v13210_v19, %v13394_v57  ;;  %v8461_v56 = vsub.f32 %v13232_v58, %v13394_v57  ;;  %v8462_v41 = vsub.f32 %v13244_v47, %v13394_v57  ;;  %v8463_v32 = vsub.f32 %v13230_v26, %v13394_v57 }
 0x4fb   : > { %10625 = vrsqrt.f32 %v8415_v28  ;;  %v8464_v36 = vsub.f32 %v13242_v43, %v13394_v57  ;;  %v8465_v38 = vsub.f32 %v13262_v31, %v13394_v57  ;;  %v8466_v48 = vsub.f32 %v13280_v53, %v13394_v57 }
 0x4fc   : > { %v8467_v19 = vsub.f32 %v13264_v1, %v13394_v57  ;;  %v8468_v58 = vsub.f32 %v13278_v17, %v13394_v57  ;;  %v8471_v47 = vsub.f32 %v13302_v60, %v13394_v57  ;;  %v13838_v16 = vsub.f32 %v13387_v34, %v13394_v57 }
 0x508   : > { %v10626_v44 = vpop.eup %10625 }
 0x509   : > { %v8489_v26 = vmul.f32 %v10626_v44, %v8453_v2  ;;  %v8490_v28 = vmul.f32 %v10626_v44, %v8454_v61  ;;  %v8491_v43 = vmul.f32 %v10626_v44, %v8455_v18  ;;  %v8492_v31 = vmul.f32 %v10626_v44, %v8456_v14 }
 0x50a   : > { %v8493_v12 = vmul.f32 %v10626_v44, %v8457_v52  ;;  %v8494_v53 = vmul.f32 %v10626_v44, %v8458_v10  ;;  %v8495_v51 = vmul.f32 %v10626_v44, %v8459_v63  ;;  %v8496_v4 = vmul.f32 %v10626_v44, %v8460_v15  ;;  %v8417_v52 = vld [vmem:[%s10707_s14 + $0x13] sm:$0xff]  ;;  %v8418_v10 = vld [vmem:[%s10707_s14 + $0x1b] sm:$0xff]  ;;  %v8419_v63 = vld [vmem:[%s10707_s14 + $0x23] sm:$0xff] }
 0x50b   : > { %v13470_v1 = vmul.f32 %v10626_v44, %v8461_v56  ;;  %v13472_v23 = vmul.f32 %v10626_v44, %v8462_v41  ;;  %v13474_v17 = vmul.f32 %v10626_v44, %v8463_v32  ;;  %v13476_v60 = vmul.f32 %v10626_v44, %v8464_v36  ;;  %v8420_v15 = vld [vmem:[%s10707_s14 + $0x2b] sm:$0xff] }
 0x50c   : > { %v13478_v2 = vmul.f32 %v10626_v44, %v8465_v38  ;;  %v13480_v61 = vmul.f32 %v10626_v44, %v8466_v48  ;;  %v13482_v18 = vmul.f32 %v10626_v44, %v8467_v19  ;;  %v13484_v14 = vmul.f32 %v10626_v44, %v8468_v58  ;;  %v8421_v38 = vld [vmem:[%s10707_s14 + $0x33] sm:$0xff]  ;;  %v8422_v48 = vld [vmem:[%s10707_s14 + $0x3b] sm:$0xff]  ;;  %v8423_v19 = vld [vmem:[%s10707_s14 + $0x43] sm:$0xff] }
 0x50d   : > { %v13491_v56 = vmul.f32 %v10626_v44, %v8469_v62  ;;  %v13493_v41 = vmul.f32 %v10626_v44, %v8470_v8  ;;  %v13495_v32 = vmul.f32 %v10626_v44, %v8471_v47  ;;  %v13497_v36 = vmul.f32 %v10626_v44, %v8472_v30  ;;  %v8424_v58 = vld [vmem:[%s10707_s14 + $0x4b] sm:$0xff]  ;;  %v8425_v47 = vld [vmem:[%s10707_s14 + $0x53] sm:$0xff] }
 0x50e   : > { %v13506_v33 = vmul.f32 %v10626_v44, %v8473_v40  ;;  %v13511_v62 = vmul.f32 %v10626_v44, %v8474_v39  ;;  %v13516_v8 = vmul.f32 %v10626_v44, %v8475_v25  ;;  %v13521_v30 = vmul.f32 %v10626_v44, %v8476_v6  ;;  %v8427_v40 = vld [vmem:[%s10707_s14 + $0x63] sm:$0xff]  ;;  %v8429_v6 = vld [vmem:[%s10707_s14 + $0x73] sm:$0xff] }
 0x50f   : > { %v13530_v39 = vmul.f32 %v10626_v44, %v8477_v5  ;;  %v13535_v42 = vmul.f32 %v10626_v44, %v8478_v9  ;;  %v13540_v3 = vmul.f32 %v10626_v44, %v8479_v29  ;;  %v13545_v25 = vmul.f32 %v10626_v44, %v8480_v55  ;;  %v8431_v5 = vld [vmem:[%s10707_s14 + $0x83] sm:$0xff]  ;;  %v8434_v29 = vld [vmem:[%s10707_s14 + $0x9b] sm:$0xff] }
 0x510   : > { %v13553_v45 = vmul.f32 %v10626_v44, %v8481_v37  ;;  %v13558_v21 = vmul.f32 %v10626_v44, %v8482_v35  ;;  %v13563_v50 = vmul.f32 %v10626_v44, %v8483_v54  ;;  %v13568_v9 = vmul.f32 %v10626_v44, %v8484_v11 }
 0x511   : > { %v13583_v20 = vmul.f32 %v10626_v44, %v8485_v24  ;;  %v13588_v55 = vmul.f32 %v10626_v44, %v13838_v16  ;;  %v13840_v37 = vsub.f32 %v13384_v7, %v13394_v57  ;;  %v13842_v54 = vsub.f32 %v13389_v0, %v13394_v57  ;;  %v8436_v24 = vld [vmem:[%s10707_s14 + $0xab] sm:$0xff]  ;;  %v8438_v7 = vld [vmem:[%s10707_s14 + $0xbb] sm:$0xff] }
 0x512   : > { %13835 = vst [vmem:[#allocation34_spill] sm:$0xff] %v13563_v50  ;;  %13836 = vst [vmem:[#allocation37_spill] sm:$0xff] %v13568_v9  ;;  %v8525_v9 = vadd.f32 %v8489_v26, %v8417_v52  ;;  %v8526_v34 = vadd.f32 %v8490_v28, %v8418_v10  ;;  %v8527_v16 = vadd.f32 %v8491_v43, %v8419_v63  ;;  %v8442_v50 = vld [vmem:[%s10707_s14 + $0xdb] sm:$0xff]  ;;  %v8443_v26 = vld [vmem:[%s10707_s14 + $0xe3] sm:$0xff] }
 0x513   : > { %13837 = vst [vmem:[#allocation20_spill] sm:$0xff] %v13583_v20  ;;  %13839 = vst [vmem:[#allocation33_spill] sm:$0xff] %v13588_v55  ;;  %v13593_v35 = vmul.f32 %v10626_v44, %v13840_v37  ;;  %v13598_v11 = vmul.f32 %v10626_v44, %v13842_v54  ;;  %v8437_v20 = vld [vmem:[%s10707_s14 + $0xb3] sm:$0xff]  ;;  %v8528_v55 = vadd.f32 %v8492_v31, %v8420_v15  ;;  %v8439_v37 = vld [vmem:[%s10707_s14 + $0xc3] sm:$0xff] }
 0x514   : > { %v8529_v0 = vadd.f32 %v8493_v12, %v8421_v38  ;;  %v8530_v57 = vadd.f32 %v8494_v53, %v8422_v48  ;;  %v8531_v44 = vadd.f32 %v8495_v51, %v8423_v19  ;;  %v8532_v54 = vadd.f32 %v8496_v4, %v8424_v58  ;;  %8561 = vst [vmem:[%s13575_s12] sm:$0xff] %v8525_v9  ;;  %v8444_v4 = vld [vmem:[%s10707_s14 + $0xeb] sm:$0xff]  ;;  %v8445_v53 = vld [vmem:[%s10707_s14 + $0xf3] sm:$0xff]  ;;  %v8446_v51 = vld [vmem:[%s10707_s14 + $0xfb] sm:$0xff] }
 0x515   : > { %13841 = vst [vmem:[#allocation35_spill] sm:$0xff] %v13593_v35  ;;  %13843 = vst [vmem:[#allocation11_spill] sm:$0xff] %v13598_v11  ;;  %v8440_v35 = vld [vmem:[%s10707_s14 + $0xcb] sm:$0xff]  ;;  %v8441_v11 = vld [vmem:[%s10707_s14 + $0xd3] sm:$0xff]  ;;  %v8533_v28 = vadd.f32 %v13470_v1, %v8425_v47  ;;  %v8534_v43 = vadd.f32 %v13472_v23, %v8426_v22  ;;  %v8535_v31 = vadd.f32 %v13474_v17, %v8427_v40 }
 0x516   : > { %v8536_v12 = vadd.f32 %v13476_v60, %v8428_v49  ;;  %8562 = vst [vmem:[%s13575_s12 + $0x8] sm:$0xff] %v8526_v34  ;;  %8563 = vst [vmem:[%s13575_s12 + $0x10] sm:$0xff] %v8527_v16  ;;  %v8537_v1 = vadd.f32 %v13478_v2, %v8429_v6  ;;  %v8538_v23 = vadd.f32 %v13480_v61, %v8430_v46  ;;  %v8447_v52 = vld [vmem:[%s10707_s14 + $0x103] sm:$0xff]  ;;  %v8448_v10 = vld [vmem:[%s10707_s14 + $0x10b] sm:$0xff] }
 0x517   : > { %8564 = vst [vmem:[%s13575_s12 + $0x18] sm:$0xff] %v8528_v55  ;;  %v8539_v17 = vadd.f32 %v13482_v18, %v8431_v5  ;;  %v8540_v60 = vadd.f32 %v13484_v14, %v8432_v27  ;;  %8565 = vst [vmem:[%s13575_s12 + $0x20] sm:$0xff] %v8529_v0  ;;  %v8449_v63 = vld [vmem:[%s10707_s14 + $0x113] sm:$0xff]  ;;  %v8541_v2 = vadd.f32 %v13491_v56, %v8433_v13  ;;  %v8450_v15 = vld [vmem:[%s10707_s14 + $0x11b] sm:$0xff] }
 0x518   : > { %8566 = vst [vmem:[%s13575_s12 + $0x28] sm:$0xff] %v8530_v57  ;;  %8567 = vst [vmem:[%s13575_s12 + $0x30] sm:$0xff] %v8531_v44  ;;  %v8542_v61 = vadd.f32 %v13493_v41, %v8434_v29  ;;  %v8543_v18 = vadd.f32 %v13495_v32, %v8435_v59  ;;  %v8544_v14 = vadd.f32 %v13497_v36, %v8436_v24  ;;  %v8451_v38 = vld [vmem:[%s10707_s14 + $0x123] sm:$0xff]  ;;  %v8452_v48 = vld [vmem:[%s10707_s14 + $0x12b] sm:$0xff] }
 0x519   : > { %8568 = vst [vmem:[%s13575_s12 + $0x38] sm:$0xff] %v8532_v54  ;;  %8569 = vst [vmem:[%s13575_s12 + $0x40] sm:$0xff] %v8533_v28  ;;  %v8545_v56 = vadd.f32 %v13506_v33, %v8437_v20  ;;  %v8546_v41 = vadd.f32 %v13511_v62, %v8438_v7  ;;  %v8547_v32 = vadd.f32 %v13516_v8, %v8439_v37  ;;  %v13844_v47 = vld [vmem:[#allocation34_spill] sm:$0xff]  ;;  %v13845_v40 = vld [vmem:[#allocation37_spill] sm:$0xff] }
 0x51a   : > { %8570 = vst [vmem:[%s13575_s12 + $0x48] sm:$0xff] %v8534_v43  ;;  %8571 = vst [vmem:[%s13575_s12 + $0x50] sm:$0xff] %v8535_v31  ;;  %v8548_v19 = vadd.f32 %v13521_v30, %v8440_v35  ;;  %v8549_v36 = vadd.f32 %v13530_v39, %v8441_v11  ;;  %v8550_v58 = vadd.f32 %v13535_v42, %v8442_v50  ;;  %v13846_v39 = vld [vmem:[#allocation20_spill] sm:$0xff] }
 0x51b   : > { %8572 = vst [vmem:[%s13575_s12 + $0x58] sm:$0xff] %v8536_v12  ;;  %8573 = vst [vmem:[%s13575_s12 + $0x60] sm:$0xff] %v8537_v1  ;;  %v8551_v33 = vadd.f32 %v13540_v3, %v8443_v26  ;;  %v8552_v62 = vadd.f32 %v13545_v25, %v8444_v4  ;;  %v8553_v8 = vadd.f32 %v13553_v45, %v8445_v53  ;;  %v13847_v3 = vld [vmem:[#allocation33_spill] sm:$0xff] }
 0x51c   : > { %8574 = vst [vmem:[%s13575_s12 + $0x68] sm:$0xff] %v8538_v23  ;;  %8575 = vst [vmem:[%s13575_s12 + $0x70] sm:$0xff] %v8539_v17  ;;  %v8554_v30 = vadd.f32 %v13558_v21, %v8446_v51  ;;  %v8555_v22 = vadd.f32 %v13844_v47, %v8447_v52  ;;  %v8556_v49 = vadd.f32 %v13845_v40, %v8448_v10  ;;  %v13848_v6 = vld [vmem:[#allocation35_spill] sm:$0xff] }
 0x51d   : > { %8576 = vst [vmem:[%s13575_s12 + $0x78] sm:$0xff] %v8540_v60  ;;  %8577 = vst [vmem:[%s13575_s12 + $0x80] sm:$0xff] %v8541_v2  ;;  %v8557_v42 = vadd.f32 %v13846_v39, %v8449_v63  ;;  %v8558_v25 = vadd.f32 %v13847_v3, %v8450_v15  ;;  %v8559_v46 = vadd.f32 %v13848_v6, %v8451_v38  ;;  %v13849_v5 = vld [vmem:[#allocation11_spill] sm:$0xff] }
 0x51e   : > { %8578 = vst [vmem:[%s13575_s12 + $0x88] sm:$0xff] %v8542_v61  ;;  %8579 = vst [vmem:[%s13575_s12 + $0x90] sm:$0xff] %v8543_v18  ;;  %v8560_v45 = vadd.f32 %v13849_v5, %v8452_v48 }
 0x51f   : > { %8580 = vst [vmem:[%s13575_s12 + $0x98] sm:$0xff] %v8544_v14  ;;  %8581 = vst [vmem:[%s13575_s12 + $0xa0] sm:$0xff] %v8545_v56 }
 0x520   : > { %8582 = vst [vmem:[%s13575_s12 + $0xa8] sm:$0xff] %v8546_v41  ;;  %8583 = vst [vmem:[%s13575_s12 + $0xb0] sm:$0xff] %v8547_v32 }
 0x521   : > { %8584 = vst [vmem:[%s13575_s12 + $0xb8] sm:$0xff] %v8548_v19  ;;  %8585 = vst [vmem:[%s13575_s12 + $0xc0] sm:$0xff] %v8549_v36 }
 0x522   : > { %8586 = vst [vmem:[%s13575_s12 + $0xc8] sm:$0xff] %v8550_v58  ;;  %8587 = vst [vmem:[%s13575_s12 + $0xd0] sm:$0xff] %v8551_v33 }
 0x523   : > { %8588 = vst [vmem:[%s13575_s12 + $0xd8] sm:$0xff] %v8552_v62  ;;  %8589 = vst [vmem:[%s13575_s12 + $0xe0] sm:$0xff] %v8553_v8 }
 0x524   : > { %8590 = vst [vmem:[%s13575_s12 + $0xe8] sm:$0xff] %v8554_v30  ;;  %8591 = vst [vmem:[%s13575_s12 + $0xf0] sm:$0xff] %v8555_v22 }
 0x525   : > { %8592 = vst [vmem:[%s13575_s12 + $0xf8] sm:$0xff] %v8556_v49  ;;  %8593 = vst [vmem:[%s13575_s12 + $0x100] sm:$0xff] %v8557_v42 }
 0x526   : > { %8594 = vst [vmem:[%s13575_s12 + $0x108] sm:$0xff] %v8558_v25  ;;  %8595 = vst [vmem:[%s13575_s12 + $0x110] sm:$0xff] %v8559_v46 }
 0x527   : > { %8596 = vst [vmem:[%s13575_s12 + $0x118] sm:$0xff] %v8560_v45 }
 0x528 PF: > { %s14_s15 = sadd.s32 1, %s10634_s15  }
 0x529   : > { %p11_p4 = scmp.ge.s32.totalorder %s14_s15, 4  }
 0x52b   :  { %13 = sbr.rel (!%p11_p4) target bundleno = 1 (0x1), region = 82 }

</bundles_post_ra>
